<compile_context>
chip_gen: v7x
topology: tpu7x:2x2x1
jax: 0.10.0
libtpu: 0.0.40
codegen_flags: <defaults>
</compile_context>

<pallas_src>
import functools

import jax
import jax.numpy as jnp
from jax.experimental import pallas as pl
from jax.experimental.pallas import tpu as pltpu


def _round_up(x, m):
    return ((x + m - 1) // m) * m


# ---------------------------------------------------------------------------
# Pallas kernel 1: tiled matmul with fused bias + activation epilogue
# ---------------------------------------------------------------------------

def _matmul_bias_kernel(a_ref, b_ref, bias_ref, o_ref, acc_ref, *, act):
    """acc += A @ B (bf16 x bf16 -> f32); last k-step: +bias, act, cast."""
    k = pl.program_id(2)

    @pl.when(k == 0)
    def _():
        acc_ref[...] = jnp.zeros_like(acc_ref)

    acc_ref[...] += jnp.dot(a_ref[...], b_ref[...],
                            preferred_element_type=jnp.float32)

    @pl.when(k == pl.num_programs(2) - 1)
    def _():
        out = acc_ref[...] + bias_ref[...]          # f32 epilogue (v5e-friendly)
        if act == "relu":
            out = jnp.maximum(out, 0.0)
        elif act == "sigmoid":
            out = 1.0 / (1.0 + jnp.exp(-out))
        o_ref[...] = out.astype(o_ref.dtype)


def matmul_bias_act(a, b, bias, *, act=None, out_dtype=jnp.float32):
    """y = act(a @ b + bias);  a:(M,K)  b:(K,N)  bias:(N,)."""
    M, K = a.shape
    K2, N = b.shape
    assert K == K2, (a.shape, b.shape)

    # Adaptive tiles: do not pad tiny M up to 128; keep K/N tiles large & aligned.
    tm = min(_round_up(M, 16), 512)
    tk = min(_round_up(K, 128), 1024)
    tn = min(_round_up(N, 128), 512)
    Mp, Kp, Np = _round_up(M, tm), _round_up(K, tk), _round_up(N, tn)

    a_p = jnp.pad(a.astype(jnp.bfloat16), ((0, Mp - M), (0, Kp - K)))
    b_p = jnp.pad(b.astype(jnp.bfloat16), ((0, Kp - K), (0, Np - N)))
    bias_p = jnp.pad(bias.astype(jnp.float32).reshape(1, N),
                     ((0, 0), (0, Np - N)))

    out = pl.pallas_call(
        functools.partial(_matmul_bias_kernel, act=act),
        out_shape=jax.ShapeDtypeStruct((Mp, Np), out_dtype),
        grid_spec=pltpu.PrefetchScalarGridSpec(
            num_scalar_prefetch=0,
            grid=(Mp // tm, Np // tn, Kp // tk),
            in_specs=[
                pl.BlockSpec((tm, tk), lambda i, j, k: (i, k)),
                pl.BlockSpec((tk, tn), lambda i, j, k: (k, j)),
                pl.BlockSpec((1, tn), lambda i, j, k: (0, j)),
            ],
            out_specs=pl.BlockSpec((tm, tn), lambda i, j, k: (i, j)),
            scratch_shapes=[pltpu.VMEM((tm, tn), jnp.float32)],
        ),
        compiler_params=pltpu.CompilerParams(
            dimension_semantics=("parallel", "parallel", "arbitrary"),
            vmem_limit_bytes=32 * 1024 * 1024),
    )(a_p, b_p, bias_p)
    return out[:M, :N]


# ---------------------------------------------------------------------------
# Pallas kernel 2: fused residual-add + LayerNorm (transformer post-norm)
# ---------------------------------------------------------------------------

def _add_layernorm_kernel(x_ref, y_ref, g_ref, b_ref, o_ref, *, eps):
    x = x_ref[...].astype(jnp.float32) + y_ref[...].astype(jnp.float32)
    mu = jnp.mean(x, axis=-1, keepdims=True)
    var = jnp.mean(jnp.square(x - mu), axis=-1, keepdims=True)
    inv = jax.lax.rsqrt(var + eps)
    o_ref[...] = (((x - mu) * inv) * g_ref[...] + b_ref[...]).astype(o_ref.dtype)


def add_layernorm(x, y, gamma, beta, eps=1e-5):
    """LayerNorm(x + y) over the last axis; x, y: (S, D)."""
    S, D = x.shape
    Sp = _round_up(S, 8)
    x_p = jnp.pad(x.astype(jnp.float32), ((0, Sp - S), (0, 0)))
    y_p = jnp.pad(y.astype(jnp.float32), ((0, Sp - S), (0, 0)))
    out = pl.pallas_call(
        functools.partial(_add_layernorm_kernel, eps=eps),
        out_shape=jax.ShapeDtypeStruct((Sp, D), jnp.float32),
    )(x_p, y_p, gamma.reshape(1, D).astype(jnp.float32),
      beta.reshape(1, D).astype(jnp.float32))
    return out[:S]


# ---------------------------------------------------------------------------
# Conv / pool building blocks (matmuls go through the Pallas kernel)
# ---------------------------------------------------------------------------

def _fold_bn(w, b, bn, eps=1e-5):
    """Fold eval-mode BatchNorm2d into the preceding conv's weights/bias."""
    scale = bn["g"] / jnp.sqrt(bn["v"] + eps)
    return w * scale, (b - bn["m"]) * scale + bn["b"]


def conv2d_same5(x, w, b, *, relu, out_dtype=jnp.bfloat16):
    """5x5 'same' conv (stride 1, pad 2). x: NHWC, w: (5,5,Cin,Cout)."""
    n, H, W, cin = x.shape
    kh, kw, _, cout = w.shape
    xp = jnp.pad(x.astype(jnp.bfloat16), ((0, 0), (2, 2), (2, 2), (0, 0)))
    # TODO(synk): im2col materializes kh*kw x the activation in HBM; for the
    # reference 512x512 inputs this should become an in-kernel gather.
    cols = [xp[:, i:i + H, j:j + W, :] for i in range(kh) for j in range(kw)]
    patches = jnp.stack(cols, axis=3).reshape(n * H * W, kh * kw * cin)
    y = matmul_bias_act(patches, w.reshape(kh * kw * cin, cout), b,
                        act="relu" if relu else None, out_dtype=out_dtype)
    return y.reshape(n, H, W, cout)


def double_conv(x, p):
    w1, b1 = _fold_bn(p["w1"], p["b1"], p["bn1"])
    x = conv2d_same5(x, w1, b1, relu=True)
    w2, b2 = _fold_bn(p["w2"], p["b2"], p["bn2"])
    return conv2d_same5(x, w2, b2, relu=True)


def maxpool4(x):
    # MaxPool2d(4): kernel == stride == 4 -> pure reshape + max; single fused
    # XLA pass, memory-bound, no window stacking / extra HBM traffic.
    n, H, W, c = x.shape
    return jnp.max(x.reshape(n, H // 4, 4, W // 4, 4, c), axis=(2, 4))


def conv_transpose4(x, w, b, out_dtype=jnp.bfloat16):
    """ConvTranspose2d(k=4, s=4) == per-pixel linear map + 4x4 pixel shuffle.
    x: (n,h,w,Cin), w: (Cin,4,4,Cout), b: (Cout,)."""
    n, h, wd, cin = x.shape
    cout = w.shape[-1]
    rows = x.reshape(n * h * wd, cin)
    y = matmul_bias_act(rows, w.reshape(cin, 16 * cout), jnp.tile(b, 16),
                        act=None, out_dtype=out_dtype)
    y = y.reshape(n, h, wd, 4, 4, cout)
    return jnp.transpose(y, (0, 1, 3, 2, 4, 5)).reshape(n, 4 * h, 4 * wd, cout)


def conv1x1(x, w, b, out_dtype=jnp.float32):
    n, h, wd, cin = x.shape
    y = matmul_bias_act(x.reshape(n * h * wd, cin), w, b, act=None,
                        out_dtype=out_dtype)
    return y.reshape(n, h, wd, w.shape[-1])


# ---------------------------------------------------------------------------
# Transformer encoder layer (post-norm, ReLU FFN, eval mode)
# ---------------------------------------------------------------------------

def transformer_encoder_layer(x, p, *, nhead=8):
    """x: (S, D) float32.  Dropout == identity (inference mode)."""
    S, D = x.shape
    dh = D // nhead
    qkv = matmul_bias_act(x, p["w_qkv"], p["b_qkv"], act=None)       # (S, 3D)
    q, k, v = jnp.split(qkv, 3, axis=-1)
    q = q.reshape(S, nhead, dh).transpose(1, 0, 2)
    k = k.reshape(S, nhead, dh).transpose(1, 0, 2)
    v = v.reshape(S, nhead, dh).transpose(1, 0, 2)
    # TODO(synk): attention core (seq <= 48, head_dim 32) kept in plain JAX;
    # too small to benefit from a fused Pallas flash-attention kernel.
    scores = jnp.einsum("hqd,hkd->hqk", q, k) / jnp.sqrt(jnp.float32(dh))
    probs = jax.nn.softmax(scores, axis=-1)
    ctx = jnp.einsum("hqk,hkd->hqd", probs, v).transpose(1, 0, 2).reshape(S, D)
    attn = matmul_bias_act(ctx, p["w_o"], p["b_o"], act=None)
    x = add_layernorm(x, attn, p["ln1_g"], p["ln1_b"])
    h = matmul_bias_act(x, p["w_ff1"], p["b_ff1"], act="relu")
    h = matmul_bias_act(h, p["w_ff2"], p["b_ff2"], act=None)
    return add_layernorm(x, h, p["ln2_g"], p["ln2_b"])


# ---------------------------------------------------------------------------
# Full forward
# ---------------------------------------------------------------------------

def skull_unet_transformer_forward(params, x):
    """x: (B=1, L, S, S).  B must be 1 (the reference torch.cat of the (1,1,d)
    diagnosis token with the (B,L,d) token sequence requires batch 1)."""
    B, L, S, _ = x.shape
    depth = len(params["down"]) - 1

    # torch: x.reshape(B*L, 1, 512, 512) (NCHW, C=1) -> NHWC here.
    temp = x.reshape(B * L, S, S, 1).astype(jnp.float32)
    out_x = []
    temp = double_conv(temp, params["down"][0])
    out_x.append(temp)
    for lvl in range(1, depth + 1):
        temp = maxpool4(temp)
        temp = double_conv(temp, params["down"][lvl])
        out_x.append(temp)

    # bottleneck -> transformer tokens (torch flattens NCHW, i.e. (C,h,w) order)
    _, s_b, _, c_b = out_x[-1].shape
    d_model = c_b * s_b * s_b
    tokens = jnp.transpose(out_x[-1], (0, 3, 1, 2)).reshape(B, L, d_model)
    seq = jnp.concatenate([params["diag_token"],
                           tokens.astype(jnp.float32)], axis=1)   # (1, L+1, d)
    seq = seq + params["pos_emb"]
    h = seq[0]                                                    # (L+1, d)
    for lp in params["trans"]:
        h = transformer_encoder_layer(h, lp)

    diagnosis = matmul_bias_act(h[0:1], params["diag_fc_w"],
                                params["diag_fc_b"], act="sigmoid")       # (1,1)
    slice_diag = matmul_bias_act(h[1:], params["slice_fc_w"],
                                 params["slice_fc_b"], act="sigmoid")     # (L,1)
    slice_diag = slice_diag.reshape(B, L, 1)

    # write transformer tokens back as the bottom feature map (torch C,h,w order)
    bottom = h[1:].reshape(B * L, c_b, s_b, s_b)
    cur = jnp.transpose(bottom, (0, 2, 3, 1))                     # NHWC

    for i in range(depth):
        up_p = params["up"][i]
        up = conv_transpose4(cur, up_p["up_w"], up_p["up_b"])
        skip = out_x[depth - 1 - i]                               # == out_x[-i-2]
        cur = double_conv(
            jnp.concatenate([up, skip.astype(up.dtype)], axis=-1), up_p["dc"])

    logits = conv1x1(cur, params["final_w"], params["final_b"])   # (BL, S, S, 2)
    seg = jnp.transpose(logits, (0, 3, 1, 2)).reshape(B, L, 2, S, S)
    seg = jnp.transpose(seg, (0, 2, 1, 3, 4))                     # (B, 2, L, S, S)
    return diagnosis, slice_diag, seg


# ---------------------------------------------------------------------------
# Parameters
# ---------------------------------------------------------------------------

def init_params(key, *, in_ch=4, depth=2, trans_layers=2, num_slices=8):
    d_model = in_ch * 64
    keys = iter(jax.random.split(key, 512))

    def rnd(shape, scale):
        return scale * jax.random.normal(next(keys), shape, jnp.float32)

    def bn(c):
        return dict(g=1.0 + rnd((c,), 0.1), b=rnd((c,), 0.1),
                    m=rnd((c,), 0.1), v=1.0 + jnp.abs(rnd((c,), 0.1)))

    def dconv(cin, cout):
        return dict(w1=rnd((5, 5, cin, cout), 0.08), b1=rnd((cout,), 0.05),
                    bn1=bn(cout),
                    w2=rnd((5, 5, cout, cout), 0.08), b2=rnd((cout,), 0.05),
                    bn2=bn(cout))

    p = {}
    down = [dconv(1, in_ch)]
    ch = in_ch
    for _ in range(depth):
        down.append(dconv(ch, ch * 2))
        ch *= 2
    p["down"] = down

    up = []
    for _ in range(depth):
        up.append(dict(up_w=rnd((ch, 4, 4, ch // 2), 0.05),
                       up_b=rnd((ch // 2,), 0.05),
                       dc=dconv(ch, ch // 2)))
        ch //= 2
    p["up"] = up
    p["final_w"] = rnd((ch, 2), 0.1)
    p["final_b"] = rnd((2,), 0.05)

    def tlayer():
        return dict(w_qkv=rnd((d_model, 3 * d_model), 0.03),
                    b_qkv=rnd((3 * d_model,), 0.02),
                    w_o=rnd((d_model, d_model), 0.03),
                    b_o=rnd((d_model,), 0.02),
                    ln1_g=jnp.ones((d_model,), jnp.float32),
                    ln1_b=jnp.zeros((d_model,), jnp.float32),
                    w_ff1=rnd((d_model, d_model), 0.03),
                    b_ff1=rnd((d_model,), 0.02),
                    w_ff2=rnd((d_model, d_model), 0.03),
                    b_ff2=rnd((d_model,), 0.02),
                    ln2_g=jnp.ones((d_model,), jnp.float32),
                    ln2_b=jnp.zeros((d_model,), jnp.float32))

    p["trans"] = [tlayer() for _ in range(trans_layers)]
    p["pos_emb"] = rnd((1, num_slices + 1, d_model), 0.02)
    p["diag_token"] = rnd((1, 1, d_model), 0.02)
    p["diag_fc_w"] = rnd((d_model, 1), 0.05)
    p["diag_fc_b"] = rnd((1,), 0.02)
    p["slice_fc_w"] = rnd((d_model, 1), 0.05)
    p["slice_fc_b"] = rnd((1,), 0.02)
    return p


if __name__ == "__main__":
    # Small config consistent with the module's shape constraint
    # (bottleneck flatten C*h*w == d_model == in_ch*64):
    #   reference: 512x512, depth 4, MAXLENGTH=47 slices
    #   here     :  64x64,  depth 2, 8 slices (in_ch=4 -> d_model=256)
    IN_CH, DEPTH, TRANS_LAYERS = 4, 2, 2
    L, S = 8, 64

    key = jax.random.PRNGKey(0)
    pkey, xkey = jax.random.split(key)
    params = init_params(pkey, in_ch=IN_CH, depth=DEPTH,
                         trans_layers=TRANS_LAYERS, num_slices=L)
    x = jax.random.normal(xkey, (1, L, S, S), jnp.float32)

    fwd = jax.jit(skull_unet_transformer_forward)
    diag, slice_diag, seg = jax.block_until_ready(fwd(params, x))

    assert diag.shape == (1, 1), diag.shape
    assert slice_diag.shape == (1, L, 1), slice_diag.shape
    assert seg.shape == (1, 2, L, S, S), seg.shape
    for t in (diag, slice_diag, seg):
        assert bool(jnp.all(jnp.isfinite(t)))
    print("KERNEL_OK")
</pallas_src>

<mosaic_0001>
module attributes {stable_mosaic.version = 11 : i64} {
  func.func @_matmul_bias_kernel(%arg0: i32, %arg1: i32, %arg2: i32, %arg3: memref<512x128xbf16, #tpu.memory_space<vmem>>, %arg4: memref<128x128xbf16, #tpu.memory_space<vmem>>, %arg5: memref<1x128xf32, #tpu.memory_space<vmem>>, %arg6: memref<512x128xbf16, #tpu.memory_space<vmem>>, %arg7: memref<512x128xf32, #tpu.memory_space<vmem>>) attributes {dimension_semantics = [#tpu.dimension_semantics<parallel>, #tpu.dimension_semantics<parallel>, #tpu.dimension_semantics<arbitrary>], iteration_bounds = array<i64: 64, 1, 1>, scalar_prefetch = 0 : i64, scratch_operands = 1 : i64, tpu.core_type = #tpu.core_type<tc>, window_params = [{transform_indices = @transform_0, window_bounds = array<i64: 512, 128>}, {transform_indices = @transform_1, window_bounds = array<i64: 128, 128>}, {transform_indices = @transform_2, window_bounds = array<i64: 1, 128>}, {transform_indices = @transform_3, window_bounds = array<i64: 512, 128>}]} {
    %c0_i32 = arith.constant 0 : i32
    %0 = arith.cmpi eq, %arg2, %c0_i32 : i32
    %1 = arith.extui %0 : i1 to i32
    %c0_i32_0 = arith.constant 0 : i32
    %2 = arith.cmpi ne, %1, %c0_i32_0 : i32
    scf.if %2 {
      %cst_10 = arith.constant 0.000000e+00 : f32
      %12 = vector.broadcast %cst_10 : f32 to vector<512x128xf32>
      %c0_11 = arith.constant 0 : index
      %c0_12 = arith.constant 0 : index
      %13 = vector.load %arg7[%c0_11, %c0_12] : memref<512x128xf32, #tpu.memory_space<vmem>>, vector<512x128xf32>
      tpu.vector_store %arg7[%c0_11, %c0_12], %12 {strides = array<i32>} : memref<512x128xf32, #tpu.memory_space<vmem>>, vector<512x128xf32>,
    } else {
    }
    %c0 = arith.constant 0 : index
    %c0_1 = arith.constant 0 : index
    %3 = vector.load %arg7[%c0, %c0_1] : memref<512x128xf32, #tpu.memory_space<vmem>>, vector<512x128xf32>
    %c0_2 = arith.constant 0 : index
    %c0_3 = arith.constant 0 : index
    %4 = vector.load %arg3[%c0_2, %c0_3] : memref<512x128xbf16, #tpu.memory_space<vmem>>, vector<512x128xbf16>
    %c0_4 = arith.constant 0 : index
    %c0_5 = arith.constant 0 : index
    %5 = vector.load %arg4[%c0_4, %c0_5] : memref<128x128xbf16, #tpu.memory_space<vmem>>, vector<128x128xbf16>
    %cst = arith.constant dense<0.000000e+00> : vector<512x128xf32>
    %6 = tpu.matmul %4, %5, %cst {dimension_numbers = #tpu.dot_dimension_numbers<[1], [0], [0], [1], [0, 0, 1, 1], [], []>} : vector<512x128xbf16>, vector<128x128xbf16>, vector<512x128xf32> -> vector<512x128xf32>
    %7 = arith.addf %3, %6 : vector<512x128xf32>
    %c0_6 = arith.constant 0 : index
    %c0_7 = arith.constant 0 : index
    %8 = vector.load %arg7[%c0_6, %c0_7] : memref<512x128xf32, #tpu.memory_space<vmem>>, vector<512x128xf32>
    tpu.vector_store %arg7[%c0_6, %c0_7], %7 {strides = array<i32>} : memref<512x128xf32, #tpu.memory_space<vmem>>, vector<512x128xf32>,
    %c0_i32_8 = arith.constant 0 : i32
    %9 = arith.cmpi eq, %arg2, %c0_i32_8 : i32
    %10 = arith.extui %9 : i1 to i32
    %c0_i32_9 = arith.constant 0 : i32
    %11 = arith.cmpi ne, %10, %c0_i32_9 : i32
    scf.if %11 {
      %c0_10 = arith.constant 0 : index
      %c0_11 = arith.constant 0 : index
      %12 = vector.load %arg7[%c0_10, %c0_11] : memref<512x128xf32, #tpu.memory_space<vmem>>, vector<512x128xf32>
      %c0_12 = arith.constant 0 : index
      %c0_13 = arith.constant 0 : index
      %13 = vector.load %arg5[%c0_12, %c0_13] : memref<1x128xf32, #tpu.memory_space<vmem>>, vector<1x128xf32>
      %14 = vector.broadcast %13 : vector<1x128xf32> to vector<512x128xf32>
      %15 = arith.addf %12, %14 : vector<512x128xf32>
      %cst_14 = arith.constant 0.000000e+00 : f32
      %16 = vector.broadcast %cst_14 : f32 to vector<512x128xf32>
      %17 = arith.maximumf %15, %16 : vector<512x128xf32>
      %18 = arith.truncf %17 : vector<512x128xf32> to vector<512x128xbf16>
      %c0_15 = arith.constant 0 : index
      %c0_16 = arith.constant 0 : index
      %19 = vector.load %arg6[%c0_15, %c0_16] : memref<512x128xbf16, #tpu.memory_space<vmem>>, vector<512x128xbf16>
      tpu.vector_store %arg6[%c0_15, %c0_16], %18 {strides = array<i32>} : memref<512x128xbf16, #tpu.memory_space<vmem>>, vector<512x128xbf16>,
    } else {
    }
    return
  }
  func.func @transform_0(%arg0: i32, %arg1: i32, %arg2: i32) -> (i32, i32) {
    %c0_i32 = arith.constant 0 : i32
    return %arg0, %arg2 : i32, i32
  }
  func.func @transform_1(%arg0: i32, %arg1: i32, %arg2: i32) -> (i32, i32) {
    %c0_i32 = arith.constant 0 : i32
    return %arg2, %arg1 : i32, i32
  }
  func.func @transform_2(%arg0: i32, %arg1: i32, %arg2: i32) -> (i32, i32) {
    %c0_i32 = arith.constant 0 : i32
    %c0_i32_0 = arith.constant 0 : i32
    return %c0_i32, %arg1 : i32, i32
  }
  func.func @transform_3(%arg0: i32, %arg1: i32, %arg2: i32) -> (i32, i32) {
    %c0_i32 = arith.constant 0 : i32
    return %arg0, %arg1 : i32, i32
  }
}

module attributes {stable_mosaic.version = 11 : i64} {
  func.func @_matmul_bias_kernel(%arg0: i32, %arg1: i32, %arg2: i32, %arg3: memref<512x128xbf16, #tpu.memory_space<vmem>>, %arg4: memref<128x128xbf16, #tpu.memory_space<vmem>>, %arg5: memref<1x128xf32, #tpu.memory_space<vmem>>, %arg6: memref<512x128xbf16, #tpu.memory_space<vmem>>, %arg7: memref<512x128xf32, #tpu.memory_space<vmem>>) attributes {dimension_semantics = [#tpu.dimension_semantics<parallel>, #tpu.dimension_semantics<parallel>, #tpu.dimension_semantics<arbitrary>], iteration_bounds = array<i64: 4, 1, 1>, scalar_prefetch = 0 : i64, scratch_operands = 1 : i64, tpu.core_type = #tpu.core_type<tc>, window_params = [{transform_indices = @transform_0, window_bounds = array<i64: 512, 128>}, {transform_indices = @transform_1, window_bounds = array<i64: 128, 128>}, {transform_indices = @transform_2, window_bounds = array<i64: 1, 128>}, {transform_indices = @transform_3, window_bounds = array<i64: 512, 128>}]} {
    %c0_i32 = arith.constant 0 : i32
    %0 = arith.cmpi eq, %arg2, %c0_i32 : i32
    %1 = arith.extui %0 : i1 to i32
    %c0_i32_0 = arith.constant 0 : i32
    %2 = arith.cmpi ne, %1, %c0_i32_0 : i32
    scf.if %2 {
      %cst_10 = arith.constant 0.000000e+00 : f32
      %12 = vector.broadcast %cst_10 : f32 to vector<512x128xf32>
      %c0_11 = arith.constant 0 : index
      %c0_12 = arith.constant 0 : index
      %13 = vector.load %arg7[%c0_11, %c0_12] : memref<512x128xf32, #tpu.memory_space<vmem>>, vector<512x128xf32>
      tpu.vector_store %arg7[%c0_11, %c0_12], %12 {strides = array<i32>} : memref<512x128xf32, #tpu.memory_space<vmem>>, vector<512x128xf32>,
    } else {
    }
    %c0 = arith.constant 0 : index
    %c0_1 = arith.constant 0 : index
    %3 = vector.load %arg7[%c0, %c0_1] : memref<512x128xf32, #tpu.memory_space<vmem>>, vector<512x128xf32>
    %c0_2 = arith.constant 0 : index
    %c0_3 = arith.constant 0 : index
    %4 = vector.load %arg3[%c0_2, %c0_3] : memref<512x128xbf16, #tpu.memory_space<vmem>>, vector<512x128xbf16>
    %c0_4 = arith.constant 0 : index
    %c0_5 = arith.constant 0 : index
    %5 = vector.load %arg4[%c0_4, %c0_5] : memref<128x128xbf16, #tpu.memory_space<vmem>>, vector<128x128xbf16>
    %cst = arith.constant dense<0.000000e+00> : vector<512x128xf32>
    %6 = tpu.matmul %4, %5, %cst {dimension_numbers = #tpu.dot_dimension_numbers<[1], [0], [0], [1], [0, 0, 1, 1], [], []>} : vector<512x128xbf16>, vector<128x128xbf16>, vector<512x128xf32> -> vector<512x128xf32>
    %7 = arith.addf %3, %6 : vector<512x128xf32>
    %c0_6 = arith.constant 0 : index
    %c0_7 = arith.constant 0 : index
    %8 = vector.load %arg7[%c0_6, %c0_7] : memref<512x128xf32, #tpu.memory_space<vmem>>, vector<512x128xf32>
    tpu.vector_store %arg7[%c0_6, %c0_7], %7 {strides = array<i32>} : memref<512x128xf32, #tpu.memory_space<vmem>>, vector<512x128xf32>,
    %c0_i32_8 = arith.constant 0 : i32
    %9 = arith.cmpi eq, %arg2, %c0_i32_8 : i32
    %10 = arith.extui %9 : i1 to i32
    %c0_i32_9 = arith.constant 0 : i32
    %11 = arith.cmpi ne, %10, %c0_i32_9 : i32
    scf.if %11 {
      %c0_10 = arith.constant 0 : index
      %c0_11 = arith.constant 0 : index
      %12 = vector.load %arg7[%c0_10, %c0_11] : memref<512x128xf32, #tpu.memory_space<vmem>>, vector<512x128xf32>
      %c0_12 = arith.constant 0 : index
      %c0_13 = arith.constant 0 : index
      %13 = vector.load %arg5[%c0_12, %c0_13] : memref<1x128xf32, #tpu.memory_space<vmem>>, vector<1x128xf32>
      %14 = vector.broadcast %13 : vector<1x128xf32> to vector<512x128xf32>
      %15 = arith.addf %12, %14 : vector<512x128xf32>
      %cst_14 = arith.constant 0.000000e+00 : f32
      %16 = vector.broadcast %cst_14 : f32 to vector<512x128xf32>
      %17 = arith.maximumf %15, %16 : vector<512x128xf32>
      %18 = arith.truncf %17 : vector<512x128xf32> to vector<512x128xbf16>
      %c0_15 = arith.constant 0 : index
      %c0_16 = arith.constant 0 : index
      %19 = vector.load %arg6[%c0_15, %c0_16] : memref<512x128xbf16, #tpu.memory_space<vmem>>, vector<512x128xbf16>
      tpu.vector_store %arg6[%c0_15, %c0_16], %18 {strides = array<i32>} : memref<512x128xbf16, #tpu.memory_space<vmem>>, vector<512x128xbf16>,
    } else {
    }
    return
  }
  func.func @transform_0(%arg0: i32, %arg1: i32, %arg2: i32) -> (i32, i32) {
    %c0_i32 = arith.constant 0 : i32
    return %arg0, %arg2 : i32, i32
  }
  func.func @transform_1(%arg0: i32, %arg1: i32, %arg2: i32) -> (i32, i32) {
    %c0_i32 = arith.constant 0 : i32
    return %arg2, %arg1 : i32, i32
  }
  func.func @transform_2(%arg0: i32, %arg1: i32, %arg2: i32) -> (i32, i32) {
    %c0_i32 = arith.constant 0 : i32
    %c0_i32_0 = arith.constant 0 : i32
    return %c0_i32, %arg1 : i32, i32
  }
  func.func @transform_3(%arg0: i32, %arg1: i32, %arg2: i32) -> (i32, i32) {
    %c0_i32 = arith.constant 0 : i32
    return %arg0, %arg1 : i32, i32
  }
}

module attributes {stable_mosaic.version = 11 : i64} {
  func.func @_matmul_bias_kernel(%arg0: i32, %arg1: i32, %arg2: i32, %arg3: memref<512x256xbf16, #tpu.memory_space<vmem>>, %arg4: memref<256x128xbf16, #tpu.memory_space<vmem>>, %arg5: memref<1x128xf32, #tpu.memory_space<vmem>>, %arg6: memref<512x128xbf16, #tpu.memory_space<vmem>>, %arg7: memref<512x128xf32, #tpu.memory_space<vmem>>) attributes {dimension_semantics = [#tpu.dimension_semantics<parallel>, #tpu.dimension_semantics<parallel>, #tpu.dimension_semantics<arbitrary>], iteration_bounds = array<i64: 4, 1, 1>, scalar_prefetch = 0 : i64, scratch_operands = 1 : i64, tpu.core_type = #tpu.core_type<tc>, window_params = [{transform_indices = @transform_0, window_bounds = array<i64: 512, 256>}, {transform_indices = @transform_1, window_bounds = array<i64: 256, 128>}, {transform_indices = @transform_2, window_bounds = array<i64: 1, 128>}, {transform_indices = @transform_3, window_bounds = array<i64: 512, 128>}]} {
    %c0_i32 = arith.constant 0 : i32
    %0 = arith.cmpi eq, %arg2, %c0_i32 : i32
    %1 = arith.extui %0 : i1 to i32
    %c0_i32_0 = arith.constant 0 : i32
    %2 = arith.cmpi ne, %1, %c0_i32_0 : i32
    scf.if %2 {
      %cst_10 = arith.constant 0.000000e+00 : f32
      %12 = vector.broadcast %cst_10 : f32 to vector<512x128xf32>
      %c0_11 = arith.constant 0 : index
      %c0_12 = arith.constant 0 : index
      %13 = vector.load %arg7[%c0_11, %c0_12] : memref<512x128xf32, #tpu.memory_space<vmem>>, vector<512x128xf32>
      tpu.vector_store %arg7[%c0_11, %c0_12], %12 {strides = array<i32>} : memref<512x128xf32, #tpu.memory_space<vmem>>, vector<512x128xf32>,
    } else {
    }
    %c0 = arith.constant 0 : index
    %c0_1 = arith.constant 0 : index
    %3 = vector.load %arg7[%c0, %c0_1] : memref<512x128xf32, #tpu.memory_space<vmem>>, vector<512x128xf32>
    %c0_2 = arith.constant 0 : index
    %c0_3 = arith.constant 0 : index
    %4 = vector.load %arg3[%c0_2, %c0_3] : memref<512x256xbf16, #tpu.memory_space<vmem>>, vector<512x256xbf16>
    %c0_4 = arith.constant 0 : index
    %c0_5 = arith.constant 0 : index
    %5 = vector.load %arg4[%c0_4, %c0_5] : memref<256x128xbf16, #tpu.memory_space<vmem>>, vector<256x128xbf16>
    %cst = arith.constant dense<0.000000e+00> : vector<512x128xf32>
    %6 = tpu.matmul %4, %5, %cst {dimension_numbers = #tpu.dot_dimension_numbers<[1], [0], [0], [1], [0, 0, 1, 1], [], []>} : vector<512x256xbf16>, vector<256x128xbf16>, vector<512x128xf32> -> vector<512x128xf32>
    %7 = arith.addf %3, %6 : vector<512x128xf32>
    %c0_6 = arith.constant 0 : index
    %c0_7 = arith.constant 0 : index
    %8 = vector.load %arg7[%c0_6, %c0_7] : memref<512x128xf32, #tpu.memory_space<vmem>>, vector<512x128xf32>
    tpu.vector_store %arg7[%c0_6, %c0_7], %7 {strides = array<i32>} : memref<512x128xf32, #tpu.memory_space<vmem>>, vector<512x128xf32>,
    %c0_i32_8 = arith.constant 0 : i32
    %9 = arith.cmpi eq, %arg2, %c0_i32_8 : i32
    %10 = arith.extui %9 : i1 to i32
    %c0_i32_9 = arith.constant 0 : i32
    %11 = arith.cmpi ne, %10, %c0_i32_9 : i32
    scf.if %11 {
      %c0_10 = arith.constant 0 : index
      %c0_11 = arith.constant 0 : index
      %12 = vector.load %arg7[%c0_10, %c0_11] : memref<512x128xf32, #tpu.memory_space<vmem>>, vector<512x128xf32>
      %c0_12 = arith.constant 0 : index
      %c0_13 = arith.constant 0 : index
      %13 = vector.load %arg5[%c0_12, %c0_13] : memref<1x128xf32, #tpu.memory_space<vmem>>, vector<1x128xf32>
      %14 = vector.broadcast %13 : vector<1x128xf32> to vector<512x128xf32>
      %15 = arith.addf %12, %14 : vector<512x128xf32>
      %cst_14 = arith.constant 0.000000e+00 : f32
      %16 = vector.broadcast %cst_14 : f32 to vector<512x128xf32>
      %17 = arith.maximumf %15, %16 : vector<512x128xf32>
      %18 = arith.truncf %17 : vector<512x128xf32> to vector<512x128xbf16>
      %c0_15 = arith.constant 0 : index
      %c0_16 = arith.constant 0 : index
      %19 = vector.load %arg6[%c0_15, %c0_16] : memref<512x128xbf16, #tpu.memory_space<vmem>>, vector<512x128xbf16>
      tpu.vector_store %arg6[%c0_15, %c0_16], %18 {strides = array<i32>} : memref<512x128xbf16, #tpu.memory_space<vmem>>, vector<512x128xbf16>,
    } else {
    }
    return
  }
  func.func @transform_0(%arg0: i32, %arg1: i32, %arg2: i32) -> (i32, i32) {
    %c0_i32 = arith.constant 0 : i32
    return %arg0, %arg2 : i32, i32
  }
  func.func @transform_1(%arg0: i32, %arg1: i32, %arg2: i32) -> (i32, i32) {
    %c0_i32 = arith.constant 0 : i32
    return %arg2, %arg1 : i32, i32
  }
  func.func @transform_2(%arg0: i32, %arg1: i32, %arg2: i32) -> (i32, i32) {
    %c0_i32 = arith.constant 0 : i32
    %c0_i32_0 = arith.constant 0 : i32
    return %c0_i32, %arg1 : i32, i32
  }
  func.func @transform_3(%arg0: i32, %arg1: i32, %arg2: i32) -> (i32, i32) {
    %c0_i32 = arith.constant 0 : i32
    return %arg0, %arg1 : i32, i32
  }
}

module attributes {stable_mosaic.version = 11 : i64} {
  func.func @_matmul_bias_kernel(%arg0: i32, %arg1: i32, %arg2: i32, %arg3: memref<128x256xbf16, #tpu.memory_space<vmem>>, %arg4: memref<256x128xbf16, #tpu.memory_space<vmem>>, %arg5: memref<1x128xf32, #tpu.memory_space<vmem>>, %arg6: memref<128x128xbf16, #tpu.memory_space<vmem>>, %arg7: memref<128x128xf32, #tpu.memory_space<vmem>>) attributes {dimension_semantics = [#tpu.dimension_semantics<parallel>, #tpu.dimension_semantics<parallel>, #tpu.dimension_semantics<arbitrary>], iteration_bounds = array<i64: 1, 1, 1>, scalar_prefetch = 0 : i64, scratch_operands = 1 : i64, tpu.core_type = #tpu.core_type<tc>, window_params = [{transform_indices = @transform_0, window_bounds = array<i64: 128, 256>}, {transform_indices = @transform_1, window_bounds = array<i64: 256, 128>}, {transform_indices = @transform_2, window_bounds = array<i64: 1, 128>}, {transform_indices = @transform_3, window_bounds = array<i64: 128, 128>}]} {
    %c0_i32 = arith.constant 0 : i32
    %0 = arith.cmpi eq, %arg2, %c0_i32 : i32
    %1 = arith.extui %0 : i1 to i32
    %c0_i32_0 = arith.constant 0 : i32
    %2 = arith.cmpi ne, %1, %c0_i32_0 : i32
    scf.if %2 {
      %cst_10 = arith.constant 0.000000e+00 : f32
      %12 = vector.broadcast %cst_10 : f32 to vector<128x128xf32>
      %c0_11 = arith.constant 0 : index
      %c0_12 = arith.constant 0 : index
      %13 = vector.load %arg7[%c0_11, %c0_12] : memref<128x128xf32, #tpu.memory_space<vmem>>, vector<128x128xf32>
      tpu.vector_store %arg7[%c0_11, %c0_12], %12 {strides = array<i32>} : memref<128x128xf32, #tpu.memory_space<vmem>>, vector<128x128xf32>,
    } else {
    }
    %c0 = arith.constant 0 : index
    %c0_1 = arith.constant 0 : index
    %3 = vector.load %arg7[%c0, %c0_1] : memref<128x128xf32, #tpu.memory_space<vmem>>, vector<128x128xf32>
    %c0_2 = arith.constant 0 : index
    %c0_3 = arith.constant 0 : index
    %4 = vector.load %arg3[%c0_2, %c0_3] : memref<128x256xbf16, #tpu.memory_space<vmem>>, vector<128x256xbf16>
    %c0_4 = arith.constant 0 : index
    %c0_5 = arith.constant 0 : index
    %5 = vector.load %arg4[%c0_4, %c0_5] : memref<256x128xbf16, #tpu.memory_space<vmem>>, vector<256x128xbf16>
    %cst = arith.constant dense<0.000000e+00> : vector<128x128xf32>
    %6 = tpu.matmul %4, %5, %cst {dimension_numbers = #tpu.dot_dimension_numbers<[1], [0], [0], [1], [0, 0, 1, 1], [], []>} : vector<128x256xbf16>, vector<256x128xbf16>, vector<128x128xf32> -> vector<128x128xf32>
    %7 = arith.addf %3, %6 : vector<128x128xf32>
    %c0_6 = arith.constant 0 : index
    %c0_7 = arith.constant 0 : index
    %8 = vector.load %arg7[%c0_6, %c0_7] : memref<128x128xf32, #tpu.memory_space<vmem>>, vector<128x128xf32>
    tpu.vector_store %arg7[%c0_6, %c0_7], %7 {strides = array<i32>} : memref<128x128xf32, #tpu.memory_space<vmem>>, vector<128x128xf32>,
    %c0_i32_8 = arith.constant 0 : i32
    %9 = arith.cmpi eq, %arg2, %c0_i32_8 : i32
    %10 = arith.extui %9 : i1 to i32
    %c0_i32_9 = arith.constant 0 : i32
    %11 = arith.cmpi ne, %10, %c0_i32_9 : i32
    scf.if %11 {
      %c0_10 = arith.constant 0 : index
      %c0_11 = arith.constant 0 : index
      %12 = vector.load %arg7[%c0_10, %c0_11] : memref<128x128xf32, #tpu.memory_space<vmem>>, vector<128x128xf32>
      %c0_12 = arith.constant 0 : index
      %c0_13 = arith.constant 0 : index
      %13 = vector.load %arg5[%c0_12, %c0_13] : memref<1x128xf32, #tpu.memory_space<vmem>>, vector<1x128xf32>
      %14 = vector.broadcast %13 : vector<1x128xf32> to vector<128x128xf32>
      %15 = arith.addf %12, %14 : vector<128x128xf32>
      %cst_14 = arith.constant 0.000000e+00 : f32
      %16 = vector.broadcast %cst_14 : f32 to vector<128x128xf32>
      %17 = arith.maximumf %15, %16 : vector<128x128xf32>
      %18 = arith.truncf %17 : vector<128x128xf32> to vector<128x128xbf16>
      %c0_15 = arith.constant 0 : index
      %c0_16 = arith.constant 0 : index
      %19 = vector.load %arg6[%c0_15, %c0_16] : memref<128x128xbf16, #tpu.memory_space<vmem>>, vector<128x128xbf16>
      tpu.vector_store %arg6[%c0_15, %c0_16], %18 {strides = array<i32>} : memref<128x128xbf16, #tpu.memory_space<vmem>>, vector<128x128xbf16>,
    } else {
    }
    return
  }
  func.func @transform_0(%arg0: i32, %arg1: i32, %arg2: i32) -> (i32, i32) {
    %c0_i32 = arith.constant 0 : i32
    return %arg0, %arg2 : i32, i32
  }
  func.func @transform_1(%arg0: i32, %arg1: i32, %arg2: i32) -> (i32, i32) {
    %c0_i32 = arith.constant 0 : i32
    return %arg2, %arg1 : i32, i32
  }
  func.func @transform_2(%arg0: i32, %arg1: i32, %arg2: i32) -> (i32, i32) {
    %c0_i32 = arith.constant 0 : i32
    %c0_i32_0 = arith.constant 0 : i32
    return %c0_i32, %arg1 : i32, i32
  }
  func.func @transform_3(%arg0: i32, %arg1: i32, %arg2: i32) -> (i32, i32) {
    %c0_i32 = arith.constant 0 : i32
    return %arg0, %arg1 : i32, i32
  }
}

module attributes {stable_mosaic.version = 11 : i64} {
  func.func @_matmul_bias_kernel(%arg0: i32, %arg1: i32, %arg2: i32, %arg3: memref<128x512xbf16, #tpu.memory_space<vmem>>, %arg4: memref<512x128xbf16, #tpu.memory_space<vmem>>, %arg5: memref<1x128xf32, #tpu.memory_space<vmem>>, %arg6: memref<128x128xbf16, #tpu.memory_space<vmem>>, %arg7: memref<128x128xf32, #tpu.memory_space<vmem>>) attributes {dimension_semantics = [#tpu.dimension_semantics<parallel>, #tpu.dimension_semantics<parallel>, #tpu.dimension_semantics<arbitrary>], iteration_bounds = array<i64: 1, 1, 1>, scalar_prefetch = 0 : i64, scratch_operands = 1 : i64, tpu.core_type = #tpu.core_type<tc>, window_params = [{transform_indices = @transform_0, window_bounds = array<i64: 128, 512>}, {transform_indices = @transform_1, window_bounds = array<i64: 512, 128>}, {transform_indices = @transform_2, window_bounds = array<i64: 1, 128>}, {transform_indices = @transform_3, window_bounds = array<i64: 128, 128>}]} {
    %c0_i32 = arith.constant 0 : i32
    %0 = arith.cmpi eq, %arg2, %c0_i32 : i32
    %1 = arith.extui %0 : i1 to i32
    %c0_i32_0 = arith.constant 0 : i32
    %2 = arith.cmpi ne, %1, %c0_i32_0 : i32
    scf.if %2 {
      %cst_10 = arith.constant 0.000000e+00 : f32
      %12 = vector.broadcast %cst_10 : f32 to vector<128x128xf32>
      %c0_11 = arith.constant 0 : index
      %c0_12 = arith.constant 0 : index
      %13 = vector.load %arg7[%c0_11, %c0_12] : memref<128x128xf32, #tpu.memory_space<vmem>>, vector<128x128xf32>
      tpu.vector_store %arg7[%c0_11, %c0_12], %12 {strides = array<i32>} : memref<128x128xf32, #tpu.memory_space<vmem>>, vector<128x128xf32>,
    } else {
    }
    %c0 = arith.constant 0 : index
    %c0_1 = arith.constant 0 : index
    %3 = vector.load %arg7[%c0, %c0_1] : memref<128x128xf32, #tpu.memory_space<vmem>>, vector<128x128xf32>
    %c0_2 = arith.constant 0 : index
    %c0_3 = arith.constant 0 : index
    %4 = vector.load %arg3[%c0_2, %c0_3] : memref<128x512xbf16, #tpu.memory_space<vmem>>, vector<128x512xbf16>
    %c0_4 = arith.constant 0 : index
    %c0_5 = arith.constant 0 : index
    %5 = vector.load %arg4[%c0_4, %c0_5] : memref<512x128xbf16, #tpu.memory_space<vmem>>, vector<512x128xbf16>
    %cst = arith.constant dense<0.000000e+00> : vector<128x128xf32>
    %6 = tpu.matmul %4, %5, %cst {dimension_numbers = #tpu.dot_dimension_numbers<[1], [0], [0], [1], [0, 0, 1, 1], [], []>} : vector<128x512xbf16>, vector<512x128xbf16>, vector<128x128xf32> -> vector<128x128xf32>
    %7 = arith.addf %3, %6 : vector<128x128xf32>
    %c0_6 = arith.constant 0 : index
    %c0_7 = arith.constant 0 : index
    %8 = vector.load %arg7[%c0_6, %c0_7] : memref<128x128xf32, #tpu.memory_space<vmem>>, vector<128x128xf32>
    tpu.vector_store %arg7[%c0_6, %c0_7], %7 {strides = array<i32>} : memref<128x128xf32, #tpu.memory_space<vmem>>, vector<128x128xf32>,
    %c0_i32_8 = arith.constant 0 : i32
    %9 = arith.cmpi eq, %arg2, %c0_i32_8 : i32
    %10 = arith.extui %9 : i1 to i32
    %c0_i32_9 = arith.constant 0 : i32
    %11 = arith.cmpi ne, %10, %c0_i32_9 : i32
    scf.if %11 {
      %c0_10 = arith.constant 0 : index
      %c0_11 = arith.constant 0 : index
      %12 = vector.load %arg7[%c0_10, %c0_11] : memref<128x128xf32, #tpu.memory_space<vmem>>, vector<128x128xf32>
      %c0_12 = arith.constant 0 : index
      %c0_13 = arith.constant 0 : index
      %13 = vector.load %arg5[%c0_12, %c0_13] : memref<1x128xf32, #tpu.memory_space<vmem>>, vector<1x128xf32>
      %14 = vector.broadcast %13 : vector<1x128xf32> to vector<128x128xf32>
      %15 = arith.addf %12, %14 : vector<128x128xf32>
      %cst_14 = arith.constant 0.000000e+00 : f32
      %16 = vector.broadcast %cst_14 : f32 to vector<128x128xf32>
      %17 = arith.maximumf %15, %16 : vector<128x128xf32>
      %18 = arith.truncf %17 : vector<128x128xf32> to vector<128x128xbf16>
      %c0_15 = arith.constant 0 : index
      %c0_16 = arith.constant 0 : index
      %19 = vector.load %arg6[%c0_15, %c0_16] : memref<128x128xbf16, #tpu.memory_space<vmem>>, vector<128x128xbf16>
      tpu.vector_store %arg6[%c0_15, %c0_16], %18 {strides = array<i32>} : memref<128x128xbf16, #tpu.memory_space<vmem>>, vector<128x128xbf16>,
    } else {
    }
    return
  }
  func.func @transform_0(%arg0: i32, %arg1: i32, %arg2: i32) -> (i32, i32) {
    %c0_i32 = arith.constant 0 : i32
    return %arg0, %arg2 : i32, i32
  }
  func.func @transform_1(%arg0: i32, %arg1: i32, %arg2: i32) -> (i32, i32) {
    %c0_i32 = arith.constant 0 : i32
    return %arg2, %arg1 : i32, i32
  }
  func.func @transform_2(%arg0: i32, %arg1: i32, %arg2: i32) -> (i32, i32) {
    %c0_i32 = arith.constant 0 : i32
    %c0_i32_0 = arith.constant 0 : i32
    return %c0_i32, %arg1 : i32, i32
  }
  func.func @transform_3(%arg0: i32, %arg1: i32, %arg2: i32) -> (i32, i32) {
    %c0_i32 = arith.constant 0 : i32
    return %arg0, %arg1 : i32, i32
  }
}

module attributes {stable_mosaic.version = 11 : i64} {
  func.func @_matmul_bias_kernel(%arg0: i32, %arg1: i32, %arg2: i32, %arg3: memref<16x256xbf16, #tpu.memory_space<vmem>>, %arg4: memref<256x512xbf16, #tpu.memory_space<vmem>>, %arg5: memref<1x512xf32, #tpu.memory_space<vmem>>, %arg6: memref<16x512xf32, #tpu.memory_space<vmem>>, %arg7: memref<16x512xf32, #tpu.memory_space<vmem>>) attributes {dimension_semantics = [#tpu.dimension_semantics<parallel>, #tpu.dimension_semantics<parallel>, #tpu.dimension_semantics<arbitrary>], iteration_bounds = array<i64: 1, 2, 1>, scalar_prefetch = 0 : i64, scratch_operands = 1 : i64, tpu.core_type = #tpu.core_type<tc>, window_params = [{transform_indices = @transform_0, window_bounds = array<i64: 16, 256>}, {transform_indices = @transform_1, window_bounds = array<i64: 256, 512>}, {transform_indices = @transform_2, window_bounds = array<i64: 1, 512>}, {transform_indices = @transform_3, window_bounds = array<i64: 16, 512>}]} {
    %c0_i32 = arith.constant 0 : i32
    %0 = arith.cmpi eq, %arg2, %c0_i32 : i32
    %1 = arith.extui %0 : i1 to i32
    %c0_i32_0 = arith.constant 0 : i32
    %2 = arith.cmpi ne, %1, %c0_i32_0 : i32
    scf.if %2 {
      %cst_10 = arith.constant 0.000000e+00 : f32
      %12 = vector.broadcast %cst_10 : f32 to vector<16x512xf32>
      %c0_11 = arith.constant 0 : index
      %c0_12 = arith.constant 0 : index
      %13 = vector.load %arg7[%c0_11, %c0_12] : memref<16x512xf32, #tpu.memory_space<vmem>>, vector<16x512xf32>
      tpu.vector_store %arg7[%c0_11, %c0_12], %12 {strides = array<i32>} : memref<16x512xf32, #tpu.memory_space<vmem>>, vector<16x512xf32>,
    } else {
    }
    %c0 = arith.constant 0 : index
    %c0_1 = arith.constant 0 : index
    %3 = vector.load %arg7[%c0, %c0_1] : memref<16x512xf32, #tpu.memory_space<vmem>>, vector<16x512xf32>
    %c0_2 = arith.constant 0 : index
    %c0_3 = arith.constant 0 : index
    %4 = vector.load %arg3[%c0_2, %c0_3] : memref<16x256xbf16, #tpu.memory_space<vmem>>, vector<16x256xbf16>
    %c0_4 = arith.constant 0 : index
    %c0_5 = arith.constant 0 : index
    %5 = vector.load %arg4[%c0_4, %c0_5] : memref<256x512xbf16, #tpu.memory_space<vmem>>, vector<256x512xbf16>
    %cst = arith.constant dense<0.000000e+00> : vector<16x512xf32>
    %6 = tpu.matmul %4, %5, %cst {dimension_numbers = #tpu.dot_dimension_numbers<[1], [0], [0], [1], [0, 0, 1, 1], [], []>} : vector<16x256xbf16>, vector<256x512xbf16>, vector<16x512xf32> -> vector<16x512xf32>
    %7 = arith.addf %3, %6 : vector<16x512xf32>
    %c0_6 = arith.constant 0 : index
    %c0_7 = arith.constant 0 : index
    %8 = vector.load %arg7[%c0_6, %c0_7] : memref<16x512xf32, #tpu.memory_space<vmem>>, vector<16x512xf32>
    tpu.vector_store %arg7[%c0_6, %c0_7], %7 {strides = array<i32>} : memref<16x512xf32, #tpu.memory_space<vmem>>, vector<16x512xf32>,
    %c0_i32_8 = arith.constant 0 : i32
    %9 = arith.cmpi eq, %arg2, %c0_i32_8 : i32
    %10 = arith.extui %9 : i1 to i32
    %c0_i32_9 = arith.constant 0 : i32
    %11 = arith.cmpi ne, %10, %c0_i32_9 : i32
    scf.if %11 {
      %c0_10 = arith.constant 0 : index
      %c0_11 = arith.constant 0 : index
      %12 = vector.load %arg7[%c0_10, %c0_11] : memref<16x512xf32, #tpu.memory_space<vmem>>, vector<16x512xf32>
      %c0_12 = arith.constant 0 : index
      %c0_13 = arith.constant 0 : index
      %13 = vector.load %arg5[%c0_12, %c0_13] : memref<1x512xf32, #tpu.memory_space<vmem>>, vector<1x512xf32>
      %14 = vector.broadcast %13 : vector<1x512xf32> to vector<16x512xf32>
      %15 = arith.addf %12, %14 : vector<16x512xf32>
      %c0_14 = arith.constant 0 : index
      %c0_15 = arith.constant 0 : index
      %16 = vector.load %arg6[%c0_14, %c0_15] : memref<16x512xf32, #tpu.memory_space<vmem>>, vector<16x512xf32>
      tpu.vector_store %arg6[%c0_14, %c0_15], %15 {strides = array<i32>} : memref<16x512xf32, #tpu.memory_space<vmem>>, vector<16x512xf32>,
    } else {
    }
    return
  }
  func.func @transform_0(%arg0: i32, %arg1: i32, %arg2: i32) -> (i32, i32) {
    %c0_i32 = arith.constant 0 : i32
    return %arg0, %arg2 : i32, i32
  }
  func.func @transform_1(%arg0: i32, %arg1: i32, %arg2: i32) -> (i32, i32) {
    %c0_i32 = arith.constant 0 : i32
    return %arg2, %arg1 : i32, i32
  }
  func.func @transform_2(%arg0: i32, %arg1: i32, %arg2: i32) -> (i32, i32) {
    %c0_i32 = arith.constant 0 : i32
    %c0_i32_0 = arith.constant 0 : i32
    return %c0_i32, %arg1 : i32, i32
  }
  func.func @transform_3(%arg0: i32, %arg1: i32, %arg2: i32) -> (i32, i32) {
    %c0_i32 = arith.constant 0 : i32
    return %arg0, %arg1 : i32, i32
  }
}

module attributes {stable_mosaic.version = 11 : i64} {
  func.func @_matmul_bias_kernel(%arg0: i32, %arg1: i32, %arg2: i32, %arg3: memref<16x256xbf16, #tpu.memory_space<vmem>>, %arg4: memref<256x256xbf16, #tpu.memory_space<vmem>>, %arg5: memref<1x256xf32, #tpu.memory_space<vmem>>, %arg6: memref<16x256xf32, #tpu.memory_space<vmem>>, %arg7: memref<16x256xf32, #tpu.memory_space<vmem>>) attributes {dimension_semantics = [#tpu.dimension_semantics<parallel>, #tpu.dimension_semantics<parallel>, #tpu.dimension_semantics<arbitrary>], iteration_bounds = array<i64: 1, 1, 1>, scalar_prefetch = 0 : i64, scratch_operands = 1 : i64, tpu.core_type = #tpu.core_type<tc>, window_params = [{transform_indices = @transform_0, window_bounds = array<i64: 16, 256>}, {transform_indices = @transform_1, window_bounds = array<i64: 256, 256>}, {transform_indices = @transform_2, window_bounds = array<i64: 1, 256>}, {transform_indices = @transform_3, window_bounds = array<i64: 16, 256>}]} {
    %c0_i32 = arith.constant 0 : i32
    %0 = arith.cmpi eq, %arg2, %c0_i32 : i32
    %1 = arith.extui %0 : i1 to i32
    %c0_i32_0 = arith.constant 0 : i32
    %2 = arith.cmpi ne, %1, %c0_i32_0 : i32
    scf.if %2 {
      %cst_10 = arith.constant 0.000000e+00 : f32
      %12 = vector.broadcast %cst_10 : f32 to vector<16x256xf32>
      %c0_11 = arith.constant 0 : index
      %c0_12 = arith.constant 0 : index
      %13 = vector.load %arg7[%c0_11, %c0_12] : memref<16x256xf32, #tpu.memory_space<vmem>>, vector<16x256xf32>
      tpu.vector_store %arg7[%c0_11, %c0_12], %12 {strides = array<i32>} : memref<16x256xf32, #tpu.memory_space<vmem>>, vector<16x256xf32>,
    } else {
    }
    %c0 = arith.constant 0 : index
    %c0_1 = arith.constant 0 : index
    %3 = vector.load %arg7[%c0, %c0_1] : memref<16x256xf32, #tpu.memory_space<vmem>>, vector<16x256xf32>
    %c0_2 = arith.constant 0 : index
    %c0_3 = arith.constant 0 : index
    %4 = vector.load %arg3[%c0_2, %c0_3] : memref<16x256xbf16, #tpu.memory_space<vmem>>, vector<16x256xbf16>
    %c0_4 = arith.constant 0 : index
    %c0_5 = arith.constant 0 : index
    %5 = vector.load %arg4[%c0_4, %c0_5] : memref<256x256xbf16, #tpu.memory_space<vmem>>, vector<256x256xbf16>
    %cst = arith.constant dense<0.000000e+00> : vector<16x256xf32>
    %6 = tpu.matmul %4, %5, %cst {dimension_numbers = #tpu.dot_dimension_numbers<[1], [0], [0], [1], [0, 0, 1, 1], [], []>} : vector<16x256xbf16>, vector<256x256xbf16>, vector<16x256xf32> -> vector<16x256xf32>
    %7 = arith.addf %3, %6 : vector<16x256xf32>
    %c0_6 = arith.constant 0 : index
    %c0_7 = arith.constant 0 : index
    %8 = vector.load %arg7[%c0_6, %c0_7] : memref<16x256xf32, #tpu.memory_space<vmem>>, vector<16x256xf32>
    tpu.vector_store %arg7[%c0_6, %c0_7], %7 {strides = array<i32>} : memref<16x256xf32, #tpu.memory_space<vmem>>, vector<16x256xf32>,
    %c0_i32_8 = arith.constant 0 : i32
    %9 = arith.cmpi eq, %arg2, %c0_i32_8 : i32
    %10 = arith.extui %9 : i1 to i32
    %c0_i32_9 = arith.constant 0 : i32
    %11 = arith.cmpi ne, %10, %c0_i32_9 : i32
    scf.if %11 {
      %c0_10 = arith.constant 0 : index
      %c0_11 = arith.constant 0 : index
      %12 = vector.load %arg7[%c0_10, %c0_11] : memref<16x256xf32, #tpu.memory_space<vmem>>, vector<16x256xf32>
      %c0_12 = arith.constant 0 : index
      %c0_13 = arith.constant 0 : index
      %13 = vector.load %arg5[%c0_12, %c0_13] : memref<1x256xf32, #tpu.memory_space<vmem>>, vector<1x256xf32>
      %14 = vector.broadcast %13 : vector<1x256xf32> to vector<16x256xf32>
      %15 = arith.addf %12, %14 : vector<16x256xf32>
      %c0_14 = arith.constant 0 : index
      %c0_15 = arith.constant 0 : index
      %16 = vector.load %arg6[%c0_14, %c0_15] : memref<16x256xf32, #tpu.memory_space<vmem>>, vector<16x256xf32>
      tpu.vector_store %arg6[%c0_14, %c0_15], %15 {strides = array<i32>} : memref<16x256xf32, #tpu.memory_space<vmem>>, vector<16x256xf32>,
    } else {
    }
    return
  }
  func.func @transform_0(%arg0: i32, %arg1: i32, %arg2: i32) -> (i32, i32) {
    %c0_i32 = arith.constant 0 : i32
    return %arg0, %arg2 : i32, i32
  }
  func.func @transform_1(%arg0: i32, %arg1: i32, %arg2: i32) -> (i32, i32) {
    %c0_i32 = arith.constant 0 : i32
    return %arg2, %arg1 : i32, i32
  }
  func.func @transform_2(%arg0: i32, %arg1: i32, %arg2: i32) -> (i32, i32) {
    %c0_i32 = arith.constant 0 : i32
    %c0_i32_0 = arith.constant 0 : i32
    return %c0_i32, %arg1 : i32, i32
  }
  func.func @transform_3(%arg0: i32, %arg1: i32, %arg2: i32) -> (i32, i32) {
    %c0_i32 = arith.constant 0 : i32
    return %arg0, %arg1 : i32, i32
  }
}

module attributes {stable_mosaic.version = 11 : i64} {
  func.func @_add_layernorm_kernel(%arg0: memref<16x256xf32, #tpu.memory_space<vmem>>, %arg1: memref<16x256xf32, #tpu.memory_space<vmem>>, %arg2: memref<1x256xf32, #tpu.memory_space<vmem>>, %arg3: memref<1x256xf32, #tpu.memory_space<vmem>>, %arg4: memref<16x256xf32, #tpu.memory_space<vmem>>) attributes {dimension_semantics = [], scalar_prefetch = 0 : i64, scratch_operands = 0 : i64, tpu.core_type = #tpu.core_type<tc>} {
    %c0 = arith.constant 0 : index
    %c0_0 = arith.constant 0 : index
    %0 = vector.load %arg0[%c0, %c0_0] : memref<16x256xf32, #tpu.memory_space<vmem>>, vector<16x256xf32>
    %c0_1 = arith.constant 0 : index
    %c0_2 = arith.constant 0 : index
    %1 = vector.load %arg1[%c0_1, %c0_2] : memref<16x256xf32, #tpu.memory_space<vmem>>, vector<16x256xf32>
    %2 = arith.addf %0, %1 : vector<16x256xf32>
    %cst = arith.constant dense<0.000000e+00> : vector<16xf32>
    %3 = vector.multi_reduction <add>, %2, %cst [1] : vector<16x256xf32> to vector<16xf32>
    %4 = vector.shape_cast %3 : vector<16xf32> to vector<16x1xf32>
    %cst_3 = arith.constant 2.560000e+02 : f32
    %5 = vector.broadcast %cst_3 : f32 to vector<16x1xf32>
    %6 = arith.divf %4, %5 : vector<16x1xf32>
    %7 = vector.broadcast %6 : vector<16x1xf32> to vector<16x256xf32>
    %8 = arith.subf %2, %7 : vector<16x256xf32>
    %9 = arith.mulf %8, %8 : vector<16x256xf32>
    %cst_4 = arith.constant dense<0.000000e+00> : vector<16xf32>
    %10 = vector.multi_reduction <add>, %9, %cst_4 [1] : vector<16x256xf32> to vector<16xf32>
    %11 = vector.shape_cast %10 : vector<16xf32> to vector<16x1xf32>
    %cst_5 = arith.constant 2.560000e+02 : f32
    %12 = vector.broadcast %cst_5 : f32 to vector<16x1xf32>
    %13 = arith.divf %11, %12 : vector<16x1xf32>
    %cst_6 = arith.constant 9.99999974E-6 : f32
    %14 = vector.broadcast %cst_6 : f32 to vector<16x1xf32>
    %15 = arith.addf %13, %14 : vector<16x1xf32>
    %16 = math.rsqrt %15 : vector<16x1xf32>
    %17 = vector.broadcast %6 : vector<16x1xf32> to vector<16x256xf32>
    %18 = arith.subf %2, %17 : vector<16x256xf32>
    %19 = vector.broadcast %16 : vector<16x1xf32> to vector<16x256xf32>
    %20 = arith.mulf %18, %19 : vector<16x256xf32>
    %c0_7 = arith.constant 0 : index
    %c0_8 = arith.constant 0 : index
    %21 = vector.load %arg2[%c0_7, %c0_8] : memref<1x256xf32, #tpu.memory_space<vmem>>, vector<1x256xf32>
    %22 = vector.broadcast %21 : vector<1x256xf32> to vector<16x256xf32>
    %23 = arith.mulf %20, %22 : vector<16x256xf32>
    %c0_9 = arith.constant 0 : index
    %c0_10 = arith.constant 0 : index
    %24 = vector.load %arg3[%c0_9, %c0_10] : memref<1x256xf32, #tpu.memory_space<vmem>>, vector<1x256xf32>
    %25 = vector.broadcast %24 : vector<1x256xf32> to vector<16x256xf32>
    %26 = arith.addf %23, %25 : vector<16x256xf32>
    %c0_11 = arith.constant 0 : index
    %c0_12 = arith.constant 0 : index
    %27 = vector.load %arg4[%c0_11, %c0_12] : memref<16x256xf32, #tpu.memory_space<vmem>>, vector<16x256xf32>
    tpu.vector_store %arg4[%c0_11, %c0_12], %26 {strides = array<i32>} : memref<16x256xf32, #tpu.memory_space<vmem>>, vector<16x256xf32>,
    return
  }
}

module attributes {stable_mosaic.version = 11 : i64} {
  func.func @_matmul_bias_kernel(%arg0: i32, %arg1: i32, %arg2: i32, %arg3: memref<16x256xbf16, #tpu.memory_space<vmem>>, %arg4: memref<256x256xbf16, #tpu.memory_space<vmem>>, %arg5: memref<1x256xf32, #tpu.memory_space<vmem>>, %arg6: memref<16x256xf32, #tpu.memory_space<vmem>>, %arg7: memref<16x256xf32, #tpu.memory_space<vmem>>) attributes {dimension_semantics = [#tpu.dimension_semantics<parallel>, #tpu.dimension_semantics<parallel>, #tpu.dimension_semantics<arbitrary>], iteration_bounds = array<i64: 1, 1, 1>, scalar_prefetch = 0 : i64, scratch_operands = 1 : i64, tpu.core_type = #tpu.core_type<tc>, window_params = [{transform_indices = @transform_0, window_bounds = array<i64: 16, 256>}, {transform_indices = @transform_1, window_bounds = array<i64: 256, 256>}, {transform_indices = @transform_2, window_bounds = array<i64: 1, 256>}, {transform_indices = @transform_3, window_bounds = array<i64: 16, 256>}]} {
    %c0_i32 = arith.constant 0 : i32
    %0 = arith.cmpi eq, %arg2, %c0_i32 : i32
    %1 = arith.extui %0 : i1 to i32
    %c0_i32_0 = arith.constant 0 : i32
    %2 = arith.cmpi ne, %1, %c0_i32_0 : i32
    scf.if %2 {
      %cst_10 = arith.constant 0.000000e+00 : f32
      %12 = vector.broadcast %cst_10 : f32 to vector<16x256xf32>
      %c0_11 = arith.constant 0 : index
      %c0_12 = arith.constant 0 : index
      %13 = vector.load %arg7[%c0_11, %c0_12] : memref<16x256xf32, #tpu.memory_space<vmem>>, vector<16x256xf32>
      tpu.vector_store %arg7[%c0_11, %c0_12], %12 {strides = array<i32>} : memref<16x256xf32, #tpu.memory_space<vmem>>, vector<16x256xf32>,
    } else {
    }
    %c0 = arith.constant 0 : index
    %c0_1 = arith.constant 0 : index
    %3 = vector.load %arg7[%c0, %c0_1] : memref<16x256xf32, #tpu.memory_space<vmem>>, vector<16x256xf32>
    %c0_2 = arith.constant 0 : index
    %c0_3 = arith.constant 0 : index
    %4 = vector.load %arg3[%c0_2, %c0_3] : memref<16x256xbf16, #tpu.memory_space<vmem>>, vector<16x256xbf16>
    %c0_4 = arith.constant 0 : index
    %c0_5 = arith.constant 0 : index
    %5 = vector.load %arg4[%c0_4, %c0_5] : memref<256x256xbf16, #tpu.memory_space<vmem>>, vector<256x256xbf16>
    %cst = arith.constant dense<0.000000e+00> : vector<16x256xf32>
    %6 = tpu.matmul %4, %5, %cst {dimension_numbers = #tpu.dot_dimension_numbers<[1], [0], [0], [1], [0, 0, 1, 1], [], []>} : vector<16x256xbf16>, vector<256x256xbf16>, vector<16x256xf32> -> vector<16x256xf32>
    %7 = arith.addf %3, %6 : vector<16x256xf32>
    %c0_6 = arith.constant 0 : index
    %c0_7 = arith.constant 0 : index
    %8 = vector.load %arg7[%c0_6, %c0_7] : memref<16x256xf32, #tpu.memory_space<vmem>>, vector<16x256xf32>
    tpu.vector_store %arg7[%c0_6, %c0_7], %7 {strides = array<i32>} : memref<16x256xf32, #tpu.memory_space<vmem>>, vector<16x256xf32>,
    %c0_i32_8 = arith.constant 0 : i32
    %9 = arith.cmpi eq, %arg2, %c0_i32_8 : i32
    %10 = arith.extui %9 : i1 to i32
    %c0_i32_9 = arith.constant 0 : i32
    %11 = arith.cmpi ne, %10, %c0_i32_9 : i32
    scf.if %11 {
      %c0_10 = arith.constant 0 : index
      %c0_11 = arith.constant 0 : index
      %12 = vector.load %arg7[%c0_10, %c0_11] : memref<16x256xf32, #tpu.memory_space<vmem>>, vector<16x256xf32>
      %c0_12 = arith.constant 0 : index
      %c0_13 = arith.constant 0 : index
      %13 = vector.load %arg5[%c0_12, %c0_13] : memref<1x256xf32, #tpu.memory_space<vmem>>, vector<1x256xf32>
      %14 = vector.broadcast %13 : vector<1x256xf32> to vector<16x256xf32>
      %15 = arith.addf %12, %14 : vector<16x256xf32>
      %cst_14 = arith.constant 0.000000e+00 : f32
      %16 = vector.broadcast %cst_14 : f32 to vector<16x256xf32>
      %17 = arith.maximumf %15, %16 : vector<16x256xf32>
      %c0_15 = arith.constant 0 : index
      %c0_16 = arith.constant 0 : index
      %18 = vector.load %arg6[%c0_15, %c0_16] : memref<16x256xf32, #tpu.memory_space<vmem>>, vector<16x256xf32>
      tpu.vector_store %arg6[%c0_15, %c0_16], %17 {strides = array<i32>} : memref<16x256xf32, #tpu.memory_space<vmem>>, vector<16x256xf32>,
    } else {
    }
    return
  }
  func.func @transform_0(%arg0: i32, %arg1: i32, %arg2: i32) -> (i32, i32) {
    %c0_i32 = arith.constant 0 : i32
    return %arg0, %arg2 : i32, i32
  }
  func.func @transform_1(%arg0: i32, %arg1: i32, %arg2: i32) -> (i32, i32) {
    %c0_i32 = arith.constant 0 : i32
    return %arg2, %arg1 : i32, i32
  }
  func.func @transform_2(%arg0: i32, %arg1: i32, %arg2: i32) -> (i32, i32) {
    %c0_i32 = arith.constant 0 : i32
    %c0_i32_0 = arith.constant 0 : i32
    return %c0_i32, %arg1 : i32, i32
  }
  func.func @transform_3(%arg0: i32, %arg1: i32, %arg2: i32) -> (i32, i32) {
    %c0_i32 = arith.constant 0 : i32
    return %arg0, %arg1 : i32, i32
  }
}

module attributes {stable_mosaic.version = 11 : i64} {
  func.func @_matmul_bias_kernel(%arg0: i32, %arg1: i32, %arg2: i32, %arg3: memref<16x256xbf16, #tpu.memory_space<vmem>>, %arg4: memref<256x128xbf16, #tpu.memory_space<vmem>>, %arg5: memref<1x128xf32, #tpu.memory_space<vmem>>, %arg6: memref<16x128xf32, #tpu.memory_space<vmem>>, %arg7: memref<16x128xf32, #tpu.memory_space<vmem>>) attributes {dimension_semantics = [#tpu.dimension_semantics<parallel>, #tpu.dimension_semantics<parallel>, #tpu.dimension_semantics<arbitrary>], iteration_bounds = array<i64: 1, 1, 1>, scalar_prefetch = 0 : i64, scratch_operands = 1 : i64, tpu.core_type = #tpu.core_type<tc>, window_params = [{transform_indices = @transform_0, window_bounds = array<i64: 16, 256>}, {transform_indices = @transform_1, window_bounds = array<i64: 256, 128>}, {transform_indices = @transform_2, window_bounds = array<i64: 1, 128>}, {transform_indices = @transform_3, window_bounds = array<i64: 16, 128>}]} {
    %c0_i32 = arith.constant 0 : i32
    %0 = arith.cmpi eq, %arg2, %c0_i32 : i32
    %1 = arith.extui %0 : i1 to i32
    %c0_i32_0 = arith.constant 0 : i32
    %2 = arith.cmpi ne, %1, %c0_i32_0 : i32
    scf.if %2 {
      %cst_10 = arith.constant 0.000000e+00 : f32
      %12 = vector.broadcast %cst_10 : f32 to vector<16x128xf32>
      %c0_11 = arith.constant 0 : index
      %c0_12 = arith.constant 0 : index
      %13 = vector.load %arg7[%c0_11, %c0_12] : memref<16x128xf32, #tpu.memory_space<vmem>>, vector<16x128xf32>
      tpu.vector_store %arg7[%c0_11, %c0_12], %12 {strides = array<i32>} : memref<16x128xf32, #tpu.memory_space<vmem>>, vector<16x128xf32>,
    } else {
    }
    %c0 = arith.constant 0 : index
    %c0_1 = arith.constant 0 : index
    %3 = vector.load %arg7[%c0, %c0_1] : memref<16x128xf32, #tpu.memory_space<vmem>>, vector<16x128xf32>
    %c0_2 = arith.constant 0 : index
    %c0_3 = arith.constant 0 : index
    %4 = vector.load %arg3[%c0_2, %c0_3] : memref<16x256xbf16, #tpu.memory_space<vmem>>, vector<16x256xbf16>
    %c0_4 = arith.constant 0 : index
    %c0_5 = arith.constant 0 : index
    %5 = vector.load %arg4[%c0_4, %c0_5] : memref<256x128xbf16, #tpu.memory_space<vmem>>, vector<256x128xbf16>
    %cst = arith.constant dense<0.000000e+00> : vector<16x128xf32>
    %6 = tpu.matmul %4, %5, %cst {dimension_numbers = #tpu.dot_dimension_numbers<[1], [0], [0], [1], [0, 0, 1, 1], [], []>} : vector<16x256xbf16>, vector<256x128xbf16>, vector<16x128xf32> -> vector<16x128xf32>
    %7 = arith.addf %3, %6 : vector<16x128xf32>
    %c0_6 = arith.constant 0 : index
    %c0_7 = arith.constant 0 : index
    %8 = vector.load %arg7[%c0_6, %c0_7] : memref<16x128xf32, #tpu.memory_space<vmem>>, vector<16x128xf32>
    tpu.vector_store %arg7[%c0_6, %c0_7], %7 {strides = array<i32>} : memref<16x128xf32, #tpu.memory_space<vmem>>, vector<16x128xf32>,
    %c0_i32_8 = arith.constant 0 : i32
    %9 = arith.cmpi eq, %arg2, %c0_i32_8 : i32
    %10 = arith.extui %9 : i1 to i32
    %c0_i32_9 = arith.constant 0 : i32
    %11 = arith.cmpi ne, %10, %c0_i32_9 : i32
    scf.if %11 {
      %c0_10 = arith.constant 0 : index
      %c0_11 = arith.constant 0 : index
      %12 = vector.load %arg7[%c0_10, %c0_11] : memref<16x128xf32, #tpu.memory_space<vmem>>, vector<16x128xf32>
      %c0_12 = arith.constant 0 : index
      %c0_13 = arith.constant 0 : index
      %13 = vector.load %arg5[%c0_12, %c0_13] : memref<1x128xf32, #tpu.memory_space<vmem>>, vector<1x128xf32>
      %14 = vector.broadcast %13 : vector<1x128xf32> to vector<16x128xf32>
      %15 = arith.addf %12, %14 : vector<16x128xf32>
      %cst_14 = arith.constant 0.000000e+00 : f32
      %16 = vector.broadcast %cst_14 : f32 to vector<16x128xf32>
      %17 = arith.subf %16, %15 : vector<16x128xf32>
      %18 = math.exp %17 : vector<16x128xf32>
      %cst_15 = arith.constant 1.000000e+00 : f32
      %19 = vector.broadcast %cst_15 : f32 to vector<16x128xf32>
      %20 = arith.addf %19, %18 : vector<16x128xf32>
      %cst_16 = arith.constant 1.000000e+00 : f32
      %21 = vector.broadcast %cst_16 : f32 to vector<16x128xf32>
      %22 = arith.divf %21, %20 : vector<16x128xf32>
      %c0_17 = arith.constant 0 : index
      %c0_18 = arith.constant 0 : index
      %23 = vector.load %arg6[%c0_17, %c0_18] : memref<16x128xf32, #tpu.memory_space<vmem>>, vector<16x128xf32>
      tpu.vector_store %arg6[%c0_17, %c0_18], %22 {strides = array<i32>} : memref<16x128xf32, #tpu.memory_space<vmem>>, vector<16x128xf32>,
    } else {
    }
    return
  }
  func.func @transform_0(%arg0: i32, %arg1: i32, %arg2: i32) -> (i32, i32) {
    %c0_i32 = arith.constant 0 : i32
    return %arg0, %arg2 : i32, i32
  }
  func.func @transform_1(%arg0: i32, %arg1: i32, %arg2: i32) -> (i32, i32) {
    %c0_i32 = arith.constant 0 : i32
    return %arg2, %arg1 : i32, i32
  }
  func.func @transform_2(%arg0: i32, %arg1: i32, %arg2: i32) -> (i32, i32) {
    %c0_i32 = arith.constant 0 : i32
    %c0_i32_0 = arith.constant 0 : i32
    return %c0_i32, %arg1 : i32, i32
  }
  func.func @transform_3(%arg0: i32, %arg1: i32, %arg2: i32) -> (i32, i32) {
    %c0_i32 = arith.constant 0 : i32
    return %arg0, %arg1 : i32, i32
  }
}

module attributes {stable_mosaic.version = 11 : i64} {
  func.func @_matmul_bias_kernel(%arg0: i32, %arg1: i32, %arg2: i32, %arg3: memref<128x128xbf16, #tpu.memory_space<vmem>>, %arg4: memref<128x128xbf16, #tpu.memory_space<vmem>>, %arg5: memref<1x128xf32, #tpu.memory_space<vmem>>, %arg6: memref<128x128xbf16, #tpu.memory_space<vmem>>, %arg7: memref<128x128xf32, #tpu.memory_space<vmem>>) attributes {dimension_semantics = [#tpu.dimension_semantics<parallel>, #tpu.dimension_semantics<parallel>, #tpu.dimension_semantics<arbitrary>], iteration_bounds = array<i64: 1, 1, 1>, scalar_prefetch = 0 : i64, scratch_operands = 1 : i64, tpu.core_type = #tpu.core_type<tc>, window_params = [{transform_indices = @transform_0, window_bounds = array<i64: 128, 128>}, {transform_indices = @transform_1, window_bounds = array<i64: 128, 128>}, {transform_indices = @transform_2, window_bounds = array<i64: 1, 128>}, {transform_indices = @transform_3, window_bounds = array<i64: 128, 128>}]} {
    %c0_i32 = arith.constant 0 : i32
    %0 = arith.cmpi eq, %arg2, %c0_i32 : i32
    %1 = arith.extui %0 : i1 to i32
    %c0_i32_0 = arith.constant 0 : i32
    %2 = arith.cmpi ne, %1, %c0_i32_0 : i32
    scf.if %2 {
      %cst_10 = arith.constant 0.000000e+00 : f32
      %12 = vector.broadcast %cst_10 : f32 to vector<128x128xf32>
      %c0_11 = arith.constant 0 : index
      %c0_12 = arith.constant 0 : index
      %13 = vector.load %arg7[%c0_11, %c0_12] : memref<128x128xf32, #tpu.memory_space<vmem>>, vector<128x128xf32>
      tpu.vector_store %arg7[%c0_11, %c0_12], %12 {strides = array<i32>} : memref<128x128xf32, #tpu.memory_space<vmem>>, vector<128x128xf32>,
    } else {
    }
    %c0 = arith.constant 0 : index
    %c0_1 = arith.constant 0 : index
    %3 = vector.load %arg7[%c0, %c0_1] : memref<128x128xf32, #tpu.memory_space<vmem>>, vector<128x128xf32>
    %c0_2 = arith.constant 0 : index
    %c0_3 = arith.constant 0 : index
    %4 = vector.load %arg3[%c0_2, %c0_3] : memref<128x128xbf16, #tpu.memory_space<vmem>>, vector<128x128xbf16>
    %c0_4 = arith.constant 0 : index
    %c0_5 = arith.constant 0 : index
    %5 = vector.load %arg4[%c0_4, %c0_5] : memref<128x128xbf16, #tpu.memory_space<vmem>>, vector<128x128xbf16>
    %cst = arith.constant dense<0.000000e+00> : vector<128x128xf32>
    %6 = tpu.matmul %4, %5, %cst {dimension_numbers = #tpu.dot_dimension_numbers<[1], [0], [0], [1], [0, 0, 1, 1], [], []>} : vector<128x128xbf16>, vector<128x128xbf16>, vector<128x128xf32> -> vector<128x128xf32>
    %7 = arith.addf %3, %6 : vector<128x128xf32>
    %c0_6 = arith.constant 0 : index
    %c0_7 = arith.constant 0 : index
    %8 = vector.load %arg7[%c0_6, %c0_7] : memref<128x128xf32, #tpu.memory_space<vmem>>, vector<128x128xf32>
    tpu.vector_store %arg7[%c0_6, %c0_7], %7 {strides = array<i32>} : memref<128x128xf32, #tpu.memory_space<vmem>>, vector<128x128xf32>,
    %c0_i32_8 = arith.constant 0 : i32
    %9 = arith.cmpi eq, %arg2, %c0_i32_8 : i32
    %10 = arith.extui %9 : i1 to i32
    %c0_i32_9 = arith.constant 0 : i32
    %11 = arith.cmpi ne, %10, %c0_i32_9 : i32
    scf.if %11 {
      %c0_10 = arith.constant 0 : index
      %c0_11 = arith.constant 0 : index
      %12 = vector.load %arg7[%c0_10, %c0_11] : memref<128x128xf32, #tpu.memory_space<vmem>>, vector<128x128xf32>
      %c0_12 = arith.constant 0 : index
      %c0_13 = arith.constant 0 : index
      %13 = vector.load %arg5[%c0_12, %c0_13] : memref<1x128xf32, #tpu.memory_space<vmem>>, vector<1x128xf32>
      %14 = vector.broadcast %13 : vector<1x128xf32> to vector<128x128xf32>
      %15 = arith.addf %12, %14 : vector<128x128xf32>
      %16 = arith.truncf %15 : vector<128x128xf32> to vector<128x128xbf16>
      %c0_14 = arith.constant 0 : index
      %c0_15 = arith.constant 0 : index
      %17 = vector.load %arg6[%c0_14, %c0_15] : memref<128x128xbf16, #tpu.memory_space<vmem>>, vector<128x128xbf16>
      tpu.vector_store %arg6[%c0_14, %c0_15], %16 {strides = array<i32>} : memref<128x128xbf16, #tpu.memory_space<vmem>>, vector<128x128xbf16>,
    } else {
    }
    return
  }
  func.func @transform_0(%arg0: i32, %arg1: i32, %arg2: i32) -> (i32, i32) {
    %c0_i32 = arith.constant 0 : i32
    return %arg0, %arg2 : i32, i32
  }
  func.func @transform_1(%arg0: i32, %arg1: i32, %arg2: i32) -> (i32, i32) {
    %c0_i32 = arith.constant 0 : i32
    return %arg2, %arg1 : i32, i32
  }
  func.func @transform_2(%arg0: i32, %arg1: i32, %arg2: i32) -> (i32, i32) {
    %c0_i32 = arith.constant 0 : i32
    %c0_i32_0 = arith.constant 0 : i32
    return %c0_i32, %arg1 : i32, i32
  }
  func.func @transform_3(%arg0: i32, %arg1: i32, %arg2: i32) -> (i32, i32) {
    %c0_i32 = arith.constant 0 : i32
    return %arg0, %arg1 : i32, i32
  }
}

module attributes {stable_mosaic.version = 11 : i64} {
  func.func @_matmul_bias_kernel(%arg0: i32, %arg1: i32, %arg2: i32, %arg3: memref<512x512xbf16, #tpu.memory_space<vmem>>, %arg4: memref<512x128xbf16, #tpu.memory_space<vmem>>, %arg5: memref<1x128xf32, #tpu.memory_space<vmem>>, %arg6: memref<512x128xbf16, #tpu.memory_space<vmem>>, %arg7: memref<512x128xf32, #tpu.memory_space<vmem>>) attributes {dimension_semantics = [#tpu.dimension_semantics<parallel>, #tpu.dimension_semantics<parallel>, #tpu.dimension_semantics<arbitrary>], iteration_bounds = array<i64: 4, 1, 1>, scalar_prefetch = 0 : i64, scratch_operands = 1 : i64, tpu.core_type = #tpu.core_type<tc>, window_params = [{transform_indices = @transform_0, window_bounds = array<i64: 512, 512>}, {transform_indices = @transform_1, window_bounds = array<i64: 512, 128>}, {transform_indices = @transform_2, window_bounds = array<i64: 1, 128>}, {transform_indices = @transform_3, window_bounds = array<i64: 512, 128>}]} {
    %c0_i32 = arith.constant 0 : i32
    %0 = arith.cmpi eq, %arg2, %c0_i32 : i32
    %1 = arith.extui %0 : i1 to i32
    %c0_i32_0 = arith.constant 0 : i32
    %2 = arith.cmpi ne, %1, %c0_i32_0 : i32
    scf.if %2 {
      %cst_10 = arith.constant 0.000000e+00 : f32
      %12 = vector.broadcast %cst_10 : f32 to vector<512x128xf32>
      %c0_11 = arith.constant 0 : index
      %c0_12 = arith.constant 0 : index
      %13 = vector.load %arg7[%c0_11, %c0_12] : memref<512x128xf32, #tpu.memory_space<vmem>>, vector<512x128xf32>
      tpu.vector_store %arg7[%c0_11, %c0_12], %12 {strides = array<i32>} : memref<512x128xf32, #tpu.memory_space<vmem>>, vector<512x128xf32>,
    } else {
    }
    %c0 = arith.constant 0 : index
    %c0_1 = arith.constant 0 : index
    %3 = vector.load %arg7[%c0, %c0_1] : memref<512x128xf32, #tpu.memory_space<vmem>>, vector<512x128xf32>
    %c0_2 = arith.constant 0 : index
    %c0_3 = arith.constant 0 : index
    %4 = vector.load %arg3[%c0_2, %c0_3] : memref<512x512xbf16, #tpu.memory_space<vmem>>, vector<512x512xbf16>
    %c0_4 = arith.constant 0 : index
    %c0_5 = arith.constant 0 : index
    %5 = vector.load %arg4[%c0_4, %c0_5] : memref<512x128xbf16, #tpu.memory_space<vmem>>, vector<512x128xbf16>
    %cst = arith.constant dense<0.000000e+00> : vector<512x128xf32>
    %6 = tpu.matmul %4, %5, %cst {dimension_numbers = #tpu.dot_dimension_numbers<[1], [0], [0], [1], [0, 0, 1, 1], [], []>} : vector<512x512xbf16>, vector<512x128xbf16>, vector<512x128xf32> -> vector<512x128xf32>
    %7 = arith.addf %3, %6 : vector<512x128xf32>
    %c0_6 = arith.constant 0 : index
    %c0_7 = arith.constant 0 : index
    %8 = vector.load %arg7[%c0_6, %c0_7] : memref<512x128xf32, #tpu.memory_space<vmem>>, vector<512x128xf32>
    tpu.vector_store %arg7[%c0_6, %c0_7], %7 {strides = array<i32>} : memref<512x128xf32, #tpu.memory_space<vmem>>, vector<512x128xf32>,
    %c0_i32_8 = arith.constant 0 : i32
    %9 = arith.cmpi eq, %arg2, %c0_i32_8 : i32
    %10 = arith.extui %9 : i1 to i32
    %c0_i32_9 = arith.constant 0 : i32
    %11 = arith.cmpi ne, %10, %c0_i32_9 : i32
    scf.if %11 {
      %c0_10 = arith.constant 0 : index
      %c0_11 = arith.constant 0 : index
      %12 = vector.load %arg7[%c0_10, %c0_11] : memref<512x128xf32, #tpu.memory_space<vmem>>, vector<512x128xf32>
      %c0_12 = arith.constant 0 : index
      %c0_13 = arith.constant 0 : index
      %13 = vector.load %arg5[%c0_12, %c0_13] : memref<1x128xf32, #tpu.memory_space<vmem>>, vector<1x128xf32>
      %14 = vector.broadcast %13 : vector<1x128xf32> to vector<512x128xf32>
      %15 = arith.addf %12, %14 : vector<512x128xf32>
      %cst_14 = arith.constant 0.000000e+00 : f32
      %16 = vector.broadcast %cst_14 : f32 to vector<512x128xf32>
      %17 = arith.maximumf %15, %16 : vector<512x128xf32>
      %18 = arith.truncf %17 : vector<512x128xf32> to vector<512x128xbf16>
      %c0_15 = arith.constant 0 : index
      %c0_16 = arith.constant 0 : index
      %19 = vector.load %arg6[%c0_15, %c0_16] : memref<512x128xbf16, #tpu.memory_space<vmem>>, vector<512x128xbf16>
      tpu.vector_store %arg6[%c0_15, %c0_16], %18 {strides = array<i32>} : memref<512x128xbf16, #tpu.memory_space<vmem>>, vector<512x128xbf16>,
    } else {
    }
    return
  }
  func.func @transform_0(%arg0: i32, %arg1: i32, %arg2: i32) -> (i32, i32) {
    %c0_i32 = arith.constant 0 : i32
    return %arg0, %arg2 : i32, i32
  }
  func.func @transform_1(%arg0: i32, %arg1: i32, %arg2: i32) -> (i32, i32) {
    %c0_i32 = arith.constant 0 : i32
    return %arg2, %arg1 : i32, i32
  }
  func.func @transform_2(%arg0: i32, %arg1: i32, %arg2: i32) -> (i32, i32) {
    %c0_i32 = arith.constant 0 : i32
    %c0_i32_0 = arith.constant 0 : i32
    return %c0_i32, %arg1 : i32, i32
  }
  func.func @transform_3(%arg0: i32, %arg1: i32, %arg2: i32) -> (i32, i32) {
    %c0_i32 = arith.constant 0 : i32
    return %arg0, %arg1 : i32, i32
  }
}

module attributes {stable_mosaic.version = 11 : i64} {
  func.func @_matmul_bias_kernel(%arg0: i32, %arg1: i32, %arg2: i32, %arg3: memref<512x128xbf16, #tpu.memory_space<vmem>>, %arg4: memref<128x128xbf16, #tpu.memory_space<vmem>>, %arg5: memref<1x128xf32, #tpu.memory_space<vmem>>, %arg6: memref<512x128xbf16, #tpu.memory_space<vmem>>, %arg7: memref<512x128xf32, #tpu.memory_space<vmem>>) attributes {dimension_semantics = [#tpu.dimension_semantics<parallel>, #tpu.dimension_semantics<parallel>, #tpu.dimension_semantics<arbitrary>], iteration_bounds = array<i64: 4, 1, 1>, scalar_prefetch = 0 : i64, scratch_operands = 1 : i64, tpu.core_type = #tpu.core_type<tc>, window_params = [{transform_indices = @transform_0, window_bounds = array<i64: 512, 128>}, {transform_indices = @transform_1, window_bounds = array<i64: 128, 128>}, {transform_indices = @transform_2, window_bounds = array<i64: 1, 128>}, {transform_indices = @transform_3, window_bounds = array<i64: 512, 128>}]} {
    %c0_i32 = arith.constant 0 : i32
    %0 = arith.cmpi eq, %arg2, %c0_i32 : i32
    %1 = arith.extui %0 : i1 to i32
    %c0_i32_0 = arith.constant 0 : i32
    %2 = arith.cmpi ne, %1, %c0_i32_0 : i32
    scf.if %2 {
      %cst_10 = arith.constant 0.000000e+00 : f32
      %12 = vector.broadcast %cst_10 : f32 to vector<512x128xf32>
      %c0_11 = arith.constant 0 : index
      %c0_12 = arith.constant 0 : index
      %13 = vector.load %arg7[%c0_11, %c0_12] : memref<512x128xf32, #tpu.memory_space<vmem>>, vector<512x128xf32>
      tpu.vector_store %arg7[%c0_11, %c0_12], %12 {strides = array<i32>} : memref<512x128xf32, #tpu.memory_space<vmem>>, vector<512x128xf32>,
    } else {
    }
    %c0 = arith.constant 0 : index
    %c0_1 = arith.constant 0 : index
    %3 = vector.load %arg7[%c0, %c0_1] : memref<512x128xf32, #tpu.memory_space<vmem>>, vector<512x128xf32>
    %c0_2 = arith.constant 0 : index
    %c0_3 = arith.constant 0 : index
    %4 = vector.load %arg3[%c0_2, %c0_3] : memref<512x128xbf16, #tpu.memory_space<vmem>>, vector<512x128xbf16>
    %c0_4 = arith.constant 0 : index
    %c0_5 = arith.constant 0 : index
    %5 = vector.load %arg4[%c0_4, %c0_5] : memref<128x128xbf16, #tpu.memory_space<vmem>>, vector<128x128xbf16>
    %cst = arith.constant dense<0.000000e+00> : vector<512x128xf32>
    %6 = tpu.matmul %4, %5, %cst {dimension_numbers = #tpu.dot_dimension_numbers<[1], [0], [0], [1], [0, 0, 1, 1], [], []>} : vector<512x128xbf16>, vector<128x128xbf16>, vector<512x128xf32> -> vector<512x128xf32>
    %7 = arith.addf %3, %6 : vector<512x128xf32>
    %c0_6 = arith.constant 0 : index
    %c0_7 = arith.constant 0 : index
    %8 = vector.load %arg7[%c0_6, %c0_7] : memref<512x128xf32, #tpu.memory_space<vmem>>, vector<512x128xf32>
    tpu.vector_store %arg7[%c0_6, %c0_7], %7 {strides = array<i32>} : memref<512x128xf32, #tpu.memory_space<vmem>>, vector<512x128xf32>,
    %c0_i32_8 = arith.constant 0 : i32
    %9 = arith.cmpi eq, %arg2, %c0_i32_8 : i32
    %10 = arith.extui %9 : i1 to i32
    %c0_i32_9 = arith.constant 0 : i32
    %11 = arith.cmpi ne, %10, %c0_i32_9 : i32
    scf.if %11 {
      %c0_10 = arith.constant 0 : index
      %c0_11 = arith.constant 0 : index
      %12 = vector.load %arg7[%c0_10, %c0_11] : memref<512x128xf32, #tpu.memory_space<vmem>>, vector<512x128xf32>
      %c0_12 = arith.constant 0 : index
      %c0_13 = arith.constant 0 : index
      %13 = vector.load %arg5[%c0_12, %c0_13] : memref<1x128xf32, #tpu.memory_space<vmem>>, vector<1x128xf32>
      %14 = vector.broadcast %13 : vector<1x128xf32> to vector<512x128xf32>
      %15 = arith.addf %12, %14 : vector<512x128xf32>
      %16 = arith.truncf %15 : vector<512x128xf32> to vector<512x128xbf16>
      %c0_14 = arith.constant 0 : index
      %c0_15 = arith.constant 0 : index
      %17 = vector.load %arg6[%c0_14, %c0_15] : memref<512x128xbf16, #tpu.memory_space<vmem>>, vector<512x128xbf16>
      tpu.vector_store %arg6[%c0_14, %c0_15], %16 {strides = array<i32>} : memref<512x128xbf16, #tpu.memory_space<vmem>>, vector<512x128xbf16>,
    } else {
    }
    return
  }
  func.func @transform_0(%arg0: i32, %arg1: i32, %arg2: i32) -> (i32, i32) {
    %c0_i32 = arith.constant 0 : i32
    return %arg0, %arg2 : i32, i32
  }
  func.func @transform_1(%arg0: i32, %arg1: i32, %arg2: i32) -> (i32, i32) {
    %c0_i32 = arith.constant 0 : i32
    return %arg2, %arg1 : i32, i32
  }
  func.func @transform_2(%arg0: i32, %arg1: i32, %arg2: i32) -> (i32, i32) {
    %c0_i32 = arith.constant 0 : i32
    %c0_i32_0 = arith.constant 0 : i32
    return %c0_i32, %arg1 : i32, i32
  }
  func.func @transform_3(%arg0: i32, %arg1: i32, %arg2: i32) -> (i32, i32) {
    %c0_i32 = arith.constant 0 : i32
    return %arg0, %arg1 : i32, i32
  }
}

module attributes {stable_mosaic.version = 11 : i64} {
  func.func @_matmul_bias_kernel(%arg0: i32, %arg1: i32, %arg2: i32, %arg3: memref<512x256xbf16, #tpu.memory_space<vmem>>, %arg4: memref<256x128xbf16, #tpu.memory_space<vmem>>, %arg5: memref<1x128xf32, #tpu.memory_space<vmem>>, %arg6: memref<512x128xbf16, #tpu.memory_space<vmem>>, %arg7: memref<512x128xf32, #tpu.memory_space<vmem>>) attributes {dimension_semantics = [#tpu.dimension_semantics<parallel>, #tpu.dimension_semantics<parallel>, #tpu.dimension_semantics<arbitrary>], iteration_bounds = array<i64: 64, 1, 1>, scalar_prefetch = 0 : i64, scratch_operands = 1 : i64, tpu.core_type = #tpu.core_type<tc>, window_params = [{transform_indices = @transform_0, window_bounds = array<i64: 512, 256>}, {transform_indices = @transform_1, window_bounds = array<i64: 256, 128>}, {transform_indices = @transform_2, window_bounds = array<i64: 1, 128>}, {transform_indices = @transform_3, window_bounds = array<i64: 512, 128>}]} {
    %c0_i32 = arith.constant 0 : i32
    %0 = arith.cmpi eq, %arg2, %c0_i32 : i32
    %1 = arith.extui %0 : i1 to i32
    %c0_i32_0 = arith.constant 0 : i32
    %2 = arith.cmpi ne, %1, %c0_i32_0 : i32
    scf.if %2 {
      %cst_10 = arith.constant 0.000000e+00 : f32
      %12 = vector.broadcast %cst_10 : f32 to vector<512x128xf32>
      %c0_11 = arith.constant 0 : index
      %c0_12 = arith.constant 0 : index
      %13 = vector.load %arg7[%c0_11, %c0_12] : memref<512x128xf32, #tpu.memory_space<vmem>>, vector<512x128xf32>
      tpu.vector_store %arg7[%c0_11, %c0_12], %12 {strides = array<i32>} : memref<512x128xf32, #tpu.memory_space<vmem>>, vector<512x128xf32>,
    } else {
    }
    %c0 = arith.constant 0 : index
    %c0_1 = arith.constant 0 : index
    %3 = vector.load %arg7[%c0, %c0_1] : memref<512x128xf32, #tpu.memory_space<vmem>>, vector<512x128xf32>
    %c0_2 = arith.constant 0 : index
    %c0_3 = arith.constant 0 : index
    %4 = vector.load %arg3[%c0_2, %c0_3] : memref<512x256xbf16, #tpu.memory_space<vmem>>, vector<512x256xbf16>
    %c0_4 = arith.constant 0 : index
    %c0_5 = arith.constant 0 : index
    %5 = vector.load %arg4[%c0_4, %c0_5] : memref<256x128xbf16, #tpu.memory_space<vmem>>, vector<256x128xbf16>
    %cst = arith.constant dense<0.000000e+00> : vector<512x128xf32>
    %6 = tpu.matmul %4, %5, %cst {dimension_numbers = #tpu.dot_dimension_numbers<[1], [0], [0], [1], [0, 0, 1, 1], [], []>} : vector<512x256xbf16>, vector<256x128xbf16>, vector<512x128xf32> -> vector<512x128xf32>
    %7 = arith.addf %3, %6 : vector<512x128xf32>
    %c0_6 = arith.constant 0 : index
    %c0_7 = arith.constant 0 : index
    %8 = vector.load %arg7[%c0_6, %c0_7] : memref<512x128xf32, #tpu.memory_space<vmem>>, vector<512x128xf32>
    tpu.vector_store %arg7[%c0_6, %c0_7], %7 {strides = array<i32>} : memref<512x128xf32, #tpu.memory_space<vmem>>, vector<512x128xf32>,
    %c0_i32_8 = arith.constant 0 : i32
    %9 = arith.cmpi eq, %arg2, %c0_i32_8 : i32
    %10 = arith.extui %9 : i1 to i32
    %c0_i32_9 = arith.constant 0 : i32
    %11 = arith.cmpi ne, %10, %c0_i32_9 : i32
    scf.if %11 {
      %c0_10 = arith.constant 0 : index
      %c0_11 = arith.constant 0 : index
      %12 = vector.load %arg7[%c0_10, %c0_11] : memref<512x128xf32, #tpu.memory_space<vmem>>, vector<512x128xf32>
      %c0_12 = arith.constant 0 : index
      %c0_13 = arith.constant 0 : index
      %13 = vector.load %arg5[%c0_12, %c0_13] : memref<1x128xf32, #tpu.memory_space<vmem>>, vector<1x128xf32>
      %14 = vector.broadcast %13 : vector<1x128xf32> to vector<512x128xf32>
      %15 = arith.addf %12, %14 : vector<512x128xf32>
      %cst_14 = arith.constant 0.000000e+00 : f32
      %16 = vector.broadcast %cst_14 : f32 to vector<512x128xf32>
      %17 = arith.maximumf %15, %16 : vector<512x128xf32>
      %18 = arith.truncf %17 : vector<512x128xf32> to vector<512x128xbf16>
      %c0_15 = arith.constant 0 : index
      %c0_16 = arith.constant 0 : index
      %19 = vector.load %arg6[%c0_15, %c0_16] : memref<512x128xbf16, #tpu.memory_space<vmem>>, vector<512x128xbf16>
      tpu.vector_store %arg6[%c0_15, %c0_16], %18 {strides = array<i32>} : memref<512x128xbf16, #tpu.memory_space<vmem>>, vector<512x128xbf16>,
    } else {
    }
    return
  }
  func.func @transform_0(%arg0: i32, %arg1: i32, %arg2: i32) -> (i32, i32) {
    %c0_i32 = arith.constant 0 : i32
    return %arg0, %arg2 : i32, i32
  }
  func.func @transform_1(%arg0: i32, %arg1: i32, %arg2: i32) -> (i32, i32) {
    %c0_i32 = arith.constant 0 : i32
    return %arg2, %arg1 : i32, i32
  }
  func.func @transform_2(%arg0: i32, %arg1: i32, %arg2: i32) -> (i32, i32) {
    %c0_i32 = arith.constant 0 : i32
    %c0_i32_0 = arith.constant 0 : i32
    return %c0_i32, %arg1 : i32, i32
  }
  func.func @transform_3(%arg0: i32, %arg1: i32, %arg2: i32) -> (i32, i32) {
    %c0_i32 = arith.constant 0 : i32
    return %arg0, %arg1 : i32, i32
  }
}

module attributes {stable_mosaic.version = 11 : i64} {
  func.func @_matmul_bias_kernel(%arg0: i32, %arg1: i32, %arg2: i32, %arg3: memref<512x128xbf16, #tpu.memory_space<vmem>>, %arg4: memref<128x128xbf16, #tpu.memory_space<vmem>>, %arg5: memref<1x128xf32, #tpu.memory_space<vmem>>, %arg6: memref<512x128xf32, #tpu.memory_space<vmem>>, %arg7: memref<512x128xf32, #tpu.memory_space<vmem>>) attributes {dimension_semantics = [#tpu.dimension_semantics<parallel>, #tpu.dimension_semantics<parallel>, #tpu.dimension_semantics<arbitrary>], iteration_bounds = array<i64: 64, 1, 1>, scalar_prefetch = 0 : i64, scratch_operands = 1 : i64, tpu.core_type = #tpu.core_type<tc>, window_params = [{transform_indices = @transform_0, window_bounds = array<i64: 512, 128>}, {transform_indices = @transform_1, window_bounds = array<i64: 128, 128>}, {transform_indices = @transform_2, window_bounds = array<i64: 1, 128>}, {transform_indices = @transform_3, window_bounds = array<i64: 512, 128>}]} {
    %c0_i32 = arith.constant 0 : i32
    %0 = arith.cmpi eq, %arg2, %c0_i32 : i32
    %1 = arith.extui %0 : i1 to i32
    %c0_i32_0 = arith.constant 0 : i32
    %2 = arith.cmpi ne, %1, %c0_i32_0 : i32
    scf.if %2 {
      %cst_10 = arith.constant 0.000000e+00 : f32
      %12 = vector.broadcast %cst_10 : f32 to vector<512x128xf32>
      %c0_11 = arith.constant 0 : index
      %c0_12 = arith.constant 0 : index
      %13 = vector.load %arg7[%c0_11, %c0_12] : memref<512x128xf32, #tpu.memory_space<vmem>>, vector<512x128xf32>
      tpu.vector_store %arg7[%c0_11, %c0_12], %12 {strides = array<i32>} : memref<512x128xf32, #tpu.memory_space<vmem>>, vector<512x128xf32>,
    } else {
    }
    %c0 = arith.constant 0 : index
    %c0_1 = arith.constant 0 : index
    %3 = vector.load %arg7[%c0, %c0_1] : memref<512x128xf32, #tpu.memory_space<vmem>>, vector<512x128xf32>
    %c0_2 = arith.constant 0 : index
    %c0_3 = arith.constant 0 : index
    %4 = vector.load %arg3[%c0_2, %c0_3] : memref<512x128xbf16, #tpu.memory_space<vmem>>, vector<512x128xbf16>
    %c0_4 = arith.constant 0 : index
    %c0_5 = arith.constant 0 : index
    %5 = vector.load %arg4[%c0_4, %c0_5] : memref<128x128xbf16, #tpu.memory_space<vmem>>, vector<128x128xbf16>
    %cst = arith.constant dense<0.000000e+00> : vector<512x128xf32>
    %6 = tpu.matmul %4, %5, %cst {dimension_numbers = #tpu.dot_dimension_numbers<[1], [0], [0], [1], [0, 0, 1, 1], [], []>} : vector<512x128xbf16>, vector<128x128xbf16>, vector<512x128xf32> -> vector<512x128xf32>
    %7 = arith.addf %3, %6 : vector<512x128xf32>
    %c0_6 = arith.constant 0 : index
    %c0_7 = arith.constant 0 : index
    %8 = vector.load %arg7[%c0_6, %c0_7] : memref<512x128xf32, #tpu.memory_space<vmem>>, vector<512x128xf32>
    tpu.vector_store %arg7[%c0_6, %c0_7], %7 {strides = array<i32>} : memref<512x128xf32, #tpu.memory_space<vmem>>, vector<512x128xf32>,
    %c0_i32_8 = arith.constant 0 : i32
    %9 = arith.cmpi eq, %arg2, %c0_i32_8 : i32
    %10 = arith.extui %9 : i1 to i32
    %c0_i32_9 = arith.constant 0 : i32
    %11 = arith.cmpi ne, %10, %c0_i32_9 : i32
    scf.if %11 {
      %c0_10 = arith.constant 0 : index
      %c0_11 = arith.constant 0 : index
      %12 = vector.load %arg7[%c0_10, %c0_11] : memref<512x128xf32, #tpu.memory_space<vmem>>, vector<512x128xf32>
      %c0_12 = arith.constant 0 : index
      %c0_13 = arith.constant 0 : index
      %13 = vector.load %arg5[%c0_12, %c0_13] : memref<1x128xf32, #tpu.memory_space<vmem>>, vector<1x128xf32>
      %14 = vector.broadcast %13 : vector<1x128xf32> to vector<512x128xf32>
      %15 = arith.addf %12, %14 : vector<512x128xf32>
      %c0_14 = arith.constant 0 : index
      %c0_15 = arith.constant 0 : index
      %16 = vector.load %arg6[%c0_14, %c0_15] : memref<512x128xf32, #tpu.memory_space<vmem>>, vector<512x128xf32>
      tpu.vector_store %arg6[%c0_14, %c0_15], %15 {strides = array<i32>} : memref<512x128xf32, #tpu.memory_space<vmem>>, vector<512x128xf32>,
    } else {
    }
    return
  }
  func.func @transform_0(%arg0: i32, %arg1: i32, %arg2: i32) -> (i32, i32) {
    %c0_i32 = arith.constant 0 : i32
    return %arg0, %arg2 : i32, i32
  }
  func.func @transform_1(%arg0: i32, %arg1: i32, %arg2: i32) -> (i32, i32) {
    %c0_i32 = arith.constant 0 : i32
    return %arg2, %arg1 : i32, i32
  }
  func.func @transform_2(%arg0: i32, %arg1: i32, %arg2: i32) -> (i32, i32) {
    %c0_i32 = arith.constant 0 : i32
    %c0_i32_0 = arith.constant 0 : i32
    return %c0_i32, %arg1 : i32, i32
  }
  func.func @transform_3(%arg0: i32, %arg1: i32, %arg2: i32) -> (i32, i32) {
    %c0_i32 = arith.constant 0 : i32
    return %arg0, %arg1 : i32, i32
  }
}

</mosaic_0001>

<bundles_post_ra>
// kernel: skull_unet_transformer_forward.27
= control target key start
LH: loop header
LB: loop body
LE: loop exit
PB: predicated region body
PF: predicated region fallthrough
CT: control target
= control target key end

     0   :  { %s2379_s12 = smov 0   ;;  %s2381_s13 = smov 0   ;;  %s2580_s0 = inlined_call_operand.vmem [shape: bf16[32768,128], index: 0, kind: input, shape index: {}]   ;;  %s2581_s1 = inlined_call_operand.vmem [shape: bf16[128,128], index: 1, kind: input, shape index: {}]   ;;  %s2582_s2 = inlined_call_operand.vmem [shape: f32[1,128], index: 2, kind: input, shape index: {}]   ;;  %s2583_s3 = inlined_call_operand.vmem [shape: bf16[32768,128], index: 3, kind: output, shape index: {}]  }
   0x1   :  { %s2383_s14 = smov 0  }
   0x2 LB: > { %s32_s15 = sadd.s32 1, %s2353_s13  ;;  %p1768_p0 = scmp.ge.s32.totalorder %s2357_s14, 1  ;;  %s2357_s14 = sphi %s2383_s14, %s13_s14   ;;  %s2353_s13 = sphi %s2381_s13, %s2585_s13   ;;  %s2349_s12 = sphi %s2379_s12, %s2584_s12  }
   0x3   : > { %p34_p1 = scmp.ge.s32.totalorder %s32_s15, 64  ;;  %p188_p2 = scmp.lt.s32.totalorder %s2357_s14, 65 }
   0x5   : > { %s2587_s15 = smov (%p34_p1, %s32_s15), 0  ;;  %p189_p3 = pnand %p1768_p0, %p188_p2 }
   0x6   : > { %v2295_v0 = vld [vmem:[%s2581_s1] sm:$0xff] (!%p189_p3)   ;;  %s1769_s18 = sshll.u32 (!%p189_p3), %s2349_s12, 6  ;;  %v2296_v1 = vld [vmem:[%s2581_s1 + $0x8] sm:$0xff] (!%p189_p3)   ;;  %v2297_v2 = vld [vmem:[%s2581_s1 + $0x10] sm:$0xff] (!%p189_p3)  }
   0x7   : > { %192 = sbr.rel (%p189_p3) target bundleno = 317 (0x13d), region = 32  ;;  %p230_p4 = scmp.lt.s32.totalorder (!%p189_p3), %s1769_s18, 4095  ;;  %2175 = vmatprep.subr.bf16.mxu0 (!%p189_p3), %v2295_v0  ;;  %2255 = vmatprep.subr.bf16.mxu1 (!%p189_p3), %v2295_v0  ;;  %v2298_v3 = vld [vmem:[%s2581_s1 + $0x18] sm:$0xff] (!%p189_p3)   ;;  %v2299_v6 = vld [vmem:[%s2581_s1 + $0x20] sm:$0xff] (!%p189_p3)   ;;  %v2300_v7 = vld [vmem:[%s2581_s1 + $0x28] sm:$0xff] (!%p189_p3)  }
   0x8   : > { %2176 = vmatpush3.bf16.msra.mxu0 (!%p189_p3), %v2295_v0  ;;  %2263 = vmatpush3.bf16.msra.mxu1 (!%p189_p3), %v2295_v0  ;;  %v2301_v8 = vld [vmem:[%s2581_s1 + $0x30] sm:$0xff] (!%p189_p3)   ;;  %v2302_v9 = vld [vmem:[%s2581_s1 + $0x38] sm:$0xff] (!%p189_p3)   ;;  %v2466_v40 = vld [vmem:[%s2582_s2] ss:$0 sm:$0xff] (!%p189_p3) }
   0x9   : > { %2177 = vmatprep.subr.bf16.mxu0 (!%p189_p3), %v2296_v1  ;;  %2256 = vmatprep.subr.bf16.mxu1 (!%p189_p3), %v2296_v1 }
   0xc   : > { %2178 = vmatpush3.bf16.msra.mxu0 (!%p189_p3), %v2296_v1  ;;  %2264 = vmatpush3.bf16.msra.mxu1 (!%p189_p3), %v2296_v1 }
   0xd   : > { %2179 = vmatprep.subr.bf16.mxu0 (!%p189_p3), %v2297_v2  ;;  %2257 = vmatprep.subr.bf16.mxu1 (!%p189_p3), %v2297_v2 }
   0xe   : > { %s2589_s18 = smov (!%p230_p4, %s1769_s18), 4095 }
   0xf   : > { %s1770_s23 = sshll.u32 %s2589_s18, 2 }
  0x10   : > { %s2414_s26 = scalar_lea.vmem %s2580_s0, %s1770_s23  ;;  %2180 = vmatpush3.bf16.msra.mxu0 %v2297_v2  ;;  %2265 = vmatpush3.bf16.msra.mxu1 %v2297_v2  ;;  %s2481_s17 = scalar_lea.vmem %s2583_s3, %s1770_s23 }
  0x11   : > { %v2303_v4 = vld [vmem:[%s2414_s26] sm:$0xff]   ;;  %2181 = vmatprep.subr.bf16.mxu0 %v2298_v3  ;;  %2258 = vmatprep.subr.bf16.mxu1 %v2298_v3  ;;  %v2305_v10 = vld [vmem:[%s2414_s26 + $0x8] sm:$0xff]   ;;  %v2307_v12 = vld [vmem:[%s2414_s26 + $0x10] sm:$0xff]  }
  0x12   : > { %v2304_v5 = vld [vmem:[%s2414_s26 + $0x80] sm:$0xff]   ;;  %2191 = vmatprep.mubr.bf16.mxu0 %v2303_v4  ;;  %v2306_v11 = vld [vmem:[%s2414_s26 + $0x88] sm:$0xff]   ;;  %v2308_v13 = vld [vmem:[%s2414_s26 + $0x90] sm:$0xff]  }
  0x13   : > { %2223 = vmatprep.mubr.bf16.mxu1 %v2304_v5  ;;  %v2309_v14 = vld [vmem:[%s2414_s26 + $0x18] sm:$0xff]   ;;  %v2311_v16 = vld [vmem:[%s2414_s26 + $0x20] sm:$0xff]   ;;  %v2313_v18 = vld [vmem:[%s2414_s26 + $0x28] sm:$0xff]  }
  0x14   : > { %2182 = vmatpush3.bf16.msra.mxu0 %v2298_v3  ;;  %2266 = vmatpush3.bf16.msra.mxu1 %v2298_v3  ;;  %v2310_v15 = vld [vmem:[%s2414_s26 + $0x98] sm:$0xff]   ;;  %v2312_v17 = vld [vmem:[%s2414_s26 + $0xa0] sm:$0xff]   ;;  %v2314_v19 = vld [vmem:[%s2414_s26 + $0xa8] sm:$0xff]  }
  0x15   : > { %2183 = vmatprep.subr.bf16.mxu0 %v2299_v6  ;;  %2259 = vmatprep.subr.bf16.mxu1 %v2299_v6  ;;  %v2315_v20 = vld [vmem:[%s2414_s26 + $0x30] sm:$0xff]   ;;  %v2317_v22 = vld [vmem:[%s2414_s26 + $0x38] sm:$0xff]   ;;  %v2319_v24 = vld [vmem:[%s2414_s26 + $0x40] sm:$0xff]  }
  0x16   : > { %v2316_v21 = vld [vmem:[%s2414_s26 + $0xb0] sm:$0xff]   ;;  %v2318_v23 = vld [vmem:[%s2414_s26 + $0xb8] sm:$0xff]   ;;  %v2320_v25 = vld [vmem:[%s2414_s26 + $0xc0] sm:$0xff]  }
  0x17   : > { %v2321_v26 = vld [vmem:[%s2414_s26 + $0x48] sm:$0xff]   ;;  %v2323_v28 = vld [vmem:[%s2414_s26 + $0x50] sm:$0xff]   ;;  %v2325_v30 = vld [vmem:[%s2414_s26 + $0x58] sm:$0xff]  }
  0x18   : > { %2184 = vmatpush3.bf16.msra.mxu0 %v2299_v6  ;;  %2267 = vmatpush3.bf16.msra.mxu1 %v2299_v6  ;;  %v2322_v27 = vld [vmem:[%s2414_s26 + $0xc8] sm:$0xff]   ;;  %v2324_v29 = vld [vmem:[%s2414_s26 + $0xd0] sm:$0xff]   ;;  %v2326_v31 = vld [vmem:[%s2414_s26 + $0xd8] sm:$0xff]  }
  0x19   : > { %2185 = vmatprep.subr.bf16.mxu0 %v2300_v7  ;;  %2260 = vmatprep.subr.bf16.mxu1 %v2300_v7  ;;  %v2327_v32 = vld [vmem:[%s2414_s26 + $0x60] sm:$0xff]   ;;  %v2329_v34 = vld [vmem:[%s2414_s26 + $0x68] sm:$0xff]   ;;  %v2331_v36 = vld [vmem:[%s2414_s26 + $0x70] sm:$0xff]  }
  0x1a   : > { %v2328_v33 = vld [vmem:[%s2414_s26 + $0xe0] sm:$0xff]   ;;  %v2330_v35 = vld [vmem:[%s2414_s26 + $0xe8] sm:$0xff]   ;;  %v2332_v37 = vld [vmem:[%s2414_s26 + $0xf0] sm:$0xff]  }
  0x1b   : > { %v2333_v38 = vld [vmem:[%s2414_s26 + $0x78] sm:$0xff]  }
  0x1c   : > { %2186 = vmatpush3.bf16.msra.mxu0 %v2300_v7  ;;  %2268 = vmatpush3.bf16.msra.mxu1 %v2300_v7  ;;  %v2334_v39 = vld [vmem:[%s2414_s26 + $0xf8] sm:$0xff]  }
  0x1d   : > { %2187 = vmatprep.subr.bf16.mxu0 %v2301_v8  ;;  %2261 = vmatprep.subr.bf16.mxu1 %v2301_v8 }
  0x20   : > { %2188 = vmatpush3.bf16.msra.mxu0 %v2301_v8  ;;  %2269 = vmatpush3.bf16.msra.mxu1 %v2301_v8 }
  0x21   : > { %2189 = vmatprep.subr.bf16.mxu0 %v2302_v9  ;;  %2262 = vmatprep.subr.bf16.mxu1 %v2302_v9 }
  0x24   : > { %2190 = vmatpush3.bf16.msra.mxu0 %v2302_v9  ;;  %2270 = vmatpush3.bf16.msra.mxu1 %v2302_v9 }
  0x27   : > { %2192 = vmatmul.mubr.bf16.vlgmr.msra.gmra.mrb[0].mxu0 %v2305_v10  ;;  %2224 = vmatmul.mubr.bf16.vlgmr.msra.gmra.mrb[0].mxu1 %v2306_v11 }
  0x28   : > { %2195 = vmatprep.mubr.bf16.mxu0 %v2307_v12  ;;  %2227 = vmatprep.mubr.bf16.mxu1 %v2308_v13 }
  0x2f   : > { %2196 = vmatmul.mubr.bf16.gmra.mrb[4].mxu0 %v2309_v14  ;;  %2228 = vmatmul.mubr.bf16.gmra.mrb[4].mxu1 %v2310_v15 }
  0x30   : > { %2199 = vmatprep.mubr.bf16.mxu0 %v2311_v16  ;;  %2231 = vmatprep.mubr.bf16.mxu1 %v2312_v17 }
  0x37   : > { %2200 = vmatmul.mubr.bf16.gmra.mrb[8].mxu0 %v2313_v18  ;;  %2232 = vmatmul.mubr.bf16.gmra.mrb[8].mxu1 %v2314_v19 }
  0x38   : > { %2203 = vmatprep.mubr.bf16.mxu0 %v2315_v20  ;;  %2235 = vmatprep.mubr.bf16.mxu1 %v2316_v21 }
  0x3f   : > { %2204 = vmatmul.mubr.bf16.gmra.mrb[12].mxu0 %v2317_v22  ;;  %2236 = vmatmul.mubr.bf16.gmra.mrb[12].mxu1 %v2318_v23 }
  0x40   : > { %2207 = vmatprep.mubr.bf16.mxu0 %v2319_v24  ;;  %2239 = vmatprep.mubr.bf16.mxu1 %v2320_v25 }
  0x47   : > { %2208 = vmatmul.mubr.bf16.gmra.mrb[16].mxu0 %v2321_v26  ;;  %2240 = vmatmul.mubr.bf16.gmra.mrb[16].mxu1 %v2322_v27 }
  0x48   : > { %2211 = vmatprep.mubr.bf16.mxu0 %v2323_v28  ;;  %2243 = vmatprep.mubr.bf16.mxu1 %v2324_v29 }
  0x4f   : > { %2212 = vmatmul.mubr.bf16.gmra.mrb[20].mxu0 %v2325_v30  ;;  %2244 = vmatmul.mubr.bf16.gmra.mrb[20].mxu1 %v2326_v31 }
  0x50   : > { %2215 = vmatprep.mubr.bf16.mxu0 %v2327_v32  ;;  %2247 = vmatprep.mubr.bf16.mxu1 %v2328_v33 }
  0x57   : > { %2216 = vmatmul.mubr.bf16.gmra.mrb[24].mxu0 %v2329_v34  ;;  %2248 = vmatmul.mubr.bf16.gmra.mrb[24].mxu1 %v2330_v35 }
  0x58   : > { %2219 = vmatprep.mubr.bf16.mxu0 %v2331_v36  ;;  %2251 = vmatprep.mubr.bf16.mxu1 %v2332_v37 }
  0x5f   : > { %2220 = vmatmul.mubr.bf16.gmra.mrb[28].mxu0 %v2333_v38  ;;  %2252 = vmatmul.mubr.bf16.gmra.mrb[28].mxu1 %v2334_v39 }
  0xfa   : > { %v2193_v41 = vpop.f32.mrb[0].mxu0  ;;  %v2225_v42 = vpop.f32.mrb[0].mxu1 }
  0xfb   : > { %v1205_v43 = vadd.f32 %v2193_v41, %v2466_v40  ;;  %v1237_v44 = vadd.f32 %v2225_v42, %v2466_v40  ;;  %v746_v45 = vpop.f32.mrb[1].mxu0  ;;  %v874_v46 = vpop.f32.mrb[1].mxu1 }
  0xfc   : > { %v1203_v47 = vadd.f32 %v2466_v40, %v746_v45  ;;  %v1235_v48 = vadd.f32 %v2466_v40, %v874_v46  ;;  %v2194_v49 = vpop.f32.mrb[2].mxu0  ;;  %v2226_v50 = vpop.f32.mrb[2].mxu1 }
  0xfd   : > { %v1206_v51 = vadd.f32 %v2194_v49, %v2466_v40  ;;  %v1238_v52 = vadd.f32 %v2226_v50, %v2466_v40  ;;  %v749_v53 = vpop.f32.mrb[3].mxu0  ;;  %v877_v54 = vpop.f32.mrb[3].mxu1  ;;  %v1269_v57 = vmax.f32 %v1205_v43, 0.0  ;;  %v1301_v58 = vmax.f32 %v1237_v44, 0.0 }
  0xfe   : > { %v1204_v55 = vadd.f32 %v2466_v40, %v749_v53  ;;  %v1236_v56 = vadd.f32 %v2466_v40, %v877_v54  ;;  %v1267_v61 = vmax.f32 %v1203_v47, 0.0  ;;  %v1299_v62 = vmax.f32 %v1235_v48, 0.0 }
  0xff   : > { %v1270_v59 = vmax.f32 %v1206_v51, 0.0  ;;  %v1302_v60 = vmax.f32 %v1238_v52, 0.0 }
 0x100   : > { %v1268_v63 = vmax.f32 %v1204_v55, 0.0  ;;  %v1300_v0 = vmax.f32 %v1236_v56, 0.0 }
 0x101   : > { %v1952_v1 = vpack.c.bf16 %v1270_v59, %v1269_v57  ;;  %v2032_v2 = vpack.c.bf16 %v1302_v60, %v1301_v58 }
 0x102   : > { %v1947_v3 = vpack.c.bf16 %v1268_v63, %v1267_v61  ;;  %v2027_v4 = vpack.c.bf16 %v1300_v0, %v1299_v62  ;;  %v2197_v5 = vpop.f32.mrb[4].mxu0  ;;  %v2229_v6 = vpop.f32.mrb[4].mxu1 }
 0x103   : > { %2104 = vst [vmem:[%s2481_s17 + $0x8] sm:$0xff] %v1952_v1   ;;  %2120 = vst [vmem:[%s2481_s17 + $0x88] sm:$0xff] %v2032_v2   ;;  %v1209_v7 = vadd.f32 %v2197_v5, %v2466_v40  ;;  %v1241_v8 = vadd.f32 %v2229_v6, %v2466_v40  ;;  %v762_v9 = vpop.f32.mrb[5].mxu0  ;;  %v890_v10 = vpop.f32.mrb[5].mxu1 }
 0x104   : > { %1948 = vst [vmem:[%s2481_s17] sm:$0xff] %v1947_v3   ;;  %2119 = vst [vmem:[%s2481_s17 + $0x80] sm:$0xff] %v2027_v4   ;;  %v1207_v11 = vadd.f32 %v2466_v40, %v762_v9  ;;  %v1239_v12 = vadd.f32 %v2466_v40, %v890_v10  ;;  %v2198_v13 = vpop.f32.mrb[6].mxu0  ;;  %v2230_v14 = vpop.f32.mrb[6].mxu1 }
 0x105   : > { %v1210_v15 = vadd.f32 %v2198_v13, %v2466_v40  ;;  %v1242_v16 = vadd.f32 %v2230_v14, %v2466_v40  ;;  %v765_v17 = vpop.f32.mrb[7].mxu0  ;;  %v893_v18 = vpop.f32.mrb[7].mxu1  ;;  %v1273_v21 = vmax.f32 %v1209_v7, 0.0  ;;  %v1305_v22 = vmax.f32 %v1241_v8, 0.0 }
 0x106   : > { %v1208_v19 = vadd.f32 %v2466_v40, %v765_v17  ;;  %v1240_v20 = vadd.f32 %v2466_v40, %v893_v18  ;;  %v1271_v25 = vmax.f32 %v1207_v11, 0.0  ;;  %v1303_v26 = vmax.f32 %v1239_v12, 0.0 }
 0x107   : > { %v1274_v23 = vmax.f32 %v1210_v15, 0.0  ;;  %v1306_v24 = vmax.f32 %v1242_v16, 0.0 }
 0x108   : > { %v1272_v27 = vmax.f32 %v1208_v19, 0.0  ;;  %v1304_v28 = vmax.f32 %v1240_v20, 0.0 }
 0x109   : > { %v1962_v29 = vpack.c.bf16 %v1274_v23, %v1273_v21  ;;  %v2042_v30 = vpack.c.bf16 %v1306_v24, %v1305_v22 }
 0x10a   : > { %v1957_v31 = vpack.c.bf16 %v1272_v27, %v1271_v25  ;;  %v2037_v32 = vpack.c.bf16 %v1304_v28, %v1303_v26  ;;  %v2201_v33 = vpop.f32.mrb[8].mxu0  ;;  %v2233_v34 = vpop.f32.mrb[8].mxu1 }
 0x10b   : > { %2106 = vst [vmem:[%s2481_s17 + $0x18] sm:$0xff] %v1962_v29   ;;  %2122 = vst [vmem:[%s2481_s17 + $0x98] sm:$0xff] %v2042_v30   ;;  %v1213_v35 = vadd.f32 %v2201_v33, %v2466_v40  ;;  %v1245_v36 = vadd.f32 %v2233_v34, %v2466_v40  ;;  %v778_v37 = vpop.f32.mrb[9].mxu0  ;;  %v906_v38 = vpop.f32.mrb[9].mxu1 }
 0x10c   : > { %2105 = vst [vmem:[%s2481_s17 + $0x10] sm:$0xff] %v1957_v31   ;;  %2121 = vst [vmem:[%s2481_s17 + $0x90] sm:$0xff] %v2037_v32   ;;  %v1211_v39 = vadd.f32 %v2466_v40, %v778_v37  ;;  %v1243_v41 = vadd.f32 %v2466_v40, %v906_v38  ;;  %v2202_v42 = vpop.f32.mrb[10].mxu0  ;;  %v2234_v43 = vpop.f32.mrb[10].mxu1 }
 0x10d   : > { %v1214_v44 = vadd.f32 %v2202_v42, %v2466_v40  ;;  %v1246_v45 = vadd.f32 %v2234_v43, %v2466_v40  ;;  %v781_v46 = vpop.f32.mrb[11].mxu0  ;;  %v909_v47 = vpop.f32.mrb[11].mxu1  ;;  %v1277_v50 = vmax.f32 %v1213_v35, 0.0  ;;  %v1309_v51 = vmax.f32 %v1245_v36, 0.0 }
 0x10e   : > { %v1212_v48 = vadd.f32 %v2466_v40, %v781_v46  ;;  %v1244_v49 = vadd.f32 %v2466_v40, %v909_v47  ;;  %v1275_v54 = vmax.f32 %v1211_v39, 0.0  ;;  %v1307_v55 = vmax.f32 %v1243_v41, 0.0 }
 0x10f   : > { %v1278_v52 = vmax.f32 %v1214_v44, 0.0  ;;  %v1310_v53 = vmax.f32 %v1246_v45, 0.0 }
 0x110   : > { %v1276_v56 = vmax.f32 %v1212_v48, 0.0  ;;  %v1308_v57 = vmax.f32 %v1244_v49, 0.0 }
 0x111   : > { %v1972_v58 = vpack.c.bf16 %v1278_v52, %v1277_v50  ;;  %v2052_v59 = vpack.c.bf16 %v1310_v53, %v1309_v51 }
 0x112   : > { %v1967_v60 = vpack.c.bf16 %v1276_v56, %v1275_v54  ;;  %v2047_v61 = vpack.c.bf16 %v1308_v57, %v1307_v55  ;;  %v2205_v62 = vpop.f32.mrb[12].mxu0  ;;  %v2237_v63 = vpop.f32.mrb[12].mxu1 }
 0x113   : > { %2108 = vst [vmem:[%s2481_s17 + $0x28] sm:$0xff] %v1972_v58   ;;  %2124 = vst [vmem:[%s2481_s17 + $0xa8] sm:$0xff] %v2052_v59   ;;  %v1217_v0 = vadd.f32 %v2205_v62, %v2466_v40  ;;  %v1249_v1 = vadd.f32 %v2237_v63, %v2466_v40  ;;  %v794_v2 = vpop.f32.mrb[13].mxu0  ;;  %v922_v3 = vpop.f32.mrb[13].mxu1 }
 0x114   : > { %2107 = vst [vmem:[%s2481_s17 + $0x20] sm:$0xff] %v1967_v60   ;;  %2123 = vst [vmem:[%s2481_s17 + $0xa0] sm:$0xff] %v2047_v61   ;;  %v1215_v4 = vadd.f32 %v2466_v40, %v794_v2  ;;  %v1247_v5 = vadd.f32 %v2466_v40, %v922_v3  ;;  %v2206_v6 = vpop.f32.mrb[14].mxu0  ;;  %v2238_v7 = vpop.f32.mrb[14].mxu1 }
 0x115   : > { %v1218_v8 = vadd.f32 %v2206_v6, %v2466_v40  ;;  %v1250_v9 = vadd.f32 %v2238_v7, %v2466_v40  ;;  %v797_v10 = vpop.f32.mrb[15].mxu0  ;;  %v925_v11 = vpop.f32.mrb[15].mxu1  ;;  %v1281_v14 = vmax.f32 %v1217_v0, 0.0  ;;  %v1313_v15 = vmax.f32 %v1249_v1, 0.0 }
 0x116   : > { %v1216_v12 = vadd.f32 %v2466_v40, %v797_v10  ;;  %v1248_v13 = vadd.f32 %v2466_v40, %v925_v11  ;;  %v1279_v18 = vmax.f32 %v1215_v4, 0.0  ;;  %v1311_v19 = vmax.f32 %v1247_v5, 0.0 }
 0x117   : > { %v1282_v16 = vmax.f32 %v1218_v8, 0.0  ;;  %v1314_v17 = vmax.f32 %v1250_v9, 0.0 }
 0x118   : > { %v1280_v20 = vmax.f32 %v1216_v12, 0.0  ;;  %v1312_v21 = vmax.f32 %v1248_v13, 0.0 }
 0x119   : > { %v1982_v22 = vpack.c.bf16 %v1282_v16, %v1281_v14  ;;  %v2062_v23 = vpack.c.bf16 %v1314_v17, %v1313_v15 }
 0x11a   : > { %v1977_v24 = vpack.c.bf16 %v1280_v20, %v1279_v18  ;;  %v2057_v25 = vpack.c.bf16 %v1312_v21, %v1311_v19  ;;  %v2209_v26 = vpop.f32.mrb[16].mxu0  ;;  %v2241_v27 = vpop.f32.mrb[16].mxu1 }
 0x11b   : > { %2110 = vst [vmem:[%s2481_s17 + $0x38] sm:$0xff] %v1982_v22   ;;  %2126 = vst [vmem:[%s2481_s17 + $0xb8] sm:$0xff] %v2062_v23   ;;  %v1221_v28 = vadd.f32 %v2209_v26, %v2466_v40  ;;  %v1253_v29 = vadd.f32 %v2241_v27, %v2466_v40  ;;  %v810_v30 = vpop.f32.mrb[17].mxu0  ;;  %v938_v31 = vpop.f32.mrb[17].mxu1 }
 0x11c   : > { %2109 = vst [vmem:[%s2481_s17 + $0x30] sm:$0xff] %v1977_v24   ;;  %2125 = vst [vmem:[%s2481_s17 + $0xb0] sm:$0xff] %v2057_v25   ;;  %v1219_v32 = vadd.f32 %v2466_v40, %v810_v30  ;;  %v1251_v33 = vadd.f32 %v2466_v40, %v938_v31  ;;  %v2210_v34 = vpop.f32.mrb[18].mxu0  ;;  %v2242_v35 = vpop.f32.mrb[18].mxu1 }
 0x11d   : > { %v1222_v36 = vadd.f32 %v2210_v34, %v2466_v40  ;;  %v1254_v37 = vadd.f32 %v2242_v35, %v2466_v40  ;;  %v813_v38 = vpop.f32.mrb[19].mxu0  ;;  %v941_v39 = vpop.f32.mrb[19].mxu1  ;;  %v1285_v43 = vmax.f32 %v1221_v28, 0.0  ;;  %v1317_v44 = vmax.f32 %v1253_v29, 0.0 }
 0x11e   : > { %v1220_v41 = vadd.f32 %v2466_v40, %v813_v38  ;;  %v1252_v42 = vadd.f32 %v2466_v40, %v941_v39  ;;  %v1283_v47 = vmax.f32 %v1219_v32, 0.0  ;;  %v1315_v48 = vmax.f32 %v1251_v33, 0.0 }
 0x11f   : > { %v1286_v45 = vmax.f32 %v1222_v36, 0.0  ;;  %v1318_v46 = vmax.f32 %v1254_v37, 0.0 }
 0x120   : > { %v1284_v49 = vmax.f32 %v1220_v41, 0.0  ;;  %v1316_v50 = vmax.f32 %v1252_v42, 0.0 }
 0x121   : > { %v1992_v51 = vpack.c.bf16 %v1286_v45, %v1285_v43  ;;  %v2072_v52 = vpack.c.bf16 %v1318_v46, %v1317_v44 }
 0x122   : > { %v1987_v53 = vpack.c.bf16 %v1284_v49, %v1283_v47  ;;  %v2067_v54 = vpack.c.bf16 %v1316_v50, %v1315_v48  ;;  %v2213_v55 = vpop.f32.mrb[20].mxu0  ;;  %v2245_v56 = vpop.f32.mrb[20].mxu1 }
 0x123   : > { %2112 = vst [vmem:[%s2481_s17 + $0x48] sm:$0xff] %v1992_v51   ;;  %2128 = vst [vmem:[%s2481_s17 + $0xc8] sm:$0xff] %v2072_v52   ;;  %v1225_v57 = vadd.f32 %v2213_v55, %v2466_v40  ;;  %v1257_v58 = vadd.f32 %v2245_v56, %v2466_v40  ;;  %v826_v59 = vpop.f32.mrb[21].mxu0  ;;  %v954_v60 = vpop.f32.mrb[21].mxu1 }
 0x124   : > { %2111 = vst [vmem:[%s2481_s17 + $0x40] sm:$0xff] %v1987_v53   ;;  %2127 = vst [vmem:[%s2481_s17 + $0xc0] sm:$0xff] %v2067_v54   ;;  %v1223_v61 = vadd.f32 %v2466_v40, %v826_v59  ;;  %v1255_v62 = vadd.f32 %v2466_v40, %v954_v60  ;;  %v2214_v63 = vpop.f32.mrb[22].mxu0  ;;  %v2246_v0 = vpop.f32.mrb[22].mxu1 }
 0x125   : > { %v1226_v1 = vadd.f32 %v2214_v63, %v2466_v40  ;;  %v1258_v2 = vadd.f32 %v2246_v0, %v2466_v40  ;;  %v829_v3 = vpop.f32.mrb[23].mxu0  ;;  %v957_v4 = vpop.f32.mrb[23].mxu1  ;;  %v1289_v7 = vmax.f32 %v1225_v57, 0.0  ;;  %v1321_v8 = vmax.f32 %v1257_v58, 0.0 }
 0x126   : > { %v1224_v5 = vadd.f32 %v2466_v40, %v829_v3  ;;  %v1256_v6 = vadd.f32 %v2466_v40, %v957_v4  ;;  %v1287_v11 = vmax.f32 %v1223_v61, 0.0  ;;  %v1319_v12 = vmax.f32 %v1255_v62, 0.0 }
 0x127   : > { %v1290_v9 = vmax.f32 %v1226_v1, 0.0  ;;  %v1322_v10 = vmax.f32 %v1258_v2, 0.0 }
 0x128   : > { %v1288_v13 = vmax.f32 %v1224_v5, 0.0  ;;  %v1320_v14 = vmax.f32 %v1256_v6, 0.0 }
 0x129   : > { %v2002_v15 = vpack.c.bf16 %v1290_v9, %v1289_v7  ;;  %v2082_v16 = vpack.c.bf16 %v1322_v10, %v1321_v8 }
 0x12a   : > { %v1997_v17 = vpack.c.bf16 %v1288_v13, %v1287_v11  ;;  %v2077_v18 = vpack.c.bf16 %v1320_v14, %v1319_v12  ;;  %v2217_v19 = vpop.f32.mrb[24].mxu0  ;;  %v2249_v20 = vpop.f32.mrb[24].mxu1 }
 0x12b   : > { %2114 = vst [vmem:[%s2481_s17 + $0x58] sm:$0xff] %v2002_v15   ;;  %2130 = vst [vmem:[%s2481_s17 + $0xd8] sm:$0xff] %v2082_v16   ;;  %v1229_v21 = vadd.f32 %v2217_v19, %v2466_v40  ;;  %v1261_v22 = vadd.f32 %v2249_v20, %v2466_v40  ;;  %v842_v23 = vpop.f32.mrb[25].mxu0  ;;  %v970_v24 = vpop.f32.mrb[25].mxu1 }
 0x12c   : > { %2113 = vst [vmem:[%s2481_s17 + $0x50] sm:$0xff] %v1997_v17   ;;  %2129 = vst [vmem:[%s2481_s17 + $0xd0] sm:$0xff] %v2077_v18   ;;  %v1227_v25 = vadd.f32 %v2466_v40, %v842_v23  ;;  %v1259_v26 = vadd.f32 %v2466_v40, %v970_v24  ;;  %v2218_v27 = vpop.f32.mrb[26].mxu0  ;;  %v2250_v28 = vpop.f32.mrb[26].mxu1 }
 0x12d   : > { %v1230_v29 = vadd.f32 %v2218_v27, %v2466_v40  ;;  %v1262_v30 = vadd.f32 %v2250_v28, %v2466_v40  ;;  %v845_v31 = vpop.f32.mrb[27].mxu0  ;;  %v973_v32 = vpop.f32.mrb[27].mxu1  ;;  %v1293_v35 = vmax.f32 %v1229_v21, 0.0  ;;  %v1325_v36 = vmax.f32 %v1261_v22, 0.0 }
 0x12e   : > { %v1228_v33 = vadd.f32 %v2466_v40, %v845_v31  ;;  %v1260_v34 = vadd.f32 %v2466_v40, %v973_v32  ;;  %v1291_v39 = vmax.f32 %v1227_v25, 0.0  ;;  %v1323_v41 = vmax.f32 %v1259_v26, 0.0 }
 0x12f   : > { %v1294_v37 = vmax.f32 %v1230_v29, 0.0  ;;  %v1326_v38 = vmax.f32 %v1262_v30, 0.0 }
 0x130   : > { %v1292_v42 = vmax.f32 %v1228_v33, 0.0  ;;  %v1324_v43 = vmax.f32 %v1260_v34, 0.0 }
 0x131   : > { %v2012_v44 = vpack.c.bf16 %v1294_v37, %v1293_v35  ;;  %v2092_v45 = vpack.c.bf16 %v1326_v38, %v1325_v36 }
 0x132   : > { %v2007_v46 = vpack.c.bf16 %v1292_v42, %v1291_v39  ;;  %v2087_v47 = vpack.c.bf16 %v1324_v43, %v1323_v41  ;;  %v2221_v48 = vpop.f32.mrb[28].mxu0  ;;  %v2253_v49 = vpop.f32.mrb[28].mxu1 }
 0x133   : > { %2116 = vst [vmem:[%s2481_s17 + $0x68] sm:$0xff] %v2012_v44   ;;  %2132 = vst [vmem:[%s2481_s17 + $0xe8] sm:$0xff] %v2092_v45   ;;  %v1233_v50 = vadd.f32 %v2221_v48, %v2466_v40  ;;  %v1265_v51 = vadd.f32 %v2253_v49, %v2466_v40  ;;  %v858_v52 = vpop.f32.mrb[29].mxu0  ;;  %v986_v53 = vpop.f32.mrb[29].mxu1 }
 0x134   : > { %2115 = vst [vmem:[%s2481_s17 + $0x60] sm:$0xff] %v2007_v46   ;;  %2131 = vst [vmem:[%s2481_s17 + $0xe0] sm:$0xff] %v2087_v47   ;;  %v1231_v54 = vadd.f32 %v2466_v40, %v858_v52  ;;  %v1263_v55 = vadd.f32 %v2466_v40, %v986_v53  ;;  %v2222_v56 = vpop.f32.mrb[30].mxu0  ;;  %v2254_v57 = vpop.f32.mrb[30].mxu1 }
 0x135   : > { %v1234_v58 = vadd.f32 %v2222_v56, %v2466_v40  ;;  %v1266_v59 = vadd.f32 %v2254_v57, %v2466_v40  ;;  %v861_v60 = vpop.f32.mrb[31].mxu0  ;;  %v989_v61 = vpop.f32.mrb[31].mxu1  ;;  %v1297_v0 = vmax.f32 %v1233_v50, 0.0  ;;  %v1329_v1 = vmax.f32 %v1265_v51, 0.0 }
 0x136   : > { %v1232_v62 = vadd.f32 %v2466_v40, %v861_v60  ;;  %v1264_v63 = vadd.f32 %v2466_v40, %v989_v61  ;;  %v1295_v4 = vmax.f32 %v1231_v54, 0.0  ;;  %v1327_v5 = vmax.f32 %v1263_v55, 0.0 }
 0x137   : > { %v1298_v2 = vmax.f32 %v1234_v58, 0.0  ;;  %v1330_v3 = vmax.f32 %v1266_v59, 0.0 }
 0x138   : > { %v1296_v6 = vmax.f32 %v1232_v62, 0.0  ;;  %v1328_v7 = vmax.f32 %v1264_v63, 0.0 }
 0x139   : > { %v2022_v8 = vpack.c.bf16 %v1298_v2, %v1297_v0  ;;  %v2102_v9 = vpack.c.bf16 %v1330_v3, %v1329_v1 }
 0x13a   : > { %v2017_v10 = vpack.c.bf16 %v1296_v6, %v1295_v4  ;;  %v2097_v11 = vpack.c.bf16 %v1328_v7, %v1327_v5 }
 0x13b   : > { %2118 = vst [vmem:[%s2481_s17 + $0x78] sm:$0xff] %v2022_v8   ;;  %2134 = vst [vmem:[%s2481_s17 + $0xf8] sm:$0xff] %v2102_v9  }
 0x13c   : > { %2117 = vst [vmem:[%s2481_s17 + $0x70] sm:$0xff] %v2017_v10   ;;  %2133 = vst [vmem:[%s2481_s17 + $0xf0] sm:$0xff] %v2097_v11  }
 0x13d PF: > { %s13_s14 = sadd.s32 1, %s2357_s14   ;;  %s2584_s12 = smov %s2353_s13 }
 0x13e   : > { %p10_p5 = scmp.ge.s32.totalorder %s13_s14, 66   ;;  %s2585_s13 = smov %s2587_s15 }
 0x140   :  { %12 = sbr.rel (!%p10_p5) target bundleno = 2 (0x2), region = 76 }

// kernel: skull_unet_transformer_forward.29
= control target key start
LH: loop header
LB: loop body
LE: loop exit
PB: predicated region body
PF: predicated region fallthrough
CT: control target
= control target key end

     0   :  { %s2379_s12 = smov 0   ;;  %s2381_s13 = smov 0   ;;  %s2580_s0 = inlined_call_operand.vmem [shape: bf16[2048,128], index: 0, kind: input, shape index: {}]   ;;  %s2581_s1 = inlined_call_operand.vmem [shape: bf16[128,128], index: 1, kind: input, shape index: {}]   ;;  %s2582_s2 = inlined_call_operand.vmem [shape: f32[1,128], index: 2, kind: input, shape index: {}]   ;;  %s2583_s3 = inlined_call_operand.vmem [shape: bf16[2048,128], index: 3, kind: output, shape index: {}]  }
   0x1   :  { %s2383_s14 = smov 0  }
   0x2 LB: > { %s32_s15 = sadd.s32 1, %s2353_s13  ;;  %p1768_p0 = scmp.ge.s32.totalorder %s2357_s14, 1  ;;  %s2357_s14 = sphi %s2383_s14, %s13_s14   ;;  %s2353_s13 = sphi %s2381_s13, %s2585_s13   ;;  %s2349_s12 = sphi %s2379_s12, %s2584_s12  }
   0x3   : > { %p34_p1 = scmp.ge.s32.totalorder %s32_s15, 4  ;;  %p188_p2 = scmp.lt.s32.totalorder %s2357_s14, 5 }
   0x5   : > { %s2587_s15 = smov (%p34_p1, %s32_s15), 0  ;;  %p189_p3 = pnand %p1768_p0, %p188_p2 }
   0x6   : > { %v2295_v0 = vld [vmem:[%s2581_s1] sm:$0xff] (!%p189_p3)   ;;  %s1769_s18 = sshll.u32 (!%p189_p3), %s2349_s12, 6  ;;  %v2296_v1 = vld [vmem:[%s2581_s1 + $0x8] sm:$0xff] (!%p189_p3)   ;;  %v2297_v2 = vld [vmem:[%s2581_s1 + $0x10] sm:$0xff] (!%p189_p3)  }
   0x7   : > { %192 = sbr.rel (%p189_p3) target bundleno = 317 (0x13d), region = 32  ;;  %p230_p4 = scmp.lt.s32.totalorder (!%p189_p3), %s1769_s18, 255  ;;  %2175 = vmatprep.subr.bf16.mxu0 (!%p189_p3), %v2295_v0  ;;  %2255 = vmatprep.subr.bf16.mxu1 (!%p189_p3), %v2295_v0  ;;  %v2298_v3 = vld [vmem:[%s2581_s1 + $0x18] sm:$0xff] (!%p189_p3)   ;;  %v2299_v6 = vld [vmem:[%s2581_s1 + $0x20] sm:$0xff] (!%p189_p3)   ;;  %v2300_v7 = vld [vmem:[%s2581_s1 + $0x28] sm:$0xff] (!%p189_p3)  }
   0x8   : > { %2176 = vmatpush3.bf16.msra.mxu0 (!%p189_p3), %v2295_v0  ;;  %2263 = vmatpush3.bf16.msra.mxu1 (!%p189_p3), %v2295_v0  ;;  %v2301_v8 = vld [vmem:[%s2581_s1 + $0x30] sm:$0xff] (!%p189_p3)   ;;  %v2302_v9 = vld [vmem:[%s2581_s1 + $0x38] sm:$0xff] (!%p189_p3)   ;;  %v2466_v40 = vld [vmem:[%s2582_s2] ss:$0 sm:$0xff] (!%p189_p3) }
   0x9   : > { %2177 = vmatprep.subr.bf16.mxu0 (!%p189_p3), %v2296_v1  ;;  %2256 = vmatprep.subr.bf16.mxu1 (!%p189_p3), %v2296_v1 }
   0xc   : > { %2178 = vmatpush3.bf16.msra.mxu0 (!%p189_p3), %v2296_v1  ;;  %2264 = vmatpush3.bf16.msra.mxu1 (!%p189_p3), %v2296_v1 }
   0xd   : > { %2179 = vmatprep.subr.bf16.mxu0 (!%p189_p3), %v2297_v2  ;;  %2257 = vmatprep.subr.bf16.mxu1 (!%p189_p3), %v2297_v2 }
   0xe   : > { %s2589_s18 = smov (!%p230_p4, %s1769_s18), 255 }
   0xf   : > { %s1770_s23 = sshll.u32 %s2589_s18, 2 }
  0x10   : > { %s2414_s26 = scalar_lea.vmem %s2580_s0, %s1770_s23  ;;  %2180 = vmatpush3.bf16.msra.mxu0 %v2297_v2  ;;  %2265 = vmatpush3.bf16.msra.mxu1 %v2297_v2  ;;  %s2481_s17 = scalar_lea.vmem %s2583_s3, %s1770_s23 }
  0x11   : > { %v2303_v4 = vld [vmem:[%s2414_s26] sm:$0xff]   ;;  %2181 = vmatprep.subr.bf16.mxu0 %v2298_v3  ;;  %2258 = vmatprep.subr.bf16.mxu1 %v2298_v3  ;;  %v2305_v10 = vld [vmem:[%s2414_s26 + $0x8] sm:$0xff]   ;;  %v2307_v12 = vld [vmem:[%s2414_s26 + $0x10] sm:$0xff]  }
  0x12   : > { %v2304_v5 = vld [vmem:[%s2414_s26 + $0x80] sm:$0xff]   ;;  %2191 = vmatprep.mubr.bf16.mxu0 %v2303_v4  ;;  %v2306_v11 = vld [vmem:[%s2414_s26 + $0x88] sm:$0xff]   ;;  %v2308_v13 = vld [vmem:[%s2414_s26 + $0x90] sm:$0xff]  }
  0x13   : > { %2223 = vmatprep.mubr.bf16.mxu1 %v2304_v5  ;;  %v2309_v14 = vld [vmem:[%s2414_s26 + $0x18] sm:$0xff]   ;;  %v2311_v16 = vld [vmem:[%s2414_s26 + $0x20] sm:$0xff]   ;;  %v2313_v18 = vld [vmem:[%s2414_s26 + $0x28] sm:$0xff]  }
  0x14   : > { %2182 = vmatpush3.bf16.msra.mxu0 %v2298_v3  ;;  %2266 = vmatpush3.bf16.msra.mxu1 %v2298_v3  ;;  %v2310_v15 = vld [vmem:[%s2414_s26 + $0x98] sm:$0xff]   ;;  %v2312_v17 = vld [vmem:[%s2414_s26 + $0xa0] sm:$0xff]   ;;  %v2314_v19 = vld [vmem:[%s2414_s26 + $0xa8] sm:$0xff]  }
  0x15   : > { %2183 = vmatprep.subr.bf16.mxu0 %v2299_v6  ;;  %2259 = vmatprep.subr.bf16.mxu1 %v2299_v6  ;;  %v2315_v20 = vld [vmem:[%s2414_s26 + $0x30] sm:$0xff]   ;;  %v2317_v22 = vld [vmem:[%s2414_s26 + $0x38] sm:$0xff]   ;;  %v2319_v24 = vld [vmem:[%s2414_s26 + $0x40] sm:$0xff]  }
  0x16   : > { %v2316_v21 = vld [vmem:[%s2414_s26 + $0xb0] sm:$0xff]   ;;  %v2318_v23 = vld [vmem:[%s2414_s26 + $0xb8] sm:$0xff]   ;;  %v2320_v25 = vld [vmem:[%s2414_s26 + $0xc0] sm:$0xff]  }
  0x17   : > { %v2321_v26 = vld [vmem:[%s2414_s26 + $0x48] sm:$0xff]   ;;  %v2323_v28 = vld [vmem:[%s2414_s26 + $0x50] sm:$0xff]   ;;  %v2325_v30 = vld [vmem:[%s2414_s26 + $0x58] sm:$0xff]  }
  0x18   : > { %2184 = vmatpush3.bf16.msra.mxu0 %v2299_v6  ;;  %2267 = vmatpush3.bf16.msra.mxu1 %v2299_v6  ;;  %v2322_v27 = vld [vmem:[%s2414_s26 + $0xc8] sm:$0xff]   ;;  %v2324_v29 = vld [vmem:[%s2414_s26 + $0xd0] sm:$0xff]   ;;  %v2326_v31 = vld [vmem:[%s2414_s26 + $0xd8] sm:$0xff]  }
  0x19   : > { %2185 = vmatprep.subr.bf16.mxu0 %v2300_v7  ;;  %2260 = vmatprep.subr.bf16.mxu1 %v2300_v7  ;;  %v2327_v32 = vld [vmem:[%s2414_s26 + $0x60] sm:$0xff]   ;;  %v2329_v34 = vld [vmem:[%s2414_s26 + $0x68] sm:$0xff]   ;;  %v2331_v36 = vld [vmem:[%s2414_s26 + $0x70] sm:$0xff]  }
  0x1a   : > { %v2328_v33 = vld [vmem:[%s2414_s26 + $0xe0] sm:$0xff]   ;;  %v2330_v35 = vld [vmem:[%s2414_s26 + $0xe8] sm:$0xff]   ;;  %v2332_v37 = vld [vmem:[%s2414_s26 + $0xf0] sm:$0xff]  }
  0x1b   : > { %v2333_v38 = vld [vmem:[%s2414_s26 + $0x78] sm:$0xff]  }
  0x1c   : > { %2186 = vmatpush3.bf16.msra.mxu0 %v2300_v7  ;;  %2268 = vmatpush3.bf16.msra.mxu1 %v2300_v7  ;;  %v2334_v39 = vld [vmem:[%s2414_s26 + $0xf8] sm:$0xff]  }
  0x1d   : > { %2187 = vmatprep.subr.bf16.mxu0 %v2301_v8  ;;  %2261 = vmatprep.subr.bf16.mxu1 %v2301_v8 }
  0x20   : > { %2188 = vmatpush3.bf16.msra.mxu0 %v2301_v8  ;;  %2269 = vmatpush3.bf16.msra.mxu1 %v2301_v8 }
  0x21   : > { %2189 = vmatprep.subr.bf16.mxu0 %v2302_v9  ;;  %2262 = vmatprep.subr.bf16.mxu1 %v2302_v9 }
  0x24   : > { %2190 = vmatpush3.bf16.msra.mxu0 %v2302_v9  ;;  %2270 = vmatpush3.bf16.msra.mxu1 %v2302_v9 }
  0x27   : > { %2192 = vmatmul.mubr.bf16.vlgmr.msra.gmra.mrb[0].mxu0 %v2305_v10  ;;  %2224 = vmatmul.mubr.bf16.vlgmr.msra.gmra.mrb[0].mxu1 %v2306_v11 }
  0x28   : > { %2195 = vmatprep.mubr.bf16.mxu0 %v2307_v12  ;;  %2227 = vmatprep.mubr.bf16.mxu1 %v2308_v13 }
  0x2f   : > { %2196 = vmatmul.mubr.bf16.gmra.mrb[4].mxu0 %v2309_v14  ;;  %2228 = vmatmul.mubr.bf16.gmra.mrb[4].mxu1 %v2310_v15 }
  0x30   : > { %2199 = vmatprep.mubr.bf16.mxu0 %v2311_v16  ;;  %2231 = vmatprep.mubr.bf16.mxu1 %v2312_v17 }
  0x37   : > { %2200 = vmatmul.mubr.bf16.gmra.mrb[8].mxu0 %v2313_v18  ;;  %2232 = vmatmul.mubr.bf16.gmra.mrb[8].mxu1 %v2314_v19 }
  0x38   : > { %2203 = vmatprep.mubr.bf16.mxu0 %v2315_v20  ;;  %2235 = vmatprep.mubr.bf16.mxu1 %v2316_v21 }
  0x3f   : > { %2204 = vmatmul.mubr.bf16.gmra.mrb[12].mxu0 %v2317_v22  ;;  %2236 = vmatmul.mubr.bf16.gmra.mrb[12].mxu1 %v2318_v23 }
  0x40   : > { %2207 = vmatprep.mubr.bf16.mxu0 %v2319_v24  ;;  %2239 = vmatprep.mubr.bf16.mxu1 %v2320_v25 }
  0x47   : > { %2208 = vmatmul.mubr.bf16.gmra.mrb[16].mxu0 %v2321_v26  ;;  %2240 = vmatmul.mubr.bf16.gmra.mrb[16].mxu1 %v2322_v27 }
  0x48   : > { %2211 = vmatprep.mubr.bf16.mxu0 %v2323_v28  ;;  %2243 = vmatprep.mubr.bf16.mxu1 %v2324_v29 }
  0x4f   : > { %2212 = vmatmul.mubr.bf16.gmra.mrb[20].mxu0 %v2325_v30  ;;  %2244 = vmatmul.mubr.bf16.gmra.mrb[20].mxu1 %v2326_v31 }
  0x50   : > { %2215 = vmatprep.mubr.bf16.mxu0 %v2327_v32  ;;  %2247 = vmatprep.mubr.bf16.mxu1 %v2328_v33 }
  0x57   : > { %2216 = vmatmul.mubr.bf16.gmra.mrb[24].mxu0 %v2329_v34  ;;  %2248 = vmatmul.mubr.bf16.gmra.mrb[24].mxu1 %v2330_v35 }
  0x58   : > { %2219 = vmatprep.mubr.bf16.mxu0 %v2331_v36  ;;  %2251 = vmatprep.mubr.bf16.mxu1 %v2332_v37 }
  0x5f   : > { %2220 = vmatmul.mubr.bf16.gmra.mrb[28].mxu0 %v2333_v38  ;;  %2252 = vmatmul.mubr.bf16.gmra.mrb[28].mxu1 %v2334_v39 }
  0xfa   : > { %v2193_v41 = vpop.f32.mrb[0].mxu0  ;;  %v2225_v42 = vpop.f32.mrb[0].mxu1 }
  0xfb   : > { %v1205_v43 = vadd.f32 %v2193_v41, %v2466_v40  ;;  %v1237_v44 = vadd.f32 %v2225_v42, %v2466_v40  ;;  %v746_v45 = vpop.f32.mrb[1].mxu0  ;;  %v874_v46 = vpop.f32.mrb[1].mxu1 }
  0xfc   : > { %v1203_v47 = vadd.f32 %v2466_v40, %v746_v45  ;;  %v1235_v48 = vadd.f32 %v2466_v40, %v874_v46  ;;  %v2194_v49 = vpop.f32.mrb[2].mxu0  ;;  %v2226_v50 = vpop.f32.mrb[2].mxu1 }
  0xfd   : > { %v1206_v51 = vadd.f32 %v2194_v49, %v2466_v40  ;;  %v1238_v52 = vadd.f32 %v2226_v50, %v2466_v40  ;;  %v749_v53 = vpop.f32.mrb[3].mxu0  ;;  %v877_v54 = vpop.f32.mrb[3].mxu1  ;;  %v1269_v57 = vmax.f32 %v1205_v43, 0.0  ;;  %v1301_v58 = vmax.f32 %v1237_v44, 0.0 }
  0xfe   : > { %v1204_v55 = vadd.f32 %v2466_v40, %v749_v53  ;;  %v1236_v56 = vadd.f32 %v2466_v40, %v877_v54  ;;  %v1267_v61 = vmax.f32 %v1203_v47, 0.0  ;;  %v1299_v62 = vmax.f32 %v1235_v48, 0.0 }
  0xff   : > { %v1270_v59 = vmax.f32 %v1206_v51, 0.0  ;;  %v1302_v60 = vmax.f32 %v1238_v52, 0.0 }
 0x100   : > { %v1268_v63 = vmax.f32 %v1204_v55, 0.0  ;;  %v1300_v0 = vmax.f32 %v1236_v56, 0.0 }
 0x101   : > { %v1952_v1 = vpack.c.bf16 %v1270_v59, %v1269_v57  ;;  %v2032_v2 = vpack.c.bf16 %v1302_v60, %v1301_v58 }
 0x102   : > { %v1947_v3 = vpack.c.bf16 %v1268_v63, %v1267_v61  ;;  %v2027_v4 = vpack.c.bf16 %v1300_v0, %v1299_v62  ;;  %v2197_v5 = vpop.f32.mrb[4].mxu0  ;;  %v2229_v6 = vpop.f32.mrb[4].mxu1 }
 0x103   : > { %2104 = vst [vmem:[%s2481_s17 + $0x8] sm:$0xff] %v1952_v1   ;;  %2120 = vst [vmem:[%s2481_s17 + $0x88] sm:$0xff] %v2032_v2   ;;  %v1209_v7 = vadd.f32 %v2197_v5, %v2466_v40  ;;  %v1241_v8 = vadd.f32 %v2229_v6, %v2466_v40  ;;  %v762_v9 = vpop.f32.mrb[5].mxu0  ;;  %v890_v10 = vpop.f32.mrb[5].mxu1 }
 0x104   : > { %1948 = vst [vmem:[%s2481_s17] sm:$0xff] %v1947_v3   ;;  %2119 = vst [vmem:[%s2481_s17 + $0x80] sm:$0xff] %v2027_v4   ;;  %v1207_v11 = vadd.f32 %v2466_v40, %v762_v9  ;;  %v1239_v12 = vadd.f32 %v2466_v40, %v890_v10  ;;  %v2198_v13 = vpop.f32.mrb[6].mxu0  ;;  %v2230_v14 = vpop.f32.mrb[6].mxu1 }
 0x105   : > { %v1210_v15 = vadd.f32 %v2198_v13, %v2466_v40  ;;  %v1242_v16 = vadd.f32 %v2230_v14, %v2466_v40  ;;  %v765_v17 = vpop.f32.mrb[7].mxu0  ;;  %v893_v18 = vpop.f32.mrb[7].mxu1  ;;  %v1273_v21 = vmax.f32 %v1209_v7, 0.0  ;;  %v1305_v22 = vmax.f32 %v1241_v8, 0.0 }
 0x106   : > { %v1208_v19 = vadd.f32 %v2466_v40, %v765_v17  ;;  %v1240_v20 = vadd.f32 %v2466_v40, %v893_v18  ;;  %v1271_v25 = vmax.f32 %v1207_v11, 0.0  ;;  %v1303_v26 = vmax.f32 %v1239_v12, 0.0 }
 0x107   : > { %v1274_v23 = vmax.f32 %v1210_v15, 0.0  ;;  %v1306_v24 = vmax.f32 %v1242_v16, 0.0 }
 0x108   : > { %v1272_v27 = vmax.f32 %v1208_v19, 0.0  ;;  %v1304_v28 = vmax.f32 %v1240_v20, 0.0 }
 0x109   : > { %v1962_v29 = vpack.c.bf16 %v1274_v23, %v1273_v21  ;;  %v2042_v30 = vpack.c.bf16 %v1306_v24, %v1305_v22 }
 0x10a   : > { %v1957_v31 = vpack.c.bf16 %v1272_v27, %v1271_v25  ;;  %v2037_v32 = vpack.c.bf16 %v1304_v28, %v1303_v26  ;;  %v2201_v33 = vpop.f32.mrb[8].mxu0  ;;  %v2233_v34 = vpop.f32.mrb[8].mxu1 }
 0x10b   : > { %2106 = vst [vmem:[%s2481_s17 + $0x18] sm:$0xff] %v1962_v29   ;;  %2122 = vst [vmem:[%s2481_s17 + $0x98] sm:$0xff] %v2042_v30   ;;  %v1213_v35 = vadd.f32 %v2201_v33, %v2466_v40  ;;  %v1245_v36 = vadd.f32 %v2233_v34, %v2466_v40  ;;  %v778_v37 = vpop.f32.mrb[9].mxu0  ;;  %v906_v38 = vpop.f32.mrb[9].mxu1 }
 0x10c   : > { %2105 = vst [vmem:[%s2481_s17 + $0x10] sm:$0xff] %v1957_v31   ;;  %2121 = vst [vmem:[%s2481_s17 + $0x90] sm:$0xff] %v2037_v32   ;;  %v1211_v39 = vadd.f32 %v2466_v40, %v778_v37  ;;  %v1243_v41 = vadd.f32 %v2466_v40, %v906_v38  ;;  %v2202_v42 = vpop.f32.mrb[10].mxu0  ;;  %v2234_v43 = vpop.f32.mrb[10].mxu1 }
 0x10d   : > { %v1214_v44 = vadd.f32 %v2202_v42, %v2466_v40  ;;  %v1246_v45 = vadd.f32 %v2234_v43, %v2466_v40  ;;  %v781_v46 = vpop.f32.mrb[11].mxu0  ;;  %v909_v47 = vpop.f32.mrb[11].mxu1  ;;  %v1277_v50 = vmax.f32 %v1213_v35, 0.0  ;;  %v1309_v51 = vmax.f32 %v1245_v36, 0.0 }
 0x10e   : > { %v1212_v48 = vadd.f32 %v2466_v40, %v781_v46  ;;  %v1244_v49 = vadd.f32 %v2466_v40, %v909_v47  ;;  %v1275_v54 = vmax.f32 %v1211_v39, 0.0  ;;  %v1307_v55 = vmax.f32 %v1243_v41, 0.0 }
 0x10f   : > { %v1278_v52 = vmax.f32 %v1214_v44, 0.0  ;;  %v1310_v53 = vmax.f32 %v1246_v45, 0.0 }
 0x110   : > { %v1276_v56 = vmax.f32 %v1212_v48, 0.0  ;;  %v1308_v57 = vmax.f32 %v1244_v49, 0.0 }
 0x111   : > { %v1972_v58 = vpack.c.bf16 %v1278_v52, %v1277_v50  ;;  %v2052_v59 = vpack.c.bf16 %v1310_v53, %v1309_v51 }
 0x112   : > { %v1967_v60 = vpack.c.bf16 %v1276_v56, %v1275_v54  ;;  %v2047_v61 = vpack.c.bf16 %v1308_v57, %v1307_v55  ;;  %v2205_v62 = vpop.f32.mrb[12].mxu0  ;;  %v2237_v63 = vpop.f32.mrb[12].mxu1 }
 0x113   : > { %2108 = vst [vmem:[%s2481_s17 + $0x28] sm:$0xff] %v1972_v58   ;;  %2124 = vst [vmem:[%s2481_s17 + $0xa8] sm:$0xff] %v2052_v59   ;;  %v1217_v0 = vadd.f32 %v2205_v62, %v2466_v40  ;;  %v1249_v1 = vadd.f32 %v2237_v63, %v2466_v40  ;;  %v794_v2 = vpop.f32.mrb[13].mxu0  ;;  %v922_v3 = vpop.f32.mrb[13].mxu1 }
 0x114   : > { %2107 = vst [vmem:[%s2481_s17 + $0x20] sm:$0xff] %v1967_v60   ;;  %2123 = vst [vmem:[%s2481_s17 + $0xa0] sm:$0xff] %v2047_v61   ;;  %v1215_v4 = vadd.f32 %v2466_v40, %v794_v2  ;;  %v1247_v5 = vadd.f32 %v2466_v40, %v922_v3  ;;  %v2206_v6 = vpop.f32.mrb[14].mxu0  ;;  %v2238_v7 = vpop.f32.mrb[14].mxu1 }
 0x115   : > { %v1218_v8 = vadd.f32 %v2206_v6, %v2466_v40  ;;  %v1250_v9 = vadd.f32 %v2238_v7, %v2466_v40  ;;  %v797_v10 = vpop.f32.mrb[15].mxu0  ;;  %v925_v11 = vpop.f32.mrb[15].mxu1  ;;  %v1281_v14 = vmax.f32 %v1217_v0, 0.0  ;;  %v1313_v15 = vmax.f32 %v1249_v1, 0.0 }
 0x116   : > { %v1216_v12 = vadd.f32 %v2466_v40, %v797_v10  ;;  %v1248_v13 = vadd.f32 %v2466_v40, %v925_v11  ;;  %v1279_v18 = vmax.f32 %v1215_v4, 0.0  ;;  %v1311_v19 = vmax.f32 %v1247_v5, 0.0 }
 0x117   : > { %v1282_v16 = vmax.f32 %v1218_v8, 0.0  ;;  %v1314_v17 = vmax.f32 %v1250_v9, 0.0 }
 0x118   : > { %v1280_v20 = vmax.f32 %v1216_v12, 0.0  ;;  %v1312_v21 = vmax.f32 %v1248_v13, 0.0 }
 0x119   : > { %v1982_v22 = vpack.c.bf16 %v1282_v16, %v1281_v14  ;;  %v2062_v23 = vpack.c.bf16 %v1314_v17, %v1313_v15 }
 0x11a   : > { %v1977_v24 = vpack.c.bf16 %v1280_v20, %v1279_v18  ;;  %v2057_v25 = vpack.c.bf16 %v1312_v21, %v1311_v19  ;;  %v2209_v26 = vpop.f32.mrb[16].mxu0  ;;  %v2241_v27 = vpop.f32.mrb[16].mxu1 }
 0x11b   : > { %2110 = vst [vmem:[%s2481_s17 + $0x38] sm:$0xff] %v1982_v22   ;;  %2126 = vst [vmem:[%s2481_s17 + $0xb8] sm:$0xff] %v2062_v23   ;;  %v1221_v28 = vadd.f32 %v2209_v26, %v2466_v40  ;;  %v1253_v29 = vadd.f32 %v2241_v27, %v2466_v40  ;;  %v810_v30 = vpop.f32.mrb[17].mxu0  ;;  %v938_v31 = vpop.f32.mrb[17].mxu1 }
 0x11c   : > { %2109 = vst [vmem:[%s2481_s17 + $0x30] sm:$0xff] %v1977_v24   ;;  %2125 = vst [vmem:[%s2481_s17 + $0xb0] sm:$0xff] %v2057_v25   ;;  %v1219_v32 = vadd.f32 %v2466_v40, %v810_v30  ;;  %v1251_v33 = vadd.f32 %v2466_v40, %v938_v31  ;;  %v2210_v34 = vpop.f32.mrb[18].mxu0  ;;  %v2242_v35 = vpop.f32.mrb[18].mxu1 }
 0x11d   : > { %v1222_v36 = vadd.f32 %v2210_v34, %v2466_v40  ;;  %v1254_v37 = vadd.f32 %v2242_v35, %v2466_v40  ;;  %v813_v38 = vpop.f32.mrb[19].mxu0  ;;  %v941_v39 = vpop.f32.mrb[19].mxu1  ;;  %v1285_v43 = vmax.f32 %v1221_v28, 0.0  ;;  %v1317_v44 = vmax.f32 %v1253_v29, 0.0 }
 0x11e   : > { %v1220_v41 = vadd.f32 %v2466_v40, %v813_v38  ;;  %v1252_v42 = vadd.f32 %v2466_v40, %v941_v39  ;;  %v1283_v47 = vmax.f32 %v1219_v32, 0.0  ;;  %v1315_v48 = vmax.f32 %v1251_v33, 0.0 }
 0x11f   : > { %v1286_v45 = vmax.f32 %v1222_v36, 0.0  ;;  %v1318_v46 = vmax.f32 %v1254_v37, 0.0 }
 0x120   : > { %v1284_v49 = vmax.f32 %v1220_v41, 0.0  ;;  %v1316_v50 = vmax.f32 %v1252_v42, 0.0 }
 0x121   : > { %v1992_v51 = vpack.c.bf16 %v1286_v45, %v1285_v43  ;;  %v2072_v52 = vpack.c.bf16 %v1318_v46, %v1317_v44 }
 0x122   : > { %v1987_v53 = vpack.c.bf16 %v1284_v49, %v1283_v47  ;;  %v2067_v54 = vpack.c.bf16 %v1316_v50, %v1315_v48  ;;  %v2213_v55 = vpop.f32.mrb[20].mxu0  ;;  %v2245_v56 = vpop.f32.mrb[20].mxu1 }
 0x123   : > { %2112 = vst [vmem:[%s2481_s17 + $0x48] sm:$0xff] %v1992_v51   ;;  %2128 = vst [vmem:[%s2481_s17 + $0xc8] sm:$0xff] %v2072_v52   ;;  %v1225_v57 = vadd.f32 %v2213_v55, %v2466_v40  ;;  %v1257_v58 = vadd.f32 %v2245_v56, %v2466_v40  ;;  %v826_v59 = vpop.f32.mrb[21].mxu0  ;;  %v954_v60 = vpop.f32.mrb[21].mxu1 }
 0x124   : > { %2111 = vst [vmem:[%s2481_s17 + $0x40] sm:$0xff] %v1987_v53   ;;  %2127 = vst [vmem:[%s2481_s17 + $0xc0] sm:$0xff] %v2067_v54   ;;  %v1223_v61 = vadd.f32 %v2466_v40, %v826_v59  ;;  %v1255_v62 = vadd.f32 %v2466_v40, %v954_v60  ;;  %v2214_v63 = vpop.f32.mrb[22].mxu0  ;;  %v2246_v0 = vpop.f32.mrb[22].mxu1 }
 0x125   : > { %v1226_v1 = vadd.f32 %v2214_v63, %v2466_v40  ;;  %v1258_v2 = vadd.f32 %v2246_v0, %v2466_v40  ;;  %v829_v3 = vpop.f32.mrb[23].mxu0  ;;  %v957_v4 = vpop.f32.mrb[23].mxu1  ;;  %v1289_v7 = vmax.f32 %v1225_v57, 0.0  ;;  %v1321_v8 = vmax.f32 %v1257_v58, 0.0 }
 0x126   : > { %v1224_v5 = vadd.f32 %v2466_v40, %v829_v3  ;;  %v1256_v6 = vadd.f32 %v2466_v40, %v957_v4  ;;  %v1287_v11 = vmax.f32 %v1223_v61, 0.0  ;;  %v1319_v12 = vmax.f32 %v1255_v62, 0.0 }
 0x127   : > { %v1290_v9 = vmax.f32 %v1226_v1, 0.0  ;;  %v1322_v10 = vmax.f32 %v1258_v2, 0.0 }
 0x128   : > { %v1288_v13 = vmax.f32 %v1224_v5, 0.0  ;;  %v1320_v14 = vmax.f32 %v1256_v6, 0.0 }
 0x129   : > { %v2002_v15 = vpack.c.bf16 %v1290_v9, %v1289_v7  ;;  %v2082_v16 = vpack.c.bf16 %v1322_v10, %v1321_v8 }
 0x12a   : > { %v1997_v17 = vpack.c.bf16 %v1288_v13, %v1287_v11  ;;  %v2077_v18 = vpack.c.bf16 %v1320_v14, %v1319_v12  ;;  %v2217_v19 = vpop.f32.mrb[24].mxu0  ;;  %v2249_v20 = vpop.f32.mrb[24].mxu1 }
 0x12b   : > { %2114 = vst [vmem:[%s2481_s17 + $0x58] sm:$0xff] %v2002_v15   ;;  %2130 = vst [vmem:[%s2481_s17 + $0xd8] sm:$0xff] %v2082_v16   ;;  %v1229_v21 = vadd.f32 %v2217_v19, %v2466_v40  ;;  %v1261_v22 = vadd.f32 %v2249_v20, %v2466_v40  ;;  %v842_v23 = vpop.f32.mrb[25].mxu0  ;;  %v970_v24 = vpop.f32.mrb[25].mxu1 }
 0x12c   : > { %2113 = vst [vmem:[%s2481_s17 + $0x50] sm:$0xff] %v1997_v17   ;;  %2129 = vst [vmem:[%s2481_s17 + $0xd0] sm:$0xff] %v2077_v18   ;;  %v1227_v25 = vadd.f32 %v2466_v40, %v842_v23  ;;  %v1259_v26 = vadd.f32 %v2466_v40, %v970_v24  ;;  %v2218_v27 = vpop.f32.mrb[26].mxu0  ;;  %v2250_v28 = vpop.f32.mrb[26].mxu1 }
 0x12d   : > { %v1230_v29 = vadd.f32 %v2218_v27, %v2466_v40  ;;  %v1262_v30 = vadd.f32 %v2250_v28, %v2466_v40  ;;  %v845_v31 = vpop.f32.mrb[27].mxu0  ;;  %v973_v32 = vpop.f32.mrb[27].mxu1  ;;  %v1293_v35 = vmax.f32 %v1229_v21, 0.0  ;;  %v1325_v36 = vmax.f32 %v1261_v22, 0.0 }
 0x12e   : > { %v1228_v33 = vadd.f32 %v2466_v40, %v845_v31  ;;  %v1260_v34 = vadd.f32 %v2466_v40, %v973_v32  ;;  %v1291_v39 = vmax.f32 %v1227_v25, 0.0  ;;  %v1323_v41 = vmax.f32 %v1259_v26, 0.0 }
 0x12f   : > { %v1294_v37 = vmax.f32 %v1230_v29, 0.0  ;;  %v1326_v38 = vmax.f32 %v1262_v30, 0.0 }
 0x130   : > { %v1292_v42 = vmax.f32 %v1228_v33, 0.0  ;;  %v1324_v43 = vmax.f32 %v1260_v34, 0.0 }
 0x131   : > { %v2012_v44 = vpack.c.bf16 %v1294_v37, %v1293_v35  ;;  %v2092_v45 = vpack.c.bf16 %v1326_v38, %v1325_v36 }
 0x132   : > { %v2007_v46 = vpack.c.bf16 %v1292_v42, %v1291_v39  ;;  %v2087_v47 = vpack.c.bf16 %v1324_v43, %v1323_v41  ;;  %v2221_v48 = vpop.f32.mrb[28].mxu0  ;;  %v2253_v49 = vpop.f32.mrb[28].mxu1 }
 0x133   : > { %2116 = vst [vmem:[%s2481_s17 + $0x68] sm:$0xff] %v2012_v44   ;;  %2132 = vst [vmem:[%s2481_s17 + $0xe8] sm:$0xff] %v2092_v45   ;;  %v1233_v50 = vadd.f32 %v2221_v48, %v2466_v40  ;;  %v1265_v51 = vadd.f32 %v2253_v49, %v2466_v40  ;;  %v858_v52 = vpop.f32.mrb[29].mxu0  ;;  %v986_v53 = vpop.f32.mrb[29].mxu1 }
 0x134   : > { %2115 = vst [vmem:[%s2481_s17 + $0x60] sm:$0xff] %v2007_v46   ;;  %2131 = vst [vmem:[%s2481_s17 + $0xe0] sm:$0xff] %v2087_v47   ;;  %v1231_v54 = vadd.f32 %v2466_v40, %v858_v52  ;;  %v1263_v55 = vadd.f32 %v2466_v40, %v986_v53  ;;  %v2222_v56 = vpop.f32.mrb[30].mxu0  ;;  %v2254_v57 = vpop.f32.mrb[30].mxu1 }
 0x135   : > { %v1234_v58 = vadd.f32 %v2222_v56, %v2466_v40  ;;  %v1266_v59 = vadd.f32 %v2254_v57, %v2466_v40  ;;  %v861_v60 = vpop.f32.mrb[31].mxu0  ;;  %v989_v61 = vpop.f32.mrb[31].mxu1  ;;  %v1297_v0 = vmax.f32 %v1233_v50, 0.0  ;;  %v1329_v1 = vmax.f32 %v1265_v51, 0.0 }
 0x136   : > { %v1232_v62 = vadd.f32 %v2466_v40, %v861_v60  ;;  %v1264_v63 = vadd.f32 %v2466_v40, %v989_v61  ;;  %v1295_v4 = vmax.f32 %v1231_v54, 0.0  ;;  %v1327_v5 = vmax.f32 %v1263_v55, 0.0 }
 0x137   : > { %v1298_v2 = vmax.f32 %v1234_v58, 0.0  ;;  %v1330_v3 = vmax.f32 %v1266_v59, 0.0 }
 0x138   : > { %v1296_v6 = vmax.f32 %v1232_v62, 0.0  ;;  %v1328_v7 = vmax.f32 %v1264_v63, 0.0 }
 0x139   : > { %v2022_v8 = vpack.c.bf16 %v1298_v2, %v1297_v0  ;;  %v2102_v9 = vpack.c.bf16 %v1330_v3, %v1329_v1 }
 0x13a   : > { %v2017_v10 = vpack.c.bf16 %v1296_v6, %v1295_v4  ;;  %v2097_v11 = vpack.c.bf16 %v1328_v7, %v1327_v5 }
 0x13b   : > { %2118 = vst [vmem:[%s2481_s17 + $0x78] sm:$0xff] %v2022_v8   ;;  %2134 = vst [vmem:[%s2481_s17 + $0xf8] sm:$0xff] %v2102_v9  }
 0x13c   : > { %2117 = vst [vmem:[%s2481_s17 + $0x70] sm:$0xff] %v2017_v10   ;;  %2133 = vst [vmem:[%s2481_s17 + $0xf0] sm:$0xff] %v2097_v11  }
 0x13d PF: > { %s13_s14 = sadd.s32 1, %s2357_s14   ;;  %s2584_s12 = smov %s2353_s13 }
 0x13e   : > { %p10_p5 = scmp.ge.s32.totalorder %s13_s14, 6   ;;  %s2585_s13 = smov %s2587_s15 }
 0x140   :  { %12 = sbr.rel (!%p10_p5) target bundleno = 2 (0x2), region = 76 }

// kernel: skull_unet_transformer_forward.30
= control target key start
LH: loop header
LB: loop body
LE: loop exit
PB: predicated region body
PF: predicated region fallthrough
CT: control target
= control target key end

     0   :  { %s2594_s12 = smov 0   ;;  %s2596_s13 = smov 0   ;;  %s2880_s0 = inlined_call_operand.vmem [shape: bf16[2048,256], index: 0, kind: input, shape index: {}]   ;;  %s2881_s1 = inlined_call_operand.vmem [shape: bf16[256,128], index: 1, kind: input, shape index: {}]   ;;  %s2882_s2 = inlined_call_operand.vmem [shape: f32[1,128], index: 2, kind: input, shape index: {}]   ;;  %s2883_s3 = inlined_call_operand.vmem [shape: bf16[2048,128], index: 3, kind: output, shape index: {}]  }
   0x1   :  { %s2598_s14 = smov 0  }
   0x2 LB: > { %s32_s15 = sadd.s32 1, %s2567_s13  ;;  %p1971_p0 = scmp.ge.s32.totalorder %s2571_s14, 1  ;;  %s2571_s14 = sphi %s2598_s14, %s13_s14   ;;  %s2567_s13 = sphi %s2596_s13, %s2885_s13   ;;  %s2563_s12 = sphi %s2594_s12, %s2884_s12  }
   0x3   : > { %p34_p1 = scmp.ge.s32.totalorder %s32_s15, 4  ;;  %p191_p2 = scmp.lt.s32.totalorder %s2571_s14, 5 }
   0x5   : > { %s2887_s15 = smov (%p34_p1, %s32_s15), 0  ;;  %p192_p3 = pnand %p1971_p0, %p191_p2 }
   0x6   : > { %v2437_v0 = vld [vmem:[%s2881_s1] sm:$0xff] (!%p192_p3)   ;;  %v2573_v1 = vmov (!%p192_p3), 0   ;;  %s1972_s18 = sshll.u32 (!%p192_p3), %s2563_s12, 6  ;;  %v2438_v2 = vld [vmem:[%s2881_s1 + $0x8] sm:$0xff] (!%p192_p3)   ;;  %v2439_v3 = vld [vmem:[%s2881_s1 + $0x10] sm:$0xff] (!%p192_p3)  }
   0x7   : > { %195 = sbr.rel (%p192_p3) target bundleno = 412 (0x19c), region = 32  ;;  %912 = vmatprep.subr.bf16.mxu0 (!%p192_p3), %v2573_v1  ;;  %2380 = vmatprep.subr.bf16.mxu1 (!%p192_p3), %v2573_v1  ;;  %p236_p4 = scmp.lt.s32.totalorder (!%p192_p3), %s1972_s18, 255  ;;  %v2440_v4 = vld [vmem:[%s2881_s1 + $0x18] sm:$0xff] (!%p192_p3)   ;;  %v2441_v5 = vld [vmem:[%s2881_s1 + $0x20] sm:$0xff] (!%p192_p3)   ;;  %v2442_v7 = vld [vmem:[%s2881_s1 + $0x28] sm:$0xff] (!%p192_p3)  }
   0x8   : > { %913 = vmatpush1.bf16.msra.mxu0 (!%p192_p3), %v2437_v0  ;;  %2396 = vmatpush1.bf16.msra.mxu1 (!%p192_p3), %v2437_v0  ;;  %v2443_v9 = vld [vmem:[%s2881_s1 + $0x30] sm:$0xff] (!%p192_p3)   ;;  %v2444_v10 = vld [vmem:[%s2881_s1 + $0x38] sm:$0xff] (!%p192_p3)   ;;  %v2445_v11 = vld [vmem:[%s2881_s1 + $0x40] sm:$0xff] (!%p192_p3)  }
   0x9   : > { %914 = vmatprep.subr.bf16.mxu0 (!%p192_p3), %v2573_v1  ;;  %2381 = vmatprep.subr.bf16.mxu1 (!%p192_p3), %v2573_v1  ;;  %v2446_v12 = vld [vmem:[%s2881_s1 + $0x48] sm:$0xff] (!%p192_p3)   ;;  %v2447_v13 = vld [vmem:[%s2881_s1 + $0x50] sm:$0xff] (!%p192_p3)   ;;  %v2448_v14 = vld [vmem:[%s2881_s1 + $0x58] sm:$0xff] (!%p192_p3)  }
   0xa   : > { %v2449_v15 = vld [vmem:[%s2881_s1 + $0x60] sm:$0xff] (!%p192_p3)   ;;  %v2450_v16 = vld [vmem:[%s2881_s1 + $0x68] sm:$0xff] (!%p192_p3)   ;;  %v2451_v17 = vld [vmem:[%s2881_s1 + $0x70] sm:$0xff] (!%p192_p3)  }
   0xb   : > { %v2452_v18 = vld [vmem:[%s2881_s1 + $0x78] sm:$0xff] (!%p192_p3)  }
   0xc   : > { %915 = vmatpush1.bf16.msra.mxu0 (!%p192_p3), %v2438_v2  ;;  %2397 = vmatpush1.bf16.msra.mxu1 (!%p192_p3), %v2438_v2 }
   0xd   : > { %916 = vmatprep.subr.bf16.mxu0 (!%p192_p3), %v2573_v1  ;;  %2382 = vmatprep.subr.bf16.mxu1 (!%p192_p3), %v2573_v1 }
   0xe   : > { %s2889_s18 = smov (!%p236_p4, %s1972_s18), 255 }
   0xf   : > { %s2124_s25 = sshll.u32 %s2889_s18, 3  ;;  %s1976_s6 = sshll.u32 %s2889_s18, 2 }
  0x10   : > { %917 = vmatpush1.bf16.msra.mxu0 %v2439_v3  ;;  %2398 = vmatpush1.bf16.msra.mxu1 %v2439_v3  ;;  %s2641_s30 = scalar_lea.vmem %s2880_s0, %s2124_s25  ;;  %s2777_s8 = scalar_lea.vmem %s2883_s3, %s1976_s6 }
  0x11   : > { %918 = vmatprep.subr.bf16.mxu0 %v2573_v1  ;;  %2383 = vmatprep.subr.bf16.mxu1 %v2573_v1  ;;  %v2455_v6 = vld [vmem:[%s2641_s30 + $0x4] ss:$8 sps:$4 sm:$0xff]   ;;  %v2453_v19 = vld [vmem:[%s2641_s30] ss:$8 sps:$4 sm:$0xff]   ;;  %v2459_v21 = vld [vmem:[%s2641_s30 + $0x14] ss:$8 sps:$4 sm:$0xff]  }
  0x12   : > { %v2458_v8 = vld [vmem:[%s2641_s30 + $0x104] ss:$8 sps:$4 sm:$0xff]   ;;  %944 = vmatprep.mubr.bf16.mxu0 %v2455_v6  ;;  %v2456_v20 = vld [vmem:[%s2641_s30 + $0x100] ss:$8 sps:$4 sm:$0xff]   ;;  %v2461_v22 = vld [vmem:[%s2641_s30 + $0x114] ss:$8 sps:$4 sm:$0xff]  }
  0x13   : > { %1072 = vmatprep.mubr.bf16.mxu1 %v2458_v8  ;;  %v2463_v23 = vld [vmem:[%s2641_s30 + $0x10] ss:$8 sps:$4 sm:$0xff]   ;;  %v2465_v25 = vld [vmem:[%s2641_s30 + $0x24] ss:$8 sps:$4 sm:$0xff]   ;;  %v2469_v27 = vld [vmem:[%s2641_s30 + $0x20] ss:$8 sps:$4 sm:$0xff]  }
  0x14   : > { %919 = vmatpush1.bf16.msra.mxu0 %v2440_v4  ;;  %2399 = vmatpush1.bf16.msra.mxu1 %v2440_v4  ;;  %v2464_v24 = vld [vmem:[%s2641_s30 + $0x110] ss:$8 sps:$4 sm:$0xff]   ;;  %v2467_v26 = vld [vmem:[%s2641_s30 + $0x124] ss:$8 sps:$4 sm:$0xff]   ;;  %v2470_v28 = vld [vmem:[%s2641_s30 + $0x120] ss:$8 sps:$4 sm:$0xff]  }
  0x15   : > { %920 = vmatprep.subr.bf16.mxu0 %v2573_v1  ;;  %2384 = vmatprep.subr.bf16.mxu1 %v2573_v1  ;;  %v2471_v29 = vld [vmem:[%s2641_s30 + $0x34] ss:$8 sps:$4 sm:$0xff]   ;;  %v2475_v31 = vld [vmem:[%s2641_s30 + $0x30] ss:$8 sps:$4 sm:$0xff]   ;;  %v2477_v33 = vld [vmem:[%s2641_s30 + $0x44] ss:$8 sps:$4 sm:$0xff]  }
  0x16   : > { %v2473_v30 = vld [vmem:[%s2641_s30 + $0x134] ss:$8 sps:$4 sm:$0xff]   ;;  %v2476_v32 = vld [vmem:[%s2641_s30 + $0x130] ss:$8 sps:$4 sm:$0xff]   ;;  %v2479_v34 = vld [vmem:[%s2641_s30 + $0x144] ss:$8 sps:$4 sm:$0xff]  }
  0x17   : > { %v2481_v35 = vld [vmem:[%s2641_s30 + $0x40] ss:$8 sps:$4 sm:$0xff]   ;;  %v2483_v37 = vld [vmem:[%s2641_s30 + $0x54] ss:$8 sps:$4 sm:$0xff]   ;;  %v2487_v39 = vld [vmem:[%s2641_s30 + $0x50] ss:$8 sps:$4 sm:$0xff]  }
  0x18   : > { %921 = vmatpush1.bf16.msra.mxu0 %v2441_v5  ;;  %2400 = vmatpush1.bf16.msra.mxu1 %v2441_v5  ;;  %v2482_v36 = vld [vmem:[%s2641_s30 + $0x140] ss:$8 sps:$4 sm:$0xff]   ;;  %v2485_v38 = vld [vmem:[%s2641_s30 + $0x154] ss:$8 sps:$4 sm:$0xff]   ;;  %v2488_v40 = vld [vmem:[%s2641_s30 + $0x150] ss:$8 sps:$4 sm:$0xff]  }
  0x19   : > { %922 = vmatprep.subr.bf16.mxu0 %v2573_v1  ;;  %2385 = vmatprep.subr.bf16.mxu1 %v2573_v1  ;;  %v2489_v41 = vld [vmem:[%s2641_s30 + $0x64] ss:$8 sps:$4 sm:$0xff]   ;;  %v2493_v43 = vld [vmem:[%s2641_s30 + $0x60] ss:$8 sps:$4 sm:$0xff]   ;;  %v2495_v45 = vld [vmem:[%s2641_s30 + $0x74] ss:$8 sps:$4 sm:$0xff]  }
  0x1a   : > { %v2491_v42 = vld [vmem:[%s2641_s30 + $0x164] ss:$8 sps:$4 sm:$0xff]   ;;  %v2494_v44 = vld [vmem:[%s2641_s30 + $0x160] ss:$8 sps:$4 sm:$0xff]   ;;  %v2497_v46 = vld [vmem:[%s2641_s30 + $0x174] ss:$8 sps:$4 sm:$0xff]  }
  0x1b   : > { %v2499_v47 = vld [vmem:[%s2641_s30 + $0x70] ss:$8 sps:$4 sm:$0xff]   ;;  %v2501_v49 = vld [vmem:[%s2641_s30 + $0x84] ss:$8 sps:$4 sm:$0xff]   ;;  %v2505_v51 = vld [vmem:[%s2641_s30 + $0x80] ss:$8 sps:$4 sm:$0xff]  }
  0x1c   : > { %923 = vmatpush1.bf16.msra.mxu0 %v2442_v7  ;;  %2401 = vmatpush1.bf16.msra.mxu1 %v2442_v7  ;;  %v2500_v48 = vld [vmem:[%s2641_s30 + $0x170] ss:$8 sps:$4 sm:$0xff]   ;;  %v2503_v50 = vld [vmem:[%s2641_s30 + $0x184] ss:$8 sps:$4 sm:$0xff]   ;;  %v2506_v52 = vld [vmem:[%s2641_s30 + $0x180] ss:$8 sps:$4 sm:$0xff]  }
  0x1d   : > { %924 = vmatprep.subr.bf16.mxu0 %v2573_v1  ;;  %2386 = vmatprep.subr.bf16.mxu1 %v2573_v1  ;;  %v2507_v53 = vld [vmem:[%s2641_s30 + $0x94] ss:$8 sps:$4 sm:$0xff]   ;;  %v2511_v55 = vld [vmem:[%s2641_s30 + $0x90] ss:$8 sps:$4 sm:$0xff]   ;;  %v2513_v57 = vld [vmem:[%s2641_s30 + $0xa4] ss:$8 sps:$4 sm:$0xff]  }
  0x1e   : > { %v2509_v54 = vld [vmem:[%s2641_s30 + $0x194] ss:$8 sps:$4 sm:$0xff]   ;;  %v2512_v56 = vld [vmem:[%s2641_s30 + $0x190] ss:$8 sps:$4 sm:$0xff]   ;;  %v2515_v58 = vld [vmem:[%s2641_s30 + $0x1a4] ss:$8 sps:$4 sm:$0xff]  }
  0x1f   : > { %v2517_v59 = vld [vmem:[%s2641_s30 + $0xa0] ss:$8 sps:$4 sm:$0xff]   ;;  %v2519_v61 = vld [vmem:[%s2641_s30 + $0xb4] ss:$8 sps:$4 sm:$0xff]   ;;  %v2523_v63 = vld [vmem:[%s2641_s30 + $0xb0] ss:$8 sps:$4 sm:$0xff]  }
  0x20   : > { %925 = vmatpush1.bf16.msra.mxu0 %v2443_v9  ;;  %2402 = vmatpush1.bf16.msra.mxu1 %v2443_v9  ;;  %v2518_v60 = vld [vmem:[%s2641_s30 + $0x1a0] ss:$8 sps:$4 sm:$0xff]   ;;  %v2521_v62 = vld [vmem:[%s2641_s30 + $0x1b4] ss:$8 sps:$4 sm:$0xff]   ;;  %v2524_v0 = vld [vmem:[%s2641_s30 + $0x1b0] ss:$8 sps:$4 sm:$0xff]  }
  0x21   : > { %926 = vmatprep.subr.bf16.mxu0 %v2573_v1  ;;  %2387 = vmatprep.subr.bf16.mxu1 %v2573_v1  ;;  %v2527_v2 = vld [vmem:[%s2641_s30 + $0x1c4] ss:$8 sps:$4 sm:$0xff]   ;;  %v2529_v3 = vld [vmem:[%s2641_s30 + $0xc0] ss:$8 sps:$4 sm:$0xff]   ;;  %v2531_v5 = vld [vmem:[%s2641_s30 + $0xd4] ss:$8 sps:$4 sm:$0xff]  }
  0x22   : > { %v2530_v4 = vld [vmem:[%s2641_s30 + $0x1c0] ss:$8 sps:$4 sm:$0xff]   ;;  %v2533_v6 = vld [vmem:[%s2641_s30 + $0x1d4] ss:$8 sps:$4 sm:$0xff]   ;;  %v2535_v7 = vld [vmem:[%s2641_s30 + $0xd0] ss:$8 sps:$4 sm:$0xff]  }
  0x23   : > { %v2536_v8 = vld [vmem:[%s2641_s30 + $0x1d0] ss:$8 sps:$4 sm:$0xff]   ;;  %v2537_v9 = vld [vmem:[%s2641_s30 + $0xe4] ss:$8 sps:$4 sm:$0xff]  }
  0x24   : > { %927 = vmatpush1.bf16.msra.mxu0 %v2444_v10  ;;  %2403 = vmatpush1.bf16.msra.mxu1 %v2444_v10  ;;  %v2539_v10 = vld [vmem:[%s2641_s30 + $0x1e4] ss:$8 sps:$4 sm:$0xff]  }
  0x25   : > { %928 = vmatprep.subr.bf16.mxu0 %v2573_v1  ;;  %2388 = vmatprep.subr.bf16.mxu1 %v2573_v1 }
  0x28   : > { %929 = vmatpush1.bf16.msra.mxu0 %v2445_v11  ;;  %2404 = vmatpush1.bf16.msra.mxu1 %v2445_v11  ;;  %v2541_v11 = vld [vmem:[%s2641_s30 + $0xe0] ss:$8 sps:$4 sm:$0xff]  }
  0x29   : > { %930 = vmatprep.subr.bf16.mxu0 %v2573_v1  ;;  %2389 = vmatprep.subr.bf16.mxu1 %v2573_v1 }
  0x2c   : > { %931 = vmatpush1.bf16.msra.mxu0 %v2446_v12  ;;  %2405 = vmatpush1.bf16.msra.mxu1 %v2446_v12  ;;  %v2542_v12 = vld [vmem:[%s2641_s30 + $0x1e0] ss:$8 sps:$4 sm:$0xff]  }
  0x2d   : > { %932 = vmatprep.subr.bf16.mxu0 %v2573_v1  ;;  %2390 = vmatprep.subr.bf16.mxu1 %v2573_v1 }
  0x30   : > { %933 = vmatpush1.bf16.msra.mxu0 %v2447_v13  ;;  %2406 = vmatpush1.bf16.msra.mxu1 %v2447_v13  ;;  %v2543_v13 = vld [vmem:[%s2641_s30 + $0xf4] ss:$8 sps:$4 sm:$0xff]  }
  0x31   : > { %934 = vmatprep.subr.bf16.mxu0 %v2573_v1  ;;  %2391 = vmatprep.subr.bf16.mxu1 %v2573_v1 }
  0x34   : > { %935 = vmatpush1.bf16.msra.mxu0 %v2448_v14  ;;  %2407 = vmatpush1.bf16.msra.mxu1 %v2448_v14  ;;  %v2545_v14 = vld [vmem:[%s2641_s30 + $0x1f4] ss:$8 sps:$4 sm:$0xff]  }
  0x35   : > { %936 = vmatprep.subr.bf16.mxu0 %v2573_v1  ;;  %2392 = vmatprep.subr.bf16.mxu1 %v2573_v1 }
  0x38   : > { %937 = vmatpush1.bf16.msra.mxu0 %v2449_v15  ;;  %2408 = vmatpush1.bf16.msra.mxu1 %v2449_v15  ;;  %v2547_v15 = vld [vmem:[%s2641_s30 + $0xf0] ss:$8 sps:$4 sm:$0xff]  }
  0x39   : > { %938 = vmatprep.subr.bf16.mxu0 %v2573_v1  ;;  %2393 = vmatprep.subr.bf16.mxu1 %v2573_v1 }
  0x3c   : > { %939 = vmatpush1.bf16.msra.mxu0 %v2450_v16  ;;  %2409 = vmatpush1.bf16.msra.mxu1 %v2450_v16  ;;  %v2548_v16 = vld [vmem:[%s2641_s30 + $0x1f0] ss:$8 sps:$4 sm:$0xff]  }
  0x3d   : > { %940 = vmatprep.subr.bf16.mxu0 %v2573_v1  ;;  %2394 = vmatprep.subr.bf16.mxu1 %v2573_v1 }
  0x40   : > { %941 = vmatpush1.bf16.msra.mxu0 %v2451_v17  ;;  %2410 = vmatpush1.bf16.msra.mxu1 %v2451_v17  ;;  %v2767_v17 = vld [vmem:[%s2882_s2] ss:$0 sm:$0xff] }
  0x41   : > { %942 = vmatprep.subr.bf16.mxu0 %v2573_v1  ;;  %2395 = vmatprep.subr.bf16.mxu1 %v2573_v1  ;;  %v2525_v1 = vld [vmem:[%s2641_s30 + $0xc4] ss:$8 sps:$4 sm:$0xff]  }
  0x44   : > { %943 = vmatpush1.bf16.msra.mxu0 %v2452_v18  ;;  %2411 = vmatpush1.bf16.msra.mxu1 %v2452_v18 }
  0x47   : > { %945 = vmatmul.mubr.bf16.vlgmr.msra.gmra.mrb[0].mxu0 %v2453_v19  ;;  %1073 = vmatmul.mubr.bf16.vlgmr.msra.gmra.mrb[0].mxu1 %v2456_v20 }
  0x48   : > { %952 = vmatprep.mubr.bf16.mxu0 %v2459_v21  ;;  %1080 = vmatprep.mubr.bf16.mxu1 %v2461_v22 }
  0x4f   : > { %953 = vmatmul.mubr.bf16.gmra.mrb[4].mxu0 %v2463_v23  ;;  %1081 = vmatmul.mubr.bf16.gmra.mrb[4].mxu1 %v2464_v24 }
  0x50   : > { %960 = vmatprep.mubr.bf16.mxu0 %v2465_v25  ;;  %1088 = vmatprep.mubr.bf16.mxu1 %v2467_v26 }
  0x57   : > { %961 = vmatmul.mubr.bf16.gmra.mrb[8].mxu0 %v2469_v27  ;;  %1089 = vmatmul.mubr.bf16.gmra.mrb[8].mxu1 %v2470_v28 }
  0x58   : > { %968 = vmatprep.mubr.bf16.mxu0 %v2471_v29  ;;  %1096 = vmatprep.mubr.bf16.mxu1 %v2473_v30 }
  0x5f   : > { %969 = vmatmul.mubr.bf16.gmra.mrb[12].mxu0 %v2475_v31  ;;  %1097 = vmatmul.mubr.bf16.gmra.mrb[12].mxu1 %v2476_v32 }
  0x60   : > { %976 = vmatprep.mubr.bf16.mxu0 %v2477_v33  ;;  %1104 = vmatprep.mubr.bf16.mxu1 %v2479_v34 }
  0x67   : > { %977 = vmatmul.mubr.bf16.gmra.mrb[16].mxu0 %v2481_v35  ;;  %1105 = vmatmul.mubr.bf16.gmra.mrb[16].mxu1 %v2482_v36 }
  0x68   : > { %984 = vmatprep.mubr.bf16.mxu0 %v2483_v37  ;;  %1112 = vmatprep.mubr.bf16.mxu1 %v2485_v38 }
  0x6f   : > { %985 = vmatmul.mubr.bf16.gmra.mrb[20].mxu0 %v2487_v39  ;;  %1113 = vmatmul.mubr.bf16.gmra.mrb[20].mxu1 %v2488_v40 }
  0x70   : > { %992 = vmatprep.mubr.bf16.mxu0 %v2489_v41  ;;  %1120 = vmatprep.mubr.bf16.mxu1 %v2491_v42 }
  0x77   : > { %993 = vmatmul.mubr.bf16.gmra.mrb[24].mxu0 %v2493_v43  ;;  %1121 = vmatmul.mubr.bf16.gmra.mrb[24].mxu1 %v2494_v44 }
  0x78   : > { %1000 = vmatprep.mubr.bf16.mxu0 %v2495_v45  ;;  %1128 = vmatprep.mubr.bf16.mxu1 %v2497_v46 }
  0x7f   : > { %1001 = vmatmul.mubr.bf16.gmra.mrb[28].mxu0 %v2499_v47  ;;  %1129 = vmatmul.mubr.bf16.gmra.mrb[28].mxu1 %v2500_v48 }
  0x80   : > { %1008 = vmatprep.mubr.bf16.mxu0 %v2501_v49  ;;  %1136 = vmatprep.mubr.bf16.mxu1 %v2503_v50 }
  0x87   : > { %1009 = vmatmul.mubr.bf16.gmra.mrb[32].mxu0 %v2505_v51  ;;  %1137 = vmatmul.mubr.bf16.gmra.mrb[32].mxu1 %v2506_v52 }
  0x88   : > { %1016 = vmatprep.mubr.bf16.mxu0 %v2507_v53  ;;  %1144 = vmatprep.mubr.bf16.mxu1 %v2509_v54 }
  0x8f   : > { %1017 = vmatmul.mubr.bf16.gmra.mrb[36].mxu0 %v2511_v55  ;;  %1145 = vmatmul.mubr.bf16.gmra.mrb[36].mxu1 %v2512_v56 }
  0x90   : > { %1024 = vmatprep.mubr.bf16.mxu0 %v2513_v57  ;;  %1152 = vmatprep.mubr.bf16.mxu1 %v2515_v58 }
  0x97   : > { %1025 = vmatmul.mubr.bf16.gmra.mrb[40].mxu0 %v2517_v59  ;;  %1153 = vmatmul.mubr.bf16.gmra.mrb[40].mxu1 %v2518_v60 }
  0x98   : > { %1032 = vmatprep.mubr.bf16.mxu0 %v2519_v61  ;;  %1160 = vmatprep.mubr.bf16.mxu1 %v2521_v62 }
  0x9f   : > { %1033 = vmatmul.mubr.bf16.gmra.mrb[44].mxu0 %v2523_v63  ;;  %1161 = vmatmul.mubr.bf16.gmra.mrb[44].mxu1 %v2524_v0 }
  0xa0   : > { %1040 = vmatprep.mubr.bf16.mxu0 %v2525_v1  ;;  %1168 = vmatprep.mubr.bf16.mxu1 %v2527_v2 }
  0xa7   : > { %1041 = vmatmul.mubr.bf16.gmra.mrb[48].mxu0 %v2529_v3  ;;  %1169 = vmatmul.mubr.bf16.gmra.mrb[48].mxu1 %v2530_v4 }
  0xa8   : > { %1048 = vmatprep.mubr.bf16.mxu0 %v2531_v5  ;;  %1176 = vmatprep.mubr.bf16.mxu1 %v2533_v6 }
  0xaf   : > { %1049 = vmatmul.mubr.bf16.gmra.mrb[52].mxu0 %v2535_v7  ;;  %1177 = vmatmul.mubr.bf16.gmra.mrb[52].mxu1 %v2536_v8 }
  0xb0   : > { %1056 = vmatprep.mubr.bf16.mxu0 %v2537_v9  ;;  %1184 = vmatprep.mubr.bf16.mxu1 %v2539_v10 }
  0xb7   : > { %1057 = vmatmul.mubr.bf16.gmra.mrb[56].mxu0 %v2541_v11  ;;  %1185 = vmatmul.mubr.bf16.gmra.mrb[56].mxu1 %v2542_v12 }
  0xb8   : > { %1064 = vmatprep.mubr.bf16.mxu0 %v2543_v13  ;;  %1192 = vmatprep.mubr.bf16.mxu1 %v2545_v14 }
  0xbf   : > { %1065 = vmatmul.mubr.bf16.gmra.mrb[60].mxu0 %v2547_v15  ;;  %1193 = vmatmul.mubr.bf16.gmra.mrb[60].mxu1 %v2548_v16 }
 0x11a   : > { %v946_v18 = vpop.f32.mrb[0].mxu0  ;;  %v1074_v19 = vpop.f32.mrb[0].mxu1 }
 0x11b   : > { %v1403_v20 = vadd.f32 %v2767_v17, %v946_v18  ;;  %v1435_v21 = vadd.f32 %v2767_v17, %v1074_v19  ;;  %v948_v22 = vpop.f32.mrb[1].mxu0  ;;  %v1076_v23 = vpop.f32.mrb[1].mxu1 }
 0x11c   : > { %v949_v24 = vpop.f32.mrb[2].mxu0  ;;  %v1077_v25 = vpop.f32.mrb[2].mxu1 }
 0x11d   : > { %v1404_v26 = vadd.f32 %v2767_v17, %v949_v24  ;;  %v1436_v27 = vadd.f32 %v2767_v17, %v1077_v25  ;;  %v951_v28 = vpop.f32.mrb[3].mxu0  ;;  %v1079_v29 = vpop.f32.mrb[3].mxu1  ;;  %v1467_v30 = vmax.f32 %v1403_v20, 0.0  ;;  %v1499_v31 = vmax.f32 %v1435_v21, 0.0 }
 0x11f   : > { %v1468_v32 = vmax.f32 %v1404_v26, 0.0  ;;  %v1500_v33 = vmax.f32 %v1436_v27, 0.0 }
 0x121   : > { %v2192_v34 = vpack.c.bf16 %v1468_v32, %v1467_v30  ;;  %v2272_v35 = vpack.c.bf16 %v1500_v33, %v1499_v31 }
 0x122   : > { %v954_v36 = vpop.f32.mrb[4].mxu0  ;;  %v1082_v37 = vpop.f32.mrb[4].mxu1 }
 0x123   : > { %2193 = vst [vmem:[%s2777_s8] sm:$0xff] %v2192_v34   ;;  %2364 = vst [vmem:[%s2777_s8 + $0x80] sm:$0xff] %v2272_v35   ;;  %v1405_v38 = vadd.f32 %v2767_v17, %v954_v36  ;;  %v1437_v39 = vadd.f32 %v2767_v17, %v1082_v37  ;;  %v956_v40 = vpop.f32.mrb[5].mxu0  ;;  %v1084_v41 = vpop.f32.mrb[5].mxu1 }
 0x124   : > { %v957_v42 = vpop.f32.mrb[6].mxu0  ;;  %v1085_v43 = vpop.f32.mrb[6].mxu1 }
 0x125   : > { %v1406_v44 = vadd.f32 %v2767_v17, %v957_v42  ;;  %v1438_v45 = vadd.f32 %v2767_v17, %v1085_v43  ;;  %v959_v46 = vpop.f32.mrb[7].mxu0  ;;  %v1087_v47 = vpop.f32.mrb[7].mxu1  ;;  %v1469_v48 = vmax.f32 %v1405_v38, 0.0  ;;  %v1501_v49 = vmax.f32 %v1437_v39, 0.0 }
 0x127   : > { %v1470_v50 = vmax.f32 %v1406_v44, 0.0  ;;  %v1502_v51 = vmax.f32 %v1438_v45, 0.0 }
 0x129   : > { %v2197_v52 = vpack.c.bf16 %v1470_v50, %v1469_v48  ;;  %v2277_v53 = vpack.c.bf16 %v1502_v51, %v1501_v49 }
 0x12a   : > { %v962_v54 = vpop.f32.mrb[8].mxu0  ;;  %v1090_v55 = vpop.f32.mrb[8].mxu1 }
 0x12b   : > { %2349 = vst [vmem:[%s2777_s8 + $0x8] sm:$0xff] %v2197_v52   ;;  %2365 = vst [vmem:[%s2777_s8 + $0x88] sm:$0xff] %v2277_v53   ;;  %v1407_v56 = vadd.f32 %v2767_v17, %v962_v54  ;;  %v1439_v57 = vadd.f32 %v2767_v17, %v1090_v55  ;;  %v964_v58 = vpop.f32.mrb[9].mxu0  ;;  %v1092_v59 = vpop.f32.mrb[9].mxu1 }
 0x12c   : > { %v965_v60 = vpop.f32.mrb[10].mxu0  ;;  %v1093_v61 = vpop.f32.mrb[10].mxu1 }
 0x12d   : > { %v1408_v62 = vadd.f32 %v2767_v17, %v965_v60  ;;  %v1440_v63 = vadd.f32 %v2767_v17, %v1093_v61  ;;  %v967_v0 = vpop.f32.mrb[11].mxu0  ;;  %v1095_v1 = vpop.f32.mrb[11].mxu1  ;;  %v1471_v2 = vmax.f32 %v1407_v56, 0.0  ;;  %v1503_v3 = vmax.f32 %v1439_v57, 0.0 }
 0x12f   : > { %v1472_v4 = vmax.f32 %v1408_v62, 0.0  ;;  %v1504_v5 = vmax.f32 %v1440_v63, 0.0 }
 0x131   : > { %v2202_v6 = vpack.c.bf16 %v1472_v4, %v1471_v2  ;;  %v2282_v7 = vpack.c.bf16 %v1504_v5, %v1503_v3 }
 0x132   : > { %v970_v8 = vpop.f32.mrb[12].mxu0  ;;  %v1098_v9 = vpop.f32.mrb[12].mxu1 }
 0x133   : > { %2350 = vst [vmem:[%s2777_s8 + $0x10] sm:$0xff] %v2202_v6   ;;  %2366 = vst [vmem:[%s2777_s8 + $0x90] sm:$0xff] %v2282_v7   ;;  %v1409_v10 = vadd.f32 %v2767_v17, %v970_v8  ;;  %v1441_v11 = vadd.f32 %v2767_v17, %v1098_v9  ;;  %v972_v12 = vpop.f32.mrb[13].mxu0  ;;  %v1100_v13 = vpop.f32.mrb[13].mxu1 }
 0x134   : > { %v973_v14 = vpop.f32.mrb[14].mxu0  ;;  %v1101_v15 = vpop.f32.mrb[14].mxu1 }
 0x135   : > { %v1410_v16 = vadd.f32 %v2767_v17, %v973_v14  ;;  %v1442_v18 = vadd.f32 %v2767_v17, %v1101_v15  ;;  %v975_v19 = vpop.f32.mrb[15].mxu0  ;;  %v1103_v20 = vpop.f32.mrb[15].mxu1  ;;  %v1473_v21 = vmax.f32 %v1409_v10, 0.0  ;;  %v1505_v22 = vmax.f32 %v1441_v11, 0.0 }
 0x137   : > { %v1474_v23 = vmax.f32 %v1410_v16, 0.0  ;;  %v1506_v24 = vmax.f32 %v1442_v18, 0.0 }
 0x139   : > { %v2207_v25 = vpack.c.bf16 %v1474_v23, %v1473_v21  ;;  %v2287_v26 = vpack.c.bf16 %v1506_v24, %v1505_v22 }
 0x13a   : > { %v978_v27 = vpop.f32.mrb[16].mxu0  ;;  %v1106_v28 = vpop.f32.mrb[16].mxu1 }
 0x13b   : > { %2351 = vst [vmem:[%s2777_s8 + $0x18] sm:$0xff] %v2207_v25   ;;  %2367 = vst [vmem:[%s2777_s8 + $0x98] sm:$0xff] %v2287_v26   ;;  %v1411_v29 = vadd.f32 %v2767_v17, %v978_v27  ;;  %v1443_v30 = vadd.f32 %v2767_v17, %v1106_v28  ;;  %v980_v31 = vpop.f32.mrb[17].mxu0  ;;  %v1108_v32 = vpop.f32.mrb[17].mxu1 }
 0x13c   : > { %v981_v33 = vpop.f32.mrb[18].mxu0  ;;  %v1109_v34 = vpop.f32.mrb[18].mxu1 }
 0x13d   : > { %v1412_v35 = vadd.f32 %v2767_v17, %v981_v33  ;;  %v1444_v36 = vadd.f32 %v2767_v17, %v1109_v34  ;;  %v983_v37 = vpop.f32.mrb[19].mxu0  ;;  %v1111_v38 = vpop.f32.mrb[19].mxu1  ;;  %v1475_v39 = vmax.f32 %v1411_v29, 0.0  ;;  %v1507_v40 = vmax.f32 %v1443_v30, 0.0 }
 0x13f   : > { %v1476_v41 = vmax.f32 %v1412_v35, 0.0  ;;  %v1508_v42 = vmax.f32 %v1444_v36, 0.0 }
 0x141   : > { %v2212_v43 = vpack.c.bf16 %v1476_v41, %v1475_v39  ;;  %v2292_v44 = vpack.c.bf16 %v1508_v42, %v1507_v40 }
 0x142   : > { %v986_v45 = vpop.f32.mrb[20].mxu0  ;;  %v1114_v46 = vpop.f32.mrb[20].mxu1 }
 0x143   : > { %2352 = vst [vmem:[%s2777_s8 + $0x20] sm:$0xff] %v2212_v43   ;;  %2368 = vst [vmem:[%s2777_s8 + $0xa0] sm:$0xff] %v2292_v44   ;;  %v1413_v47 = vadd.f32 %v2767_v17, %v986_v45  ;;  %v1445_v48 = vadd.f32 %v2767_v17, %v1114_v46  ;;  %v988_v49 = vpop.f32.mrb[21].mxu0  ;;  %v1116_v50 = vpop.f32.mrb[21].mxu1 }
 0x144   : > { %v989_v51 = vpop.f32.mrb[22].mxu0  ;;  %v1117_v52 = vpop.f32.mrb[22].mxu1 }
 0x145   : > { %v1414_v53 = vadd.f32 %v2767_v17, %v989_v51  ;;  %v1446_v54 = vadd.f32 %v2767_v17, %v1117_v52  ;;  %v991_v55 = vpop.f32.mrb[23].mxu0  ;;  %v1119_v56 = vpop.f32.mrb[23].mxu1  ;;  %v1477_v57 = vmax.f32 %v1413_v47, 0.0  ;;  %v1509_v58 = vmax.f32 %v1445_v48, 0.0 }
 0x147   : > { %v1478_v59 = vmax.f32 %v1414_v53, 0.0  ;;  %v1510_v60 = vmax.f32 %v1446_v54, 0.0 }
 0x149   : > { %v2217_v61 = vpack.c.bf16 %v1478_v59, %v1477_v57  ;;  %v2297_v62 = vpack.c.bf16 %v1510_v60, %v1509_v58 }
 0x14a   : > { %v994_v63 = vpop.f32.mrb[24].mxu0  ;;  %v1122_v0 = vpop.f32.mrb[24].mxu1 }
 0x14b   : > { %2353 = vst [vmem:[%s2777_s8 + $0x28] sm:$0xff] %v2217_v61   ;;  %2369 = vst [vmem:[%s2777_s8 + $0xa8] sm:$0xff] %v2297_v62   ;;  %v1415_v1 = vadd.f32 %v2767_v17, %v994_v63  ;;  %v1447_v2 = vadd.f32 %v2767_v17, %v1122_v0  ;;  %v996_v3 = vpop.f32.mrb[25].mxu0  ;;  %v1124_v4 = vpop.f32.mrb[25].mxu1 }
 0x14c   : > { %v997_v5 = vpop.f32.mrb[26].mxu0  ;;  %v1125_v6 = vpop.f32.mrb[26].mxu1 }
 0x14d   : > { %v1416_v7 = vadd.f32 %v2767_v17, %v997_v5  ;;  %v1448_v8 = vadd.f32 %v2767_v17, %v1125_v6  ;;  %v999_v9 = vpop.f32.mrb[27].mxu0  ;;  %v1127_v10 = vpop.f32.mrb[27].mxu1  ;;  %v1479_v11 = vmax.f32 %v1415_v1, 0.0  ;;  %v1511_v12 = vmax.f32 %v1447_v2, 0.0 }
 0x14f   : > { %v1480_v13 = vmax.f32 %v1416_v7, 0.0  ;;  %v1512_v14 = vmax.f32 %v1448_v8, 0.0 }
 0x151   : > { %v2222_v15 = vpack.c.bf16 %v1480_v13, %v1479_v11  ;;  %v2302_v16 = vpack.c.bf16 %v1512_v14, %v1511_v12 }
 0x152   : > { %v1002_v18 = vpop.f32.mrb[28].mxu0  ;;  %v1130_v19 = vpop.f32.mrb[28].mxu1 }
 0x153   : > { %2354 = vst [vmem:[%s2777_s8 + $0x30] sm:$0xff] %v2222_v15   ;;  %2370 = vst [vmem:[%s2777_s8 + $0xb0] sm:$0xff] %v2302_v16   ;;  %v1417_v20 = vadd.f32 %v2767_v17, %v1002_v18  ;;  %v1449_v21 = vadd.f32 %v2767_v17, %v1130_v19  ;;  %v1004_v22 = vpop.f32.mrb[29].mxu0  ;;  %v1132_v23 = vpop.f32.mrb[29].mxu1 }
 0x154   : > { %v1005_v24 = vpop.f32.mrb[30].mxu0  ;;  %v1133_v25 = vpop.f32.mrb[30].mxu1 }
 0x155   : > { %v1418_v26 = vadd.f32 %v2767_v17, %v1005_v24  ;;  %v1450_v27 = vadd.f32 %v2767_v17, %v1133_v25  ;;  %v1007_v28 = vpop.f32.mrb[31].mxu0  ;;  %v1135_v29 = vpop.f32.mrb[31].mxu1  ;;  %v1481_v30 = vmax.f32 %v1417_v20, 0.0  ;;  %v1513_v31 = vmax.f32 %v1449_v21, 0.0 }
 0x157   : > { %v1482_v32 = vmax.f32 %v1418_v26, 0.0  ;;  %v1514_v33 = vmax.f32 %v1450_v27, 0.0 }
 0x159   : > { %v2227_v34 = vpack.c.bf16 %v1482_v32, %v1481_v30  ;;  %v2307_v35 = vpack.c.bf16 %v1514_v33, %v1513_v31 }
 0x15a   : > { %v1010_v36 = vpop.f32.mrb[32].mxu0  ;;  %v1138_v37 = vpop.f32.mrb[32].mxu1 }
 0x15b   : > { %2355 = vst [vmem:[%s2777_s8 + $0x38] sm:$0xff] %v2227_v34   ;;  %2371 = vst [vmem:[%s2777_s8 + $0xb8] sm:$0xff] %v2307_v35   ;;  %v1419_v38 = vadd.f32 %v2767_v17, %v1010_v36  ;;  %v1451_v39 = vadd.f32 %v2767_v17, %v1138_v37  ;;  %v1012_v40 = vpop.f32.mrb[33].mxu0  ;;  %v1140_v41 = vpop.f32.mrb[33].mxu1 }
 0x15c   : > { %v1013_v42 = vpop.f32.mrb[34].mxu0  ;;  %v1141_v43 = vpop.f32.mrb[34].mxu1 }
 0x15d   : > { %v1420_v44 = vadd.f32 %v2767_v17, %v1013_v42  ;;  %v1452_v45 = vadd.f32 %v2767_v17, %v1141_v43  ;;  %v1015_v46 = vpop.f32.mrb[35].mxu0  ;;  %v1143_v47 = vpop.f32.mrb[35].mxu1  ;;  %v1483_v48 = vmax.f32 %v1419_v38, 0.0  ;;  %v1515_v49 = vmax.f32 %v1451_v39, 0.0 }
 0x15f   : > { %v1484_v50 = vmax.f32 %v1420_v44, 0.0  ;;  %v1516_v51 = vmax.f32 %v1452_v45, 0.0 }
 0x161   : > { %v2232_v52 = vpack.c.bf16 %v1484_v50, %v1483_v48  ;;  %v2312_v53 = vpack.c.bf16 %v1516_v51, %v1515_v49 }
 0x162   : > { %v1018_v54 = vpop.f32.mrb[36].mxu0  ;;  %v1146_v55 = vpop.f32.mrb[36].mxu1 }
 0x163   : > { %2356 = vst [vmem:[%s2777_s8 + $0x40] sm:$0xff] %v2232_v52   ;;  %2372 = vst [vmem:[%s2777_s8 + $0xc0] sm:$0xff] %v2312_v53   ;;  %v1421_v56 = vadd.f32 %v2767_v17, %v1018_v54  ;;  %v1453_v57 = vadd.f32 %v2767_v17, %v1146_v55  ;;  %v1020_v58 = vpop.f32.mrb[37].mxu0  ;;  %v1148_v59 = vpop.f32.mrb[37].mxu1 }
 0x164   : > { %v1021_v60 = vpop.f32.mrb[38].mxu0  ;;  %v1149_v61 = vpop.f32.mrb[38].mxu1 }
 0x165   : > { %v1422_v62 = vadd.f32 %v2767_v17, %v1021_v60  ;;  %v1454_v63 = vadd.f32 %v2767_v17, %v1149_v61  ;;  %v1023_v0 = vpop.f32.mrb[39].mxu0  ;;  %v1151_v1 = vpop.f32.mrb[39].mxu1  ;;  %v1485_v2 = vmax.f32 %v1421_v56, 0.0  ;;  %v1517_v3 = vmax.f32 %v1453_v57, 0.0 }
 0x167   : > { %v1486_v4 = vmax.f32 %v1422_v62, 0.0  ;;  %v1518_v5 = vmax.f32 %v1454_v63, 0.0 }
 0x169   : > { %v2237_v6 = vpack.c.bf16 %v1486_v4, %v1485_v2  ;;  %v2317_v7 = vpack.c.bf16 %v1518_v5, %v1517_v3 }
 0x16a   : > { %v1026_v8 = vpop.f32.mrb[40].mxu0  ;;  %v1154_v9 = vpop.f32.mrb[40].mxu1 }
 0x16b   : > { %2357 = vst [vmem:[%s2777_s8 + $0x48] sm:$0xff] %v2237_v6   ;;  %2373 = vst [vmem:[%s2777_s8 + $0xc8] sm:$0xff] %v2317_v7   ;;  %v1423_v10 = vadd.f32 %v2767_v17, %v1026_v8  ;;  %v1455_v11 = vadd.f32 %v2767_v17, %v1154_v9  ;;  %v1028_v12 = vpop.f32.mrb[41].mxu0  ;;  %v1156_v13 = vpop.f32.mrb[41].mxu1 }
 0x16c   : > { %v1029_v14 = vpop.f32.mrb[42].mxu0  ;;  %v1157_v15 = vpop.f32.mrb[42].mxu1 }
 0x16d   : > { %v1424_v16 = vadd.f32 %v2767_v17, %v1029_v14  ;;  %v1456_v18 = vadd.f32 %v2767_v17, %v1157_v15  ;;  %v1031_v19 = vpop.f32.mrb[43].mxu0  ;;  %v1159_v20 = vpop.f32.mrb[43].mxu1  ;;  %v1487_v21 = vmax.f32 %v1423_v10, 0.0  ;;  %v1519_v22 = vmax.f32 %v1455_v11, 0.0 }
 0x16f   : > { %v1488_v23 = vmax.f32 %v1424_v16, 0.0  ;;  %v1520_v24 = vmax.f32 %v1456_v18, 0.0 }
 0x171   : > { %v2242_v25 = vpack.c.bf16 %v1488_v23, %v1487_v21  ;;  %v2322_v26 = vpack.c.bf16 %v1520_v24, %v1519_v22 }
 0x172   : > { %v1034_v27 = vpop.f32.mrb[44].mxu0  ;;  %v1162_v28 = vpop.f32.mrb[44].mxu1 }
 0x173   : > { %2358 = vst [vmem:[%s2777_s8 + $0x50] sm:$0xff] %v2242_v25   ;;  %2374 = vst [vmem:[%s2777_s8 + $0xd0] sm:$0xff] %v2322_v26   ;;  %v1425_v29 = vadd.f32 %v2767_v17, %v1034_v27  ;;  %v1457_v30 = vadd.f32 %v2767_v17, %v1162_v28  ;;  %v1036_v31 = vpop.f32.mrb[45].mxu0  ;;  %v1164_v32 = vpop.f32.mrb[45].mxu1 }
 0x174   : > { %v1037_v33 = vpop.f32.mrb[46].mxu0  ;;  %v1165_v34 = vpop.f32.mrb[46].mxu1 }
 0x175   : > { %v1426_v35 = vadd.f32 %v2767_v17, %v1037_v33  ;;  %v1458_v36 = vadd.f32 %v2767_v17, %v1165_v34  ;;  %v1039_v37 = vpop.f32.mrb[47].mxu0  ;;  %v1167_v38 = vpop.f32.mrb[47].mxu1  ;;  %v1489_v39 = vmax.f32 %v1425_v29, 0.0  ;;  %v1521_v40 = vmax.f32 %v1457_v30, 0.0 }
 0x177   : > { %v1490_v41 = vmax.f32 %v1426_v35, 0.0  ;;  %v1522_v42 = vmax.f32 %v1458_v36, 0.0 }
 0x179   : > { %v2247_v43 = vpack.c.bf16 %v1490_v41, %v1489_v39  ;;  %v2327_v44 = vpack.c.bf16 %v1522_v42, %v1521_v40 }
 0x17a   : > { %v1042_v45 = vpop.f32.mrb[48].mxu0  ;;  %v1170_v46 = vpop.f32.mrb[48].mxu1 }
 0x17b   : > { %2359 = vst [vmem:[%s2777_s8 + $0x58] sm:$0xff] %v2247_v43   ;;  %2375 = vst [vmem:[%s2777_s8 + $0xd8] sm:$0xff] %v2327_v44   ;;  %v1427_v47 = vadd.f32 %v2767_v17, %v1042_v45  ;;  %v1459_v48 = vadd.f32 %v2767_v17, %v1170_v46  ;;  %v1044_v49 = vpop.f32.mrb[49].mxu0  ;;  %v1172_v50 = vpop.f32.mrb[49].mxu1 }
 0x17c   : > { %v1045_v51 = vpop.f32.mrb[50].mxu0  ;;  %v1173_v52 = vpop.f32.mrb[50].mxu1 }
 0x17d   : > { %v1428_v53 = vadd.f32 %v2767_v17, %v1045_v51  ;;  %v1460_v54 = vadd.f32 %v2767_v17, %v1173_v52  ;;  %v1047_v55 = vpop.f32.mrb[51].mxu0  ;;  %v1175_v56 = vpop.f32.mrb[51].mxu1  ;;  %v1491_v57 = vmax.f32 %v1427_v47, 0.0  ;;  %v1523_v58 = vmax.f32 %v1459_v48, 0.0 }
 0x17f   : > { %v1492_v59 = vmax.f32 %v1428_v53, 0.0  ;;  %v1524_v60 = vmax.f32 %v1460_v54, 0.0 }
 0x181   : > { %v2252_v61 = vpack.c.bf16 %v1492_v59, %v1491_v57  ;;  %v2332_v62 = vpack.c.bf16 %v1524_v60, %v1523_v58 }
 0x182   : > { %v1050_v63 = vpop.f32.mrb[52].mxu0  ;;  %v1178_v0 = vpop.f32.mrb[52].mxu1 }
 0x183   : > { %2360 = vst [vmem:[%s2777_s8 + $0x60] sm:$0xff] %v2252_v61   ;;  %2376 = vst [vmem:[%s2777_s8 + $0xe0] sm:$0xff] %v2332_v62   ;;  %v1429_v1 = vadd.f32 %v2767_v17, %v1050_v63  ;;  %v1461_v2 = vadd.f32 %v2767_v17, %v1178_v0  ;;  %v1052_v3 = vpop.f32.mrb[53].mxu0  ;;  %v1180_v4 = vpop.f32.mrb[53].mxu1 }
 0x184   : > { %v1053_v5 = vpop.f32.mrb[54].mxu0  ;;  %v1181_v6 = vpop.f32.mrb[54].mxu1 }
 0x185   : > { %v1430_v7 = vadd.f32 %v2767_v17, %v1053_v5  ;;  %v1462_v8 = vadd.f32 %v2767_v17, %v1181_v6  ;;  %v1055_v9 = vpop.f32.mrb[55].mxu0  ;;  %v1183_v10 = vpop.f32.mrb[55].mxu1  ;;  %v1493_v11 = vmax.f32 %v1429_v1, 0.0  ;;  %v1525_v12 = vmax.f32 %v1461_v2, 0.0 }
 0x187   : > { %v1494_v13 = vmax.f32 %v1430_v7, 0.0  ;;  %v1526_v14 = vmax.f32 %v1462_v8, 0.0 }
 0x189   : > { %v2257_v15 = vpack.c.bf16 %v1494_v13, %v1493_v11  ;;  %v2337_v16 = vpack.c.bf16 %v1526_v14, %v1525_v12 }
 0x18a   : > { %v1058_v18 = vpop.f32.mrb[56].mxu0  ;;  %v1186_v19 = vpop.f32.mrb[56].mxu1 }
 0x18b   : > { %2361 = vst [vmem:[%s2777_s8 + $0x68] sm:$0xff] %v2257_v15   ;;  %2377 = vst [vmem:[%s2777_s8 + $0xe8] sm:$0xff] %v2337_v16   ;;  %v1431_v20 = vadd.f32 %v2767_v17, %v1058_v18  ;;  %v1463_v21 = vadd.f32 %v2767_v17, %v1186_v19  ;;  %v1060_v22 = vpop.f32.mrb[57].mxu0  ;;  %v1188_v23 = vpop.f32.mrb[57].mxu1 }
 0x18c   : > { %v1061_v24 = vpop.f32.mrb[58].mxu0  ;;  %v1189_v25 = vpop.f32.mrb[58].mxu1 }
 0x18d   : > { %v1432_v26 = vadd.f32 %v2767_v17, %v1061_v24  ;;  %v1464_v27 = vadd.f32 %v2767_v17, %v1189_v25  ;;  %v1063_v28 = vpop.f32.mrb[59].mxu0  ;;  %v1191_v29 = vpop.f32.mrb[59].mxu1  ;;  %v1495_v30 = vmax.f32 %v1431_v20, 0.0  ;;  %v1527_v31 = vmax.f32 %v1463_v21, 0.0 }
 0x18f   : > { %v1496_v32 = vmax.f32 %v1432_v26, 0.0  ;;  %v1528_v33 = vmax.f32 %v1464_v27, 0.0 }
 0x191   : > { %v2262_v34 = vpack.c.bf16 %v1496_v32, %v1495_v30  ;;  %v2342_v35 = vpack.c.bf16 %v1528_v33, %v1527_v31 }
 0x192   : > { %v1066_v36 = vpop.f32.mrb[60].mxu0  ;;  %v1194_v37 = vpop.f32.mrb[60].mxu1 }
 0x193   : > { %2362 = vst [vmem:[%s2777_s8 + $0x70] sm:$0xff] %v2262_v34   ;;  %2378 = vst [vmem:[%s2777_s8 + $0xf0] sm:$0xff] %v2342_v35   ;;  %v1433_v38 = vadd.f32 %v2767_v17, %v1066_v36  ;;  %v1465_v39 = vadd.f32 %v2767_v17, %v1194_v37  ;;  %v1068_v40 = vpop.f32.mrb[61].mxu0  ;;  %v1196_v41 = vpop.f32.mrb[61].mxu1 }
 0x194   : > { %v1069_v42 = vpop.f32.mrb[62].mxu0  ;;  %v1197_v43 = vpop.f32.mrb[62].mxu1 }
 0x195   : > { %v1434_v44 = vadd.f32 %v2767_v17, %v1069_v42  ;;  %v1466_v45 = vadd.f32 %v2767_v17, %v1197_v43  ;;  %v1071_v46 = vpop.f32.mrb[63].mxu0  ;;  %v1199_v47 = vpop.f32.mrb[63].mxu1  ;;  %v1497_v48 = vmax.f32 %v1433_v38, 0.0  ;;  %v1529_v49 = vmax.f32 %v1465_v39, 0.0 }
 0x197   : > { %v1498_v50 = vmax.f32 %v1434_v44, 0.0  ;;  %v1530_v51 = vmax.f32 %v1466_v45, 0.0 }
 0x199   : > { %v2267_v52 = vpack.c.bf16 %v1498_v50, %v1497_v48  ;;  %v2347_v53 = vpack.c.bf16 %v1530_v51, %v1529_v49 }
 0x19b   : > { %2363 = vst [vmem:[%s2777_s8 + $0x78] sm:$0xff] %v2267_v52   ;;  %2379 = vst [vmem:[%s2777_s8 + $0xf8] sm:$0xff] %v2347_v53  }
 0x19c PF: > { %s13_s14 = sadd.s32 1, %s2571_s14   ;;  %s2884_s12 = smov %s2567_s13 }
 0x19d   : > { %p10_p5 = scmp.ge.s32.totalorder %s13_s14, 6   ;;  %s2885_s13 = smov %s2887_s15 }
 0x19f   :  { %12 = sbr.rel (!%p10_p5) target bundleno = 2 (0x2), region = 76 }

// kernel: skull_unet_transformer_forward.31
= control target key start
LH: loop header
LB: loop body
LE: loop exit
PB: predicated region body
PF: predicated region fallthrough
CT: control target
= control target key end

     0   :  { %s939_s1 = inlined_call_operand.vmem [shape: bf16[256,128], index: 1, kind: input, shape index: {}]   ;;  %s940_s0 = inlined_call_operand.vmem [shape: bf16[128,256], index: 0, kind: input, shape index: {}]   ;;  %s941_s2 = inlined_call_operand.vmem [shape: f32[1,128], index: 2, kind: input, shape index: {}]   ;;  %s942_s3 = inlined_call_operand.vmem [shape: bf16[128,128], index: 3, kind: output, shape index: {}]  }
   0x1   :  { %v738_v0 = vld [vmem:[%s939_s1 + $0x40] sm:$0xff]   ;;  %v740_v2 = vld [vmem:[%s939_s1 + $0x48] sm:$0xff]   ;;  %v742_v4 = vld [vmem:[%s939_s1 + $0x50] sm:$0xff]  }
   0x2   :  { %v739_v1 = vld [vmem:[%s939_s1] sm:$0xff]   ;;  %658 = vmatprep.subr.bf16.mxu0 %v738_v0  ;;  %722 = vmatprep.subr.bf16.mxu1 %v738_v0  ;;  %v741_v3 = vld [vmem:[%s939_s1 + $0x8] sm:$0xff]   ;;  %v743_v5 = vld [vmem:[%s939_s1 + $0x10] sm:$0xff]  }
   0x3   :  { %659 = vmatpush3.bf16.msra.mxu0 %v739_v1  ;;  %730 = vmatpush3.bf16.msra.mxu1 %v739_v1  ;;  %v744_v6 = vld [vmem:[%s939_s1 + $0x58] sm:$0xff]   ;;  %v746_v8 = vld [vmem:[%s939_s1 + $0x60] sm:$0xff]   ;;  %v748_v10 = vld [vmem:[%s939_s1 + $0x68] sm:$0xff]  }
   0x4   :  { %660 = vmatprep.subr.bf16.mxu0 %v740_v2  ;;  %723 = vmatprep.subr.bf16.mxu1 %v740_v2  ;;  %v745_v7 = vld [vmem:[%s939_s1 + $0x18] sm:$0xff]   ;;  %v747_v9 = vld [vmem:[%s939_s1 + $0x20] sm:$0xff]   ;;  %v749_v13 = vld [vmem:[%s939_s1 + $0x28] sm:$0xff]  }
   0x5   :  { %v756_v11 = vld [vmem:[%s940_s0 + $0x4] ss:$8 sps:$4 sm:$0xff]   ;;  %v750_v14 = vld [vmem:[%s939_s1 + $0x70] sm:$0xff]   ;;  %v752_v16 = vld [vmem:[%s939_s1 + $0x78] sm:$0xff]  }
   0x6   :  { %v759_v12 = vld [vmem:[%s940_s0 + $0x44] ss:$8 sps:$4 sm:$0xff]   ;;  %307 = vmatprep.mubr.bf16.mxu0 %v756_v11  ;;  %v751_v15 = vld [vmem:[%s939_s1 + $0x30] sm:$0xff]   ;;  %v753_v17 = vld [vmem:[%s939_s1 + $0x38] sm:$0xff]  }
   0x7   :  { %661 = vmatpush3.bf16.msra.mxu0 %v741_v3  ;;  %731 = vmatpush3.bf16.msra.mxu1 %v741_v3  ;;  %v754_v18 = vld [vmem:[%s940_s0] ss:$8 sps:$4 sm:$0xff]   ;;  %v760_v20 = vld [vmem:[%s940_s0 + $0x14] ss:$8 sps:$4 sm:$0xff]   ;;  %v764_v22 = vld [vmem:[%s940_s0 + $0x10] ss:$8 sps:$4 sm:$0xff]  }
   0x8   :  { %662 = vmatprep.subr.bf16.mxu0 %v742_v4  ;;  %724 = vmatprep.subr.bf16.mxu1 %v742_v4  ;;  %v757_v19 = vld [vmem:[%s940_s0 + $0x40] ss:$8 sps:$4 sm:$0xff]   ;;  %v762_v21 = vld [vmem:[%s940_s0 + $0x54] ss:$8 sps:$4 sm:$0xff]   ;;  %v765_v23 = vld [vmem:[%s940_s0 + $0x50] ss:$8 sps:$4 sm:$0xff]  }
   0x9   :  { %339 = vmatprep.mubr.bf16.mxu1 %v759_v12  ;;  %v766_v24 = vld [vmem:[%s940_s0 + $0x24] ss:$8 sps:$4 sm:$0xff]   ;;  %v770_v26 = vld [vmem:[%s940_s0 + $0x20] ss:$8 sps:$4 sm:$0xff]   ;;  %v772_v28 = vld [vmem:[%s940_s0 + $0x34] ss:$8 sps:$4 sm:$0xff]  }
   0xa   :  { %v768_v25 = vld [vmem:[%s940_s0 + $0x64] ss:$8 sps:$4 sm:$0xff]   ;;  %v771_v27 = vld [vmem:[%s940_s0 + $0x60] ss:$8 sps:$4 sm:$0xff]   ;;  %v774_v29 = vld [vmem:[%s940_s0 + $0x74] ss:$8 sps:$4 sm:$0xff]  }
   0xb   :  { %663 = vmatpush3.bf16.msra.mxu0 %v743_v5  ;;  %732 = vmatpush3.bf16.msra.mxu1 %v743_v5  ;;  %v776_v30 = vld [vmem:[%s940_s0 + $0x30] ss:$8 sps:$4 sm:$0xff]   ;;  %v897_v35 = vld [vmem:[%s941_s2] ss:$0 sm:$0xff] }
   0xc   :  { %664 = vmatprep.subr.bf16.mxu0 %v744_v6  ;;  %725 = vmatprep.subr.bf16.mxu1 %v744_v6  ;;  %v777_v31 = vld [vmem:[%s940_s0 + $0x70] ss:$8 sps:$4 sm:$0xff]  }
   0xf   :  { %665 = vmatpush3.bf16.msra.mxu0 %v745_v7  ;;  %733 = vmatpush3.bf16.msra.mxu1 %v745_v7 }
  0x10   :  { %666 = vmatprep.subr.bf16.mxu0 %v746_v8  ;;  %726 = vmatprep.subr.bf16.mxu1 %v746_v8 }
  0x13   :  { %667 = vmatpush3.bf16.msra.mxu0 %v747_v9  ;;  %734 = vmatpush3.bf16.msra.mxu1 %v747_v9 }
  0x14   :  { %668 = vmatprep.subr.bf16.mxu0 %v748_v10  ;;  %727 = vmatprep.subr.bf16.mxu1 %v748_v10 }
  0x17   :  { %669 = vmatpush3.bf16.msra.mxu0 %v749_v13  ;;  %735 = vmatpush3.bf16.msra.mxu1 %v749_v13 }
  0x18   :  { %670 = vmatprep.subr.bf16.mxu0 %v750_v14  ;;  %728 = vmatprep.subr.bf16.mxu1 %v750_v14 }
  0x1b   :  { %671 = vmatpush3.bf16.msra.mxu0 %v751_v15  ;;  %736 = vmatpush3.bf16.msra.mxu1 %v751_v15 }
  0x1c   :  { %672 = vmatprep.subr.bf16.mxu0 %v752_v16  ;;  %729 = vmatprep.subr.bf16.mxu1 %v752_v16 }
  0x1f   :  { %673 = vmatpush3.bf16.msra.mxu0 %v753_v17  ;;  %737 = vmatpush3.bf16.msra.mxu1 %v753_v17 }
  0x22   :  { %308 = vmatmul.mubr.bf16.vlgmr.msra.gmra.mrb[0].mxu0 %v754_v18  ;;  %340 = vmatmul.mubr.bf16.vlgmr.msra.gmra.mrb[0].mxu1 %v757_v19 }
  0x23   :  { %315 = vmatprep.mubr.bf16.mxu0 %v760_v20  ;;  %347 = vmatprep.mubr.bf16.mxu1 %v762_v21 }
  0x2a   :  { %316 = vmatmul.mubr.bf16.gmra.mrb[4].mxu0 %v764_v22  ;;  %348 = vmatmul.mubr.bf16.gmra.mrb[4].mxu1 %v765_v23 }
  0x2b   :  { %323 = vmatprep.mubr.bf16.mxu0 %v766_v24  ;;  %355 = vmatprep.mubr.bf16.mxu1 %v768_v25 }
  0x32   :  { %324 = vmatmul.mubr.bf16.gmra.mrb[8].mxu0 %v770_v26  ;;  %356 = vmatmul.mubr.bf16.gmra.mrb[8].mxu1 %v771_v27 }
  0x33   :  { %331 = vmatprep.mubr.bf16.mxu0 %v772_v28  ;;  %363 = vmatprep.mubr.bf16.mxu1 %v774_v29 }
  0x3a   :  { %332 = vmatmul.mubr.bf16.gmra.mrb[12].mxu0 %v776_v30  ;;  %364 = vmatmul.mubr.bf16.gmra.mrb[12].mxu1 %v777_v31 }
  0xf5   :  { %v674_v32 = vpop.f32.mrb[0].mxu0  ;;  %v698_v33 = vpop.f32.mrb[0].mxu1 }
  0xf6   :  { %v675_v34 = vpop.f32.mrb[1].mxu0  ;;  %v699_v36 = vpop.f32.mrb[1].mxu1 }
  0xf7   :  { %v676_v37 = vadd.f32 %v675_v34, %v674_v32  ;;  %v700_v38 = vadd.f32 %v699_v36, %v698_v33  ;;  %v677_v39 = vpop.f32.mrb[2].mxu0  ;;  %v701_v40 = vpop.f32.mrb[2].mxu1 }
  0xf8   :  { %v678_v41 = vpop.f32.mrb[3].mxu0  ;;  %v702_v42 = vpop.f32.mrb[3].mxu1 }
  0xf9   :  { %v430_v43 = vadd.f32 %v676_v37, %v897_v35  ;;  %v438_v44 = vadd.f32 %v700_v38, %v897_v35  ;;  %v679_v45 = vadd.f32 %v678_v41, %v677_v39  ;;  %v703_v46 = vadd.f32 %v702_v42, %v701_v40 }
  0xfb   :  { %v431_v47 = vadd.f32 %v679_v45, %v897_v35  ;;  %v439_v48 = vadd.f32 %v703_v46, %v897_v35  ;;  %v446_v49 = vmax.f32 %v430_v43, 0.0  ;;  %v454_v50 = vmax.f32 %v438_v44, 0.0 }
  0xfd   :  { %v447_v51 = vmax.f32 %v431_v47, 0.0  ;;  %v455_v52 = vmax.f32 %v439_v48, 0.0  ;;  %v680_v53 = vpop.f32.mrb[4].mxu0  ;;  %v704_v54 = vpop.f32.mrb[4].mxu1 }
  0xfe   :  { %v681_v55 = vpop.f32.mrb[5].mxu0  ;;  %v705_v56 = vpop.f32.mrb[5].mxu1 }
  0xff   :  { %v614_v57 = vpack.c.bf16 %v447_v51, %v446_v49  ;;  %v634_v58 = vpack.c.bf16 %v455_v52, %v454_v50  ;;  %v682_v59 = vadd.f32 %v681_v55, %v680_v53  ;;  %v706_v60 = vadd.f32 %v705_v56, %v704_v54  ;;  %v683_v61 = vpop.f32.mrb[6].mxu0  ;;  %v707_v62 = vpop.f32.mrb[6].mxu1 }
 0x100   :  { %v684_v63 = vpop.f32.mrb[7].mxu0  ;;  %v708_v0 = vpop.f32.mrb[7].mxu1 }
 0x101   :  { %615 = vst [vmem:[%s942_s3] sm:$0xff] %v614_v57   ;;  %654 = vst [vmem:[%s942_s3 + $0x20] sm:$0xff] %v634_v58   ;;  %v432_v1 = vadd.f32 %v682_v59, %v897_v35  ;;  %v440_v2 = vadd.f32 %v706_v60, %v897_v35  ;;  %v685_v3 = vadd.f32 %v684_v63, %v683_v61 }
 0x102   :  { %v709_v4 = vadd.f32 %v708_v0, %v707_v62 }
 0x103   :  { %v433_v5 = vadd.f32 %v685_v3, %v897_v35  ;;  %v448_v7 = vmax.f32 %v432_v1, 0.0  ;;  %v456_v8 = vmax.f32 %v440_v2, 0.0 }
 0x104   :  { %v441_v6 = vadd.f32 %v709_v4, %v897_v35 }
 0x105   :  { %v449_v9 = vmax.f32 %v433_v5, 0.0  ;;  %v686_v11 = vpop.f32.mrb[8].mxu0  ;;  %v710_v12 = vpop.f32.mrb[8].mxu1 }
 0x106   :  { %v457_v10 = vmax.f32 %v441_v6, 0.0  ;;  %v687_v13 = vpop.f32.mrb[9].mxu0  ;;  %v711_v14 = vpop.f32.mrb[9].mxu1 }
 0x107   :  { %v619_v15 = vpack.c.bf16 %v449_v9, %v448_v7  ;;  %v688_v17 = vadd.f32 %v687_v13, %v686_v11  ;;  %v712_v18 = vadd.f32 %v711_v14, %v710_v12  ;;  %v689_v19 = vpop.f32.mrb[10].mxu0  ;;  %v713_v20 = vpop.f32.mrb[10].mxu1 }
 0x108   :  { %v639_v16 = vpack.c.bf16 %v457_v10, %v456_v8  ;;  %v690_v21 = vpop.f32.mrb[11].mxu0  ;;  %v714_v22 = vpop.f32.mrb[11].mxu1 }
 0x109   :  { %651 = vst [vmem:[%s942_s3 + $0x8] sm:$0xff] %v619_v15   ;;  %v434_v23 = vadd.f32 %v688_v17, %v897_v35  ;;  %v442_v24 = vadd.f32 %v712_v18, %v897_v35  ;;  %v691_v25 = vadd.f32 %v690_v21, %v689_v19  ;;  %v715_v26 = vadd.f32 %v714_v22, %v713_v20 }
 0x10a   :  { %655 = vst [vmem:[%s942_s3 + $0x28] sm:$0xff] %v639_v16  }
 0x10b   :  { %v435_v27 = vadd.f32 %v691_v25, %v897_v35  ;;  %v443_v28 = vadd.f32 %v715_v26, %v897_v35  ;;  %v450_v29 = vmax.f32 %v434_v23, 0.0  ;;  %v458_v30 = vmax.f32 %v442_v24, 0.0 }
 0x10d   :  { %v451_v31 = vmax.f32 %v435_v27, 0.0  ;;  %v459_v32 = vmax.f32 %v443_v28, 0.0  ;;  %v692_v33 = vpop.f32.mrb[12].mxu0  ;;  %v716_v34 = vpop.f32.mrb[12].mxu1 }
 0x10e   :  { %v693_v36 = vpop.f32.mrb[13].mxu0  ;;  %v717_v37 = vpop.f32.mrb[13].mxu1 }
 0x10f   :  { %v624_v38 = vpack.c.bf16 %v451_v31, %v450_v29  ;;  %v644_v39 = vpack.c.bf16 %v459_v32, %v458_v30  ;;  %v694_v40 = vadd.f32 %v693_v36, %v692_v33  ;;  %v718_v41 = vadd.f32 %v717_v37, %v716_v34  ;;  %v695_v42 = vpop.f32.mrb[14].mxu0  ;;  %v719_v43 = vpop.f32.mrb[14].mxu1 }
 0x110   :  { %v696_v44 = vpop.f32.mrb[15].mxu0  ;;  %v720_v45 = vpop.f32.mrb[15].mxu1 }
 0x111   :  { %652 = vst [vmem:[%s942_s3 + $0x10] sm:$0xff] %v624_v38   ;;  %656 = vst [vmem:[%s942_s3 + $0x30] sm:$0xff] %v644_v39   ;;  %v436_v46 = vadd.f32 %v694_v40, %v897_v35  ;;  %v444_v47 = vadd.f32 %v718_v41, %v897_v35  ;;  %v697_v48 = vadd.f32 %v696_v44, %v695_v42 }
 0x112   :  { %v721_v49 = vadd.f32 %v720_v45, %v719_v43 }
 0x113   :  { %v437_v50 = vadd.f32 %v697_v48, %v897_v35  ;;  %v452_v52 = vmax.f32 %v436_v46, 0.0  ;;  %v460_v53 = vmax.f32 %v444_v47, 0.0 }
 0x114   :  { %v445_v51 = vadd.f32 %v721_v49, %v897_v35 }
 0x115   :  { %v453_v54 = vmax.f32 %v437_v50, 0.0 }
 0x116   :  { %v461_v55 = vmax.f32 %v445_v51, 0.0 }
 0x117   :  { %v629_v56 = vpack.c.bf16 %v453_v54, %v452_v52 }
 0x118   :  { %v649_v57 = vpack.c.bf16 %v461_v55, %v460_v53 }
 0x119   :  { %653 = vst [vmem:[%s942_s3 + $0x18] sm:$0xff] %v629_v56  }
 0x11a   :  { %657 = vst [vmem:[%s942_s3 + $0x38] sm:$0xff] %v649_v57  }

// kernel: skull_unet_transformer_forward.32
= control target key start
LH: loop header
LB: loop body
LE: loop exit
PB: predicated region body
PF: predicated region fallthrough
CT: control target
= control target key end

     0   :  { %s1476_s1 = inlined_call_operand.vmem [shape: bf16[512,128], index: 1, kind: input, shape index: {}]   ;;  %s1477_s0 = inlined_call_operand.vmem [shape: bf16[128,512], index: 0, kind: input, shape index: {}]   ;;  %s1478_s2 = inlined_call_operand.vmem [shape: f32[1,128], index: 2, kind: input, shape index: {}]   ;;  %s1479_s3 = inlined_call_operand.vmem [shape: bf16[128,128], index: 3, kind: output, shape index: {}]  }
   0x1   :  { %v1139_v0 = vld [vmem:[%s1476_s1 + $0x40] sm:$0xff]   ;;  %v1143_v4 = vld [vmem:[%s1476_s1 + $0x48] sm:$0xff]   ;;  %v1147_v8 = vld [vmem:[%s1476_s1 + $0x50] sm:$0xff]  }
   0x2   :  { %v1140_v1 = vld [vmem:[%s1476_s1 + $0xc0] sm:$0xff]   ;;  %1011 = vmatprep.subr.bf16.mxu0 %v1139_v0  ;;  %v1144_v5 = vld [vmem:[%s1476_s1 + $0xc8] sm:$0xff]   ;;  %v1148_v9 = vld [vmem:[%s1476_s1 + $0xd0] sm:$0xff]  }
   0x3   :  { %v1141_v2 = vld [vmem:[%s1476_s1] sm:$0xff]   ;;  %1075 = vmatprep.subr.bf16.mxu1 %v1140_v1  ;;  %v1145_v6 = vld [vmem:[%s1476_s1 + $0x8] sm:$0xff]   ;;  %v1149_v10 = vld [vmem:[%s1476_s1 + $0x10] sm:$0xff]  }
   0x4   :  { %v1142_v3 = vld [vmem:[%s1476_s1 + $0x80] sm:$0xff]   ;;  %1012 = vmatpush3.bf16.msra.mxu0 %v1141_v2  ;;  %v1146_v7 = vld [vmem:[%s1476_s1 + $0x88] sm:$0xff]   ;;  %v1150_v11 = vld [vmem:[%s1476_s1 + $0x90] sm:$0xff]  }
   0x5   :  { %1076 = vmatpush3.bf16.msra.mxu1 %v1142_v3  ;;  %1013 = vmatprep.subr.bf16.mxu0 %v1143_v4  ;;  %v1151_v12 = vld [vmem:[%s1476_s1 + $0x58] sm:$0xff]   ;;  %v1155_v16 = vld [vmem:[%s1476_s1 + $0x60] sm:$0xff]   ;;  %v1159_v20 = vld [vmem:[%s1476_s1 + $0x68] sm:$0xff]  }
   0x6   :  { %1077 = vmatprep.subr.bf16.mxu1 %v1144_v5  ;;  %v1152_v13 = vld [vmem:[%s1476_s1 + $0xd8] sm:$0xff]   ;;  %v1156_v17 = vld [vmem:[%s1476_s1 + $0xe0] sm:$0xff]   ;;  %v1160_v21 = vld [vmem:[%s1476_s1 + $0xe8] sm:$0xff]  }
   0x7   :  { %v1153_v14 = vld [vmem:[%s1476_s1 + $0x18] sm:$0xff]   ;;  %v1157_v18 = vld [vmem:[%s1476_s1 + $0x20] sm:$0xff]   ;;  %v1161_v22 = vld [vmem:[%s1476_s1 + $0x28] sm:$0xff]  }
   0x8   :  { %1014 = vmatpush3.bf16.msra.mxu0 %v1145_v6  ;;  %v1154_v15 = vld [vmem:[%s1476_s1 + $0x98] sm:$0xff]   ;;  %v1158_v19 = vld [vmem:[%s1476_s1 + $0xa0] sm:$0xff]   ;;  %v1162_v23 = vld [vmem:[%s1476_s1 + $0xa8] sm:$0xff]  }
   0x9   :  { %1078 = vmatpush3.bf16.msra.mxu1 %v1146_v7  ;;  %1015 = vmatprep.subr.bf16.mxu0 %v1147_v8  ;;  %v1163_v24 = vld [vmem:[%s1476_s1 + $0x70] sm:$0xff]   ;;  %v1167_v28 = vld [vmem:[%s1476_s1 + $0x78] sm:$0xff]  }
   0xa   :  { %1079 = vmatprep.subr.bf16.mxu1 %v1148_v9  ;;  %v1164_v25 = vld [vmem:[%s1476_s1 + $0xf0] sm:$0xff]   ;;  %v1168_v29 = vld [vmem:[%s1476_s1 + $0xf8] sm:$0xff]   ;;  %v1434_v9 = vld [vmem:[%s1478_s2] ss:$0 sm:$0xff] }
   0xb   :  { %v1165_v26 = vld [vmem:[%s1476_s1 + $0x30] sm:$0xff]   ;;  %v1169_v30 = vld [vmem:[%s1476_s1 + $0x38] sm:$0xff]  }
   0xc   :  { %1016 = vmatpush3.bf16.msra.mxu0 %v1149_v10  ;;  %v1166_v27 = vld [vmem:[%s1476_s1 + $0xb0] sm:$0xff]   ;;  %v1170_v31 = vld [vmem:[%s1476_s1 + $0xb8] sm:$0xff]  }
   0xd   :  { %1080 = vmatpush3.bf16.msra.mxu1 %v1150_v11  ;;  %1017 = vmatprep.subr.bf16.mxu0 %v1151_v12  ;;  %v1171_v32 = vld [vmem:[%s1477_s0] ss:$16 sps:$4 sm:$0xff]   ;;  %v1173_v33 = vld [vmem:[%s1477_s0 + $0x4] ss:$16 sps:$4 sm:$0xff]   ;;  %v1174_v34 = vld [vmem:[%s1477_s0 + $0x8] ss:$16 sps:$4 sm:$0xff]  }
   0xe   :  { %1081 = vmatprep.subr.bf16.mxu1 %v1152_v13  ;;  %v1176_v35 = vld [vmem:[%s1477_s0 + $0xc] ss:$16 sps:$4 sm:$0xff]   ;;  %531 = vmatprep.mubr.bf16.mxu0 %v1173_v33  ;;  %v1177_v36 = vld [vmem:[%s1477_s0 + $0x24] ss:$16 sps:$4 sm:$0xff]   ;;  %v1181_v38 = vld [vmem:[%s1477_s0 + $0x20] ss:$16 sps:$4 sm:$0xff]  }
   0xf   :  { %628 = vmatprep.mubr.bf16.mxu1 %v1176_v35  ;;  %v1179_v37 = vld [vmem:[%s1477_s0 + $0x2c] ss:$16 sps:$4 sm:$0xff]   ;;  %v1182_v39 = vld [vmem:[%s1477_s0 + $0x28] ss:$16 sps:$4 sm:$0xff]   ;;  %v1183_v40 = vld [vmem:[%s1477_s0 + $0x44] ss:$16 sps:$4 sm:$0xff]  }
  0x10   :  { %1018 = vmatpush3.bf16.msra.mxu0 %v1153_v14  ;;  %v1185_v41 = vld [vmem:[%s1477_s0 + $0x4c] ss:$16 sps:$4 sm:$0xff]   ;;  %v1187_v42 = vld [vmem:[%s1477_s0 + $0x40] ss:$16 sps:$4 sm:$0xff]   ;;  %v1188_v43 = vld [vmem:[%s1477_s0 + $0x48] ss:$16 sps:$4 sm:$0xff]  }
  0x11   :  { %1082 = vmatpush3.bf16.msra.mxu1 %v1154_v15  ;;  %1019 = vmatprep.subr.bf16.mxu0 %v1155_v16  ;;  %v1189_v44 = vld [vmem:[%s1477_s0 + $0x64] ss:$16 sps:$4 sm:$0xff]   ;;  %v1191_v45 = vld [vmem:[%s1477_s0 + $0x6c] ss:$16 sps:$4 sm:$0xff]   ;;  %v1193_v46 = vld [vmem:[%s1477_s0 + $0x60] ss:$16 sps:$4 sm:$0xff]  }
  0x12   :  { %1083 = vmatprep.subr.bf16.mxu1 %v1156_v17  ;;  %v1194_v47 = vld [vmem:[%s1477_s0 + $0x68] ss:$16 sps:$4 sm:$0xff]   ;;  %v1195_v48 = vld [vmem:[%s1477_s0 + $0x84] ss:$16 sps:$4 sm:$0xff]   ;;  %v1197_v49 = vld [vmem:[%s1477_s0 + $0x8c] ss:$16 sps:$4 sm:$0xff]  }
  0x13   :  { %v1199_v50 = vld [vmem:[%s1477_s0 + $0x80] ss:$16 sps:$4 sm:$0xff]   ;;  %v1200_v51 = vld [vmem:[%s1477_s0 + $0x88] ss:$16 sps:$4 sm:$0xff]   ;;  %v1201_v52 = vld [vmem:[%s1477_s0 + $0xa4] ss:$16 sps:$4 sm:$0xff]  }
  0x14   :  { %1020 = vmatpush3.bf16.msra.mxu0 %v1157_v18  ;;  %v1203_v53 = vld [vmem:[%s1477_s0 + $0xac] ss:$16 sps:$4 sm:$0xff]   ;;  %v1205_v54 = vld [vmem:[%s1477_s0 + $0xa0] ss:$16 sps:$4 sm:$0xff]   ;;  %v1206_v55 = vld [vmem:[%s1477_s0 + $0xa8] ss:$16 sps:$4 sm:$0xff]  }
  0x15   :  { %1084 = vmatpush3.bf16.msra.mxu1 %v1158_v19  ;;  %1021 = vmatprep.subr.bf16.mxu0 %v1159_v20  ;;  %v1207_v56 = vld [vmem:[%s1477_s0 + $0xc4] ss:$16 sps:$4 sm:$0xff]   ;;  %v1209_v57 = vld [vmem:[%s1477_s0 + $0xcc] ss:$16 sps:$4 sm:$0xff]   ;;  %v1211_v58 = vld [vmem:[%s1477_s0 + $0xc0] ss:$16 sps:$4 sm:$0xff]  }
  0x16   :  { %1085 = vmatprep.subr.bf16.mxu1 %v1160_v21  ;;  %v1212_v59 = vld [vmem:[%s1477_s0 + $0xc8] ss:$16 sps:$4 sm:$0xff]   ;;  %v1213_v60 = vld [vmem:[%s1477_s0 + $0xe4] ss:$16 sps:$4 sm:$0xff]   ;;  %v1215_v61 = vld [vmem:[%s1477_s0 + $0xec] ss:$16 sps:$4 sm:$0xff]  }
  0x17   :  { %v1217_v62 = vld [vmem:[%s1477_s0 + $0xe0] ss:$16 sps:$4 sm:$0xff]   ;;  %v1218_v63 = vld [vmem:[%s1477_s0 + $0xe8] ss:$16 sps:$4 sm:$0xff]  }
  0x18   :  { %1022 = vmatpush3.bf16.msra.mxu0 %v1161_v22 }
  0x19   :  { %1086 = vmatpush3.bf16.msra.mxu1 %v1162_v23  ;;  %1023 = vmatprep.subr.bf16.mxu0 %v1163_v24 }
  0x1a   :  { %1087 = vmatprep.subr.bf16.mxu1 %v1164_v25 }
  0x1c   :  { %1024 = vmatpush3.bf16.msra.mxu0 %v1165_v26 }
  0x1d   :  { %1088 = vmatpush3.bf16.msra.mxu1 %v1166_v27  ;;  %1025 = vmatprep.subr.bf16.mxu0 %v1167_v28 }
  0x1e   :  { %1089 = vmatprep.subr.bf16.mxu1 %v1168_v29 }
  0x20   :  { %1026 = vmatpush3.bf16.msra.mxu0 %v1169_v30 }
  0x21   :  { %1090 = vmatpush3.bf16.msra.mxu1 %v1170_v31 }
  0x23   :  { %532 = vmatmul.mubr.bf16.vlgmr.msra.gmra.mrb[0].mxu0 %v1171_v32 }
  0x24   :  { %629 = vmatmul.mubr.bf16.vlgmr.msra.gmra.mrb[0].mxu1 %v1174_v34  ;;  %539 = vmatprep.mubr.bf16.mxu0 %v1177_v36 }
  0x25   :  { %636 = vmatprep.mubr.bf16.mxu1 %v1179_v37 }
  0x2b   :  { %540 = vmatmul.mubr.bf16.gmra.mrb[4].mxu0 %v1181_v38 }
  0x2c   :  { %637 = vmatmul.mubr.bf16.gmra.mrb[4].mxu1 %v1182_v39  ;;  %547 = vmatprep.mubr.bf16.mxu0 %v1183_v40 }
  0x2d   :  { %644 = vmatprep.mubr.bf16.mxu1 %v1185_v41 }
  0x33   :  { %548 = vmatmul.mubr.bf16.gmra.mrb[8].mxu0 %v1187_v42 }
  0x34   :  { %645 = vmatmul.mubr.bf16.gmra.mrb[8].mxu1 %v1188_v43  ;;  %555 = vmatprep.mubr.bf16.mxu0 %v1189_v44 }
  0x35   :  { %652 = vmatprep.mubr.bf16.mxu1 %v1191_v45 }
  0x3b   :  { %556 = vmatmul.mubr.bf16.gmra.mrb[12].mxu0 %v1193_v46 }
  0x3c   :  { %653 = vmatmul.mubr.bf16.gmra.mrb[12].mxu1 %v1194_v47  ;;  %563 = vmatprep.mubr.bf16.mxu0 %v1195_v48 }
  0x3d   :  { %660 = vmatprep.mubr.bf16.mxu1 %v1197_v49 }
  0x43   :  { %564 = vmatmul.mubr.bf16.gmra.mrb[16].mxu0 %v1199_v50 }
  0x44   :  { %661 = vmatmul.mubr.bf16.gmra.mrb[16].mxu1 %v1200_v51  ;;  %571 = vmatprep.mubr.bf16.mxu0 %v1201_v52 }
  0x45   :  { %668 = vmatprep.mubr.bf16.mxu1 %v1203_v53 }
  0x4b   :  { %572 = vmatmul.mubr.bf16.gmra.mrb[20].mxu0 %v1205_v54 }
  0x4c   :  { %669 = vmatmul.mubr.bf16.gmra.mrb[20].mxu1 %v1206_v55  ;;  %579 = vmatprep.mubr.bf16.mxu0 %v1207_v56 }
  0x4d   :  { %676 = vmatprep.mubr.bf16.mxu1 %v1209_v57 }
  0x53   :  { %580 = vmatmul.mubr.bf16.gmra.mrb[24].mxu0 %v1211_v58 }
  0x54   :  { %677 = vmatmul.mubr.bf16.gmra.mrb[24].mxu1 %v1212_v59  ;;  %587 = vmatprep.mubr.bf16.mxu0 %v1213_v60 }
  0x55   :  { %684 = vmatprep.mubr.bf16.mxu1 %v1215_v61 }
  0x5b   :  { %588 = vmatmul.mubr.bf16.gmra.mrb[28].mxu0 %v1217_v62 }
  0x5c   :  { %685 = vmatmul.mubr.bf16.gmra.mrb[28].mxu1 %v1218_v63 }
  0xf6   :  { %v1027_v0 = vpop.f32.mrb[0].mxu0 }
  0xf7   :  { %v1091_v1 = vpop.f32.mrb[0].mxu1  ;;  %v1028_v2 = vpop.f32.mrb[1].mxu0 }
  0xf8   :  { %v1029_v3 = vadd.f32 %v1028_v2, %v1027_v0  ;;  %v1092_v4 = vpop.f32.mrb[1].mxu1  ;;  %v1030_v5 = vpop.f32.mrb[2].mxu0 }
  0xf9   :  { %v1093_v6 = vadd.f32 %v1092_v4, %v1091_v1  ;;  %v1094_v7 = vpop.f32.mrb[2].mxu1  ;;  %v1031_v8 = vpop.f32.mrb[3].mxu0 }
  0xfa   :  { %v1032_v10 = vadd.f32 %v1031_v8, %v1030_v5  ;;  %v1095_v11 = vpop.f32.mrb[3].mxu1 }
  0xfb   :  { %v631_v12 = vadd.f32 %v1093_v6, %v1029_v3  ;;  %v1096_v13 = vadd.f32 %v1095_v11, %v1094_v7 }
  0xfd   :  { %v751_v14 = vadd.f32 %v1434_v9, %v631_v12  ;;  %v634_v15 = vadd.f32 %v1096_v13, %v1032_v10 }
  0xfe   :  { %v1033_v16 = vpop.f32.mrb[4].mxu0 }
  0xff   :  { %v752_v17 = vadd.f32 %v1434_v9, %v634_v15  ;;  %v1097_v18 = vpop.f32.mrb[4].mxu1  ;;  %v1034_v19 = vpop.f32.mrb[5].mxu0  ;;  %v767_v23 = vmax.f32 %v751_v14, 0.0 }
 0x100   :  { %v1035_v20 = vadd.f32 %v1034_v19, %v1033_v16  ;;  %v1098_v21 = vpop.f32.mrb[5].mxu1  ;;  %v1036_v22 = vpop.f32.mrb[6].mxu0 }
 0x101   :  { %v768_v24 = vmax.f32 %v752_v17, 0.0  ;;  %v1099_v25 = vadd.f32 %v1098_v21, %v1097_v18  ;;  %v1100_v26 = vpop.f32.mrb[6].mxu1  ;;  %v1037_v27 = vpop.f32.mrb[7].mxu0 }
 0x102   :  { %v1038_v28 = vadd.f32 %v1037_v27, %v1036_v22  ;;  %v1101_v29 = vpop.f32.mrb[7].mxu1 }
 0x103   :  { %v967_v30 = vpack.c.bf16 %v768_v24, %v767_v23  ;;  %v639_v31 = vadd.f32 %v1099_v25, %v1035_v20  ;;  %v1102_v32 = vadd.f32 %v1101_v29, %v1100_v26 }
 0x105   :  { %968 = vst [vmem:[%s1479_s3] sm:$0xff] %v967_v30   ;;  %v753_v33 = vadd.f32 %v1434_v9, %v639_v31  ;;  %v642_v34 = vadd.f32 %v1102_v32, %v1038_v28 }
 0x106   :  { %v1039_v35 = vpop.f32.mrb[8].mxu0 }
 0x107   :  { %v754_v36 = vadd.f32 %v1434_v9, %v642_v34  ;;  %v1103_v37 = vpop.f32.mrb[8].mxu1  ;;  %v1040_v38 = vpop.f32.mrb[9].mxu0  ;;  %v769_v42 = vmax.f32 %v753_v33, 0.0 }
 0x108   :  { %v1041_v39 = vadd.f32 %v1040_v38, %v1039_v35  ;;  %v1104_v40 = vpop.f32.mrb[9].mxu1  ;;  %v1042_v41 = vpop.f32.mrb[10].mxu0 }
 0x109   :  { %v770_v43 = vmax.f32 %v754_v36, 0.0  ;;  %v1105_v44 = vadd.f32 %v1104_v40, %v1103_v37  ;;  %v1106_v45 = vpop.f32.mrb[10].mxu1  ;;  %v1043_v46 = vpop.f32.mrb[11].mxu0 }
 0x10a   :  { %v1044_v47 = vadd.f32 %v1043_v46, %v1042_v41  ;;  %v1107_v48 = vpop.f32.mrb[11].mxu1 }
 0x10b   :  { %v972_v49 = vpack.c.bf16 %v770_v43, %v769_v42  ;;  %v647_v50 = vadd.f32 %v1105_v44, %v1041_v39  ;;  %v1108_v51 = vadd.f32 %v1107_v48, %v1106_v45 }
 0x10d   :  { %1004 = vst [vmem:[%s1479_s3 + $0x8] sm:$0xff] %v972_v49   ;;  %v755_v52 = vadd.f32 %v1434_v9, %v647_v50  ;;  %v650_v53 = vadd.f32 %v1108_v51, %v1044_v47 }
 0x10e   :  { %v1045_v54 = vpop.f32.mrb[12].mxu0 }
 0x10f   :  { %v756_v55 = vadd.f32 %v1434_v9, %v650_v53  ;;  %v1109_v56 = vpop.f32.mrb[12].mxu1  ;;  %v1046_v57 = vpop.f32.mrb[13].mxu0  ;;  %v771_v61 = vmax.f32 %v755_v52, 0.0 }
 0x110   :  { %v1047_v58 = vadd.f32 %v1046_v57, %v1045_v54  ;;  %v1110_v59 = vpop.f32.mrb[13].mxu1  ;;  %v1048_v60 = vpop.f32.mrb[14].mxu0 }
 0x111   :  { %v772_v62 = vmax.f32 %v756_v55, 0.0  ;;  %v1111_v63 = vadd.f32 %v1110_v59, %v1109_v56  ;;  %v1112_v0 = vpop.f32.mrb[14].mxu1  ;;  %v1049_v1 = vpop.f32.mrb[15].mxu0 }
 0x112   :  { %v1050_v2 = vadd.f32 %v1049_v1, %v1048_v60  ;;  %v1113_v3 = vpop.f32.mrb[15].mxu1 }
 0x113   :  { %v977_v4 = vpack.c.bf16 %v772_v62, %v771_v61  ;;  %v655_v5 = vadd.f32 %v1111_v63, %v1047_v58  ;;  %v1114_v6 = vadd.f32 %v1113_v3, %v1112_v0 }
 0x115   :  { %1005 = vst [vmem:[%s1479_s3 + $0x10] sm:$0xff] %v977_v4   ;;  %v757_v7 = vadd.f32 %v1434_v9, %v655_v5  ;;  %v658_v8 = vadd.f32 %v1114_v6, %v1050_v2 }
 0x116   :  { %v1051_v10 = vpop.f32.mrb[16].mxu0 }
 0x117   :  { %v758_v11 = vadd.f32 %v1434_v9, %v658_v8  ;;  %v1115_v12 = vpop.f32.mrb[16].mxu1  ;;  %v1052_v13 = vpop.f32.mrb[17].mxu0  ;;  %v773_v17 = vmax.f32 %v757_v7, 0.0 }
 0x118   :  { %v1053_v14 = vadd.f32 %v1052_v13, %v1051_v10  ;;  %v1116_v15 = vpop.f32.mrb[17].mxu1  ;;  %v1054_v16 = vpop.f32.mrb[18].mxu0 }
 0x119   :  { %v774_v18 = vmax.f32 %v758_v11, 0.0  ;;  %v1117_v19 = vadd.f32 %v1116_v15, %v1115_v12  ;;  %v1118_v20 = vpop.f32.mrb[18].mxu1  ;;  %v1055_v21 = vpop.f32.mrb[19].mxu0 }
 0x11a   :  { %v1056_v22 = vadd.f32 %v1055_v21, %v1054_v16  ;;  %v1119_v23 = vpop.f32.mrb[19].mxu1 }
 0x11b   :  { %v982_v24 = vpack.c.bf16 %v774_v18, %v773_v17  ;;  %v663_v25 = vadd.f32 %v1117_v19, %v1053_v14  ;;  %v1120_v26 = vadd.f32 %v1119_v23, %v1118_v20 }
 0x11d   :  { %1006 = vst [vmem:[%s1479_s3 + $0x18] sm:$0xff] %v982_v24   ;;  %v759_v27 = vadd.f32 %v1434_v9, %v663_v25  ;;  %v666_v28 = vadd.f32 %v1120_v26, %v1056_v22 }
 0x11e   :  { %v1057_v29 = vpop.f32.mrb[20].mxu0 }
 0x11f   :  { %v760_v30 = vadd.f32 %v1434_v9, %v666_v28  ;;  %v1121_v31 = vpop.f32.mrb[20].mxu1  ;;  %v1058_v32 = vpop.f32.mrb[21].mxu0  ;;  %v775_v36 = vmax.f32 %v759_v27, 0.0 }
 0x120   :  { %v1059_v33 = vadd.f32 %v1058_v32, %v1057_v29  ;;  %v1122_v34 = vpop.f32.mrb[21].mxu1  ;;  %v1060_v35 = vpop.f32.mrb[22].mxu0 }
 0x121   :  { %v776_v37 = vmax.f32 %v760_v30, 0.0  ;;  %v1123_v38 = vadd.f32 %v1122_v34, %v1121_v31  ;;  %v1124_v39 = vpop.f32.mrb[22].mxu1  ;;  %v1061_v40 = vpop.f32.mrb[23].mxu0 }
 0x122   :  { %v1062_v41 = vadd.f32 %v1061_v40, %v1060_v35  ;;  %v1125_v42 = vpop.f32.mrb[23].mxu1 }
 0x123   :  { %v987_v43 = vpack.c.bf16 %v776_v37, %v775_v36  ;;  %v671_v44 = vadd.f32 %v1123_v38, %v1059_v33  ;;  %v1126_v45 = vadd.f32 %v1125_v42, %v1124_v39 }
 0x125   :  { %1007 = vst [vmem:[%s1479_s3 + $0x20] sm:$0xff] %v987_v43   ;;  %v761_v46 = vadd.f32 %v1434_v9, %v671_v44  ;;  %v674_v47 = vadd.f32 %v1126_v45, %v1062_v41 }
 0x126   :  { %v1063_v48 = vpop.f32.mrb[24].mxu0 }
 0x127   :  { %v762_v49 = vadd.f32 %v1434_v9, %v674_v47  ;;  %v1127_v50 = vpop.f32.mrb[24].mxu1  ;;  %v1064_v51 = vpop.f32.mrb[25].mxu0  ;;  %v777_v55 = vmax.f32 %v761_v46, 0.0 }
 0x128   :  { %v1065_v52 = vadd.f32 %v1064_v51, %v1063_v48  ;;  %v1128_v53 = vpop.f32.mrb[25].mxu1  ;;  %v1066_v54 = vpop.f32.mrb[26].mxu0 }
 0x129   :  { %v778_v56 = vmax.f32 %v762_v49, 0.0  ;;  %v1129_v57 = vadd.f32 %v1128_v53, %v1127_v50  ;;  %v1130_v58 = vpop.f32.mrb[26].mxu1  ;;  %v1067_v59 = vpop.f32.mrb[27].mxu0 }
 0x12a   :  { %v1068_v60 = vadd.f32 %v1067_v59, %v1066_v54  ;;  %v1131_v61 = vpop.f32.mrb[27].mxu1 }
 0x12b   :  { %v992_v62 = vpack.c.bf16 %v778_v56, %v777_v55  ;;  %v679_v63 = vadd.f32 %v1129_v57, %v1065_v52  ;;  %v1132_v0 = vadd.f32 %v1131_v61, %v1130_v58 }
 0x12d   :  { %1008 = vst [vmem:[%s1479_s3 + $0x28] sm:$0xff] %v992_v62   ;;  %v763_v1 = vadd.f32 %v1434_v9, %v679_v63  ;;  %v682_v2 = vadd.f32 %v1132_v0, %v1068_v60 }
 0x12e   :  { %v1069_v3 = vpop.f32.mrb[28].mxu0 }
 0x12f   :  { %v764_v4 = vadd.f32 %v1434_v9, %v682_v2  ;;  %v1133_v5 = vpop.f32.mrb[28].mxu1  ;;  %v1070_v6 = vpop.f32.mrb[29].mxu0  ;;  %v779_v11 = vmax.f32 %v763_v1, 0.0 }
 0x130   :  { %v1071_v7 = vadd.f32 %v1070_v6, %v1069_v3  ;;  %v1134_v8 = vpop.f32.mrb[29].mxu1  ;;  %v1072_v10 = vpop.f32.mrb[30].mxu0 }
 0x131   :  { %v780_v12 = vmax.f32 %v764_v4, 0.0  ;;  %v1135_v13 = vadd.f32 %v1134_v8, %v1133_v5  ;;  %v1136_v14 = vpop.f32.mrb[30].mxu1  ;;  %v1073_v15 = vpop.f32.mrb[31].mxu0 }
 0x132   :  { %v1074_v16 = vadd.f32 %v1073_v15, %v1072_v10  ;;  %v1137_v17 = vpop.f32.mrb[31].mxu1 }
 0x133   :  { %v997_v18 = vpack.c.bf16 %v780_v12, %v779_v11  ;;  %v687_v19 = vadd.f32 %v1135_v13, %v1071_v7  ;;  %v1138_v20 = vadd.f32 %v1137_v17, %v1136_v14 }
 0x135   :  { %1009 = vst [vmem:[%s1479_s3 + $0x30] sm:$0xff] %v997_v18   ;;  %v765_v21 = vadd.f32 %v1434_v9, %v687_v19  ;;  %v690_v22 = vadd.f32 %v1138_v20, %v1074_v16 }
 0x137   :  { %v766_v23 = vadd.f32 %v1434_v9, %v690_v22  ;;  %v781_v24 = vmax.f32 %v765_v21, 0.0 }
 0x139   :  { %v782_v25 = vmax.f32 %v766_v23, 0.0 }
 0x13b   :  { %v1002_v26 = vpack.c.bf16 %v782_v25, %v781_v24 }
 0x13d   :  { %1010 = vst [vmem:[%s1479_s3 + $0x38] sm:$0xff] %v1002_v26  }

// kernel: skull_unet_transformer_forward.33
= control target key start
LH: loop header
LB: loop body
LE: loop exit
PB: predicated region body
PF: predicated region fallthrough
CT: control target
= control target key end

     0   :  { %s1400_s12 = smov 0   ;;  %s1402_s13 = smov 0   ;;  %s1702_s0 = inlined_call_operand.vmem [shape: bf16[16,256], index: 0, kind: input, shape index: {}]   ;;  %s1703_s1 = inlined_call_operand.vmem [shape: bf16[256,1024], index: 1, kind: input, shape index: {}]   ;;  %s1704_s2 = inlined_call_operand.vmem [shape: f32[1,1024], index: 2, kind: input, shape index: {}]   ;;  %s1705_s3 = inlined_call_operand.vmem [shape: f32[16,1024], index: 3, kind: output, shape index: {}]  }
   0x1   :  { %s1404_s14 = smov 0   ;;  %s1406_s15 = smov 0  }
   0x2   :  { %s1408_s16 = smov 0  }
   0x3 LB: > { %s28_s17 = sadd.s32 1, %s1374_s15  ;;  %s1116_s18 = sadd.s32 4294967295, %s1378_s16   ;;  %s1378_s16 = sphi %s1408_s16, %s13_s16   ;;  %s1374_s15 = sphi %s1406_s15, %s1710_s15   ;;  %s1370_s14 = sphi %s1404_s14, %s1709_s14   ;;  %s1366_s13 = sphi %s1402_s13, %s1708_s13   ;;  %s1362_s12 = sphi %s1400_s12, %s1707_s12  }
   0x4   : > { %p30_p0 = scmp.ge.s32.totalorder %s28_s17, 2  ;;  %p76_p1 = scmp.ne.s32.totalorder %s1366_s13, %s1362_s12 }
   0x5   : > { %p77_p2 = scmp.eq.s32.totalorder %s1378_s16, 0  ;;  %p134_p4 = scmp.eq.s32.totalorder %s1116_s18, 1 }
   0x6   : > { %s1712_s17 = smov (%p30_p0, %s28_s17), 0  ;;  %s69_s20 = sadd.s32 1, %s1366_s13 }
   0x7   : > { %p78_p3 = por %p77_p2, %p76_p1  ;;  %s65_s19 = ssub.s32 %s1374_s15, %s1712_s17 }
   0x8   : > { %p67_p5 = scmp.eq.s32.totalorder %s65_s19, 0  ;;  %p1435_p6 = por %p134_p4, %p76_p1 }
   0x9   : > { %p1120_p7 = scmp.ge.s32.totalorder %s1378_s16, 2 }
   0xa   : > { %s1440_s22 = scalar_select %p67_p5, %s1366_s13, %s69_s20  }
   0xb   : > { %171 = sbr.rel (%p1120_p7) target bundleno = 54 (0x36), region = 20 }
  0x12   : > { %174 = sbr.rel (!%p78_p3) target bundleno = 54 (0x36), region = 24  ;;  %s176_s23 = sand.u32 (%p78_p3), 1, %s1366_s13  }
  0x13   : > { %s1199_s24 = sshll.u32 (%p78_p3), %s1374_s15, 4  ;;  %s1121_s25 = sshll.u32 (%p78_p3), %s176_s23, 9 }
  0x14   : > { %s1448_s28 = scalar_lea.vmem (%p78_p3), %s1703_s1, %s1199_s24  ;;  %s1453_s29 = scalar_lea.vmem (%p78_p3), [#allocation3], %s1121_s25 }
  0x15   : > { %v197_v0 = vld [vmem:[%s1448_s28] sm:$0xff] (%p78_p3)  ;;  %v199_v1 = vld [vmem:[%s1448_s28 + $0x8] sm:$0xff] (%p78_p3) }
  0x16   : > { %v201_v2 = vld [vmem:[%s1448_s28 + $0x20] sm:$0xff] (%p78_p3)  ;;  %198 = vst [vmem:[%s1453_s29] sm:$0xff] (%p78_p3), %v197_v0  ;;  %200 = vst [vmem:[%s1453_s29 + $0x8] sm:$0xff] (%p78_p3), %v199_v1  ;;  %v203_v3 = vld [vmem:[%s1448_s28 + $0x28] sm:$0xff] (%p78_p3) }
  0x17   : > { %202 = vst [vmem:[%s1453_s29 + $0x10] sm:$0xff] (%p78_p3), %v201_v2  ;;  %v205_v4 = vld [vmem:[%s1448_s28 + $0x40] sm:$0xff] (%p78_p3)  ;;  %v207_v5 = vld [vmem:[%s1448_s28 + $0x48] sm:$0xff] (%p78_p3)  ;;  %204 = vst [vmem:[%s1453_s29 + $0x18] sm:$0xff] (%p78_p3), %v203_v3 }
  0x18   : > { %206 = vst [vmem:[%s1453_s29 + $0x20] sm:$0xff] (%p78_p3), %v205_v4  ;;  %208 = vst [vmem:[%s1453_s29 + $0x28] sm:$0xff] (%p78_p3), %v207_v5  ;;  %v209_v6 = vld [vmem:[%s1448_s28 + $0x60] sm:$0xff] (%p78_p3)  ;;  %v211_v7 = vld [vmem:[%s1448_s28 + $0x68] sm:$0xff] (%p78_p3) }
  0x19   : > { %v213_v8 = vld [vmem:[%s1448_s28 + $0x80] sm:$0xff]  ;;  %210 = vst [vmem:[%s1453_s29 + $0x30] sm:$0xff] %v209_v6  ;;  %212 = vst [vmem:[%s1453_s29 + $0x38] sm:$0xff] %v211_v7  ;;  %v215_v9 = vld [vmem:[%s1448_s28 + $0x88] sm:$0xff] }
  0x1a   : > { %214 = vst [vmem:[%s1453_s29 + $0x40] sm:$0xff] %v213_v8  ;;  %v217_v10 = vld [vmem:[%s1448_s28 + $0xa0] sm:$0xff]  ;;  %v219_v11 = vld [vmem:[%s1448_s28 + $0xa8] sm:$0xff]  ;;  %216 = vst [vmem:[%s1453_s29 + $0x48] sm:$0xff] %v215_v9 }
  0x1b   : > { %218 = vst [vmem:[%s1453_s29 + $0x50] sm:$0xff] %v217_v10  ;;  %220 = vst [vmem:[%s1453_s29 + $0x58] sm:$0xff] %v219_v11  ;;  %v221_v12 = vld [vmem:[%s1448_s28 + $0xc0] sm:$0xff]  ;;  %v223_v13 = vld [vmem:[%s1448_s28 + $0xc8] sm:$0xff] }
  0x1c   : > { %v225_v14 = vld [vmem:[%s1448_s28 + $0xe0] sm:$0xff]  ;;  %222 = vst [vmem:[%s1453_s29 + $0x60] sm:$0xff] %v221_v12  ;;  %224 = vst [vmem:[%s1453_s29 + $0x68] sm:$0xff] %v223_v13  ;;  %v227_v15 = vld [vmem:[%s1448_s28 + $0xe8] sm:$0xff] }
  0x1d   : > { %226 = vst [vmem:[%s1453_s29 + $0x70] sm:$0xff] %v225_v14  ;;  %v229_v16 = vld [vmem:[%s1448_s28 + $0x100] sm:$0xff]  ;;  %v231_v17 = vld [vmem:[%s1448_s28 + $0x108] sm:$0xff]  ;;  %228 = vst [vmem:[%s1453_s29 + $0x78] sm:$0xff] %v227_v15 }
  0x1e   : > { %230 = vst [vmem:[%s1453_s29 + $0x80] sm:$0xff] %v229_v16  ;;  %232 = vst [vmem:[%s1453_s29 + $0x88] sm:$0xff] %v231_v17  ;;  %v233_v18 = vld [vmem:[%s1448_s28 + $0x120] sm:$0xff]  ;;  %v235_v19 = vld [vmem:[%s1448_s28 + $0x128] sm:$0xff] }
  0x1f   : > { %v237_v20 = vld [vmem:[%s1448_s28 + $0x140] sm:$0xff]  ;;  %234 = vst [vmem:[%s1453_s29 + $0x90] sm:$0xff] %v233_v18  ;;  %236 = vst [vmem:[%s1453_s29 + $0x98] sm:$0xff] %v235_v19  ;;  %v239_v21 = vld [vmem:[%s1448_s28 + $0x148] sm:$0xff] }
  0x20   : > { %238 = vst [vmem:[%s1453_s29 + $0xa0] sm:$0xff] %v237_v20  ;;  %v241_v22 = vld [vmem:[%s1448_s28 + $0x160] sm:$0xff]  ;;  %v243_v23 = vld [vmem:[%s1448_s28 + $0x168] sm:$0xff]  ;;  %240 = vst [vmem:[%s1453_s29 + $0xa8] sm:$0xff] %v239_v21 }
  0x21   : > { %242 = vst [vmem:[%s1453_s29 + $0xb0] sm:$0xff] %v241_v22  ;;  %244 = vst [vmem:[%s1453_s29 + $0xb8] sm:$0xff] %v243_v23  ;;  %v245_v24 = vld [vmem:[%s1448_s28 + $0x180] sm:$0xff]  ;;  %v247_v25 = vld [vmem:[%s1448_s28 + $0x188] sm:$0xff] }
  0x22   : > { %v249_v26 = vld [vmem:[%s1448_s28 + $0x1a0] sm:$0xff]  ;;  %246 = vst [vmem:[%s1453_s29 + $0xc0] sm:$0xff] %v245_v24  ;;  %248 = vst [vmem:[%s1453_s29 + $0xc8] sm:$0xff] %v247_v25  ;;  %v251_v27 = vld [vmem:[%s1448_s28 + $0x1a8] sm:$0xff] }
  0x23   : > { %250 = vst [vmem:[%s1453_s29 + $0xd0] sm:$0xff] %v249_v26  ;;  %v253_v28 = vld [vmem:[%s1448_s28 + $0x1c0] sm:$0xff]  ;;  %v255_v29 = vld [vmem:[%s1448_s28 + $0x1c8] sm:$0xff]  ;;  %252 = vst [vmem:[%s1453_s29 + $0xd8] sm:$0xff] %v251_v27 }
  0x24   : > { %254 = vst [vmem:[%s1453_s29 + $0xe0] sm:$0xff] %v253_v28  ;;  %256 = vst [vmem:[%s1453_s29 + $0xe8] sm:$0xff] %v255_v29  ;;  %v257_v30 = vld [vmem:[%s1448_s28 + $0x1e0] sm:$0xff]  ;;  %v259_v31 = vld [vmem:[%s1448_s28 + $0x1e8] sm:$0xff] }
  0x25   : > { %v261_v32 = vld [vmem:[%s1448_s28 + $0x200] sm:$0xff]  ;;  %258 = vst [vmem:[%s1453_s29 + $0xf0] sm:$0xff] %v257_v30  ;;  %260 = vst [vmem:[%s1453_s29 + $0xf8] sm:$0xff] %v259_v31  ;;  %v263_v33 = vld [vmem:[%s1448_s28 + $0x208] sm:$0xff] }
  0x26   : > { %262 = vst [vmem:[%s1453_s29 + $0x100] sm:$0xff] %v261_v32  ;;  %v265_v34 = vld [vmem:[%s1448_s28 + $0x220] sm:$0xff]  ;;  %v267_v35 = vld [vmem:[%s1448_s28 + $0x228] sm:$0xff]  ;;  %264 = vst [vmem:[%s1453_s29 + $0x108] sm:$0xff] %v263_v33 }
  0x27   : > { %266 = vst [vmem:[%s1453_s29 + $0x110] sm:$0xff] %v265_v34  ;;  %268 = vst [vmem:[%s1453_s29 + $0x118] sm:$0xff] %v267_v35  ;;  %v269_v36 = vld [vmem:[%s1448_s28 + $0x240] sm:$0xff]  ;;  %v271_v37 = vld [vmem:[%s1448_s28 + $0x248] sm:$0xff] }
  0x28   : > { %v273_v38 = vld [vmem:[%s1448_s28 + $0x260] sm:$0xff]  ;;  %270 = vst [vmem:[%s1453_s29 + $0x120] sm:$0xff] %v269_v36  ;;  %272 = vst [vmem:[%s1453_s29 + $0x128] sm:$0xff] %v271_v37  ;;  %v275_v39 = vld [vmem:[%s1448_s28 + $0x268] sm:$0xff] }
  0x29   : > { %274 = vst [vmem:[%s1453_s29 + $0x130] sm:$0xff] %v273_v38  ;;  %v277_v40 = vld [vmem:[%s1448_s28 + $0x280] sm:$0xff]  ;;  %v279_v41 = vld [vmem:[%s1448_s28 + $0x288] sm:$0xff]  ;;  %276 = vst [vmem:[%s1453_s29 + $0x138] sm:$0xff] %v275_v39 }
  0x2a   : > { %278 = vst [vmem:[%s1453_s29 + $0x140] sm:$0xff] %v277_v40  ;;  %280 = vst [vmem:[%s1453_s29 + $0x148] sm:$0xff] %v279_v41  ;;  %v281_v42 = vld [vmem:[%s1448_s28 + $0x2a0] sm:$0xff]  ;;  %v283_v43 = vld [vmem:[%s1448_s28 + $0x2a8] sm:$0xff] }
  0x2b   : > { %v285_v44 = vld [vmem:[%s1448_s28 + $0x2c0] sm:$0xff]  ;;  %282 = vst [vmem:[%s1453_s29 + $0x150] sm:$0xff] %v281_v42  ;;  %284 = vst [vmem:[%s1453_s29 + $0x158] sm:$0xff] %v283_v43  ;;  %v287_v45 = vld [vmem:[%s1448_s28 + $0x2c8] sm:$0xff] }
  0x2c   : > { %286 = vst [vmem:[%s1453_s29 + $0x160] sm:$0xff] %v285_v44  ;;  %v289_v46 = vld [vmem:[%s1448_s28 + $0x2e0] sm:$0xff]  ;;  %v291_v47 = vld [vmem:[%s1448_s28 + $0x2e8] sm:$0xff]  ;;  %288 = vst [vmem:[%s1453_s29 + $0x168] sm:$0xff] %v287_v45 }
  0x2d   : > { %290 = vst [vmem:[%s1453_s29 + $0x170] sm:$0xff] %v289_v46  ;;  %292 = vst [vmem:[%s1453_s29 + $0x178] sm:$0xff] %v291_v47  ;;  %v293_v48 = vld [vmem:[%s1448_s28 + $0x300] sm:$0xff]  ;;  %v295_v49 = vld [vmem:[%s1448_s28 + $0x308] sm:$0xff] }
  0x2e   : > { %v297_v50 = vld [vmem:[%s1448_s28 + $0x320] sm:$0xff]  ;;  %294 = vst [vmem:[%s1453_s29 + $0x180] sm:$0xff] %v293_v48  ;;  %296 = vst [vmem:[%s1453_s29 + $0x188] sm:$0xff] %v295_v49  ;;  %v299_v51 = vld [vmem:[%s1448_s28 + $0x328] sm:$0xff] }
  0x2f   : > { %298 = vst [vmem:[%s1453_s29 + $0x190] sm:$0xff] %v297_v50  ;;  %v301_v52 = vld [vmem:[%s1448_s28 + $0x340] sm:$0xff]  ;;  %v303_v53 = vld [vmem:[%s1448_s28 + $0x348] sm:$0xff]  ;;  %300 = vst [vmem:[%s1453_s29 + $0x198] sm:$0xff] %v299_v51 }
  0x30   : > { %302 = vst [vmem:[%s1453_s29 + $0x1a0] sm:$0xff] %v301_v52  ;;  %304 = vst [vmem:[%s1453_s29 + $0x1a8] sm:$0xff] %v303_v53  ;;  %v305_v54 = vld [vmem:[%s1448_s28 + $0x360] sm:$0xff]  ;;  %v307_v55 = vld [vmem:[%s1448_s28 + $0x368] sm:$0xff] }
  0x31   : > { %v309_v56 = vld [vmem:[%s1448_s28 + $0x380] sm:$0xff]  ;;  %306 = vst [vmem:[%s1453_s29 + $0x1b0] sm:$0xff] %v305_v54  ;;  %308 = vst [vmem:[%s1453_s29 + $0x1b8] sm:$0xff] %v307_v55  ;;  %v311_v57 = vld [vmem:[%s1448_s28 + $0x388] sm:$0xff] }
  0x32   : > { %310 = vst [vmem:[%s1453_s29 + $0x1c0] sm:$0xff] %v309_v56  ;;  %v313_v58 = vld [vmem:[%s1448_s28 + $0x3a0] sm:$0xff]  ;;  %v315_v59 = vld [vmem:[%s1448_s28 + $0x3a8] sm:$0xff]  ;;  %312 = vst [vmem:[%s1453_s29 + $0x1c8] sm:$0xff] %v311_v57 }
  0x33   : > { %314 = vst [vmem:[%s1453_s29 + $0x1d0] sm:$0xff] %v313_v58  ;;  %316 = vst [vmem:[%s1453_s29 + $0x1d8] sm:$0xff] %v315_v59  ;;  %v317_v60 = vld [vmem:[%s1448_s28 + $0x3c0] sm:$0xff]  ;;  %v319_v61 = vld [vmem:[%s1448_s28 + $0x3c8] sm:$0xff] }
  0x34   : > { %v321_v62 = vld [vmem:[%s1448_s28 + $0x3e0] sm:$0xff]  ;;  %318 = vst [vmem:[%s1453_s29 + $0x1e0] sm:$0xff] %v317_v60  ;;  %320 = vst [vmem:[%s1453_s29 + $0x1e8] sm:$0xff] %v319_v61  ;;  %v323_v63 = vld [vmem:[%s1448_s28 + $0x3e8] sm:$0xff] }
  0x35   : > { %322 = vst [vmem:[%s1453_s29 + $0x1f0] sm:$0xff] %v321_v62  ;;  %324 = vst [vmem:[%s1453_s29 + $0x1f8] sm:$0xff] %v323_v63 }
  0x36 PF: > { %p1124_p8 = scmp.ge.s32.totalorder %s1378_s16, 1  ;;  %p337_p9 = scmp.lt.s32.totalorder %s1378_s16, 3 }
  0x38   : > { %p338_p10 = pnand %p1124_p8, %p337_p9 }
  0x39   : > { %s344_s30 = sand.u32 (!%p338_p10), 1, %s1362_s12   ;;  %v1339_v0 = vld [vmem:[%s1702_s0 + $0x4] ss:$8 sps:$4 sm:$0xff] (!%p338_p10)   ;;  %s1127_s10 = sshll.u32 (!%p338_p10), %s1370_s14, 2 }
  0x3a   : > { %341 = sbr.rel (%p338_p10) target bundleno = 351 (0x15f), region = 51  ;;  %s1125_s4 = sshll.u32 (!%p338_p10), %s344_s30, 9  ;;  %849 = vmatprep.mubr.bf16.mxu0 (!%p338_p10), %v1339_v0  ;;  %892 = vmatprep.mubr.bf16.mxu1 (!%p338_p10), %v1339_v0 }
  0x3b   : > { %s1588_s7 = scalar_lea.vmem (!%p338_p10), [#allocation3], %s1125_s4  ;;  %p395_p11 = scmp.lt.s32.totalorder (!%p338_p10), %s1127_s10, 7 }
  0x3c   : > { %v1241_v1 = vld [vmem:[%s1588_s7 + $0x4] ss:$16 sps:$4 sm:$0xff] (!%p338_p10)   ;;  %v1243_v2 = vld [vmem:[%s1588_s7 + $0xc] ss:$16 sps:$4 sm:$0xff] (!%p338_p10)   ;;  %v1245_v3 = vld [vmem:[%s1588_s7] ss:$16 sps:$4 sm:$0xff] (!%p338_p10)  }
  0x3d   : > { %817 = vmatprep.subr.bf16.mxu0 (!%p338_p10), %v1241_v1  ;;  %v1246_v4 = vld [vmem:[%s1588_s7 + $0x8] ss:$16 sps:$4 sm:$0xff] (!%p338_p10)   ;;  %860 = vmatprep.subr.bf16.mxu1 (!%p338_p10), %v1243_v2  ;;  %v1247_v5 = vld [vmem:[%s1588_s7 + $0x24] ss:$16 sps:$4 sm:$0xff] (!%p338_p10)   ;;  %v1249_v6 = vld [vmem:[%s1588_s7 + $0x2c] ss:$16 sps:$4 sm:$0xff] (!%p338_p10)   ;;  %v932_v2 = vlaneseq (!%p338_p10) }
  0x3e   : > { %818 = vmatpush1.bf16.msra.mxu0 (!%p338_p10), %v1245_v3  ;;  %861 = vmatpush1.bf16.msra.mxu1 (!%p338_p10), %v1246_v4  ;;  %v1251_v7 = vld [vmem:[%s1588_s7 + $0x20] ss:$16 sps:$4 sm:$0xff] (!%p338_p10)   ;;  %v1252_v8 = vld [vmem:[%s1588_s7 + $0x28] ss:$16 sps:$4 sm:$0xff] (!%p338_p10)   ;;  %v1253_v9 = vld [vmem:[%s1588_s7 + $0x44] ss:$16 sps:$4 sm:$0xff] (!%p338_p10)  }
  0x3f   : > { %819 = vmatprep.subr.bf16.mxu0 (!%p338_p10), %v1247_v5  ;;  %862 = vmatprep.subr.bf16.mxu1 (!%p338_p10), %v1249_v6  ;;  %v1255_v10 = vld [vmem:[%s1588_s7 + $0x4c] ss:$16 sps:$4 sm:$0xff] (!%p338_p10)   ;;  %v1257_v11 = vld [vmem:[%s1588_s7 + $0x40] ss:$16 sps:$4 sm:$0xff] (!%p338_p10)   ;;  %v1258_v12 = vld [vmem:[%s1588_s7 + $0x48] ss:$16 sps:$4 sm:$0xff] (!%p338_p10)  }
  0x40   : > { %v1259_v13 = vld [vmem:[%s1588_s7 + $0x64] ss:$16 sps:$4 sm:$0xff] (!%p338_p10)   ;;  %v1261_v14 = vld [vmem:[%s1588_s7 + $0x6c] ss:$16 sps:$4 sm:$0xff] (!%p338_p10)   ;;  %v1263_v15 = vld [vmem:[%s1588_s7 + $0x60] ss:$16 sps:$4 sm:$0xff] (!%p338_p10)  }
  0x41   : > { %v1264_v16 = vld [vmem:[%s1588_s7 + $0x68] ss:$16 sps:$4 sm:$0xff]   ;;  %v1265_v17 = vld [vmem:[%s1588_s7 + $0x84] ss:$16 sps:$4 sm:$0xff]   ;;  %v1267_v18 = vld [vmem:[%s1588_s7 + $0x8c] ss:$16 sps:$4 sm:$0xff]  }
  0x42   : > { %820 = vmatpush1.bf16.msra.mxu0 %v1251_v7  ;;  %863 = vmatpush1.bf16.msra.mxu1 %v1252_v8  ;;  %v1269_v19 = vld [vmem:[%s1588_s7 + $0x80] ss:$16 sps:$4 sm:$0xff]   ;;  %v1270_v20 = vld [vmem:[%s1588_s7 + $0x88] ss:$16 sps:$4 sm:$0xff]   ;;  %v1271_v21 = vld [vmem:[%s1588_s7 + $0xa4] ss:$16 sps:$4 sm:$0xff]  }
  0x43   : > { %821 = vmatprep.subr.bf16.mxu0 %v1253_v9  ;;  %864 = vmatprep.subr.bf16.mxu1 %v1255_v10  ;;  %v1273_v22 = vld [vmem:[%s1588_s7 + $0xac] ss:$16 sps:$4 sm:$0xff]   ;;  %v1275_v23 = vld [vmem:[%s1588_s7 + $0xa0] ss:$16 sps:$4 sm:$0xff]   ;;  %v1276_v24 = vld [vmem:[%s1588_s7 + $0xa8] ss:$16 sps:$4 sm:$0xff]  }
  0x44   : > { %v1277_v25 = vld [vmem:[%s1588_s7 + $0xc4] ss:$16 sps:$4 sm:$0xff]   ;;  %v1279_v26 = vld [vmem:[%s1588_s7 + $0xcc] ss:$16 sps:$4 sm:$0xff]   ;;  %v1281_v27 = vld [vmem:[%s1588_s7 + $0xc0] ss:$16 sps:$4 sm:$0xff]  }
  0x45   : > { %v1282_v28 = vld [vmem:[%s1588_s7 + $0xc8] ss:$16 sps:$4 sm:$0xff]   ;;  %v1283_v29 = vld [vmem:[%s1588_s7 + $0xe4] ss:$16 sps:$4 sm:$0xff]   ;;  %v1285_v30 = vld [vmem:[%s1588_s7 + $0xec] ss:$16 sps:$4 sm:$0xff]  }
  0x46   : > { %822 = vmatpush1.bf16.msra.mxu0 %v1257_v11  ;;  %865 = vmatpush1.bf16.msra.mxu1 %v1258_v12  ;;  %v1287_v31 = vld [vmem:[%s1588_s7 + $0xe0] ss:$16 sps:$4 sm:$0xff]   ;;  %v1288_v32 = vld [vmem:[%s1588_s7 + $0xe8] ss:$16 sps:$4 sm:$0xff]   ;;  %v1289_v33 = vld [vmem:[%s1588_s7 + $0x104] ss:$16 sps:$4 sm:$0xff]  }
  0x47   : > { %823 = vmatprep.subr.bf16.mxu0 %v1259_v13  ;;  %866 = vmatprep.subr.bf16.mxu1 %v1261_v14  ;;  %v1291_v34 = vld [vmem:[%s1588_s7 + $0x10c] ss:$16 sps:$4 sm:$0xff]   ;;  %v1293_v35 = vld [vmem:[%s1588_s7 + $0x100] ss:$16 sps:$4 sm:$0xff]   ;;  %v1294_v36 = vld [vmem:[%s1588_s7 + $0x108] ss:$16 sps:$4 sm:$0xff]  }
  0x48   : > { %v1295_v37 = vld [vmem:[%s1588_s7 + $0x124] ss:$16 sps:$4 sm:$0xff]   ;;  %v1297_v38 = vld [vmem:[%s1588_s7 + $0x12c] ss:$16 sps:$4 sm:$0xff]   ;;  %v1299_v39 = vld [vmem:[%s1588_s7 + $0x120] ss:$16 sps:$4 sm:$0xff]  }
  0x49   : > { %v1300_v40 = vld [vmem:[%s1588_s7 + $0x128] ss:$16 sps:$4 sm:$0xff]   ;;  %v1301_v41 = vld [vmem:[%s1588_s7 + $0x144] ss:$16 sps:$4 sm:$0xff]   ;;  %v1303_v42 = vld [vmem:[%s1588_s7 + $0x14c] ss:$16 sps:$4 sm:$0xff]  }
  0x4a   : > { %824 = vmatpush1.bf16.msra.mxu0 %v1263_v15  ;;  %867 = vmatpush1.bf16.msra.mxu1 %v1264_v16  ;;  %v1305_v43 = vld [vmem:[%s1588_s7 + $0x140] ss:$16 sps:$4 sm:$0xff]   ;;  %v1306_v44 = vld [vmem:[%s1588_s7 + $0x148] ss:$16 sps:$4 sm:$0xff]   ;;  %v1307_v45 = vld [vmem:[%s1588_s7 + $0x164] ss:$16 sps:$4 sm:$0xff]  }
  0x4b   : > { %825 = vmatprep.subr.bf16.mxu0 %v1265_v17  ;;  %868 = vmatprep.subr.bf16.mxu1 %v1267_v18  ;;  %v1309_v46 = vld [vmem:[%s1588_s7 + $0x16c] ss:$16 sps:$4 sm:$0xff]   ;;  %v1311_v47 = vld [vmem:[%s1588_s7 + $0x160] ss:$16 sps:$4 sm:$0xff]   ;;  %v1312_v48 = vld [vmem:[%s1588_s7 + $0x168] ss:$16 sps:$4 sm:$0xff]  }
  0x4c   : > { %v1313_v49 = vld [vmem:[%s1588_s7 + $0x184] ss:$16 sps:$4 sm:$0xff]   ;;  %v1315_v50 = vld [vmem:[%s1588_s7 + $0x18c] ss:$16 sps:$4 sm:$0xff]   ;;  %v1317_v51 = vld [vmem:[%s1588_s7 + $0x180] ss:$16 sps:$4 sm:$0xff]  }
  0x4d   : > { %v1318_v52 = vld [vmem:[%s1588_s7 + $0x188] ss:$16 sps:$4 sm:$0xff]   ;;  %v1319_v53 = vld [vmem:[%s1588_s7 + $0x1a4] ss:$16 sps:$4 sm:$0xff]   ;;  %v1321_v54 = vld [vmem:[%s1588_s7 + $0x1ac] ss:$16 sps:$4 sm:$0xff]  }
  0x4e   : > { %826 = vmatpush1.bf16.msra.mxu0 %v1269_v19  ;;  %869 = vmatpush1.bf16.msra.mxu1 %v1270_v20  ;;  %v1323_v55 = vld [vmem:[%s1588_s7 + $0x1a0] ss:$16 sps:$4 sm:$0xff]   ;;  %v1324_v56 = vld [vmem:[%s1588_s7 + $0x1a8] ss:$16 sps:$4 sm:$0xff]   ;;  %v1325_v57 = vld [vmem:[%s1588_s7 + $0x1c4] ss:$16 sps:$4 sm:$0xff]  }
  0x4f   : > { %827 = vmatprep.subr.bf16.mxu0 %v1271_v21  ;;  %870 = vmatprep.subr.bf16.mxu1 %v1273_v22  ;;  %v1327_v58 = vld [vmem:[%s1588_s7 + $0x1cc] ss:$16 sps:$4 sm:$0xff]   ;;  %v1329_v59 = vld [vmem:[%s1588_s7 + $0x1c0] ss:$16 sps:$4 sm:$0xff]   ;;  %v1330_v60 = vld [vmem:[%s1588_s7 + $0x1c8] ss:$16 sps:$4 sm:$0xff]  }
  0x50   : > { %v1331_v61 = vld [vmem:[%s1588_s7 + $0x1e4] ss:$16 sps:$4 sm:$0xff]   ;;  %v1333_v62 = vld [vmem:[%s1588_s7 + $0x1ec] ss:$16 sps:$4 sm:$0xff]   ;;  %v1335_v63 = vld [vmem:[%s1588_s7 + $0x1e0] ss:$16 sps:$4 sm:$0xff]  }
  0x51   : > { %v1336_v0 = vld [vmem:[%s1588_s7 + $0x1e8] ss:$16 sps:$4 sm:$0xff]   ;;  %s1714_s10 = smov (!%p395_p11, %s1127_s10), 7  ;;  %v933_v3 = vshrl.u32 %v932_v2, 7  ;;  %s1126_s20 = sshll.u32 %s344_s30, 6 }
  0x52   : > { %828 = vmatpush1.bf16.msra.mxu0 %v1275_v23  ;;  %871 = vmatpush1.bf16.msra.mxu1 %v1276_v24  ;;  %v1337_v1 = vld [vmem:[%s1702_s0] ss:$8 sps:$4 sm:$0xff]   ;;  %s397_s19 = scalar_lea.vmem %s1704_s2, %s1714_s10  ;;  %s1663_s23 = scalar_lea.vmem [#allocation4], %s1126_s20 }
  0x53   : > { %829 = vmatprep.subr.bf16.mxu0 %v1277_v25  ;;  %872 = vmatprep.subr.bf16.mxu1 %v1279_v26  ;;  %v934_v4 = vsub.s32 0, %v933_v3  ;;  %v942_v5 = vsub.s32 2, %v933_v3  ;;  %v930_v6 = vld [vmem:[%s397_s19] sm:$0xf]  ;;  %v938_v7 = vsub.s32 1, %v933_v3  ;;  %v946_v8 = vsub.s32 3, %v933_v3 }
  0x54   : > { %s1200_s12 = sshll.u32 (%p1435_p6), %s1370_s14, 5 }
  0x55   : > { %v935_v9 = vrot.slane %v930_v6, %v934_v4  ;;  %v943_v10 = vrot.slane %v930_v6, %v942_v5  ;;  %v939_v11 = vrot.slane %v930_v6, %v938_v7  ;;  %v947_v12 = vrot.slane %v930_v6, %v946_v8  ;;  %s980_s26 = scalar_lea.vmem (%p1435_p6), %s1705_s3, %s1200_s12 }
  0x56   : > { %830 = vmatpush1.bf16.msra.mxu0 %v1281_v27  ;;  %873 = vmatpush1.bf16.msra.mxu1 %v1282_v28 }
  0x57   : > { %831 = vmatprep.subr.bf16.mxu0 %v1283_v29  ;;  %874 = vmatprep.subr.bf16.mxu1 %v1285_v30 }
  0x5a   : > { %832 = vmatpush1.bf16.msra.mxu0 %v1287_v31  ;;  %875 = vmatpush1.bf16.msra.mxu1 %v1288_v32 }
  0x5b   : > { %833 = vmatprep.subr.bf16.mxu0 %v1289_v33  ;;  %876 = vmatprep.subr.bf16.mxu1 %v1291_v34 }
  0x5e   : > { %834 = vmatpush1.bf16.msra.mxu0 %v1293_v35  ;;  %877 = vmatpush1.bf16.msra.mxu1 %v1294_v36 }
  0x5f   : > { %835 = vmatprep.subr.bf16.mxu0 %v1295_v37  ;;  %878 = vmatprep.subr.bf16.mxu1 %v1297_v38 }
  0x62   : > { %836 = vmatpush1.bf16.msra.mxu0 %v1299_v39  ;;  %879 = vmatpush1.bf16.msra.mxu1 %v1300_v40 }
  0x63   : > { %837 = vmatprep.subr.bf16.mxu0 %v1301_v41  ;;  %880 = vmatprep.subr.bf16.mxu1 %v1303_v42 }
  0x66   : > { %838 = vmatpush1.bf16.msra.mxu0 %v1305_v43  ;;  %881 = vmatpush1.bf16.msra.mxu1 %v1306_v44 }
  0x67   : > { %839 = vmatprep.subr.bf16.mxu0 %v1307_v45  ;;  %882 = vmatprep.subr.bf16.mxu1 %v1309_v46 }
  0x6a   : > { %840 = vmatpush1.bf16.msra.mxu0 %v1311_v47  ;;  %883 = vmatpush1.bf16.msra.mxu1 %v1312_v48 }
  0x6b   : > { %841 = vmatprep.subr.bf16.mxu0 %v1313_v49  ;;  %884 = vmatprep.subr.bf16.mxu1 %v1315_v50 }
  0x6e   : > { %842 = vmatpush1.bf16.msra.mxu0 %v1317_v51  ;;  %885 = vmatpush1.bf16.msra.mxu1 %v1318_v52 }
  0x6f   : > { %843 = vmatprep.subr.bf16.mxu0 %v1319_v53  ;;  %886 = vmatprep.subr.bf16.mxu1 %v1321_v54 }
  0x72   : > { %844 = vmatpush1.bf16.msra.mxu0 %v1323_v55  ;;  %887 = vmatpush1.bf16.msra.mxu1 %v1324_v56 }
  0x73   : > { %845 = vmatprep.subr.bf16.mxu0 %v1325_v57  ;;  %888 = vmatprep.subr.bf16.mxu1 %v1327_v58 }
  0x76   : > { %846 = vmatpush1.bf16.msra.mxu0 %v1329_v59  ;;  %889 = vmatpush1.bf16.msra.mxu1 %v1330_v60 }
  0x77   : > { %847 = vmatprep.subr.bf16.mxu0 %v1331_v61  ;;  %890 = vmatprep.subr.bf16.mxu1 %v1333_v62 }
  0x7a   : > { %848 = vmatpush1.bf16.msra.mxu0 %v1335_v63  ;;  %891 = vmatpush1.bf16.msra.mxu1 %v1336_v0 }
  0x7d   : > { %850 = vmatmul.mubr.bf16.vlgmr.msra.gmra.mrb[0].mxu0 %v1337_v1  ;;  %893 = vmatmul.mubr.bf16.vlgmr.msra.gmra.mrb[0].mxu1 %v1337_v1 }
 0x150   : > { %v851_v13 = vpop.f32.mrb[0].mxu0  ;;  %v894_v14 = vpop.f32.mrb[0].mxu1  ;;  %974 = sbr.rel (!%p1435_p6) target bundleno = 351 (0x15f), region = 67 }
 0x151   : > { %v952_v15 = vadd.f32 %v935_v9, %v851_v13  ;;  %v954_v16 = vadd.f32 %v943_v10, %v894_v14  ;;  %v853_v17 = vpop.f32.mrb[1].mxu0  ;;  %v896_v18 = vpop.f32.mrb[1].mxu1 }
 0x152   : > { %v953_v19 = vadd.f32 %v939_v11, %v853_v17  ;;  %v955_v20 = vadd.f32 %v947_v12, %v896_v18  ;;  %v855_v21 = vpop.f32.mrb[2].mxu0  ;;  %v898_v22 = vpop.f32.mrb[2].mxu1 }
 0x153   : > { %960 = vst [vmem:[%s1663_s23] sm:$0xff] %v952_v15  ;;  %962 = vst [vmem:[%s1663_s23 + $0x10] sm:$0xff] %v954_v16  ;;  %v956_v23 = vadd.f32 %v935_v9, %v855_v21  ;;  %v958_v24 = vadd.f32 %v943_v10, %v898_v22  ;;  %v857_v25 = vpop.f32.mrb[3].mxu0  ;;  %v900_v26 = vpop.f32.mrb[3].mxu1 }
 0x154   : > { %961 = vst [vmem:[%s1663_s23 + $0x8] sm:$0xff] %v953_v19  ;;  %963 = vst [vmem:[%s1663_s23 + $0x18] sm:$0xff] %v955_v20  ;;  %v957_v27 = vadd.f32 %v939_v11, %v857_v25  ;;  %v959_v28 = vadd.f32 %v947_v12, %v900_v26 }
 0x155   : > { %964 = vst [vmem:[%s1663_s23 + $0x20] sm:$0xff] %v956_v23  ;;  %966 = vst [vmem:[%s1663_s23 + $0x30] sm:$0xff] %v958_v24 }
 0x156   : > { %965 = vst [vmem:[%s1663_s23 + $0x28] sm:$0xff] %v957_v27  ;;  %967 = vst [vmem:[%s1663_s23 + $0x38] sm:$0xff] %v959_v28 }
 0x15a   : > { %v993_v29 = vld [vmem:[%s1663_s23] sm:$0xff]  ;;  %v997_v31 = vld [vmem:[%s1663_s23 + $0x10] sm:$0xff] }
 0x15b   : > { %v995_v30 = vld [vmem:[%s1663_s23 + $0x8] sm:$0xff]  ;;  %v999_v32 = vld [vmem:[%s1663_s23 + $0x18] sm:$0xff]  ;;  %994 = vst [vmem:[%s980_s26] sm:$0xff] %v993_v29  ;;  %998 = vst [vmem:[%s980_s26 + $0x10] sm:$0xff] %v997_v31 }
 0x15c   : > { %v1001_v33 = vld [vmem:[%s1663_s23 + $0x20] sm:$0xff]  ;;  %996 = vst [vmem:[%s980_s26 + $0x8] sm:$0xff] %v995_v30  ;;  %1000 = vst [vmem:[%s980_s26 + $0x18] sm:$0xff] %v999_v32  ;;  %v1005_v35 = vld [vmem:[%s1663_s23 + $0x30] sm:$0xff] }
 0x15d   : > { %v1003_v34 = vld [vmem:[%s1663_s23 + $0x28] sm:$0xff]  ;;  %1002 = vst [vmem:[%s980_s26 + $0x40] sm:$0xff] %v1001_v33  ;;  %v1007_v36 = vld [vmem:[%s1663_s23 + $0x38] sm:$0xff]  ;;  %1006 = vst [vmem:[%s980_s26 + $0x50] sm:$0xff] %v1005_v35 }
 0x15e   : > { %1004 = vst [vmem:[%s980_s26 + $0x48] sm:$0xff] %v1003_v34  ;;  %1008 = vst [vmem:[%s980_s26 + $0x58] sm:$0xff] %v1007_v36 }
 0x15f PF: > { %s13_s16 = sadd.s32 1, %s1378_s16   ;;  %s1707_s12 = smov %s1366_s13 }
 0x160   : > { %p10_p12 = scmp.ge.s32.totalorder %s13_s16, 4   ;;  %s1708_s13 = smov %s1440_s22 }
 0x161   : > { %s1709_s14 = smov %s1374_s15  ;;  %s1710_s15 = smov %s1712_s17 }
 0x162   :  { %12 = sbr.rel (!%p10_p12) target bundleno = 3 (0x3), region = 127 }

// kernel: skull_unet_transformer_forward.34
= control target key start
LH: loop header
LB: loop body
LE: loop exit
PB: predicated region body
PF: predicated region fallthrough
CT: control target
= control target key end

     0   :  { %v290_v34 = vlaneseq  ;;  %s534_s1 = inlined_call_operand.vmem [shape: bf16[256,256], index: 1, kind: input, shape index: {}]   ;;  %s535_s0 = inlined_call_operand.vmem [shape: bf16[16,256], index: 0, kind: input, shape index: {}]   ;;  %s536_s2 = inlined_call_operand.vmem [shape: f32[1,256], index: 2, kind: input, shape index: {}]   ;;  %s537_s3 = inlined_call_operand.vmem [shape: f32[16,256], index: 3, kind: output, shape index: {}]  }
   0x1   :  { %v346_v0 = vld [vmem:[%s534_s1 + $0x4] ss:$8 sps:$4 sm:$0xff]   ;;  %v348_v1 = vld [vmem:[%s534_s1] ss:$8 sps:$4 sm:$0xff]   ;;  %v349_v2 = vld [vmem:[%s534_s1 + $0x14] ss:$8 sps:$4 sm:$0xff]  }
   0x2   :  { %230 = vmatprep.subr.bf16.mxu0 %v346_v0  ;;  %v351_v3 = vld [vmem:[%s534_s1 + $0x10] ss:$8 sps:$4 sm:$0xff]   ;;  %v352_v4 = vld [vmem:[%s534_s1 + $0x24] ss:$8 sps:$4 sm:$0xff]   ;;  %v354_v5 = vld [vmem:[%s534_s1 + $0x20] ss:$8 sps:$4 sm:$0xff]  }
   0x3   :  { %231 = vmatpush1.bf16.msra.mxu0 %v348_v1  ;;  %v355_v6 = vld [vmem:[%s534_s1 + $0x34] ss:$8 sps:$4 sm:$0xff]   ;;  %v357_v7 = vld [vmem:[%s534_s1 + $0x30] ss:$8 sps:$4 sm:$0xff]   ;;  %v358_v8 = vld [vmem:[%s534_s1 + $0x44] ss:$8 sps:$4 sm:$0xff]  }
   0x4   :  { %232 = vmatprep.subr.bf16.mxu0 %v349_v2  ;;  %v360_v9 = vld [vmem:[%s534_s1 + $0x40] ss:$8 sps:$4 sm:$0xff]   ;;  %v361_v10 = vld [vmem:[%s534_s1 + $0x54] ss:$8 sps:$4 sm:$0xff]   ;;  %v363_v11 = vld [vmem:[%s534_s1 + $0x50] ss:$8 sps:$4 sm:$0xff]  }
   0x5   :  { %v364_v12 = vld [vmem:[%s534_s1 + $0x64] ss:$8 sps:$4 sm:$0xff]   ;;  %v366_v14 = vld [vmem:[%s534_s1 + $0x60] ss:$8 sps:$4 sm:$0xff]   ;;  %v367_v15 = vld [vmem:[%s534_s1 + $0x74] ss:$8 sps:$4 sm:$0xff]  }
   0x6   :  { %v396_v13 = vld [vmem:[%s535_s0 + $0x4] ss:$8 sps:$4 sm:$0xff]   ;;  %v369_v16 = vld [vmem:[%s534_s1 + $0x70] ss:$8 sps:$4 sm:$0xff]   ;;  %v372_v18 = vld [vmem:[%s534_s1 + $0x80] ss:$8 sps:$4 sm:$0xff]  }
   0x7   :  { %233 = vmatpush1.bf16.msra.mxu0 %v351_v3  ;;  %262 = vmatprep.mubr.bf16.mxu0 %v396_v13  ;;  %v370_v17 = vld [vmem:[%s534_s1 + $0x84] ss:$8 sps:$4 sm:$0xff]   ;;  %v373_v19 = vld [vmem:[%s534_s1 + $0x94] ss:$8 sps:$4 sm:$0xff]   ;;  %v375_v20 = vld [vmem:[%s534_s1 + $0x90] ss:$8 sps:$4 sm:$0xff]  }
   0x8   :  { %234 = vmatprep.subr.bf16.mxu0 %v352_v4  ;;  %v376_v21 = vld [vmem:[%s534_s1 + $0xa4] ss:$8 sps:$4 sm:$0xff]   ;;  %v378_v22 = vld [vmem:[%s534_s1 + $0xa0] ss:$8 sps:$4 sm:$0xff]   ;;  %v379_v23 = vld [vmem:[%s534_s1 + $0xb4] ss:$8 sps:$4 sm:$0xff]  }
   0x9   :  { %v381_v24 = vld [vmem:[%s534_s1 + $0xb0] ss:$8 sps:$4 sm:$0xff]   ;;  %v382_v25 = vld [vmem:[%s534_s1 + $0xc4] ss:$8 sps:$4 sm:$0xff]   ;;  %v384_v26 = vld [vmem:[%s534_s1 + $0xc0] ss:$8 sps:$4 sm:$0xff]  }
   0xa   :  { %v385_v27 = vld [vmem:[%s534_s1 + $0xd4] ss:$8 sps:$4 sm:$0xff]   ;;  %v387_v28 = vld [vmem:[%s534_s1 + $0xd0] ss:$8 sps:$4 sm:$0xff]   ;;  %v388_v29 = vld [vmem:[%s534_s1 + $0xe4] ss:$8 sps:$4 sm:$0xff]  }
   0xb   :  { %235 = vmatpush1.bf16.msra.mxu0 %v354_v5  ;;  %v390_v30 = vld [vmem:[%s534_s1 + $0xe0] ss:$8 sps:$4 sm:$0xff]   ;;  %v391_v31 = vld [vmem:[%s534_s1 + $0xf4] ss:$8 sps:$4 sm:$0xff]   ;;  %v393_v32 = vld [vmem:[%s534_s1 + $0xf0] ss:$8 sps:$4 sm:$0xff]  }
   0xc   :  { %236 = vmatprep.subr.bf16.mxu0 %v355_v6  ;;  %v394_v33 = vld [vmem:[%s535_s0] ss:$8 sps:$4 sm:$0xff]   ;;  %v291_v35 = vshrl.u32 %v290_v34, 7 }
   0xd   :  { %v288_v37 = vld [vmem:[%s536_s2] sm:$0x3] }
   0xe   :  { %v292_v36 = vsub.s32 0, %v291_v35  ;;  %v296_v38 = vsub.s32 1, %v291_v35 }
   0xf   :  { %237 = vmatpush1.bf16.msra.mxu0 %v357_v7 }
  0x10   :  { %238 = vmatprep.subr.bf16.mxu0 %v358_v8  ;;  %v293_v39 = vrot.slane %v288_v37, %v292_v36  ;;  %v297_v40 = vrot.slane %v288_v37, %v296_v38 }
  0x13   :  { %239 = vmatpush1.bf16.msra.mxu0 %v360_v9 }
  0x14   :  { %240 = vmatprep.subr.bf16.mxu0 %v361_v10 }
  0x17   :  { %241 = vmatpush1.bf16.msra.mxu0 %v363_v11 }
  0x18   :  { %242 = vmatprep.subr.bf16.mxu0 %v364_v12 }
  0x1b   :  { %243 = vmatpush1.bf16.msra.mxu0 %v366_v14 }
  0x1c   :  { %244 = vmatprep.subr.bf16.mxu0 %v367_v15 }
  0x1f   :  { %245 = vmatpush1.bf16.msra.mxu0 %v369_v16 }
  0x20   :  { %246 = vmatprep.subr.bf16.mxu0 %v370_v17 }
  0x23   :  { %247 = vmatpush1.bf16.msra.mxu0 %v372_v18 }
  0x24   :  { %248 = vmatprep.subr.bf16.mxu0 %v373_v19 }
  0x27   :  { %249 = vmatpush1.bf16.msra.mxu0 %v375_v20 }
  0x28   :  { %250 = vmatprep.subr.bf16.mxu0 %v376_v21 }
  0x2b   :  { %251 = vmatpush1.bf16.msra.mxu0 %v378_v22 }
  0x2c   :  { %252 = vmatprep.subr.bf16.mxu0 %v379_v23 }
  0x2f   :  { %253 = vmatpush1.bf16.msra.mxu0 %v381_v24 }
  0x30   :  { %254 = vmatprep.subr.bf16.mxu0 %v382_v25 }
  0x33   :  { %255 = vmatpush1.bf16.msra.mxu0 %v384_v26 }
  0x34   :  { %256 = vmatprep.subr.bf16.mxu0 %v385_v27 }
  0x37   :  { %257 = vmatpush1.bf16.msra.mxu0 %v387_v28 }
  0x38   :  { %258 = vmatprep.subr.bf16.mxu0 %v388_v29 }
  0x3b   :  { %259 = vmatpush1.bf16.msra.mxu0 %v390_v30 }
  0x3c   :  { %260 = vmatprep.subr.bf16.mxu0 %v391_v31 }
  0x3f   :  { %261 = vmatpush1.bf16.msra.mxu0 %v393_v32 }
  0x42   :  { %263 = vmatmul.mubr.bf16.vlgmr.msra.gmra.mrb[0].mxu0 %v394_v33 }
 0x115   :  { %v264_v41 = vpop.f32.mrb[0].mxu0 }
 0x116   :  { %v300_v42 = vadd.f32 %v293_v39, %v264_v41  ;;  %v266_v43 = vpop.f32.mrb[1].mxu0 }
 0x117   :  { %v301_v44 = vadd.f32 %v297_v40, %v266_v43  ;;  %v268_v45 = vpop.f32.mrb[2].mxu0 }
 0x118   :  { %304 = vst [vmem:[%s537_s3] sm:$0xff] %v300_v42  ;;  %v302_v46 = vadd.f32 %v293_v39, %v268_v45  ;;  %v270_v47 = vpop.f32.mrb[3].mxu0 }
 0x119   :  { %305 = vst [vmem:[%s537_s3 + $0x8] sm:$0xff] %v301_v44  ;;  %v303_v48 = vadd.f32 %v297_v40, %v270_v47 }
 0x11a   :  { %306 = vst [vmem:[%s537_s3 + $0x10] sm:$0xff] %v302_v46 }
 0x11b   :  { %307 = vst [vmem:[%s537_s3 + $0x18] sm:$0xff] %v303_v48 }

// kernel: skull_unet_transformer_forward.35
= control target key start
LH: loop header
LB: loop body
LE: loop exit
PB: predicated region body
PF: predicated region fallthrough
CT: control target
= control target key end

     0   :  { %v64_v30 = vlaneseq  ;;  %s173_s0 = inlined_call_operand.vmem [shape: f32[16,256], index: 0, kind: input, shape index: {}]   ;;  %s174_s1 = inlined_call_operand.vmem [shape: f32[16,256], index: 1, kind: input, shape index: {}]   ;;  %s175_s2 = inlined_call_operand.vmem [shape: f32[1,256], index: 2, kind: input, shape index: {}]   ;;  %s176_s3 = inlined_call_operand.vmem [shape: f32[1,256], index: 3, kind: input, shape index: {}]   ;;  %s177_s4 = inlined_call_operand.vmem [shape: f32[16,256], index: 4, kind: output, shape index: {}]  }
   0x1   :  { %v17_v0 = vld [vmem:[%s173_s0] sm:$0xff]  ;;  %v18_v1 = vld [vmem:[%s173_s0 + $0x8] sm:$0xff]  ;;  %v19_v5 = vld [vmem:[%s173_s0 + $0x10] sm:$0xff] }
   0x2   :  { %v21_v2 = vld [vmem:[%s174_s1] sm:$0xff]  ;;  %v22_v3 = vld [vmem:[%s174_s1 + $0x8] sm:$0xff]  ;;  %v20_v6 = vld [vmem:[%s173_s0 + $0x18] sm:$0xff]  ;;  %v65_v34 = vshrl.u32 %v64_v30, 7 }
   0x3   :  { %v25_v4 = vadd.f32 %v21_v2, %v17_v0  ;;  %v26_v7 = vadd.f32 %v22_v3, %v18_v1  ;;  %v23_v8 = vld [vmem:[%s174_s1 + $0x10] sm:$0xff]  ;;  %v24_v9 = vld [vmem:[%s174_s1 + $0x18] sm:$0xff]  ;;  %v62_v38 = vld [vmem:[%s175_s2] sm:$0x3] }
   0x4   :  { %v27_v10 = vadd.f32 %v23_v8, %v19_v5  ;;  %v28_v11 = vadd.f32 %v24_v9, %v20_v6  ;;  %v66_v36 = vsub.s32 0, %v65_v34  ;;  %v70_v37 = vsub.s32 1, %v65_v34  ;;  %v78_v39 = vld [vmem:[%s176_s3] sm:$0x3] }
   0x5   :  { %v29_v12 = vadd.f32 %v26_v7, %v25_v4 }
   0x6   :  { %v32_v13 = vadd.f32 %v28_v11, %v27_v10  ;;  %v67_v40 = vrot.slane %v62_v38, %v66_v36  ;;  %v71_v41 = vrot.slane %v62_v38, %v70_v37  ;;  %v83_v43 = vrot.slane %v78_v39, %v66_v36 }
   0x7   :  { %30 = vadd.xlane.f32.xlu0 %v29_v12  ;;  %v87_v44 = vrot.slane %v78_v39, %v70_v37 }
   0xb   :  { %33 = vadd.xlane.f32.xlu0 %v32_v13 }
  0x94   :  { %v31_v14 = vpop.xlane.xlu0 %30 }
  0x95   :  { %v36_v15 = vmul.f32 0.00390625, %v31_v14 }
  0x97   :  { %v38_v16 = vsub.f32 %v25_v4, %v36_v15  ;;  %v39_v17 = vsub.f32 %v26_v7, %v36_v15 }
  0x98   :  { %v34_v18 = vpop.xlane.xlu0 %33 }
  0x99   :  { %v37_v19 = vmul.f32 0.00390625, %v34_v18  ;;  %v42_v20 = vmul.f32 %v38_v16, %v38_v16  ;;  %v43_v21 = vmul.f32 %v39_v17, %v39_v17 }
  0x9b   :  { %v40_v22 = vsub.f32 %v27_v10, %v37_v19  ;;  %v41_v23 = vsub.f32 %v28_v11, %v37_v19  ;;  %v46_v24 = vadd.f32 %v43_v21, %v42_v20 }
  0x9d   :  { %47 = vadd.xlane.f32.xlu1 %v46_v24  ;;  %v44_v25 = vmul.f32 %v40_v22, %v40_v22  ;;  %v45_v26 = vmul.f32 %v41_v23, %v41_v23 }
  0x9f   :  { %v49_v27 = vadd.f32 %v45_v26, %v44_v25 }
  0xa1   :  { %50 = vadd.xlane.f32.xlu1 %v49_v27 }
 0x12a   :  { %v48_v28 = vpop.xlane.xlu1 %47 }
 0x12b   :  { %v52_v29 = vmul.f32 0.00390625, %v48_v28 }
 0x12d   :  { %v54_v31 = vadd.f32 1e-05, %v52_v29 }
 0x12e   :  { %v51_v32 = vpop.xlane.xlu1 %50 }
 0x12f   :  { %102 = vrsqrt.f32 %v54_v31  ;;  %v53_v33 = vmul.f32 0.00390625, %v51_v32 }
 0x131   :  { %v55_v35 = vadd.f32 1e-05, %v53_v33 }
 0x133   :  { %104 = vrsqrt.f32 %v55_v35 }
 0x139   :  { %v103_v42 = vpop.eup %102 }
 0x13a   :  { %v58_v45 = vmul.f32 %v103_v42, %v38_v16  ;;  %v59_v46 = vmul.f32 %v103_v42, %v39_v17 }
 0x13c   :  { %v74_v47 = vmul.f32 %v67_v40, %v58_v45  ;;  %v75_v48 = vmul.f32 %v71_v41, %v59_v46 }
 0x13d   :  { %v105_v49 = vpop.eup %104 }
 0x13e   :  { %v90_v50 = vadd.f32 %v83_v43, %v74_v47  ;;  %v91_v51 = vadd.f32 %v87_v44, %v75_v48  ;;  %v60_v52 = vmul.f32 %v105_v49, %v40_v22  ;;  %v61_v53 = vmul.f32 %v105_v49, %v41_v23 }
 0x140   :  { %94 = vst [vmem:[%s177_s4] sm:$0xff] %v90_v50  ;;  %95 = vst [vmem:[%s177_s4 + $0x8] sm:$0xff] %v91_v51  ;;  %v76_v54 = vmul.f32 %v67_v40, %v60_v52  ;;  %v77_v55 = vmul.f32 %v71_v41, %v61_v53 }
 0x142   :  { %v92_v56 = vadd.f32 %v83_v43, %v76_v54  ;;  %v93_v57 = vadd.f32 %v87_v44, %v77_v55 }
 0x144   :  { %96 = vst [vmem:[%s177_s4 + $0x10] sm:$0xff] %v92_v56  ;;  %97 = vst [vmem:[%s177_s4 + $0x18] sm:$0xff] %v93_v57 }

// kernel: skull_unet_transformer_forward.36
= control target key start
LH: loop header
LB: loop body
LE: loop exit
PB: predicated region body
PF: predicated region fallthrough
CT: control target
= control target key end

     0   :  { %v290_v34 = vlaneseq  ;;  %s538_s1 = inlined_call_operand.vmem [shape: bf16[256,256], index: 1, kind: input, shape index: {}]   ;;  %s539_s0 = inlined_call_operand.vmem [shape: bf16[16,256], index: 0, kind: input, shape index: {}]   ;;  %s540_s2 = inlined_call_operand.vmem [shape: f32[1,256], index: 2, kind: input, shape index: {}]   ;;  %s541_s3 = inlined_call_operand.vmem [shape: f32[16,256], index: 3, kind: output, shape index: {}]  }
   0x1   :  { %v350_v0 = vld [vmem:[%s538_s1 + $0x4] ss:$8 sps:$4 sm:$0xff]   ;;  %v352_v1 = vld [vmem:[%s538_s1] ss:$8 sps:$4 sm:$0xff]   ;;  %v353_v2 = vld [vmem:[%s538_s1 + $0x14] ss:$8 sps:$4 sm:$0xff]  }
   0x2   :  { %230 = vmatprep.subr.bf16.mxu0 %v350_v0  ;;  %v355_v3 = vld [vmem:[%s538_s1 + $0x10] ss:$8 sps:$4 sm:$0xff]   ;;  %v356_v4 = vld [vmem:[%s538_s1 + $0x24] ss:$8 sps:$4 sm:$0xff]   ;;  %v358_v5 = vld [vmem:[%s538_s1 + $0x20] ss:$8 sps:$4 sm:$0xff]  }
   0x3   :  { %231 = vmatpush1.bf16.msra.mxu0 %v352_v1  ;;  %v359_v6 = vld [vmem:[%s538_s1 + $0x34] ss:$8 sps:$4 sm:$0xff]   ;;  %v361_v7 = vld [vmem:[%s538_s1 + $0x30] ss:$8 sps:$4 sm:$0xff]   ;;  %v362_v8 = vld [vmem:[%s538_s1 + $0x44] ss:$8 sps:$4 sm:$0xff]  }
   0x4   :  { %232 = vmatprep.subr.bf16.mxu0 %v353_v2  ;;  %v364_v9 = vld [vmem:[%s538_s1 + $0x40] ss:$8 sps:$4 sm:$0xff]   ;;  %v365_v10 = vld [vmem:[%s538_s1 + $0x54] ss:$8 sps:$4 sm:$0xff]   ;;  %v367_v11 = vld [vmem:[%s538_s1 + $0x50] ss:$8 sps:$4 sm:$0xff]  }
   0x5   :  { %v368_v12 = vld [vmem:[%s538_s1 + $0x64] ss:$8 sps:$4 sm:$0xff]   ;;  %v370_v14 = vld [vmem:[%s538_s1 + $0x60] ss:$8 sps:$4 sm:$0xff]   ;;  %v371_v15 = vld [vmem:[%s538_s1 + $0x74] ss:$8 sps:$4 sm:$0xff]  }
   0x6   :  { %v400_v13 = vld [vmem:[%s539_s0 + $0x4] ss:$8 sps:$4 sm:$0xff]   ;;  %v373_v16 = vld [vmem:[%s538_s1 + $0x70] ss:$8 sps:$4 sm:$0xff]   ;;  %v376_v18 = vld [vmem:[%s538_s1 + $0x80] ss:$8 sps:$4 sm:$0xff]  }
   0x7   :  { %233 = vmatpush1.bf16.msra.mxu0 %v355_v3  ;;  %262 = vmatprep.mubr.bf16.mxu0 %v400_v13  ;;  %v374_v17 = vld [vmem:[%s538_s1 + $0x84] ss:$8 sps:$4 sm:$0xff]   ;;  %v377_v19 = vld [vmem:[%s538_s1 + $0x94] ss:$8 sps:$4 sm:$0xff]   ;;  %v379_v20 = vld [vmem:[%s538_s1 + $0x90] ss:$8 sps:$4 sm:$0xff]  }
   0x8   :  { %234 = vmatprep.subr.bf16.mxu0 %v356_v4  ;;  %v380_v21 = vld [vmem:[%s538_s1 + $0xa4] ss:$8 sps:$4 sm:$0xff]   ;;  %v382_v22 = vld [vmem:[%s538_s1 + $0xa0] ss:$8 sps:$4 sm:$0xff]   ;;  %v383_v23 = vld [vmem:[%s538_s1 + $0xb4] ss:$8 sps:$4 sm:$0xff]  }
   0x9   :  { %v385_v24 = vld [vmem:[%s538_s1 + $0xb0] ss:$8 sps:$4 sm:$0xff]   ;;  %v386_v25 = vld [vmem:[%s538_s1 + $0xc4] ss:$8 sps:$4 sm:$0xff]   ;;  %v388_v26 = vld [vmem:[%s538_s1 + $0xc0] ss:$8 sps:$4 sm:$0xff]  }
   0xa   :  { %v389_v27 = vld [vmem:[%s538_s1 + $0xd4] ss:$8 sps:$4 sm:$0xff]   ;;  %v391_v28 = vld [vmem:[%s538_s1 + $0xd0] ss:$8 sps:$4 sm:$0xff]   ;;  %v392_v29 = vld [vmem:[%s538_s1 + $0xe4] ss:$8 sps:$4 sm:$0xff]  }
   0xb   :  { %235 = vmatpush1.bf16.msra.mxu0 %v358_v5  ;;  %v394_v30 = vld [vmem:[%s538_s1 + $0xe0] ss:$8 sps:$4 sm:$0xff]   ;;  %v395_v31 = vld [vmem:[%s538_s1 + $0xf4] ss:$8 sps:$4 sm:$0xff]   ;;  %v397_v32 = vld [vmem:[%s538_s1 + $0xf0] ss:$8 sps:$4 sm:$0xff]  }
   0xc   :  { %236 = vmatprep.subr.bf16.mxu0 %v359_v6  ;;  %v398_v33 = vld [vmem:[%s539_s0] ss:$8 sps:$4 sm:$0xff]   ;;  %v291_v35 = vshrl.u32 %v290_v34, 7 }
   0xd   :  { %v288_v37 = vld [vmem:[%s540_s2] sm:$0x3] }
   0xe   :  { %v292_v36 = vsub.s32 0, %v291_v35  ;;  %v296_v38 = vsub.s32 1, %v291_v35 }
   0xf   :  { %237 = vmatpush1.bf16.msra.mxu0 %v361_v7 }
  0x10   :  { %238 = vmatprep.subr.bf16.mxu0 %v362_v8  ;;  %v293_v39 = vrot.slane %v288_v37, %v292_v36  ;;  %v297_v40 = vrot.slane %v288_v37, %v296_v38 }
  0x13   :  { %239 = vmatpush1.bf16.msra.mxu0 %v364_v9 }
  0x14   :  { %240 = vmatprep.subr.bf16.mxu0 %v365_v10 }
  0x17   :  { %241 = vmatpush1.bf16.msra.mxu0 %v367_v11 }
  0x18   :  { %242 = vmatprep.subr.bf16.mxu0 %v368_v12 }
  0x1b   :  { %243 = vmatpush1.bf16.msra.mxu0 %v370_v14 }
  0x1c   :  { %244 = vmatprep.subr.bf16.mxu0 %v371_v15 }
  0x1f   :  { %245 = vmatpush1.bf16.msra.mxu0 %v373_v16 }
  0x20   :  { %246 = vmatprep.subr.bf16.mxu0 %v374_v17 }
  0x23   :  { %247 = vmatpush1.bf16.msra.mxu0 %v376_v18 }
  0x24   :  { %248 = vmatprep.subr.bf16.mxu0 %v377_v19 }
  0x27   :  { %249 = vmatpush1.bf16.msra.mxu0 %v379_v20 }
  0x28   :  { %250 = vmatprep.subr.bf16.mxu0 %v380_v21 }
  0x2b   :  { %251 = vmatpush1.bf16.msra.mxu0 %v382_v22 }
  0x2c   :  { %252 = vmatprep.subr.bf16.mxu0 %v383_v23 }
  0x2f   :  { %253 = vmatpush1.bf16.msra.mxu0 %v385_v24 }
  0x30   :  { %254 = vmatprep.subr.bf16.mxu0 %v386_v25 }
  0x33   :  { %255 = vmatpush1.bf16.msra.mxu0 %v388_v26 }
  0x34   :  { %256 = vmatprep.subr.bf16.mxu0 %v389_v27 }
  0x37   :  { %257 = vmatpush1.bf16.msra.mxu0 %v391_v28 }
  0x38   :  { %258 = vmatprep.subr.bf16.mxu0 %v392_v29 }
  0x3b   :  { %259 = vmatpush1.bf16.msra.mxu0 %v394_v30 }
  0x3c   :  { %260 = vmatprep.subr.bf16.mxu0 %v395_v31 }
  0x3f   :  { %261 = vmatpush1.bf16.msra.mxu0 %v397_v32 }
  0x42   :  { %263 = vmatmul.mubr.bf16.vlgmr.msra.gmra.mrb[0].mxu0 %v398_v33 }
 0x115   :  { %v264_v41 = vpop.f32.mrb[0].mxu0 }
 0x116   :  { %v300_v42 = vadd.f32 %v293_v39, %v264_v41  ;;  %v266_v43 = vpop.f32.mrb[1].mxu0 }
 0x117   :  { %v301_v44 = vadd.f32 %v297_v40, %v266_v43  ;;  %v268_v45 = vpop.f32.mrb[2].mxu0 }
 0x118   :  { %v304_v46 = vmax.f32 %v300_v42, 0.0  ;;  %v302_v47 = vadd.f32 %v293_v39, %v268_v45  ;;  %v270_v48 = vpop.f32.mrb[3].mxu0 }
 0x119   :  { %v305_v49 = vmax.f32 %v301_v44, 0.0  ;;  %v303_v50 = vadd.f32 %v297_v40, %v270_v48 }
 0x11a   :  { %308 = vst [vmem:[%s541_s3] sm:$0xff] %v304_v46  ;;  %v306_v51 = vmax.f32 %v302_v47, 0.0 }
 0x11b   :  { %309 = vst [vmem:[%s541_s3 + $0x8] sm:$0xff] %v305_v49  ;;  %v307_v52 = vmax.f32 %v303_v50, 0.0 }
 0x11c   :  { %310 = vst [vmem:[%s541_s3 + $0x10] sm:$0xff] %v306_v51 }
 0x11d   :  { %311 = vst [vmem:[%s541_s3 + $0x18] sm:$0xff] %v307_v52 }

// kernel: skull_unet_transformer_forward.45
= control target key start
LH: loop header
LB: loop body
LE: loop exit
PB: predicated region body
PF: predicated region fallthrough
CT: control target
= control target key end

     0   :  { %s391_s1 = inlined_call_operand.vmem [shape: bf16[256,128], index: 1, kind: input, shape index: {}]   ;;  %s392_s0 = inlined_call_operand.vmem [shape: bf16[16,256], index: 0, kind: input, shape index: {}]   ;;  %s393_s2 = inlined_call_operand.vmem [shape: f32[1,128], index: 2, kind: input, shape index: {}]   ;;  %s394_s3 = inlined_call_operand.vmem [shape: f32[16,128], index: 3, kind: output, shape index: {}]  }
   0x1   :  { %v281_v0 = vld [vmem:[%s391_s1 + $0x40] sm:$0xff]   ;;  %v283_v2 = vld [vmem:[%s391_s1 + $0x48] sm:$0xff]   ;;  %v285_v4 = vld [vmem:[%s391_s1 + $0x50] sm:$0xff]  }
   0x2   :  { %v282_v1 = vld [vmem:[%s391_s1] sm:$0xff]   ;;  %259 = vmatprep.subr.bf16.mxu0 %v281_v0  ;;  %v284_v3 = vld [vmem:[%s391_s1 + $0x8] sm:$0xff]   ;;  %v286_v5 = vld [vmem:[%s391_s1 + $0x10] sm:$0xff]  }
   0x3   :  { %260 = vmatpush3.bf16.msra.mxu0 %v282_v1  ;;  %v287_v6 = vld [vmem:[%s391_s1 + $0x58] sm:$0xff]   ;;  %v289_v8 = vld [vmem:[%s391_s1 + $0x60] sm:$0xff]   ;;  %v291_v10 = vld [vmem:[%s391_s1 + $0x68] sm:$0xff]  }
   0x4   :  { %261 = vmatprep.subr.bf16.mxu0 %v283_v2  ;;  %v288_v7 = vld [vmem:[%s391_s1 + $0x18] sm:$0xff]   ;;  %v290_v9 = vld [vmem:[%s391_s1 + $0x20] sm:$0xff]   ;;  %v292_v12 = vld [vmem:[%s391_s1 + $0x28] sm:$0xff]  }
   0x5   :  { %v299_v11 = vld [vmem:[%s392_s0 + $0x4] ss:$8 sps:$4 sm:$0xff]   ;;  %v293_v13 = vld [vmem:[%s391_s1 + $0x70] sm:$0xff]   ;;  %v295_v15 = vld [vmem:[%s391_s1 + $0x78] sm:$0xff]  }
   0x6   :  { %195 = vmatprep.mubr.bf16.mxu0 %v299_v11  ;;  %v294_v14 = vld [vmem:[%s391_s1 + $0x30] sm:$0xff]   ;;  %v296_v16 = vld [vmem:[%s391_s1 + $0x38] sm:$0xff]   ;;  %v297_v17 = vld [vmem:[%s392_s0] ss:$8 sps:$4 sm:$0xff]  }
   0x7   :  { %262 = vmatpush3.bf16.msra.mxu0 %v284_v3  ;;  %v258_v20 = vld [vmem:[%s393_s2] ss:$0 sm:$0xff] }
   0x8   :  { %263 = vmatprep.subr.bf16.mxu0 %v285_v4 }
   0xb   :  { %264 = vmatpush3.bf16.msra.mxu0 %v286_v5 }
   0xc   :  { %265 = vmatprep.subr.bf16.mxu0 %v287_v6 }
   0xf   :  { %266 = vmatpush3.bf16.msra.mxu0 %v288_v7 }
  0x10   :  { %267 = vmatprep.subr.bf16.mxu0 %v289_v8 }
  0x13   :  { %268 = vmatpush3.bf16.msra.mxu0 %v290_v9 }
  0x14   :  { %269 = vmatprep.subr.bf16.mxu0 %v291_v10 }
  0x17   :  { %270 = vmatpush3.bf16.msra.mxu0 %v292_v12 }
  0x18   :  { %271 = vmatprep.subr.bf16.mxu0 %v293_v13 }
  0x1b   :  { %272 = vmatpush3.bf16.msra.mxu0 %v294_v14 }
  0x1c   :  { %273 = vmatprep.subr.bf16.mxu0 %v295_v15 }
  0x1f   :  { %274 = vmatpush3.bf16.msra.mxu0 %v296_v16 }
  0x22   :  { %196 = vmatmul.mubr.bf16.vlgmr.msra.gmra.mrb[0].mxu0 %v297_v17 }
  0xf5   :  { %v275_v18 = vpop.f32.mrb[0].mxu0 }
  0xf6   :  { %v276_v19 = vpop.f32.mrb[1].mxu0 }
  0xf7   :  { %v277_v21 = vadd.f32 %v276_v19, %v275_v18  ;;  %v278_v22 = vpop.f32.mrb[2].mxu0 }
  0xf8   :  { %v279_v23 = vpop.f32.mrb[3].mxu0 }
  0xf9   :  { %v220_v24 = vadd.f32 %v277_v21, %v258_v20  ;;  %v280_v25 = vadd.f32 %v279_v23, %v278_v22 }
  0xfb   :  { %v222_v26 = vsub.f32 0.0, %v220_v24  ;;  %v221_v27 = vadd.f32 %v280_v25, %v258_v20 }
  0xfd   :  { %v224_v28 = vmul.f32 1.442695, %v222_v26  ;;  %v223_v29 = vsub.f32 0.0, %v221_v27 }
  0xff   :  { %300 = vpow2.f32 %v224_v28  ;;  %v226_v30 = vmul.f32 1.442695, %v223_v29 }
 0x101   :  { %302 = vpow2.f32 %v226_v30 }
 0x109   :  { %v301_v31 = vpop.eup %300 }
 0x10a   :  { %v228_v32 = vadd.f32 1.0, %v301_v31 }
 0x10b   :  { %v303_v33 = vpop.eup %302 }
 0x10c   :  { %304 = vrcp.f32 %v228_v32  ;;  %v229_v34 = vadd.f32 1.0, %v303_v33 }
 0x10e   :  { %306 = vrcp.f32 %v229_v34 }
 0x116   :  { %v305_v35 = vpop.eup %304 }
 0x117   :  { %234 = vst [vmem:[%s394_s3] sm:$0xff] %v305_v35 }
 0x118   :  { %v307_v36 = vpop.eup %306 }
 0x119   :  { %235 = vst [vmem:[%s394_s3 + $0x8] sm:$0xff] %v307_v36 }

// kernel: tile.13
= control target key start
LH: loop header
LB: loop body
LE: loop exit
PB: predicated region body
PF: predicated region fallthrough
CT: control target
= control target key end

     0   :  { %s28_s0 = inlined_call_operand.vmem [shape: f32[8], index: 0, kind: input, shape index: {}]   ;;  %s29_s1 = inlined_call_operand.vmem [shape: f32[16,8], index: 1, kind: output, shape index: {}]  }
   0x1   :  { %v4_v0 = vld [vmem:[%s28_s0] ss:$0 sm:$0xff] }
   0x2   :  { %5 = vst [vmem:[%s29_s1] sm:$0xff] %v4_v0  ;;  %8 = vst [vmem:[%s29_s1 + $0x8] sm:$0xff] %v4_v0 }

// kernel: tile.14
= control target key start
LH: loop header
LB: loop body
LE: loop exit
PB: predicated region body
PF: predicated region fallthrough
CT: control target
= control target key end

     0   :  { %s131_s10 = smov 120   ;;  %s132_s11 = smov 104   ;;  %vm3_vm0 = vcmask 64512   ;;  %vm9_vm1 = vcmask 1048512   ;;  %vm15_vm2 = vcmask 982912   ;;  %vm21_vm3 = vcmask 917312   ;;  %s207_s0 = inlined_call_operand.vmem [shape: f32[16,8], index: 0, kind: input, shape index: {}]   ;;  %s208_s1 = inlined_call_operand.vmem [shape: f32[1,128], index: 1, kind: output, shape index: {}]  }
   0x1   :  { %v101_v0 = vld [vmem:[%s207_s0 + $0xf] sm:$0x1]   ;;  %v103_v1 = vld [vmem:[%s207_s0 + $0xd] sm:$0x1]   ;;  %v102_v2 = vld [vmem:[%s207_s0 + $0xe] sm:$0x1]  }
   0x2   :  { %7 = vrot.lane.b32.xlu0 %v101_v0, %s131_s10  ;;  %19 = vrot.lane.b32.xlu1 %v103_v1, %s132_s11  ;;  %v104_v3 = vld [vmem:[%s207_s0 + $0xc] sm:$0x1]   ;;  %s133_s16 = smov 112   ;;  %s134_s17 = smov 96   ;;  %v105_v4 = vld [vmem:[%s207_s0 + $0xb] sm:$0x1]  }
   0x3   :  { %v106_v5 = vld [vmem:[%s207_s0 + $0xa] sm:$0x1]   ;;  %v2_v6 = vld [vmem:[%s207_s0] sm:$0x1]   ;;  %s135_s24 = smov 88   ;;  %s136_s25 = smov 80  }
   0x4   :  { %4 = vst.msk [vmem:[#allocation0] sm:$0x1] %vm3_vm0, %v2_v6   ;;  %v107_v7 = vld [vmem:[%s207_s0 + $0x9] sm:$0x1]   ;;  %v108_v8 = vld [vmem:[%s207_s0 + $0x8] sm:$0x1]  }
   0x5   :  { %s137_s30 = smov 72   ;;  %s138_s2 = smov 64   ;;  %v109_v9 = vld [vmem:[%s207_s0 + $0x7] sm:$0x1]   ;;  %v110_v10 = vld [vmem:[%s207_s0 + $0x6] sm:$0x1]  }
   0x6   :  { %13 = vrot.lane.b32.xlu0 %v102_v2, %s133_s16  ;;  %25 = vrot.lane.b32.xlu1 %v104_v3, %s134_s17  ;;  %s139_s7 = smov 56   ;;  %s140_s8 = smov 48   ;;  %v111_v11 = vld [vmem:[%s207_s0 + $0x5] sm:$0x1]   ;;  %v112_v12 = vld [vmem:[%s207_s0 + $0x4] sm:$0x1]  }
   0x7   :  { %s141_s13 = smov 40   ;;  %s142_s14 = smov 32   ;;  %v113_v13 = vld [vmem:[%s207_s0 + $0x3] sm:$0x1]   ;;  %v114_v14 = vld [vmem:[%s207_s0 + $0x2] sm:$0x1]  }
   0x8   :  { %s143_s19 = smov 24   ;;  %s144_s20 = smov 16   ;;  %v115_v15 = vld [vmem:[%s207_s0 + $0x1] sm:$0x1]   ;;  %vm27_vm4 = vcmask 851712   ;;  %vm33_vm5 = vcmask 786112  }
   0x9   :  { %s145_s0 = smov 8   ;;  %vm39_vm6 = vcmask 720512   ;;  %vm45_vm7 = vcmask 654912   ;;  %vm51_vm8 = vcmask 589312   ;;  %vm57_vm9 = vcmask 523712  }
   0xa   :  { %31 = vrot.lane.b32.xlu0 %v105_v4, %s135_s24  ;;  %37 = vrot.lane.b32.xlu1 %v106_v5, %s136_s25  ;;  %vm63_vm10 = vcmask 458112   ;;  %vm69_vm11 = vcmask 392512   ;;  %vm75_vm12 = vcmask 326912   ;;  %vm81_vm13 = vcmask 261312  }
   0xb   :  { %vm87_vm14 = vcmask 195712   ;;  %vm93_vm15 = vcmask 130112  }
   0xe   :  { %43 = vrot.lane.b32.xlu0 %v107_v7, %s137_s30  ;;  %49 = vrot.lane.b32.xlu1 %v108_v8, %s138_s2 }
  0x12   :  { %55 = vrot.lane.b32.xlu0 %v109_v9, %s139_s7  ;;  %61 = vrot.lane.b32.xlu1 %v110_v10, %s140_s8 }
  0x16   :  { %67 = vrot.lane.b32.xlu0 %v111_v11, %s141_s13  ;;  %73 = vrot.lane.b32.xlu1 %v112_v12, %s142_s14 }
  0x1a   :  { %79 = vrot.lane.b32.xlu0 %v113_v13, %s143_s19  ;;  %85 = vrot.lane.b32.xlu1 %v114_v14, %s144_s20 }
  0x1e   :  { %91 = vrot.lane.b32.xlu0 %v115_v15, %s145_s0 }
  0x74   :  { %v8_v16 = vpop.permute.xlu0 %7   ;;  %v20_v17 = vpop.permute.xlu1 %19  }
  0x75   :  { %10 = vst.msk [vmem:[#allocation0] sm:$0x1] %vm9_vm1, %v8_v16  }
  0x78   :  { %v14_v18 = vpop.permute.xlu0 %13   ;;  %v26_v19 = vpop.permute.xlu1 %25  }
  0x79   :  { %16 = vst.msk [vmem:[#allocation0] sm:$0x1] %vm15_vm2, %v14_v18  }
  0x7a   :  { %22 = vst.msk [vmem:[#allocation0] sm:$0x1] %vm21_vm3, %v20_v17  }
  0x7b   :  { %28 = vst.msk [vmem:[#allocation0] sm:$0x1] %vm27_vm4, %v26_v19  }
  0x7c   :  { %v32_v20 = vpop.permute.xlu0 %31   ;;  %v38_v21 = vpop.permute.xlu1 %37  }
  0x7d   :  { %34 = vst.msk [vmem:[#allocation0] sm:$0x1] %vm33_vm5, %v32_v20  }
  0x7e   :  { %40 = vst.msk [vmem:[#allocation0] sm:$0x1] %vm39_vm6, %v38_v21  }
  0x80   :  { %v44_v22 = vpop.permute.xlu0 %43   ;;  %v50_v23 = vpop.permute.xlu1 %49  }
  0x81   :  { %46 = vst.msk [vmem:[#allocation0] sm:$0x1] %vm45_vm7, %v44_v22  }
  0x82   :  { %52 = vst.msk [vmem:[#allocation0] sm:$0x1] %vm51_vm8, %v50_v23  }
  0x84   :  { %v56_v24 = vpop.permute.xlu0 %55   ;;  %v62_v25 = vpop.permute.xlu1 %61  }
  0x85   :  { %58 = vst.msk [vmem:[#allocation0] sm:$0x1] %vm57_vm9, %v56_v24  }
  0x86   :  { %64 = vst.msk [vmem:[#allocation0] sm:$0x1] %vm63_vm10, %v62_v25  }
  0x88   :  { %v68_v26 = vpop.permute.xlu0 %67   ;;  %v74_v27 = vpop.permute.xlu1 %73  }
  0x89   :  { %70 = vst.msk [vmem:[#allocation0] sm:$0x1] %vm69_vm11, %v68_v26  }
  0x8a   :  { %76 = vst.msk [vmem:[#allocation0] sm:$0x1] %vm75_vm12, %v74_v27  }
  0x8c   :  { %v80_v28 = vpop.permute.xlu0 %79   ;;  %v86_v29 = vpop.permute.xlu1 %85  }
  0x8d   :  { %82 = vst.msk [vmem:[#allocation0] sm:$0x1] %vm81_vm13, %v80_v28  }
  0x8e   :  { %88 = vst.msk [vmem:[#allocation0] sm:$0x1] %vm87_vm14, %v86_v29  }
  0x90   :  { %v92_v30 = vpop.permute.xlu0 %91  }
  0x91   :  { %94 = vst.msk [vmem:[#allocation0] sm:$0x1] %vm93_vm15, %v92_v30  }
  0x98   :  { %v98_v31 = vld [vmem:[#allocation0] sm:$0x1] }
  0x99   :  { %100 = vst [vmem:[%s208_s1] sm:$0x1] %v98_v31 }

// kernel: skull_unet_transformer_forward.47
= control target key start
LH: loop header
LB: loop body
LE: loop exit
PB: predicated region body
PF: predicated region fallthrough
CT: control target
= control target key end

     0   :  { %s705_s1 = inlined_call_operand.vmem [shape: bf16[128,128], index: 1, kind: input, shape index: {}]   ;;  %s706_s0 = inlined_call_operand.vmem [shape: bf16[128,128], index: 0, kind: input, shape index: {}]   ;;  %s707_s2 = inlined_call_operand.vmem [shape: f32[1,128], index: 2, kind: input, shape index: {}]   ;;  %s708_s3 = inlined_call_operand.vmem [shape: bf16[128,128], index: 3, kind: output, shape index: {}]  }
   0x1   :  { %v594_v0 = vld [vmem:[%s705_s1] sm:$0xff]   ;;  %v595_v1 = vld [vmem:[%s705_s1 + $0x8] sm:$0xff]   ;;  %v596_v2 = vld [vmem:[%s705_s1 + $0x10] sm:$0xff]  }
   0x2   :  { %546 = vmatprep.subr.bf16.mxu0 %v594_v0  ;;  %578 = vmatprep.subr.bf16.mxu1 %v594_v0  ;;  %v597_v3 = vld [vmem:[%s705_s1 + $0x18] sm:$0xff]   ;;  %v602_v4 = vld [vmem:[%s706_s0] sm:$0xff]   ;;  %v599_v7 = vld [vmem:[%s705_s1 + $0x28] sm:$0xff]  }
   0x3   :  { %547 = vmatpush3.bf16.msra.mxu0 %v594_v0  ;;  %586 = vmatpush3.bf16.msra.mxu1 %v594_v0  ;;  %v603_v5 = vld [vmem:[%s706_s0 + $0x20] sm:$0xff]   ;;  %v600_v8 = vld [vmem:[%s705_s1 + $0x30] sm:$0xff]   ;;  %v601_v9 = vld [vmem:[%s705_s1 + $0x38] sm:$0xff]  }
   0x4   :  { %548 = vmatprep.subr.bf16.mxu0 %v595_v1  ;;  %579 = vmatprep.subr.bf16.mxu1 %v595_v1  ;;  %v598_v6 = vld [vmem:[%s705_s1 + $0x20] sm:$0xff]   ;;  %v604_v10 = vld [vmem:[%s706_s0 + $0x8] sm:$0xff]   ;;  %v606_v12 = vld [vmem:[%s706_s0 + $0x10] sm:$0xff]  }
   0x5   :  { %562 = vmatprep.mubr.bf16.mxu0 %v602_v4  ;;  %570 = vmatprep.mubr.bf16.mxu1 %v603_v5  ;;  %v605_v11 = vld [vmem:[%s706_s0 + $0x28] sm:$0xff]   ;;  %v607_v13 = vld [vmem:[%s706_s0 + $0x30] sm:$0xff]   ;;  %v608_v14 = vld [vmem:[%s706_s0 + $0x18] sm:$0xff]  }
   0x6   :  { %v609_v15 = vld [vmem:[%s706_s0 + $0x38] sm:$0xff]   ;;  %v450_v17 = vld [vmem:[%s707_s2] ss:$0 sm:$0xff] }
   0x7   :  { %549 = vmatpush3.bf16.msra.mxu0 %v595_v1  ;;  %587 = vmatpush3.bf16.msra.mxu1 %v595_v1 }
   0x8   :  { %550 = vmatprep.subr.bf16.mxu0 %v596_v2  ;;  %580 = vmatprep.subr.bf16.mxu1 %v596_v2 }
   0xb   :  { %551 = vmatpush3.bf16.msra.mxu0 %v596_v2  ;;  %588 = vmatpush3.bf16.msra.mxu1 %v596_v2 }
   0xc   :  { %552 = vmatprep.subr.bf16.mxu0 %v597_v3  ;;  %581 = vmatprep.subr.bf16.mxu1 %v597_v3 }
   0xf   :  { %553 = vmatpush3.bf16.msra.mxu0 %v597_v3  ;;  %589 = vmatpush3.bf16.msra.mxu1 %v597_v3 }
  0x10   :  { %554 = vmatprep.subr.bf16.mxu0 %v598_v6  ;;  %582 = vmatprep.subr.bf16.mxu1 %v598_v6 }
  0x13   :  { %555 = vmatpush3.bf16.msra.mxu0 %v598_v6  ;;  %590 = vmatpush3.bf16.msra.mxu1 %v598_v6 }
  0x14   :  { %556 = vmatprep.subr.bf16.mxu0 %v599_v7  ;;  %583 = vmatprep.subr.bf16.mxu1 %v599_v7 }
  0x17   :  { %557 = vmatpush3.bf16.msra.mxu0 %v599_v7  ;;  %591 = vmatpush3.bf16.msra.mxu1 %v599_v7 }
  0x18   :  { %558 = vmatprep.subr.bf16.mxu0 %v600_v8  ;;  %584 = vmatprep.subr.bf16.mxu1 %v600_v8 }
  0x1b   :  { %559 = vmatpush3.bf16.msra.mxu0 %v600_v8  ;;  %592 = vmatpush3.bf16.msra.mxu1 %v600_v8 }
  0x1c   :  { %560 = vmatprep.subr.bf16.mxu0 %v601_v9  ;;  %585 = vmatprep.subr.bf16.mxu1 %v601_v9 }
  0x1f   :  { %561 = vmatpush3.bf16.msra.mxu0 %v601_v9  ;;  %593 = vmatpush3.bf16.msra.mxu1 %v601_v9 }
  0x22   :  { %563 = vmatmul.mubr.bf16.vlgmr.msra.gmra.mrb[0].mxu0 %v604_v10  ;;  %571 = vmatmul.mubr.bf16.vlgmr.msra.gmra.mrb[0].mxu1 %v605_v11 }
  0x23   :  { %566 = vmatprep.mubr.bf16.mxu0 %v606_v12  ;;  %574 = vmatprep.mubr.bf16.mxu1 %v607_v13 }
  0x2a   :  { %567 = vmatmul.mubr.bf16.gmra.mrb[4].mxu0 %v608_v14  ;;  %575 = vmatmul.mubr.bf16.gmra.mrb[4].mxu1 %v609_v15 }
  0xf5   :  { %v564_v16 = vpop.f32.mrb[0].mxu0  ;;  %v572_v18 = vpop.f32.mrb[0].mxu1 }
  0xf6   :  { %v213_v19 = vpop.f32.mrb[1].mxu0  ;;  %v245_v20 = vpop.f32.mrb[1].mxu1  ;;  %v336_v23 = vadd.f32 %v564_v16, %v450_v17  ;;  %v344_v24 = vadd.f32 %v572_v18, %v450_v17 }
  0xf7   :  { %v565_v21 = vpop.f32.mrb[2].mxu0  ;;  %v573_v22 = vpop.f32.mrb[2].mxu1  ;;  %v334_v29 = vadd.f32 %v450_v17, %v213_v19  ;;  %v342_v30 = vadd.f32 %v450_v17, %v245_v20 }
  0xf8   :  { %v337_v25 = vadd.f32 %v565_v21, %v450_v17  ;;  %v345_v26 = vadd.f32 %v573_v22, %v450_v17  ;;  %v216_v27 = vpop.f32.mrb[3].mxu0  ;;  %v248_v28 = vpop.f32.mrb[3].mxu1 }
  0xf9   :  { %v335_v31 = vadd.f32 %v450_v17, %v216_v27  ;;  %v343_v32 = vadd.f32 %v450_v17, %v248_v28 }
  0xfa   :  { %v491_v33 = vpack.c.bf16 %v337_v25, %v336_v23  ;;  %v511_v34 = vpack.c.bf16 %v345_v26, %v344_v24 }
  0xfb   :  { %v486_v35 = vpack.c.bf16 %v335_v31, %v334_v29  ;;  %v506_v36 = vpack.c.bf16 %v343_v32, %v342_v30 }
  0xfc   :  { %523 = vst [vmem:[%s708_s3 + $0x8] sm:$0xff] %v491_v33   ;;  %527 = vst [vmem:[%s708_s3 + $0x28] sm:$0xff] %v511_v34  }
  0xfd   :  { %487 = vst [vmem:[%s708_s3] sm:$0xff] %v486_v35   ;;  %526 = vst [vmem:[%s708_s3 + $0x20] sm:$0xff] %v506_v36   ;;  %v568_v37 = vpop.f32.mrb[4].mxu0  ;;  %v576_v38 = vpop.f32.mrb[4].mxu1 }
  0xfe   :  { %v229_v39 = vpop.f32.mrb[5].mxu0  ;;  %v261_v40 = vpop.f32.mrb[5].mxu1  ;;  %v340_v43 = vadd.f32 %v568_v37, %v450_v17  ;;  %v348_v44 = vadd.f32 %v576_v38, %v450_v17 }
  0xff   :  { %v569_v41 = vpop.f32.mrb[6].mxu0  ;;  %v577_v42 = vpop.f32.mrb[6].mxu1  ;;  %v338_v49 = vadd.f32 %v450_v17, %v229_v39  ;;  %v346_v50 = vadd.f32 %v450_v17, %v261_v40 }
 0x100   :  { %v341_v45 = vadd.f32 %v569_v41, %v450_v17  ;;  %v349_v46 = vadd.f32 %v577_v42, %v450_v17  ;;  %v232_v47 = vpop.f32.mrb[7].mxu0  ;;  %v264_v48 = vpop.f32.mrb[7].mxu1 }
 0x101   :  { %v339_v51 = vadd.f32 %v450_v17, %v232_v47  ;;  %v347_v52 = vadd.f32 %v450_v17, %v264_v48 }
 0x102   :  { %v501_v53 = vpack.c.bf16 %v341_v45, %v340_v43  ;;  %v521_v54 = vpack.c.bf16 %v349_v46, %v348_v44 }
 0x103   :  { %v496_v55 = vpack.c.bf16 %v339_v51, %v338_v49  ;;  %v516_v56 = vpack.c.bf16 %v347_v52, %v346_v50 }
 0x104   :  { %525 = vst [vmem:[%s708_s3 + $0x18] sm:$0xff] %v501_v53   ;;  %529 = vst [vmem:[%s708_s3 + $0x38] sm:$0xff] %v521_v54  }
 0x105   :  { %524 = vst [vmem:[%s708_s3 + $0x10] sm:$0xff] %v496_v55   ;;  %528 = vst [vmem:[%s708_s3 + $0x30] sm:$0xff] %v516_v56  }

// kernel: skull_unet_transformer_forward.48
= control target key start
LH: loop header
LB: loop body
LE: loop exit
PB: predicated region body
PF: predicated region fallthrough
CT: control target
= control target key end

     0   :  { %s3556_s12 = smov 0   ;;  %s3558_s13 = smov 0   ;;  %s3955_s0 = inlined_call_operand.vmem [shape: bf16[2048,512], index: 0, kind: input, shape index: {}]   ;;  %s3956_s1 = inlined_call_operand.vmem [shape: bf16[512,128], index: 1, kind: input, shape index: {}]   ;;  %s3957_s2 = inlined_call_operand.vmem [shape: f32[1,128], index: 2, kind: input, shape index: {}]   ;;  %s3958_s3 = inlined_call_operand.vmem [shape: bf16[2048,128], index: 3, kind: output, shape index: {}]  }
   0x1   :  { %s3560_s14 = smov 0  }
   0x2 LB: > { %s32_s15 = sadd.s32 1, %s3529_s13  ;;  %p2772_p0 = scmp.ge.s32.totalorder %s3533_s14, 1  ;;  %s3533_s14 = sphi %s3560_s14, %s13_s14   ;;  %s3529_s13 = sphi %s3558_s13, %s3960_s13   ;;  %s3525_s12 = sphi %s3556_s12, %s3959_s12  }
   0x3   : > { %p34_p1 = scmp.ge.s32.totalorder %s32_s15, 4  ;;  %p191_p2 = scmp.lt.s32.totalorder %s3533_s14, 5 }
   0x5   : > { %s3962_s15 = smov (%p34_p1, %s32_s15), 0  ;;  %p192_p3 = pnand %p2772_p0, %p191_p2 }
   0x6   : > { %v3286_v0 = vld [vmem:[%s3956_s1] sm:$0xff] (!%p192_p3)   ;;  %v3535_v1 = vmov (!%p192_p3), 0   ;;  %v3288_v3 = vld [vmem:[%s3956_s1 + $0x8] sm:$0xff] (!%p192_p3)   ;;  %v3290_v5 = vld [vmem:[%s3956_s1 + $0x10] sm:$0xff] (!%p192_p3)   ;;  %s2773_s9 = sshll.u32 (!%p192_p3), %s3525_s12, 6 }
   0x7   : > { %195 = sbr.rel (%p192_p3) target bundleno = 542 (0x21e), region = 32  ;;  %1424 = vmatprep.subr.bf16.mxu0 (!%p192_p3), %v3535_v1  ;;  %1713 = vmatprep.subr.bf16.mxu1 (!%p192_p3), %v3535_v1  ;;  %v3287_v2 = vld [vmem:[%s3956_s1 + $0x80] sm:$0xff] (!%p192_p3)   ;;  %v3289_v4 = vld [vmem:[%s3956_s1 + $0x88] sm:$0xff] (!%p192_p3)   ;;  %v3291_v6 = vld [vmem:[%s3956_s1 + $0x90] sm:$0xff] (!%p192_p3)   ;;  %p236_p4 = scmp.lt.s32.totalorder (!%p192_p3), %s2773_s9, 255 }
   0x8   : > { %1425 = vmatpush1.bf16.msra.mxu0 (!%p192_p3), %v3286_v0  ;;  %1714 = vmatpush1.bf16.msra.mxu1 (!%p192_p3), %v3287_v2  ;;  %v3292_v7 = vld [vmem:[%s3956_s1 + $0x18] sm:$0xff] (!%p192_p3)   ;;  %v3294_v9 = vld [vmem:[%s3956_s1 + $0x20] sm:$0xff] (!%p192_p3)   ;;  %v3296_v11 = vld [vmem:[%s3956_s1 + $0x28] sm:$0xff] (!%p192_p3)  }
   0x9   : > { %1426 = vmatprep.subr.bf16.mxu0 (!%p192_p3), %v3535_v1  ;;  %1715 = vmatprep.subr.bf16.mxu1 (!%p192_p3), %v3535_v1  ;;  %v3293_v8 = vld [vmem:[%s3956_s1 + $0x98] sm:$0xff] (!%p192_p3)   ;;  %v3295_v10 = vld [vmem:[%s3956_s1 + $0xa0] sm:$0xff] (!%p192_p3)   ;;  %v3297_v12 = vld [vmem:[%s3956_s1 + $0xa8] sm:$0xff] (!%p192_p3)  }
   0xa   : > { %v3298_v13 = vld [vmem:[%s3956_s1 + $0x30] sm:$0xff] (!%p192_p3)   ;;  %v3300_v15 = vld [vmem:[%s3956_s1 + $0x38] sm:$0xff] (!%p192_p3)   ;;  %v3302_v17 = vld [vmem:[%s3956_s1 + $0x40] sm:$0xff] (!%p192_p3)  }
   0xb   : > { %v3299_v14 = vld [vmem:[%s3956_s1 + $0xb0] sm:$0xff] (!%p192_p3)   ;;  %v3301_v16 = vld [vmem:[%s3956_s1 + $0xb8] sm:$0xff] (!%p192_p3)   ;;  %v3303_v18 = vld [vmem:[%s3956_s1 + $0xc0] sm:$0xff] (!%p192_p3)  }
   0xc   : > { %1427 = vmatpush1.bf16.msra.mxu0 (!%p192_p3), %v3288_v3  ;;  %1716 = vmatpush1.bf16.msra.mxu1 (!%p192_p3), %v3289_v4  ;;  %v3304_v20 = vld [vmem:[%s3956_s1 + $0x48] sm:$0xff] (!%p192_p3)   ;;  %v3306_v23 = vld [vmem:[%s3956_s1 + $0x50] sm:$0xff] (!%p192_p3)   ;;  %v3308_v25 = vld [vmem:[%s3956_s1 + $0x58] sm:$0xff] (!%p192_p3)  }
   0xd   : > { %1428 = vmatprep.subr.bf16.mxu0 (!%p192_p3), %v3535_v1  ;;  %1717 = vmatprep.subr.bf16.mxu1 (!%p192_p3), %v3535_v1  ;;  %v3305_v22 = vld [vmem:[%s3956_s1 + $0xc8] sm:$0xff] (!%p192_p3)   ;;  %v3307_v24 = vld [vmem:[%s3956_s1 + $0xd0] sm:$0xff] (!%p192_p3)   ;;  %v3309_v26 = vld [vmem:[%s3956_s1 + $0xd8] sm:$0xff] (!%p192_p3)  }
   0xe   : > { %s3964_s9 = smov (!%p236_p4, %s2773_s9), 255  ;;  %v3310_v27 = vld [vmem:[%s3956_s1 + $0x60] sm:$0xff]   ;;  %v3312_v29 = vld [vmem:[%s3956_s1 + $0x68] sm:$0xff]   ;;  %v3314_v31 = vld [vmem:[%s3956_s1 + $0x70] sm:$0xff]  }
   0xf   : > { %s3005_s25 = sshll.u32 %s3964_s9, 4  ;;  %v3311_v28 = vld [vmem:[%s3956_s1 + $0xe0] sm:$0xff]   ;;  %v3313_v30 = vld [vmem:[%s3956_s1 + $0xe8] sm:$0xff]   ;;  %v3315_v32 = vld [vmem:[%s3956_s1 + $0xf0] sm:$0xff]   ;;  %s2777_s19 = sshll.u32 %s3964_s9, 2 }
  0x10   : > { %1429 = vmatpush1.bf16.msra.mxu0 %v3290_v5  ;;  %1718 = vmatpush1.bf16.msra.mxu1 %v3291_v6  ;;  %s3650_s30 = scalar_lea.vmem %s3955_s0, %s3005_s25  ;;  %v3316_v33 = vld [vmem:[%s3956_s1 + $0x78] sm:$0xff]   ;;  %s3838_s21 = scalar_lea.vmem %s3958_s3, %s2777_s19 }
  0x11   : > { %1430 = vmatprep.subr.bf16.mxu0 %v3535_v1  ;;  %1719 = vmatprep.subr.bf16.mxu1 %v3535_v1  ;;  %v3320_v19 = vld [vmem:[%s3650_s30 + $0x4] ss:$16 sps:$4 sm:$0xff]   ;;  %v3323_v21 = vld [vmem:[%s3650_s30 + $0xc] ss:$16 sps:$4 sm:$0xff]   ;;  %v3318_v35 = vld [vmem:[%s3650_s30] ss:$16 sps:$4 sm:$0xff]  }
  0x12   : > { %1456 = vmatprep.mubr.bf16.mxu0 %v3320_v19  ;;  %1745 = vmatprep.mubr.bf16.mxu1 %v3323_v21  ;;  %v3317_v34 = vld [vmem:[%s3956_s1 + $0xf8] sm:$0xff]   ;;  %v3324_v37 = vld [vmem:[%s3650_s30 + $0x24] ss:$16 sps:$4 sm:$0xff]   ;;  %v3328_v39 = vld [vmem:[%s3650_s30 + $0x20] ss:$16 sps:$4 sm:$0xff]  }
  0x13   : > { %v3321_v36 = vld [vmem:[%s3650_s30 + $0x8] ss:$16 sps:$4 sm:$0xff]   ;;  %v3326_v38 = vld [vmem:[%s3650_s30 + $0x2c] ss:$16 sps:$4 sm:$0xff]   ;;  %v3330_v41 = vld [vmem:[%s3650_s30 + $0x44] ss:$16 sps:$4 sm:$0xff]  }
  0x14   : > { %1431 = vmatpush1.bf16.msra.mxu0 %v3292_v7  ;;  %1720 = vmatpush1.bf16.msra.mxu1 %v3293_v8  ;;  %v3329_v40 = vld [vmem:[%s3650_s30 + $0x28] ss:$16 sps:$4 sm:$0xff]   ;;  %v3332_v42 = vld [vmem:[%s3650_s30 + $0x4c] ss:$16 sps:$4 sm:$0xff]   ;;  %v3334_v43 = vld [vmem:[%s3650_s30 + $0x40] ss:$16 sps:$4 sm:$0xff]  }
  0x15   : > { %1432 = vmatprep.subr.bf16.mxu0 %v3535_v1  ;;  %1721 = vmatprep.subr.bf16.mxu1 %v3535_v1  ;;  %v3335_v44 = vld [vmem:[%s3650_s30 + $0x48] ss:$16 sps:$4 sm:$0xff]   ;;  %v3336_v45 = vld [vmem:[%s3650_s30 + $0x64] ss:$16 sps:$4 sm:$0xff]   ;;  %v3338_v46 = vld [vmem:[%s3650_s30 + $0x6c] ss:$16 sps:$4 sm:$0xff]  }
  0x16   : > { %v3340_v47 = vld [vmem:[%s3650_s30 + $0x60] ss:$16 sps:$4 sm:$0xff]   ;;  %v3341_v48 = vld [vmem:[%s3650_s30 + $0x68] ss:$16 sps:$4 sm:$0xff]   ;;  %v3342_v49 = vld [vmem:[%s3650_s30 + $0x84] ss:$16 sps:$4 sm:$0xff]  }
  0x17   : > { %v3344_v50 = vld [vmem:[%s3650_s30 + $0x8c] ss:$16 sps:$4 sm:$0xff]   ;;  %v3346_v51 = vld [vmem:[%s3650_s30 + $0x80] ss:$16 sps:$4 sm:$0xff]   ;;  %v3347_v52 = vld [vmem:[%s3650_s30 + $0x88] ss:$16 sps:$4 sm:$0xff]  }
  0x18   : > { %1433 = vmatpush1.bf16.msra.mxu0 %v3294_v9  ;;  %1722 = vmatpush1.bf16.msra.mxu1 %v3295_v10  ;;  %v3348_v53 = vld [vmem:[%s3650_s30 + $0xa4] ss:$16 sps:$4 sm:$0xff]   ;;  %v3350_v54 = vld [vmem:[%s3650_s30 + $0xac] ss:$16 sps:$4 sm:$0xff]   ;;  %v3352_v55 = vld [vmem:[%s3650_s30 + $0xa0] ss:$16 sps:$4 sm:$0xff]  }
  0x19   : > { %1434 = vmatprep.subr.bf16.mxu0 %v3535_v1  ;;  %1723 = vmatprep.subr.bf16.mxu1 %v3535_v1  ;;  %v3353_v56 = vld [vmem:[%s3650_s30 + $0xa8] ss:$16 sps:$4 sm:$0xff]   ;;  %v3354_v57 = vld [vmem:[%s3650_s30 + $0xc4] ss:$16 sps:$4 sm:$0xff]   ;;  %v3356_v58 = vld [vmem:[%s3650_s30 + $0xcc] ss:$16 sps:$4 sm:$0xff]  }
  0x1a   : > { %v3358_v59 = vld [vmem:[%s3650_s30 + $0xc0] ss:$16 sps:$4 sm:$0xff]   ;;  %v3359_v60 = vld [vmem:[%s3650_s30 + $0xc8] ss:$16 sps:$4 sm:$0xff]   ;;  %v3360_v61 = vld [vmem:[%s3650_s30 + $0xe4] ss:$16 sps:$4 sm:$0xff]  }
  0x1b   : > { %v3362_v62 = vld [vmem:[%s3650_s30 + $0xec] ss:$16 sps:$4 sm:$0xff]   ;;  %v3364_v63 = vld [vmem:[%s3650_s30 + $0xe0] ss:$16 sps:$4 sm:$0xff]   ;;  %v3365_v0 = vld [vmem:[%s3650_s30 + $0xe8] ss:$16 sps:$4 sm:$0xff]  }
  0x1c   : > { %1435 = vmatpush1.bf16.msra.mxu0 %v3296_v11  ;;  %1724 = vmatpush1.bf16.msra.mxu1 %v3297_v12  ;;  %v3368_v2 = vld [vmem:[%s3650_s30 + $0x10c] ss:$16 sps:$4 sm:$0xff]   ;;  %v3370_v3 = vld [vmem:[%s3650_s30 + $0x100] ss:$16 sps:$4 sm:$0xff]   ;;  %v3371_v4 = vld [vmem:[%s3650_s30 + $0x108] ss:$16 sps:$4 sm:$0xff]  }
  0x1d   : > { %1436 = vmatprep.subr.bf16.mxu0 %v3535_v1  ;;  %1725 = vmatprep.subr.bf16.mxu1 %v3535_v1  ;;  %v3372_v5 = vld [vmem:[%s3650_s30 + $0x124] ss:$16 sps:$4 sm:$0xff]   ;;  %v3374_v6 = vld [vmem:[%s3650_s30 + $0x12c] ss:$16 sps:$4 sm:$0xff]   ;;  %v3376_v7 = vld [vmem:[%s3650_s30 + $0x120] ss:$16 sps:$4 sm:$0xff]  }
  0x1e   : > { %v3377_v8 = vld [vmem:[%s3650_s30 + $0x128] ss:$16 sps:$4 sm:$0xff]   ;;  %v3378_v9 = vld [vmem:[%s3650_s30 + $0x144] ss:$16 sps:$4 sm:$0xff]   ;;  %v3380_v10 = vld [vmem:[%s3650_s30 + $0x14c] ss:$16 sps:$4 sm:$0xff]  }
  0x1f   : > { %v3382_v11 = vld [vmem:[%s3650_s30 + $0x140] ss:$16 sps:$4 sm:$0xff]   ;;  %v3383_v12 = vld [vmem:[%s3650_s30 + $0x148] ss:$16 sps:$4 sm:$0xff]   ;;  %v3396_v21 = vld [vmem:[%s3650_s30 + $0x1a4] ss:$16 sps:$4 sm:$0xff]  }
  0x20   : > { %1437 = vmatpush1.bf16.msra.mxu0 %v3298_v13  ;;  %1726 = vmatpush1.bf16.msra.mxu1 %v3299_v14  ;;  %v3384_v13 = vld [vmem:[%s3650_s30 + $0x164] ss:$16 sps:$4 sm:$0xff]   ;;  %v3386_v14 = vld [vmem:[%s3650_s30 + $0x16c] ss:$16 sps:$4 sm:$0xff]   ;;  %v3394_v19 = vld [vmem:[%s3650_s30 + $0x180] ss:$16 sps:$4 sm:$0xff]  }
  0x21   : > { %1438 = vmatprep.subr.bf16.mxu0 %v3535_v1  ;;  %1727 = vmatprep.subr.bf16.mxu1 %v3535_v1 }
  0x24   : > { %1439 = vmatpush1.bf16.msra.mxu0 %v3300_v15  ;;  %1728 = vmatpush1.bf16.msra.mxu1 %v3301_v16  ;;  %v3388_v15 = vld [vmem:[%s3650_s30 + $0x160] ss:$16 sps:$4 sm:$0xff]   ;;  %v3389_v16 = vld [vmem:[%s3650_s30 + $0x168] ss:$16 sps:$4 sm:$0xff]  }
  0x25   : > { %1440 = vmatprep.subr.bf16.mxu0 %v3535_v1  ;;  %1729 = vmatprep.subr.bf16.mxu1 %v3535_v1 }
  0x28   : > { %1441 = vmatpush1.bf16.msra.mxu0 %v3302_v17  ;;  %1730 = vmatpush1.bf16.msra.mxu1 %v3303_v18  ;;  %v3390_v17 = vld [vmem:[%s3650_s30 + $0x184] ss:$16 sps:$4 sm:$0xff]   ;;  %v3392_v18 = vld [vmem:[%s3650_s30 + $0x18c] ss:$16 sps:$4 sm:$0xff]  }
  0x29   : > { %1442 = vmatprep.subr.bf16.mxu0 %v3535_v1  ;;  %1731 = vmatprep.subr.bf16.mxu1 %v3535_v1 }
  0x2c   : > { %1443 = vmatpush1.bf16.msra.mxu0 %v3304_v20  ;;  %1732 = vmatpush1.bf16.msra.mxu1 %v3305_v22  ;;  %v3395_v20 = vld [vmem:[%s3650_s30 + $0x188] ss:$16 sps:$4 sm:$0xff]   ;;  %v3398_v22 = vld [vmem:[%s3650_s30 + $0x1ac] ss:$16 sps:$4 sm:$0xff]  }
  0x2d   : > { %1444 = vmatprep.subr.bf16.mxu0 %v3535_v1  ;;  %1733 = vmatprep.subr.bf16.mxu1 %v3535_v1 }
  0x30   : > { %1445 = vmatpush1.bf16.msra.mxu0 %v3306_v23  ;;  %1734 = vmatpush1.bf16.msra.mxu1 %v3307_v24  ;;  %v3400_v23 = vld [vmem:[%s3650_s30 + $0x1a0] ss:$16 sps:$4 sm:$0xff]   ;;  %v3401_v24 = vld [vmem:[%s3650_s30 + $0x1a8] ss:$16 sps:$4 sm:$0xff]  }
  0x31   : > { %1446 = vmatprep.subr.bf16.mxu0 %v3535_v1  ;;  %1735 = vmatprep.subr.bf16.mxu1 %v3535_v1 }
  0x34   : > { %1447 = vmatpush1.bf16.msra.mxu0 %v3308_v25  ;;  %1736 = vmatpush1.bf16.msra.mxu1 %v3309_v26  ;;  %v3402_v25 = vld [vmem:[%s3650_s30 + $0x1c4] ss:$16 sps:$4 sm:$0xff]   ;;  %v3404_v26 = vld [vmem:[%s3650_s30 + $0x1cc] ss:$16 sps:$4 sm:$0xff]  }
  0x35   : > { %1448 = vmatprep.subr.bf16.mxu0 %v3535_v1  ;;  %1737 = vmatprep.subr.bf16.mxu1 %v3535_v1 }
  0x38   : > { %1449 = vmatpush1.bf16.msra.mxu0 %v3310_v27  ;;  %1738 = vmatpush1.bf16.msra.mxu1 %v3311_v28  ;;  %v3406_v27 = vld [vmem:[%s3650_s30 + $0x1c0] ss:$16 sps:$4 sm:$0xff]   ;;  %v3407_v28 = vld [vmem:[%s3650_s30 + $0x1c8] ss:$16 sps:$4 sm:$0xff]  }
  0x39   : > { %1450 = vmatprep.subr.bf16.mxu0 %v3535_v1  ;;  %1739 = vmatprep.subr.bf16.mxu1 %v3535_v1 }
  0x3c   : > { %1451 = vmatpush1.bf16.msra.mxu0 %v3312_v29  ;;  %1740 = vmatpush1.bf16.msra.mxu1 %v3313_v30  ;;  %v3408_v29 = vld [vmem:[%s3650_s30 + $0x1e4] ss:$16 sps:$4 sm:$0xff]   ;;  %v3410_v30 = vld [vmem:[%s3650_s30 + $0x1ec] ss:$16 sps:$4 sm:$0xff]  }
  0x3d   : > { %1452 = vmatprep.subr.bf16.mxu0 %v3535_v1  ;;  %1741 = vmatprep.subr.bf16.mxu1 %v3535_v1 }
  0x40   : > { %1453 = vmatpush1.bf16.msra.mxu0 %v3314_v31  ;;  %1742 = vmatpush1.bf16.msra.mxu1 %v3315_v32  ;;  %v3412_v31 = vld [vmem:[%s3650_s30 + $0x1e0] ss:$16 sps:$4 sm:$0xff]   ;;  %v3413_v32 = vld [vmem:[%s3650_s30 + $0x1e8] ss:$16 sps:$4 sm:$0xff]  }
  0x41   : > { %1454 = vmatprep.subr.bf16.mxu0 %v3535_v1  ;;  %1743 = vmatprep.subr.bf16.mxu1 %v3535_v1  ;;  %v3366_v1 = vld [vmem:[%s3650_s30 + $0x104] ss:$16 sps:$4 sm:$0xff]  }
  0x44   : > { %1455 = vmatpush1.bf16.msra.mxu0 %v3316_v33  ;;  %1744 = vmatpush1.bf16.msra.mxu1 %v3317_v34  ;;  %v3414_v33 = vld [vmem:[%s3650_s30 + $0x204] ss:$16 sps:$4 sm:$0xff]   ;;  %v3416_v34 = vld [vmem:[%s3650_s30 + $0x20c] ss:$16 sps:$4 sm:$0xff]  }
  0x47   : > { %1457 = vmatmul.mubr.bf16.vlgmr.msra.gmra.mrb[0].mxu0 %v3318_v35  ;;  %1746 = vmatmul.mubr.bf16.vlgmr.msra.gmra.mrb[0].mxu1 %v3321_v36  ;;  %v3418_v35 = vld [vmem:[%s3650_s30 + $0x200] ss:$16 sps:$4 sm:$0xff]   ;;  %v3419_v36 = vld [vmem:[%s3650_s30 + $0x208] ss:$16 sps:$4 sm:$0xff]  }
  0x48   : > { %1464 = vmatprep.mubr.bf16.mxu0 %v3324_v37  ;;  %1753 = vmatprep.mubr.bf16.mxu1 %v3326_v38  ;;  %v3420_v37 = vld [vmem:[%s3650_s30 + $0x224] ss:$16 sps:$4 sm:$0xff]   ;;  %v3422_v38 = vld [vmem:[%s3650_s30 + $0x22c] ss:$16 sps:$4 sm:$0xff]  }
  0x4f   : > { %1465 = vmatmul.mubr.bf16.gmra.mrb[4].mxu0 %v3328_v39  ;;  %1754 = vmatmul.mubr.bf16.gmra.mrb[4].mxu1 %v3329_v40  ;;  %v3424_v39 = vld [vmem:[%s3650_s30 + $0x220] ss:$16 sps:$4 sm:$0xff]   ;;  %v3425_v40 = vld [vmem:[%s3650_s30 + $0x228] ss:$16 sps:$4 sm:$0xff]  }
  0x50   : > { %1472 = vmatprep.mubr.bf16.mxu0 %v3330_v41  ;;  %1761 = vmatprep.mubr.bf16.mxu1 %v3332_v42  ;;  %v3426_v41 = vld [vmem:[%s3650_s30 + $0x244] ss:$16 sps:$4 sm:$0xff]   ;;  %v3428_v42 = vld [vmem:[%s3650_s30 + $0x24c] ss:$16 sps:$4 sm:$0xff]  }
  0x57   : > { %1473 = vmatmul.mubr.bf16.gmra.mrb[8].mxu0 %v3334_v43  ;;  %1762 = vmatmul.mubr.bf16.gmra.mrb[8].mxu1 %v3335_v44  ;;  %v3430_v43 = vld [vmem:[%s3650_s30 + $0x240] ss:$16 sps:$4 sm:$0xff]   ;;  %v3431_v44 = vld [vmem:[%s3650_s30 + $0x248] ss:$16 sps:$4 sm:$0xff]  }
  0x58   : > { %1480 = vmatprep.mubr.bf16.mxu0 %v3336_v45  ;;  %1769 = vmatprep.mubr.bf16.mxu1 %v3338_v46  ;;  %v3432_v45 = vld [vmem:[%s3650_s30 + $0x264] ss:$16 sps:$4 sm:$0xff]   ;;  %v3434_v46 = vld [vmem:[%s3650_s30 + $0x26c] ss:$16 sps:$4 sm:$0xff]  }
  0x5f   : > { %1481 = vmatmul.mubr.bf16.gmra.mrb[12].mxu0 %v3340_v47  ;;  %1770 = vmatmul.mubr.bf16.gmra.mrb[12].mxu1 %v3341_v48  ;;  %v3436_v47 = vld [vmem:[%s3650_s30 + $0x260] ss:$16 sps:$4 sm:$0xff]   ;;  %v3437_v48 = vld [vmem:[%s3650_s30 + $0x268] ss:$16 sps:$4 sm:$0xff]  }
  0x60   : > { %1488 = vmatprep.mubr.bf16.mxu0 %v3342_v49  ;;  %1777 = vmatprep.mubr.bf16.mxu1 %v3344_v50  ;;  %v3438_v49 = vld [vmem:[%s3650_s30 + $0x284] ss:$16 sps:$4 sm:$0xff]   ;;  %v3440_v50 = vld [vmem:[%s3650_s30 + $0x28c] ss:$16 sps:$4 sm:$0xff]  }
  0x67   : > { %1489 = vmatmul.mubr.bf16.gmra.mrb[16].mxu0 %v3346_v51  ;;  %1778 = vmatmul.mubr.bf16.gmra.mrb[16].mxu1 %v3347_v52  ;;  %v3442_v51 = vld [vmem:[%s3650_s30 + $0x280] ss:$16 sps:$4 sm:$0xff]   ;;  %v3443_v52 = vld [vmem:[%s3650_s30 + $0x288] ss:$16 sps:$4 sm:$0xff]  }
  0x68   : > { %1496 = vmatprep.mubr.bf16.mxu0 %v3348_v53  ;;  %1785 = vmatprep.mubr.bf16.mxu1 %v3350_v54  ;;  %v3444_v53 = vld [vmem:[%s3650_s30 + $0x2a4] ss:$16 sps:$4 sm:$0xff]   ;;  %v3446_v54 = vld [vmem:[%s3650_s30 + $0x2ac] ss:$16 sps:$4 sm:$0xff]  }
  0x6f   : > { %1497 = vmatmul.mubr.bf16.gmra.mrb[20].mxu0 %v3352_v55  ;;  %1786 = vmatmul.mubr.bf16.gmra.mrb[20].mxu1 %v3353_v56  ;;  %v3448_v55 = vld [vmem:[%s3650_s30 + $0x2a0] ss:$16 sps:$4 sm:$0xff]   ;;  %v3449_v56 = vld [vmem:[%s3650_s30 + $0x2a8] ss:$16 sps:$4 sm:$0xff]  }
  0x70   : > { %1504 = vmatprep.mubr.bf16.mxu0 %v3354_v57  ;;  %1793 = vmatprep.mubr.bf16.mxu1 %v3356_v58  ;;  %v3450_v57 = vld [vmem:[%s3650_s30 + $0x2c4] ss:$16 sps:$4 sm:$0xff]   ;;  %v3452_v58 = vld [vmem:[%s3650_s30 + $0x2cc] ss:$16 sps:$4 sm:$0xff]  }
  0x77   : > { %1505 = vmatmul.mubr.bf16.gmra.mrb[24].mxu0 %v3358_v59  ;;  %1794 = vmatmul.mubr.bf16.gmra.mrb[24].mxu1 %v3359_v60  ;;  %v3454_v59 = vld [vmem:[%s3650_s30 + $0x2c0] ss:$16 sps:$4 sm:$0xff]   ;;  %v3455_v60 = vld [vmem:[%s3650_s30 + $0x2c8] ss:$16 sps:$4 sm:$0xff]  }
  0x78   : > { %1512 = vmatprep.mubr.bf16.mxu0 %v3360_v61  ;;  %1801 = vmatprep.mubr.bf16.mxu1 %v3362_v62  ;;  %v3456_v61 = vld [vmem:[%s3650_s30 + $0x2e4] ss:$16 sps:$4 sm:$0xff]   ;;  %v3458_v62 = vld [vmem:[%s3650_s30 + $0x2ec] ss:$16 sps:$4 sm:$0xff]  }
  0x7f   : > { %1513 = vmatmul.mubr.bf16.gmra.mrb[28].mxu0 %v3364_v63  ;;  %1802 = vmatmul.mubr.bf16.gmra.mrb[28].mxu1 %v3365_v0  ;;  %v3460_v63 = vld [vmem:[%s3650_s30 + $0x2e0] ss:$16 sps:$4 sm:$0xff]   ;;  %v3461_v0 = vld [vmem:[%s3650_s30 + $0x2e8] ss:$16 sps:$4 sm:$0xff]  }
  0x80   : > { %1520 = vmatprep.mubr.bf16.mxu0 %v3366_v1  ;;  %1809 = vmatprep.mubr.bf16.mxu1 %v3368_v2  ;;  %v3462_v1 = vld [vmem:[%s3650_s30 + $0x304] ss:$16 sps:$4 sm:$0xff]   ;;  %v3464_v2 = vld [vmem:[%s3650_s30 + $0x30c] ss:$16 sps:$4 sm:$0xff]  }
  0x87   : > { %1521 = vmatmul.mubr.bf16.gmra.mrb[32].mxu0 %v3370_v3  ;;  %1810 = vmatmul.mubr.bf16.gmra.mrb[32].mxu1 %v3371_v4  ;;  %v3466_v3 = vld [vmem:[%s3650_s30 + $0x300] ss:$16 sps:$4 sm:$0xff]   ;;  %v3467_v4 = vld [vmem:[%s3650_s30 + $0x308] ss:$16 sps:$4 sm:$0xff]  }
  0x88   : > { %1528 = vmatprep.mubr.bf16.mxu0 %v3372_v5  ;;  %1817 = vmatprep.mubr.bf16.mxu1 %v3374_v6  ;;  %v3468_v5 = vld [vmem:[%s3650_s30 + $0x324] ss:$16 sps:$4 sm:$0xff]   ;;  %v3470_v6 = vld [vmem:[%s3650_s30 + $0x32c] ss:$16 sps:$4 sm:$0xff]  }
  0x8f   : > { %1529 = vmatmul.mubr.bf16.gmra.mrb[36].mxu0 %v3376_v7  ;;  %1818 = vmatmul.mubr.bf16.gmra.mrb[36].mxu1 %v3377_v8  ;;  %v3472_v7 = vld [vmem:[%s3650_s30 + $0x320] ss:$16 sps:$4 sm:$0xff]   ;;  %v3473_v8 = vld [vmem:[%s3650_s30 + $0x328] ss:$16 sps:$4 sm:$0xff]  }
  0x90   : > { %1536 = vmatprep.mubr.bf16.mxu0 %v3378_v9  ;;  %1825 = vmatprep.mubr.bf16.mxu1 %v3380_v10  ;;  %v3474_v9 = vld [vmem:[%s3650_s30 + $0x344] ss:$16 sps:$4 sm:$0xff]   ;;  %v3476_v10 = vld [vmem:[%s3650_s30 + $0x34c] ss:$16 sps:$4 sm:$0xff]  }
  0x97   : > { %1537 = vmatmul.mubr.bf16.gmra.mrb[40].mxu0 %v3382_v11  ;;  %1826 = vmatmul.mubr.bf16.gmra.mrb[40].mxu1 %v3383_v12  ;;  %v3478_v11 = vld [vmem:[%s3650_s30 + $0x340] ss:$16 sps:$4 sm:$0xff]   ;;  %v3479_v12 = vld [vmem:[%s3650_s30 + $0x348] ss:$16 sps:$4 sm:$0xff]  }
  0x98   : > { %1544 = vmatprep.mubr.bf16.mxu0 %v3384_v13  ;;  %1833 = vmatprep.mubr.bf16.mxu1 %v3386_v14  ;;  %v3480_v13 = vld [vmem:[%s3650_s30 + $0x364] ss:$16 sps:$4 sm:$0xff]   ;;  %v3482_v14 = vld [vmem:[%s3650_s30 + $0x36c] ss:$16 sps:$4 sm:$0xff]  }
  0x9f   : > { %1545 = vmatmul.mubr.bf16.gmra.mrb[44].mxu0 %v3388_v15  ;;  %1834 = vmatmul.mubr.bf16.gmra.mrb[44].mxu1 %v3389_v16 }
  0xa0   : > { %1552 = vmatprep.mubr.bf16.mxu0 %v3390_v17  ;;  %1841 = vmatprep.mubr.bf16.mxu1 %v3392_v18  ;;  %v3826_v17 = vld [vmem:[%s3957_s2] ss:$0 sm:$0xff] }
  0xa7   : > { %1553 = vmatmul.mubr.bf16.gmra.mrb[48].mxu0 %v3394_v19  ;;  %1842 = vmatmul.mubr.bf16.gmra.mrb[48].mxu1 %v3395_v20  ;;  %v3484_v19 = vld [vmem:[%s3650_s30 + $0x360] ss:$16 sps:$4 sm:$0xff]  }
  0xa8   : > { %1560 = vmatprep.mubr.bf16.mxu0 %v3396_v21  ;;  %1849 = vmatprep.mubr.bf16.mxu1 %v3398_v22 }
  0xaf   : > { %1561 = vmatmul.mubr.bf16.gmra.mrb[52].mxu0 %v3400_v23  ;;  %1850 = vmatmul.mubr.bf16.gmra.mrb[52].mxu1 %v3401_v24  ;;  %v3485_v23 = vld [vmem:[%s3650_s30 + $0x368] ss:$16 sps:$4 sm:$0xff]   ;;  %v3486_v24 = vld [vmem:[%s3650_s30 + $0x384] ss:$16 sps:$4 sm:$0xff]  }
  0xb0   : > { %1568 = vmatprep.mubr.bf16.mxu0 %v3402_v25  ;;  %1857 = vmatprep.mubr.bf16.mxu1 %v3404_v26 }
  0xb7   : > { %1569 = vmatmul.mubr.bf16.gmra.mrb[56].mxu0 %v3406_v27  ;;  %1858 = vmatmul.mubr.bf16.gmra.mrb[56].mxu1 %v3407_v28  ;;  %v3488_v27 = vld [vmem:[%s3650_s30 + $0x38c] ss:$16 sps:$4 sm:$0xff]  }
  0xb8   : > { %1576 = vmatprep.mubr.bf16.mxu0 %v3408_v29  ;;  %1865 = vmatprep.mubr.bf16.mxu1 %v3410_v30 }
  0xbf   : > { %1577 = vmatmul.mubr.bf16.gmra.mrb[60].mxu0 %v3412_v31  ;;  %1866 = vmatmul.mubr.bf16.gmra.mrb[60].mxu1 %v3413_v32 }
  0xc0   : > { %1584 = vmatprep.mubr.bf16.mxu0 %v3414_v33  ;;  %1873 = vmatprep.mubr.bf16.mxu1 %v3416_v34 }
  0xc7   : > { %1585 = vmatmul.mubr.bf16.gmra.mrb[64].mxu0 %v3418_v35  ;;  %1874 = vmatmul.mubr.bf16.gmra.mrb[64].mxu1 %v3419_v36 }
  0xc8   : > { %1592 = vmatprep.mubr.bf16.mxu0 %v3420_v37  ;;  %1881 = vmatprep.mubr.bf16.mxu1 %v3422_v38  ;;  %v3490_v37 = vld [vmem:[%s3650_s30 + $0x380] ss:$16 sps:$4 sm:$0xff]  }
  0xcf   : > { %1593 = vmatmul.mubr.bf16.gmra.mrb[68].mxu0 %v3424_v39  ;;  %1882 = vmatmul.mubr.bf16.gmra.mrb[68].mxu1 %v3425_v40 }
  0xd0   : > { %1600 = vmatprep.mubr.bf16.mxu0 %v3426_v41  ;;  %1889 = vmatprep.mubr.bf16.mxu1 %v3428_v42  ;;  %v3491_v42 = vld [vmem:[%s3650_s30 + $0x388] ss:$16 sps:$4 sm:$0xff]  }
  0xd7   : > { %1601 = vmatmul.mubr.bf16.gmra.mrb[72].mxu0 %v3430_v43  ;;  %1890 = vmatmul.mubr.bf16.gmra.mrb[72].mxu1 %v3431_v44  ;;  %v3492_v43 = vld [vmem:[%s3650_s30 + $0x3a4] ss:$16 sps:$4 sm:$0xff]  }
  0xd8   : > { %1608 = vmatprep.mubr.bf16.mxu0 %v3432_v45  ;;  %1897 = vmatprep.mubr.bf16.mxu1 %v3434_v46  ;;  %v3494_v46 = vld [vmem:[%s3650_s30 + $0x3ac] ss:$16 sps:$4 sm:$0xff]  }
  0xdf   : > { %1609 = vmatmul.mubr.bf16.gmra.mrb[76].mxu0 %v3436_v47  ;;  %1898 = vmatmul.mubr.bf16.gmra.mrb[76].mxu1 %v3437_v48 }
  0xe0   : > { %1616 = vmatprep.mubr.bf16.mxu0 %v3438_v49  ;;  %1905 = vmatprep.mubr.bf16.mxu1 %v3440_v50 }
  0xe7   : > { %1617 = vmatmul.mubr.bf16.gmra.mrb[80].mxu0 %v3442_v51  ;;  %1906 = vmatmul.mubr.bf16.gmra.mrb[80].mxu1 %v3443_v52 }
  0xe8   : > { %1624 = vmatprep.mubr.bf16.mxu0 %v3444_v53  ;;  %1913 = vmatprep.mubr.bf16.mxu1 %v3446_v54 }
  0xef   : > { %1625 = vmatmul.mubr.bf16.gmra.mrb[84].mxu0 %v3448_v55  ;;  %1914 = vmatmul.mubr.bf16.gmra.mrb[84].mxu1 %v3449_v56  ;;  %v3496_v56 = vld [vmem:[%s3650_s30 + $0x3a0] ss:$16 sps:$4 sm:$0xff]  }
  0xf0   : > { %1632 = vmatprep.mubr.bf16.mxu0 %v3450_v57  ;;  %1921 = vmatprep.mubr.bf16.mxu1 %v3452_v58 }
  0xf7   : > { %1633 = vmatmul.mubr.bf16.gmra.mrb[88].mxu0 %v3454_v59  ;;  %1922 = vmatmul.mubr.bf16.gmra.mrb[88].mxu1 %v3455_v60 }
  0xf8   : > { %1640 = vmatprep.mubr.bf16.mxu0 %v3456_v61  ;;  %1929 = vmatprep.mubr.bf16.mxu1 %v3458_v62  ;;  %v3497_v61 = vld [vmem:[%s3650_s30 + $0x3a8] ss:$16 sps:$4 sm:$0xff]   ;;  %v3498_v62 = vld [vmem:[%s3650_s30 + $0x3c4] ss:$16 sps:$4 sm:$0xff]  }
  0xff   : > { %1641 = vmatmul.mubr.bf16.gmra.mrb[92].mxu0 %v3460_v63  ;;  %1930 = vmatmul.mubr.bf16.gmra.mrb[92].mxu1 %v3461_v0 }
 0x100   : > { %1648 = vmatprep.mubr.bf16.mxu0 %v3462_v1  ;;  %1937 = vmatprep.mubr.bf16.mxu1 %v3464_v2  ;;  %v3500_v1 = vld [vmem:[%s3650_s30 + $0x3cc] ss:$16 sps:$4 sm:$0xff]  }
 0x107   : > { %1649 = vmatmul.mubr.bf16.gmra.mrb[96].mxu0 %v3466_v3  ;;  %1938 = vmatmul.mubr.bf16.gmra.mrb[96].mxu1 %v3467_v4 }
 0x108   : > { %1656 = vmatprep.mubr.bf16.mxu0 %v3468_v5  ;;  %1945 = vmatprep.mubr.bf16.mxu1 %v3470_v6 }
 0x10f   : > { %1657 = vmatmul.mubr.bf16.gmra.mrb[100].mxu0 %v3472_v7  ;;  %1946 = vmatmul.mubr.bf16.gmra.mrb[100].mxu1 %v3473_v8 }
 0x110   : > { %1664 = vmatprep.mubr.bf16.mxu0 %v3474_v9  ;;  %1953 = vmatprep.mubr.bf16.mxu1 %v3476_v10 }
 0x117   : > { %1665 = vmatmul.mubr.bf16.gmra.mrb[104].mxu0 %v3478_v11  ;;  %1954 = vmatmul.mubr.bf16.gmra.mrb[104].mxu1 %v3479_v12  ;;  %v3502_v11 = vld [vmem:[%s3650_s30 + $0x3c0] ss:$16 sps:$4 sm:$0xff]  }
 0x118   : > { %1672 = vmatprep.mubr.bf16.mxu0 %v3480_v13  ;;  %1961 = vmatprep.mubr.bf16.mxu1 %v3482_v14 }
 0x11a   : > { %v1458_v15 = vpop.f32.mrb[0].mxu0  ;;  %v1747_v16 = vpop.f32.mrb[0].mxu1 }
 0x11b   : > { %v1460_v18 = vpop.f32.mrb[1].mxu0  ;;  %v1748_v20 = vadd.f32 %v1747_v16, %v1458_v15  ;;  %v1749_v21 = vpop.f32.mrb[1].mxu1  ;;  %v3503_v16 = vld [vmem:[%s3650_s30 + $0x3c8] ss:$16 sps:$4 sm:$0xff]  }
 0x11c   : > { %v1461_v22 = vpop.f32.mrb[2].mxu0  ;;  %v1750_v25 = vpop.f32.mrb[2].mxu1  ;;  %v3504_v18 = vld [vmem:[%s3650_s30 + $0x3e4] ss:$16 sps:$4 sm:$0xff]   ;;  %v3506_v21 = vld [vmem:[%s3650_s30 + $0x3ec] ss:$16 sps:$4 sm:$0xff]  }
 0x11d   : > { %v1463_v26 = vpop.f32.mrb[3].mxu0  ;;  %v2204_v28 = vadd.f32 %v3826_v17, %v1748_v20  ;;  %v1751_v29 = vadd.f32 %v1750_v25, %v1461_v22  ;;  %v1752_v30 = vpop.f32.mrb[3].mxu1 }
 0x11f   : > { %1673 = vmatmul.mubr.bf16.gmra.mrb[108].mxu0 %v3484_v19  ;;  %v2205_v31 = vadd.f32 %v3826_v17, %v1751_v29  ;;  %1962 = vmatmul.mubr.bf16.gmra.mrb[108].mxu1 %v3485_v23  ;;  %v2268_v32 = vmax.f32 %v2204_v28, 0.0 }
 0x120   : > { %1680 = vmatprep.mubr.bf16.mxu0 %v3486_v24  ;;  %1969 = vmatprep.mubr.bf16.mxu1 %v3488_v27 }
 0x121   : > { %v2269_v33 = vmax.f32 %v2205_v31, 0.0  ;;  %v3508_v31 = vld [vmem:[%s3650_s30 + $0x3e0] ss:$16 sps:$4 sm:$0xff]  }
 0x122   : > { %v1466_v34 = vpop.f32.mrb[4].mxu0  ;;  %v1755_v35 = vpop.f32.mrb[4].mxu1 }
 0x123   : > { %v1468_v36 = vpop.f32.mrb[5].mxu0  ;;  %v3073_v38 = vpack.c.bf16 %v2269_v33, %v2268_v32  ;;  %v1756_v39 = vadd.f32 %v1755_v35, %v1466_v34  ;;  %v1757_v40 = vpop.f32.mrb[5].mxu1 }
 0x124   : > { %v1469_v41 = vpop.f32.mrb[6].mxu0  ;;  %v1758_v44 = vpop.f32.mrb[6].mxu1  ;;  %v3509_v36 = vld [vmem:[%s3650_s30 + $0x3e8] ss:$16 sps:$4 sm:$0xff]  }
 0x125   : > { %v1471_v45 = vpop.f32.mrb[7].mxu0  ;;  %3074 = vst [vmem:[%s3838_s21] sm:$0xff] %v3073_v38   ;;  %v2206_v47 = vadd.f32 %v3826_v17, %v1756_v39  ;;  %v1759_v48 = vadd.f32 %v1758_v44, %v1469_v41  ;;  %v1760_v49 = vpop.f32.mrb[7].mxu1 }
 0x127   : > { %1681 = vmatmul.mubr.bf16.gmra.mrb[112].mxu0 %v3490_v37  ;;  %v2207_v50 = vadd.f32 %v3826_v17, %v1759_v48  ;;  %1970 = vmatmul.mubr.bf16.gmra.mrb[112].mxu1 %v3491_v42  ;;  %v2270_v51 = vmax.f32 %v2206_v47, 0.0 }
 0x128   : > { %1688 = vmatprep.mubr.bf16.mxu0 %v3492_v43  ;;  %1977 = vmatprep.mubr.bf16.mxu1 %v3494_v46 }
 0x129   : > { %v2271_v52 = vmax.f32 %v2207_v50, 0.0 }
 0x12a   : > { %v1474_v53 = vpop.f32.mrb[8].mxu0  ;;  %v1763_v54 = vpop.f32.mrb[8].mxu1 }
 0x12b   : > { %v1476_v55 = vpop.f32.mrb[9].mxu0  ;;  %v3078_v57 = vpack.c.bf16 %v2271_v52, %v2270_v51  ;;  %v1764_v58 = vadd.f32 %v1763_v54, %v1474_v53  ;;  %v1765_v59 = vpop.f32.mrb[9].mxu1 }
 0x12c   : > { %v1477_v60 = vpop.f32.mrb[10].mxu0  ;;  %v1766_v63 = vpop.f32.mrb[10].mxu1 }
 0x12d   : > { %v1479_v0 = vpop.f32.mrb[11].mxu0  ;;  %3230 = vst [vmem:[%s3838_s21 + $0x8] sm:$0xff] %v3078_v57   ;;  %v2208_v2 = vadd.f32 %v3826_v17, %v1764_v58  ;;  %v1767_v3 = vadd.f32 %v1766_v63, %v1477_v60  ;;  %v1768_v4 = vpop.f32.mrb[11].mxu1 }
 0x12f   : > { %1689 = vmatmul.mubr.bf16.gmra.mrb[116].mxu0 %v3496_v56  ;;  %v2209_v5 = vadd.f32 %v3826_v17, %v1767_v3  ;;  %1978 = vmatmul.mubr.bf16.gmra.mrb[116].mxu1 %v3497_v61  ;;  %v2272_v6 = vmax.f32 %v2208_v2, 0.0 }
 0x130   : > { %1696 = vmatprep.mubr.bf16.mxu0 %v3498_v62  ;;  %1985 = vmatprep.mubr.bf16.mxu1 %v3500_v1 }
 0x131   : > { %v2273_v7 = vmax.f32 %v2209_v5, 0.0 }
 0x132   : > { %v1482_v8 = vpop.f32.mrb[12].mxu0  ;;  %v1771_v9 = vpop.f32.mrb[12].mxu1 }
 0x133   : > { %v1484_v10 = vpop.f32.mrb[13].mxu0  ;;  %v3083_v12 = vpack.c.bf16 %v2273_v7, %v2272_v6  ;;  %v1772_v13 = vadd.f32 %v1771_v9, %v1482_v8  ;;  %v1773_v14 = vpop.f32.mrb[13].mxu1 }
 0x134   : > { %v1485_v15 = vpop.f32.mrb[14].mxu0  ;;  %v1774_v19 = vpop.f32.mrb[14].mxu1 }
 0x135   : > { %v1487_v20 = vpop.f32.mrb[15].mxu0  ;;  %3231 = vst [vmem:[%s3838_s21 + $0x10] sm:$0xff] %v3083_v12   ;;  %v2210_v22 = vadd.f32 %v3826_v17, %v1772_v13  ;;  %v1775_v23 = vadd.f32 %v1774_v19, %v1485_v15  ;;  %v1776_v24 = vpop.f32.mrb[15].mxu1 }
 0x137   : > { %1697 = vmatmul.mubr.bf16.gmra.mrb[120].mxu0 %v3502_v11  ;;  %v2211_v25 = vadd.f32 %v3826_v17, %v1775_v23  ;;  %1986 = vmatmul.mubr.bf16.gmra.mrb[120].mxu1 %v3503_v16  ;;  %v2274_v26 = vmax.f32 %v2210_v22, 0.0 }
 0x138   : > { %1704 = vmatprep.mubr.bf16.mxu0 %v3504_v18  ;;  %1993 = vmatprep.mubr.bf16.mxu1 %v3506_v21 }
 0x139   : > { %v2275_v27 = vmax.f32 %v2211_v25, 0.0 }
 0x13a   : > { %v1490_v28 = vpop.f32.mrb[16].mxu0  ;;  %v1779_v29 = vpop.f32.mrb[16].mxu1 }
 0x13b   : > { %v1492_v30 = vpop.f32.mrb[17].mxu0  ;;  %v3088_v32 = vpack.c.bf16 %v2275_v27, %v2274_v26  ;;  %v1780_v33 = vadd.f32 %v1779_v29, %v1490_v28  ;;  %v1781_v34 = vpop.f32.mrb[17].mxu1 }
 0x13c   : > { %v1493_v35 = vpop.f32.mrb[18].mxu0  ;;  %v1782_v37 = vpop.f32.mrb[18].mxu1 }
 0x13d   : > { %v1495_v38 = vpop.f32.mrb[19].mxu0  ;;  %3232 = vst [vmem:[%s3838_s21 + $0x18] sm:$0xff] %v3088_v32   ;;  %v2212_v39 = vadd.f32 %v3826_v17, %v1780_v33  ;;  %v1783_v40 = vadd.f32 %v1782_v37, %v1493_v35  ;;  %v1784_v41 = vpop.f32.mrb[19].mxu1 }
 0x13f   : > { %1705 = vmatmul.mubr.bf16.gmra.mrb[124].mxu0 %v3508_v31  ;;  %v2213_v42 = vadd.f32 %v3826_v17, %v1783_v40  ;;  %1994 = vmatmul.mubr.bf16.gmra.mrb[124].mxu1 %v3509_v36  ;;  %v2276_v43 = vmax.f32 %v2212_v39, 0.0 }
 0x141   : > { %v2277_v44 = vmax.f32 %v2213_v42, 0.0 }
 0x142   : > { %v1498_v45 = vpop.f32.mrb[20].mxu0  ;;  %v1787_v46 = vpop.f32.mrb[20].mxu1 }
 0x143   : > { %v1500_v47 = vpop.f32.mrb[21].mxu0  ;;  %v3093_v48 = vpack.c.bf16 %v2277_v44, %v2276_v43  ;;  %v1788_v49 = vadd.f32 %v1787_v46, %v1498_v45  ;;  %v1789_v50 = vpop.f32.mrb[21].mxu1 }
 0x144   : > { %v1501_v51 = vpop.f32.mrb[22].mxu0  ;;  %v1790_v52 = vpop.f32.mrb[22].mxu1 }
 0x145   : > { %v1503_v53 = vpop.f32.mrb[23].mxu0  ;;  %3233 = vst [vmem:[%s3838_s21 + $0x20] sm:$0xff] %v3093_v48   ;;  %v2214_v54 = vadd.f32 %v3826_v17, %v1788_v49  ;;  %v1791_v55 = vadd.f32 %v1790_v52, %v1501_v51  ;;  %v1792_v56 = vpop.f32.mrb[23].mxu1 }
 0x147   : > { %v2215_v57 = vadd.f32 %v3826_v17, %v1791_v55  ;;  %v2278_v58 = vmax.f32 %v2214_v54, 0.0 }
 0x149   : > { %v2279_v59 = vmax.f32 %v2215_v57, 0.0 }
 0x14a   : > { %v1506_v60 = vpop.f32.mrb[24].mxu0  ;;  %v1795_v61 = vpop.f32.mrb[24].mxu1 }
 0x14b   : > { %v1508_v62 = vpop.f32.mrb[25].mxu0  ;;  %v3098_v63 = vpack.c.bf16 %v2279_v59, %v2278_v58  ;;  %v1796_v0 = vadd.f32 %v1795_v61, %v1506_v60  ;;  %v1797_v1 = vpop.f32.mrb[25].mxu1 }
 0x14c   : > { %v1509_v2 = vpop.f32.mrb[26].mxu0  ;;  %v1798_v3 = vpop.f32.mrb[26].mxu1 }
 0x14d   : > { %v1511_v4 = vpop.f32.mrb[27].mxu0  ;;  %3234 = vst [vmem:[%s3838_s21 + $0x28] sm:$0xff] %v3098_v63   ;;  %v2216_v5 = vadd.f32 %v3826_v17, %v1796_v0  ;;  %v1799_v6 = vadd.f32 %v1798_v3, %v1509_v2  ;;  %v1800_v7 = vpop.f32.mrb[27].mxu1 }
 0x14f   : > { %v2217_v8 = vadd.f32 %v3826_v17, %v1799_v6  ;;  %v2280_v9 = vmax.f32 %v2216_v5, 0.0 }
 0x151   : > { %v2281_v10 = vmax.f32 %v2217_v8, 0.0 }
 0x152   : > { %v1514_v11 = vpop.f32.mrb[28].mxu0  ;;  %v1803_v12 = vpop.f32.mrb[28].mxu1 }
 0x153   : > { %v1516_v13 = vpop.f32.mrb[29].mxu0  ;;  %v3103_v14 = vpack.c.bf16 %v2281_v10, %v2280_v9  ;;  %v1804_v15 = vadd.f32 %v1803_v12, %v1514_v11  ;;  %v1805_v16 = vpop.f32.mrb[29].mxu1 }
 0x154   : > { %v1517_v18 = vpop.f32.mrb[30].mxu0  ;;  %v1806_v19 = vpop.f32.mrb[30].mxu1 }
 0x155   : > { %v1519_v20 = vpop.f32.mrb[31].mxu0  ;;  %3235 = vst [vmem:[%s3838_s21 + $0x30] sm:$0xff] %v3103_v14   ;;  %v2218_v21 = vadd.f32 %v3826_v17, %v1804_v15  ;;  %v1807_v22 = vadd.f32 %v1806_v19, %v1517_v18  ;;  %v1808_v23 = vpop.f32.mrb[31].mxu1 }
 0x157   : > { %v2219_v24 = vadd.f32 %v3826_v17, %v1807_v22  ;;  %v2282_v25 = vmax.f32 %v2218_v21, 0.0 }
 0x159   : > { %v2283_v26 = vmax.f32 %v2219_v24, 0.0 }
 0x15a   : > { %v1522_v27 = vpop.f32.mrb[32].mxu0  ;;  %v1811_v28 = vpop.f32.mrb[32].mxu1 }
 0x15b   : > { %v1524_v29 = vpop.f32.mrb[33].mxu0  ;;  %v3108_v30 = vpack.c.bf16 %v2283_v26, %v2282_v25  ;;  %v1812_v31 = vadd.f32 %v1811_v28, %v1522_v27  ;;  %v1813_v32 = vpop.f32.mrb[33].mxu1 }
 0x15c   : > { %v1525_v33 = vpop.f32.mrb[34].mxu0  ;;  %v1814_v34 = vpop.f32.mrb[34].mxu1 }
 0x15d   : > { %v1527_v35 = vpop.f32.mrb[35].mxu0  ;;  %3236 = vst [vmem:[%s3838_s21 + $0x38] sm:$0xff] %v3108_v30   ;;  %v2220_v36 = vadd.f32 %v3826_v17, %v1812_v31  ;;  %v1815_v37 = vadd.f32 %v1814_v34, %v1525_v33  ;;  %v1816_v38 = vpop.f32.mrb[35].mxu1 }
 0x15f   : > { %v2221_v39 = vadd.f32 %v3826_v17, %v1815_v37  ;;  %v2284_v40 = vmax.f32 %v2220_v36, 0.0 }
 0x161   : > { %v2285_v41 = vmax.f32 %v2221_v39, 0.0 }
 0x162   : > { %v1530_v42 = vpop.f32.mrb[36].mxu0  ;;  %v1819_v43 = vpop.f32.mrb[36].mxu1 }
 0x163   : > { %v1532_v44 = vpop.f32.mrb[37].mxu0  ;;  %v3113_v45 = vpack.c.bf16 %v2285_v41, %v2284_v40  ;;  %v1820_v46 = vadd.f32 %v1819_v43, %v1530_v42  ;;  %v1821_v47 = vpop.f32.mrb[37].mxu1 }
 0x164   : > { %v1533_v48 = vpop.f32.mrb[38].mxu0  ;;  %v1822_v49 = vpop.f32.mrb[38].mxu1 }
 0x165   : > { %v1535_v50 = vpop.f32.mrb[39].mxu0  ;;  %3237 = vst [vmem:[%s3838_s21 + $0x40] sm:$0xff] %v3113_v45   ;;  %v2222_v51 = vadd.f32 %v3826_v17, %v1820_v46  ;;  %v1823_v52 = vadd.f32 %v1822_v49, %v1533_v48  ;;  %v1824_v53 = vpop.f32.mrb[39].mxu1 }
 0x167   : > { %v2223_v54 = vadd.f32 %v3826_v17, %v1823_v52  ;;  %v2286_v55 = vmax.f32 %v2222_v51, 0.0 }
 0x169   : > { %v2287_v56 = vmax.f32 %v2223_v54, 0.0 }
 0x16a   : > { %v1538_v57 = vpop.f32.mrb[40].mxu0  ;;  %v1827_v58 = vpop.f32.mrb[40].mxu1 }
 0x16b   : > { %v1540_v59 = vpop.f32.mrb[41].mxu0  ;;  %v3118_v60 = vpack.c.bf16 %v2287_v56, %v2286_v55  ;;  %v1828_v61 = vadd.f32 %v1827_v58, %v1538_v57  ;;  %v1829_v62 = vpop.f32.mrb[41].mxu1 }
 0x16c   : > { %v1541_v63 = vpop.f32.mrb[42].mxu0  ;;  %v1830_v0 = vpop.f32.mrb[42].mxu1 }
 0x16d   : > { %v1543_v1 = vpop.f32.mrb[43].mxu0  ;;  %3238 = vst [vmem:[%s3838_s21 + $0x48] sm:$0xff] %v3118_v60   ;;  %v2224_v2 = vadd.f32 %v3826_v17, %v1828_v61  ;;  %v1831_v3 = vadd.f32 %v1830_v0, %v1541_v63  ;;  %v1832_v4 = vpop.f32.mrb[43].mxu1 }
 0x16f   : > { %v2225_v5 = vadd.f32 %v3826_v17, %v1831_v3  ;;  %v2288_v6 = vmax.f32 %v2224_v2, 0.0 }
 0x171   : > { %v2289_v7 = vmax.f32 %v2225_v5, 0.0 }
 0x172   : > { %v1546_v8 = vpop.f32.mrb[44].mxu0  ;;  %v1835_v9 = vpop.f32.mrb[44].mxu1 }
 0x173   : > { %v1548_v10 = vpop.f32.mrb[45].mxu0  ;;  %v3123_v11 = vpack.c.bf16 %v2289_v7, %v2288_v6  ;;  %v1836_v12 = vadd.f32 %v1835_v9, %v1546_v8  ;;  %v1837_v13 = vpop.f32.mrb[45].mxu1 }
 0x174   : > { %v1549_v14 = vpop.f32.mrb[46].mxu0  ;;  %v1838_v15 = vpop.f32.mrb[46].mxu1 }
 0x175   : > { %v1551_v16 = vpop.f32.mrb[47].mxu0  ;;  %3239 = vst [vmem:[%s3838_s21 + $0x50] sm:$0xff] %v3123_v11   ;;  %v2226_v18 = vadd.f32 %v3826_v17, %v1836_v12  ;;  %v1839_v19 = vadd.f32 %v1838_v15, %v1549_v14  ;;  %v1840_v20 = vpop.f32.mrb[47].mxu1 }
 0x177   : > { %v2227_v21 = vadd.f32 %v3826_v17, %v1839_v19  ;;  %v2290_v22 = vmax.f32 %v2226_v18, 0.0 }
 0x179   : > { %v2291_v23 = vmax.f32 %v2227_v21, 0.0 }
 0x17a   : > { %v1554_v24 = vpop.f32.mrb[48].mxu0  ;;  %v1843_v25 = vpop.f32.mrb[48].mxu1 }
 0x17b   : > { %v1556_v26 = vpop.f32.mrb[49].mxu0  ;;  %v3128_v27 = vpack.c.bf16 %v2291_v23, %v2290_v22  ;;  %v1844_v28 = vadd.f32 %v1843_v25, %v1554_v24  ;;  %v1845_v29 = vpop.f32.mrb[49].mxu1 }
 0x17c   : > { %v1557_v30 = vpop.f32.mrb[50].mxu0  ;;  %v1846_v31 = vpop.f32.mrb[50].mxu1 }
 0x17d   : > { %v1559_v32 = vpop.f32.mrb[51].mxu0  ;;  %3240 = vst [vmem:[%s3838_s21 + $0x58] sm:$0xff] %v3128_v27   ;;  %v2228_v33 = vadd.f32 %v3826_v17, %v1844_v28  ;;  %v1847_v34 = vadd.f32 %v1846_v31, %v1557_v30  ;;  %v1848_v35 = vpop.f32.mrb[51].mxu1 }
 0x17f   : > { %v2229_v36 = vadd.f32 %v3826_v17, %v1847_v34  ;;  %v2292_v37 = vmax.f32 %v2228_v33, 0.0 }
 0x181   : > { %v2293_v38 = vmax.f32 %v2229_v36, 0.0 }
 0x182   : > { %v1562_v39 = vpop.f32.mrb[52].mxu0  ;;  %v1851_v40 = vpop.f32.mrb[52].mxu1 }
 0x183   : > { %v1564_v41 = vpop.f32.mrb[53].mxu0  ;;  %v3133_v42 = vpack.c.bf16 %v2293_v38, %v2292_v37  ;;  %v1852_v43 = vadd.f32 %v1851_v40, %v1562_v39  ;;  %v1853_v44 = vpop.f32.mrb[53].mxu1 }
 0x184   : > { %v1565_v45 = vpop.f32.mrb[54].mxu0  ;;  %v1854_v46 = vpop.f32.mrb[54].mxu1 }
 0x185   : > { %v1567_v47 = vpop.f32.mrb[55].mxu0  ;;  %3241 = vst [vmem:[%s3838_s21 + $0x60] sm:$0xff] %v3133_v42   ;;  %v2230_v48 = vadd.f32 %v3826_v17, %v1852_v43  ;;  %v1855_v49 = vadd.f32 %v1854_v46, %v1565_v45  ;;  %v1856_v50 = vpop.f32.mrb[55].mxu1 }
 0x187   : > { %v2231_v51 = vadd.f32 %v3826_v17, %v1855_v49  ;;  %v2294_v52 = vmax.f32 %v2230_v48, 0.0 }
 0x189   : > { %v2295_v53 = vmax.f32 %v2231_v51, 0.0 }
 0x18a   : > { %v1570_v54 = vpop.f32.mrb[56].mxu0  ;;  %v1859_v55 = vpop.f32.mrb[56].mxu1 }
 0x18b   : > { %v1572_v56 = vpop.f32.mrb[57].mxu0  ;;  %v3138_v57 = vpack.c.bf16 %v2295_v53, %v2294_v52  ;;  %v1860_v58 = vadd.f32 %v1859_v55, %v1570_v54  ;;  %v1861_v59 = vpop.f32.mrb[57].mxu1 }
 0x18c   : > { %v1573_v60 = vpop.f32.mrb[58].mxu0  ;;  %v1862_v61 = vpop.f32.mrb[58].mxu1 }
 0x18d   : > { %v1575_v62 = vpop.f32.mrb[59].mxu0  ;;  %3242 = vst [vmem:[%s3838_s21 + $0x68] sm:$0xff] %v3138_v57   ;;  %v2232_v63 = vadd.f32 %v3826_v17, %v1860_v58  ;;  %v1863_v0 = vadd.f32 %v1862_v61, %v1573_v60  ;;  %v1864_v1 = vpop.f32.mrb[59].mxu1 }
 0x18f   : > { %v2233_v2 = vadd.f32 %v3826_v17, %v1863_v0  ;;  %v2296_v3 = vmax.f32 %v2232_v63, 0.0 }
 0x191   : > { %v2297_v4 = vmax.f32 %v2233_v2, 0.0 }
 0x192   : > { %v1578_v5 = vpop.f32.mrb[60].mxu0  ;;  %v1867_v6 = vpop.f32.mrb[60].mxu1 }
 0x193   : > { %v1580_v7 = vpop.f32.mrb[61].mxu0  ;;  %v3143_v8 = vpack.c.bf16 %v2297_v4, %v2296_v3  ;;  %v1868_v9 = vadd.f32 %v1867_v6, %v1578_v5  ;;  %v1869_v10 = vpop.f32.mrb[61].mxu1 }
 0x194   : > { %v1581_v11 = vpop.f32.mrb[62].mxu0  ;;  %v1870_v12 = vpop.f32.mrb[62].mxu1 }
 0x195   : > { %v1583_v13 = vpop.f32.mrb[63].mxu0  ;;  %3243 = vst [vmem:[%s3838_s21 + $0x70] sm:$0xff] %v3143_v8   ;;  %v2234_v14 = vadd.f32 %v3826_v17, %v1868_v9  ;;  %v1871_v15 = vadd.f32 %v1870_v12, %v1581_v11  ;;  %v1872_v16 = vpop.f32.mrb[63].mxu1 }
 0x197   : > { %v2235_v18 = vadd.f32 %v3826_v17, %v1871_v15  ;;  %v2298_v19 = vmax.f32 %v2234_v14, 0.0 }
 0x199   : > { %v2299_v20 = vmax.f32 %v2235_v18, 0.0 }
 0x19a   : > { %v1586_v21 = vpop.f32.mrb[64].mxu0  ;;  %v1875_v22 = vpop.f32.mrb[64].mxu1 }
 0x19b   : > { %v1588_v23 = vpop.f32.mrb[65].mxu0  ;;  %v3148_v24 = vpack.c.bf16 %v2299_v20, %v2298_v19  ;;  %v1876_v25 = vadd.f32 %v1875_v22, %v1586_v21  ;;  %v1877_v26 = vpop.f32.mrb[65].mxu1 }
 0x19c   : > { %v1589_v27 = vpop.f32.mrb[66].mxu0  ;;  %v1878_v28 = vpop.f32.mrb[66].mxu1 }
 0x19d   : > { %v1591_v29 = vpop.f32.mrb[67].mxu0  ;;  %3244 = vst [vmem:[%s3838_s21 + $0x78] sm:$0xff] %v3148_v24   ;;  %v2236_v30 = vadd.f32 %v3826_v17, %v1876_v25  ;;  %v1879_v31 = vadd.f32 %v1878_v28, %v1589_v27  ;;  %v1880_v32 = vpop.f32.mrb[67].mxu1 }
 0x19f   : > { %v2237_v33 = vadd.f32 %v3826_v17, %v1879_v31  ;;  %v2300_v34 = vmax.f32 %v2236_v30, 0.0 }
 0x1a1   : > { %v2301_v35 = vmax.f32 %v2237_v33, 0.0 }
 0x1a2   : > { %v1594_v36 = vpop.f32.mrb[68].mxu0  ;;  %v1883_v37 = vpop.f32.mrb[68].mxu1 }
 0x1a3   : > { %v1596_v38 = vpop.f32.mrb[69].mxu0  ;;  %v3153_v39 = vpack.c.bf16 %v2301_v35, %v2300_v34  ;;  %v1884_v40 = vadd.f32 %v1883_v37, %v1594_v36  ;;  %v1885_v41 = vpop.f32.mrb[69].mxu1 }
 0x1a4   : > { %v1597_v42 = vpop.f32.mrb[70].mxu0  ;;  %v1886_v43 = vpop.f32.mrb[70].mxu1 }
 0x1a5   : > { %v1599_v44 = vpop.f32.mrb[71].mxu0  ;;  %3245 = vst [vmem:[%s3838_s21 + $0x80] sm:$0xff] %v3153_v39   ;;  %v2238_v45 = vadd.f32 %v3826_v17, %v1884_v40  ;;  %v1887_v46 = vadd.f32 %v1886_v43, %v1597_v42  ;;  %v1888_v47 = vpop.f32.mrb[71].mxu1 }
 0x1a7   : > { %v2239_v48 = vadd.f32 %v3826_v17, %v1887_v46  ;;  %v2302_v49 = vmax.f32 %v2238_v45, 0.0 }
 0x1a9   : > { %v2303_v50 = vmax.f32 %v2239_v48, 0.0 }
 0x1aa   : > { %v1602_v51 = vpop.f32.mrb[72].mxu0  ;;  %v1891_v52 = vpop.f32.mrb[72].mxu1 }
 0x1ab   : > { %v1604_v53 = vpop.f32.mrb[73].mxu0  ;;  %v3158_v54 = vpack.c.bf16 %v2303_v50, %v2302_v49  ;;  %v1892_v55 = vadd.f32 %v1891_v52, %v1602_v51  ;;  %v1893_v56 = vpop.f32.mrb[73].mxu1 }
 0x1ac   : > { %v1605_v57 = vpop.f32.mrb[74].mxu0  ;;  %v1894_v58 = vpop.f32.mrb[74].mxu1 }
 0x1ad   : > { %v1607_v59 = vpop.f32.mrb[75].mxu0  ;;  %3246 = vst [vmem:[%s3838_s21 + $0x88] sm:$0xff] %v3158_v54   ;;  %v2240_v60 = vadd.f32 %v3826_v17, %v1892_v55  ;;  %v1895_v61 = vadd.f32 %v1894_v58, %v1605_v57  ;;  %v1896_v62 = vpop.f32.mrb[75].mxu1 }
 0x1af   : > { %v2241_v63 = vadd.f32 %v3826_v17, %v1895_v61  ;;  %v2304_v0 = vmax.f32 %v2240_v60, 0.0 }
 0x1b1   : > { %v2305_v1 = vmax.f32 %v2241_v63, 0.0 }
 0x1b2   : > { %v1610_v2 = vpop.f32.mrb[76].mxu0  ;;  %v1899_v3 = vpop.f32.mrb[76].mxu1 }
 0x1b3   : > { %v1612_v4 = vpop.f32.mrb[77].mxu0  ;;  %v3163_v5 = vpack.c.bf16 %v2305_v1, %v2304_v0  ;;  %v1900_v6 = vadd.f32 %v1899_v3, %v1610_v2  ;;  %v1901_v7 = vpop.f32.mrb[77].mxu1 }
 0x1b4   : > { %v1613_v8 = vpop.f32.mrb[78].mxu0  ;;  %v1902_v9 = vpop.f32.mrb[78].mxu1 }
 0x1b5   : > { %v1615_v10 = vpop.f32.mrb[79].mxu0  ;;  %3247 = vst [vmem:[%s3838_s21 + $0x90] sm:$0xff] %v3163_v5   ;;  %v2242_v11 = vadd.f32 %v3826_v17, %v1900_v6  ;;  %v1903_v12 = vadd.f32 %v1902_v9, %v1613_v8  ;;  %v1904_v13 = vpop.f32.mrb[79].mxu1 }
 0x1b7   : > { %v2243_v14 = vadd.f32 %v3826_v17, %v1903_v12  ;;  %v2306_v15 = vmax.f32 %v2242_v11, 0.0 }
 0x1b9   : > { %v2307_v16 = vmax.f32 %v2243_v14, 0.0 }
 0x1ba   : > { %v1618_v18 = vpop.f32.mrb[80].mxu0  ;;  %v1907_v19 = vpop.f32.mrb[80].mxu1 }
 0x1bb   : > { %v1620_v20 = vpop.f32.mrb[81].mxu0  ;;  %v3168_v21 = vpack.c.bf16 %v2307_v16, %v2306_v15  ;;  %v1908_v22 = vadd.f32 %v1907_v19, %v1618_v18  ;;  %v1909_v23 = vpop.f32.mrb[81].mxu1 }
 0x1bc   : > { %v1621_v24 = vpop.f32.mrb[82].mxu0  ;;  %v1910_v25 = vpop.f32.mrb[82].mxu1 }
 0x1bd   : > { %v1623_v26 = vpop.f32.mrb[83].mxu0  ;;  %3248 = vst [vmem:[%s3838_s21 + $0x98] sm:$0xff] %v3168_v21   ;;  %v2244_v27 = vadd.f32 %v3826_v17, %v1908_v22  ;;  %v1911_v28 = vadd.f32 %v1910_v25, %v1621_v24  ;;  %v1912_v29 = vpop.f32.mrb[83].mxu1 }
 0x1bf   : > { %v2245_v30 = vadd.f32 %v3826_v17, %v1911_v28  ;;  %v2308_v31 = vmax.f32 %v2244_v27, 0.0 }
 0x1c1   : > { %v2309_v32 = vmax.f32 %v2245_v30, 0.0 }
 0x1c2   : > { %v1626_v33 = vpop.f32.mrb[84].mxu0  ;;  %v1915_v34 = vpop.f32.mrb[84].mxu1 }
 0x1c3   : > { %v1628_v35 = vpop.f32.mrb[85].mxu0  ;;  %v3173_v36 = vpack.c.bf16 %v2309_v32, %v2308_v31  ;;  %v1916_v37 = vadd.f32 %v1915_v34, %v1626_v33  ;;  %v1917_v38 = vpop.f32.mrb[85].mxu1 }
 0x1c4   : > { %v1629_v39 = vpop.f32.mrb[86].mxu0  ;;  %v1918_v40 = vpop.f32.mrb[86].mxu1 }
 0x1c5   : > { %v1631_v41 = vpop.f32.mrb[87].mxu0  ;;  %3249 = vst [vmem:[%s3838_s21 + $0xa0] sm:$0xff] %v3173_v36   ;;  %v2246_v42 = vadd.f32 %v3826_v17, %v1916_v37  ;;  %v1919_v43 = vadd.f32 %v1918_v40, %v1629_v39  ;;  %v1920_v44 = vpop.f32.mrb[87].mxu1 }
 0x1c7   : > { %v2247_v45 = vadd.f32 %v3826_v17, %v1919_v43  ;;  %v2310_v46 = vmax.f32 %v2246_v42, 0.0 }
 0x1c9   : > { %v2311_v47 = vmax.f32 %v2247_v45, 0.0 }
 0x1ca   : > { %v1634_v48 = vpop.f32.mrb[88].mxu0  ;;  %v1923_v49 = vpop.f32.mrb[88].mxu1 }
 0x1cb   : > { %v1636_v50 = vpop.f32.mrb[89].mxu0  ;;  %v3178_v51 = vpack.c.bf16 %v2311_v47, %v2310_v46  ;;  %v1924_v52 = vadd.f32 %v1923_v49, %v1634_v48  ;;  %v1925_v53 = vpop.f32.mrb[89].mxu1 }
 0x1cc   : > { %v1637_v54 = vpop.f32.mrb[90].mxu0  ;;  %v1926_v55 = vpop.f32.mrb[90].mxu1 }
 0x1cd   : > { %v1639_v56 = vpop.f32.mrb[91].mxu0  ;;  %3250 = vst [vmem:[%s3838_s21 + $0xa8] sm:$0xff] %v3178_v51   ;;  %v2248_v57 = vadd.f32 %v3826_v17, %v1924_v52  ;;  %v1927_v58 = vadd.f32 %v1926_v55, %v1637_v54  ;;  %v1928_v59 = vpop.f32.mrb[91].mxu1 }
 0x1cf   : > { %v2249_v60 = vadd.f32 %v3826_v17, %v1927_v58  ;;  %v2312_v61 = vmax.f32 %v2248_v57, 0.0 }
 0x1d1   : > { %v2313_v62 = vmax.f32 %v2249_v60, 0.0 }
 0x1d2   : > { %v1642_v63 = vpop.f32.mrb[92].mxu0  ;;  %v1931_v0 = vpop.f32.mrb[92].mxu1 }
 0x1d3   : > { %v1644_v1 = vpop.f32.mrb[93].mxu0  ;;  %v3183_v2 = vpack.c.bf16 %v2313_v62, %v2312_v61  ;;  %v1932_v3 = vadd.f32 %v1931_v0, %v1642_v63  ;;  %v1933_v4 = vpop.f32.mrb[93].mxu1 }
 0x1d4   : > { %v1645_v5 = vpop.f32.mrb[94].mxu0  ;;  %v1934_v6 = vpop.f32.mrb[94].mxu1 }
 0x1d5   : > { %v1647_v7 = vpop.f32.mrb[95].mxu0  ;;  %3251 = vst [vmem:[%s3838_s21 + $0xb0] sm:$0xff] %v3183_v2   ;;  %v2250_v8 = vadd.f32 %v3826_v17, %v1932_v3  ;;  %v1935_v9 = vadd.f32 %v1934_v6, %v1645_v5  ;;  %v1936_v10 = vpop.f32.mrb[95].mxu1 }
 0x1d7   : > { %v2251_v11 = vadd.f32 %v3826_v17, %v1935_v9  ;;  %v2314_v12 = vmax.f32 %v2250_v8, 0.0 }
 0x1d9   : > { %v2315_v13 = vmax.f32 %v2251_v11, 0.0 }
 0x1da   : > { %v1650_v14 = vpop.f32.mrb[96].mxu0  ;;  %v1939_v15 = vpop.f32.mrb[96].mxu1 }
 0x1db   : > { %v1652_v16 = vpop.f32.mrb[97].mxu0  ;;  %v3188_v18 = vpack.c.bf16 %v2315_v13, %v2314_v12  ;;  %v1940_v19 = vadd.f32 %v1939_v15, %v1650_v14  ;;  %v1941_v20 = vpop.f32.mrb[97].mxu1 }
 0x1dc   : > { %v1653_v21 = vpop.f32.mrb[98].mxu0  ;;  %v1942_v22 = vpop.f32.mrb[98].mxu1 }
 0x1dd   : > { %v1655_v23 = vpop.f32.mrb[99].mxu0  ;;  %3252 = vst [vmem:[%s3838_s21 + $0xb8] sm:$0xff] %v3188_v18   ;;  %v2252_v24 = vadd.f32 %v3826_v17, %v1940_v19  ;;  %v1943_v25 = vadd.f32 %v1942_v22, %v1653_v21  ;;  %v1944_v26 = vpop.f32.mrb[99].mxu1 }
 0x1df   : > { %v2253_v27 = vadd.f32 %v3826_v17, %v1943_v25  ;;  %v2316_v28 = vmax.f32 %v2252_v24, 0.0 }
 0x1e1   : > { %v2317_v29 = vmax.f32 %v2253_v27, 0.0 }
 0x1e2   : > { %v1658_v30 = vpop.f32.mrb[100].mxu0  ;;  %v1947_v31 = vpop.f32.mrb[100].mxu1 }
 0x1e3   : > { %v1660_v32 = vpop.f32.mrb[101].mxu0  ;;  %v3193_v33 = vpack.c.bf16 %v2317_v29, %v2316_v28  ;;  %v1948_v34 = vadd.f32 %v1947_v31, %v1658_v30  ;;  %v1949_v35 = vpop.f32.mrb[101].mxu1 }
 0x1e4   : > { %v1661_v36 = vpop.f32.mrb[102].mxu0  ;;  %v1950_v37 = vpop.f32.mrb[102].mxu1 }
 0x1e5   : > { %v1663_v38 = vpop.f32.mrb[103].mxu0  ;;  %3253 = vst [vmem:[%s3838_s21 + $0xc0] sm:$0xff] %v3193_v33   ;;  %v2254_v39 = vadd.f32 %v3826_v17, %v1948_v34  ;;  %v1951_v40 = vadd.f32 %v1950_v37, %v1661_v36  ;;  %v1952_v41 = vpop.f32.mrb[103].mxu1 }
 0x1e7   : > { %v2255_v42 = vadd.f32 %v3826_v17, %v1951_v40  ;;  %v2318_v43 = vmax.f32 %v2254_v39, 0.0  ;;  %v3510_v39 = vld [vmem:[%s3957_s2] ss:$0 sm:$0xff] }
 0x1e9   : > { %v2319_v44 = vmax.f32 %v2255_v42, 0.0 }
 0x1ea   : > { %v1666_v45 = vpop.f32.mrb[104].mxu0  ;;  %v1955_v46 = vpop.f32.mrb[104].mxu1 }
 0x1eb   : > { %v1668_v47 = vpop.f32.mrb[105].mxu0  ;;  %v3198_v48 = vpack.c.bf16 %v2319_v44, %v2318_v43  ;;  %v1956_v49 = vadd.f32 %v1955_v46, %v1666_v45  ;;  %v1957_v50 = vpop.f32.mrb[105].mxu1 }
 0x1ec   : > { %v1669_v51 = vpop.f32.mrb[106].mxu0  ;;  %v1958_v52 = vpop.f32.mrb[106].mxu1 }
 0x1ed   : > { %v1671_v53 = vpop.f32.mrb[107].mxu0  ;;  %3254 = vst [vmem:[%s3838_s21 + $0xc8] sm:$0xff] %v3198_v48   ;;  %v2256_v54 = vadd.f32 %v3826_v17, %v1956_v49  ;;  %v1959_v55 = vadd.f32 %v1958_v52, %v1669_v51  ;;  %v1960_v56 = vpop.f32.mrb[107].mxu1 }
 0x1ef   : > { %v2257_v57 = vadd.f32 %v3826_v17, %v1959_v55  ;;  %v2320_v58 = vmax.f32 %v2256_v54, 0.0 }
 0x1f1   : > { %v2321_v59 = vmax.f32 %v2257_v57, 0.0 }
 0x1f2   : > { %v1674_v60 = vpop.f32.mrb[108].mxu0  ;;  %v1963_v61 = vpop.f32.mrb[108].mxu1 }
 0x1f3   : > { %v1676_v62 = vpop.f32.mrb[109].mxu0  ;;  %v3203_v63 = vpack.c.bf16 %v2321_v59, %v2320_v58  ;;  %v1964_v0 = vadd.f32 %v1963_v61, %v1674_v60  ;;  %v1965_v1 = vpop.f32.mrb[109].mxu1 }
 0x1f4   : > { %v1677_v2 = vpop.f32.mrb[110].mxu0  ;;  %v1966_v3 = vpop.f32.mrb[110].mxu1 }
 0x1f5   : > { %v1679_v4 = vpop.f32.mrb[111].mxu0  ;;  %3255 = vst [vmem:[%s3838_s21 + $0xd0] sm:$0xff] %v3203_v63   ;;  %v2258_v5 = vadd.f32 %v3826_v17, %v1964_v0  ;;  %v1967_v6 = vadd.f32 %v1966_v3, %v1677_v2  ;;  %v1968_v7 = vpop.f32.mrb[111].mxu1 }
 0x1f7   : > { %v2259_v8 = vadd.f32 %v3826_v17, %v1967_v6  ;;  %v2322_v9 = vmax.f32 %v2258_v5, 0.0 }
 0x1f9   : > { %v2323_v10 = vmax.f32 %v2259_v8, 0.0 }
 0x1fa   : > { %v1682_v11 = vpop.f32.mrb[112].mxu0  ;;  %v1971_v12 = vpop.f32.mrb[112].mxu1 }
 0x1fb   : > { %v1684_v13 = vpop.f32.mrb[113].mxu0  ;;  %v3208_v14 = vpack.c.bf16 %v2323_v10, %v2322_v9  ;;  %v1972_v15 = vadd.f32 %v1971_v12, %v1682_v11  ;;  %v1973_v16 = vpop.f32.mrb[113].mxu1 }
 0x1fc   : > { %v1685_v18 = vpop.f32.mrb[114].mxu0  ;;  %v1974_v19 = vpop.f32.mrb[114].mxu1 }
 0x1fd   : > { %v1687_v20 = vpop.f32.mrb[115].mxu0  ;;  %3256 = vst [vmem:[%s3838_s21 + $0xd8] sm:$0xff] %v3208_v14   ;;  %v2260_v21 = vadd.f32 %v3826_v17, %v1972_v15  ;;  %v1975_v22 = vadd.f32 %v1974_v19, %v1685_v18  ;;  %v1976_v23 = vpop.f32.mrb[115].mxu1 }
 0x1ff   : > { %v2261_v24 = vadd.f32 %v3826_v17, %v1975_v22  ;;  %v2324_v25 = vmax.f32 %v2260_v21, 0.0 }
 0x201   : > { %v2325_v26 = vmax.f32 %v2261_v24, 0.0 }
 0x202   : > { %v1690_v27 = vpop.f32.mrb[116].mxu0  ;;  %v1979_v28 = vpop.f32.mrb[116].mxu1 }
 0x203   : > { %v1692_v29 = vpop.f32.mrb[117].mxu0  ;;  %v3213_v30 = vpack.c.bf16 %v2325_v26, %v2324_v25  ;;  %v1980_v31 = vadd.f32 %v1979_v28, %v1690_v27  ;;  %v1981_v32 = vpop.f32.mrb[117].mxu1 }
 0x204   : > { %v1693_v33 = vpop.f32.mrb[118].mxu0  ;;  %v1982_v34 = vpop.f32.mrb[118].mxu1 }
 0x205   : > { %v1695_v35 = vpop.f32.mrb[119].mxu0  ;;  %3257 = vst [vmem:[%s3838_s21 + $0xe0] sm:$0xff] %v3213_v30   ;;  %v2262_v36 = vadd.f32 %v3826_v17, %v1980_v31  ;;  %v1983_v37 = vadd.f32 %v1982_v34, %v1693_v33  ;;  %v1984_v38 = vpop.f32.mrb[119].mxu1 }
 0x207   : > { %v2263_v40 = vadd.f32 %v3510_v39, %v1983_v37  ;;  %v2326_v41 = vmax.f32 %v2262_v36, 0.0 }
 0x209   : > { %v2327_v42 = vmax.f32 %v2263_v40, 0.0 }
 0x20a   : > { %v1698_v43 = vpop.f32.mrb[120].mxu0  ;;  %v1987_v44 = vpop.f32.mrb[120].mxu1 }
 0x20b   : > { %v1700_v45 = vpop.f32.mrb[121].mxu0  ;;  %v3218_v46 = vpack.c.bf16 %v2327_v42, %v2326_v41  ;;  %v1988_v47 = vadd.f32 %v1987_v44, %v1698_v43  ;;  %v1989_v48 = vpop.f32.mrb[121].mxu1 }
 0x20c   : > { %v1701_v49 = vpop.f32.mrb[122].mxu0  ;;  %v1990_v50 = vpop.f32.mrb[122].mxu1 }
 0x20d   : > { %v1703_v51 = vpop.f32.mrb[123].mxu0  ;;  %3258 = vst [vmem:[%s3838_s21 + $0xe8] sm:$0xff] %v3218_v46   ;;  %v2264_v17 = vadd.f32 %v3510_v39, %v1988_v47  ;;  %v1991_v52 = vadd.f32 %v1990_v50, %v1701_v49  ;;  %v1992_v53 = vpop.f32.mrb[123].mxu1 }
 0x20f   : > { %v2265_v54 = vadd.f32 %v3510_v39, %v1991_v52  ;;  %v2328_v55 = vmax.f32 %v2264_v17, 0.0 }
 0x211   : > { %v2329_v56 = vmax.f32 %v2265_v54, 0.0 }
 0x212   : > { %v1706_v57 = vpop.f32.mrb[124].mxu0  ;;  %v1995_v58 = vpop.f32.mrb[124].mxu1 }
 0x213   : > { %v1708_v59 = vpop.f32.mrb[125].mxu0  ;;  %v3223_v60 = vpack.c.bf16 %v2329_v56, %v2328_v55  ;;  %v1996_v61 = vadd.f32 %v1995_v58, %v1706_v57  ;;  %v1997_v62 = vpop.f32.mrb[125].mxu1 }
 0x214   : > { %v1709_v63 = vpop.f32.mrb[126].mxu0  ;;  %v1998_v0 = vpop.f32.mrb[126].mxu1 }
 0x215   : > { %v1711_v1 = vpop.f32.mrb[127].mxu0  ;;  %3259 = vst [vmem:[%s3838_s21 + $0xf0] sm:$0xff] %v3223_v60   ;;  %v2266_v2 = vadd.f32 %v3510_v39, %v1996_v61  ;;  %v1999_v3 = vadd.f32 %v1998_v0, %v1709_v63  ;;  %v2000_v4 = vpop.f32.mrb[127].mxu1 }
 0x217   : > { %v2267_v5 = vadd.f32 %v3510_v39, %v1999_v3  ;;  %v2330_v6 = vmax.f32 %v2266_v2, 0.0 }
 0x219   : > { %v2331_v7 = vmax.f32 %v2267_v5, 0.0 }
 0x21b   : > { %v3228_v8 = vpack.c.bf16 %v2331_v7, %v2330_v6 }
 0x21d   : > { %3260 = vst [vmem:[%s3838_s21 + $0xf8] sm:$0xff] %v3228_v8  }
 0x21e PF: > { %s13_s14 = sadd.s32 1, %s3533_s14   ;;  %s3959_s12 = smov %s3529_s13 }
 0x21f   : > { %p10_p5 = scmp.ge.s32.totalorder %s13_s14, 6   ;;  %s3960_s13 = smov %s3962_s15 }
 0x221   :  { %12 = sbr.rel (!%p10_p5) target bundleno = 2 (0x2), region = 76 }

// kernel: tile.18
= control target key start
LH: loop header
LB: loop body
LE: loop exit
PB: predicated region body
PF: predicated region fallthrough
CT: control target
= control target key end

     0   :  { %s28_s0 = inlined_call_operand.vmem [shape: f32[4], index: 0, kind: input, shape index: {}]   ;;  %s29_s1 = inlined_call_operand.vmem [shape: f32[16,4], index: 1, kind: output, shape index: {}]  }
   0x1   :  { %v4_v0 = vld [vmem:[%s28_s0] ss:$0 sm:$0xff] }
   0x2   :  { %5 = vst [vmem:[%s29_s1] sm:$0xff] %v4_v0  ;;  %8 = vst [vmem:[%s29_s1 + $0x8] sm:$0xff] %v4_v0 }

// kernel: tile.19
= control target key start
LH: loop header
LB: loop body
LE: loop exit
PB: predicated region body
PF: predicated region fallthrough
CT: control target
= control target key end

     0   :  { %s131_s10 = smov 60   ;;  %s132_s11 = smov 52   ;;  %vm3_vm0 = vcmask 31744   ;;  %vm9_vm1 = vcmask 523744   ;;  %vm15_vm2 = vcmask 490944   ;;  %vm21_vm3 = vcmask 458144   ;;  %s207_s0 = inlined_call_operand.vmem [shape: f32[16,4], index: 0, kind: input, shape index: {}]   ;;  %s208_s1 = inlined_call_operand.vmem [shape: f32[1,64], index: 1, kind: output, shape index: {}]  }
   0x1   :  { %v101_v0 = vld [vmem:[%s207_s0 + $0xf] sm:$0x1]   ;;  %v103_v1 = vld [vmem:[%s207_s0 + $0xd] sm:$0x1]   ;;  %v102_v2 = vld [vmem:[%s207_s0 + $0xe] sm:$0x1]  }
   0x2   :  { %7 = vrot.lane.b32.xlu0 %v101_v0, %s131_s10  ;;  %19 = vrot.lane.b32.xlu1 %v103_v1, %s132_s11  ;;  %v104_v3 = vld [vmem:[%s207_s0 + $0xc] sm:$0x1]   ;;  %s133_s16 = smov 56   ;;  %s134_s17 = smov 48   ;;  %v105_v4 = vld [vmem:[%s207_s0 + $0xb] sm:$0x1]  }
   0x3   :  { %v106_v5 = vld [vmem:[%s207_s0 + $0xa] sm:$0x1]   ;;  %v2_v6 = vld [vmem:[%s207_s0] sm:$0x1]   ;;  %s135_s24 = smov 44   ;;  %s136_s25 = smov 40  }
   0x4   :  { %4 = vst.msk [vmem:[#allocation0] sm:$0x1] %vm3_vm0, %v2_v6   ;;  %v107_v7 = vld [vmem:[%s207_s0 + $0x9] sm:$0x1]   ;;  %v108_v8 = vld [vmem:[%s207_s0 + $0x8] sm:$0x1]  }
   0x5   :  { %s137_s30 = smov 36   ;;  %s138_s2 = smov 32   ;;  %v109_v9 = vld [vmem:[%s207_s0 + $0x7] sm:$0x1]   ;;  %v110_v10 = vld [vmem:[%s207_s0 + $0x6] sm:$0x1]  }
   0x6   :  { %13 = vrot.lane.b32.xlu0 %v102_v2, %s133_s16  ;;  %25 = vrot.lane.b32.xlu1 %v104_v3, %s134_s17  ;;  %s139_s7 = smov 28   ;;  %s140_s8 = smov 24   ;;  %v111_v11 = vld [vmem:[%s207_s0 + $0x5] sm:$0x1]   ;;  %v112_v12 = vld [vmem:[%s207_s0 + $0x4] sm:$0x1]  }
   0x7   :  { %s141_s13 = smov 20   ;;  %s142_s14 = smov 16   ;;  %v113_v13 = vld [vmem:[%s207_s0 + $0x3] sm:$0x1]   ;;  %v114_v14 = vld [vmem:[%s207_s0 + $0x2] sm:$0x1]  }
   0x8   :  { %s143_s19 = smov 12   ;;  %s144_s20 = smov 8   ;;  %v115_v15 = vld [vmem:[%s207_s0 + $0x1] sm:$0x1]   ;;  %vm27_vm4 = vcmask 425344   ;;  %vm33_vm5 = vcmask 392544  }
   0x9   :  { %s145_s0 = smov 4   ;;  %vm39_vm6 = vcmask 359744   ;;  %vm45_vm7 = vcmask 326944   ;;  %vm51_vm8 = vcmask 294144   ;;  %vm57_vm9 = vcmask 261344  }
   0xa   :  { %31 = vrot.lane.b32.xlu0 %v105_v4, %s135_s24  ;;  %37 = vrot.lane.b32.xlu1 %v106_v5, %s136_s25  ;;  %vm63_vm10 = vcmask 228544   ;;  %vm69_vm11 = vcmask 195744   ;;  %vm75_vm12 = vcmask 162944   ;;  %vm81_vm13 = vcmask 130144  }
   0xb   :  { %vm87_vm14 = vcmask 97344   ;;  %vm93_vm15 = vcmask 64544  }
   0xe   :  { %43 = vrot.lane.b32.xlu0 %v107_v7, %s137_s30  ;;  %49 = vrot.lane.b32.xlu1 %v108_v8, %s138_s2 }
  0x12   :  { %55 = vrot.lane.b32.xlu0 %v109_v9, %s139_s7  ;;  %61 = vrot.lane.b32.xlu1 %v110_v10, %s140_s8 }
  0x16   :  { %67 = vrot.lane.b32.xlu0 %v111_v11, %s141_s13  ;;  %73 = vrot.lane.b32.xlu1 %v112_v12, %s142_s14 }
  0x1a   :  { %79 = vrot.lane.b32.xlu0 %v113_v13, %s143_s19  ;;  %85 = vrot.lane.b32.xlu1 %v114_v14, %s144_s20 }
  0x1e   :  { %91 = vrot.lane.b32.xlu0 %v115_v15, %s145_s0 }
  0x74   :  { %v8_v16 = vpop.permute.xlu0 %7   ;;  %v20_v17 = vpop.permute.xlu1 %19  }
  0x75   :  { %10 = vst.msk [vmem:[#allocation0] sm:$0x1] %vm9_vm1, %v8_v16  }
  0x78   :  { %v14_v18 = vpop.permute.xlu0 %13   ;;  %v26_v19 = vpop.permute.xlu1 %25  }
  0x79   :  { %16 = vst.msk [vmem:[#allocation0] sm:$0x1] %vm15_vm2, %v14_v18  }
  0x7a   :  { %22 = vst.msk [vmem:[#allocation0] sm:$0x1] %vm21_vm3, %v20_v17  }
  0x7b   :  { %28 = vst.msk [vmem:[#allocation0] sm:$0x1] %vm27_vm4, %v26_v19  }
  0x7c   :  { %v32_v20 = vpop.permute.xlu0 %31   ;;  %v38_v21 = vpop.permute.xlu1 %37  }
  0x7d   :  { %34 = vst.msk [vmem:[#allocation0] sm:$0x1] %vm33_vm5, %v32_v20  }
  0x7e   :  { %40 = vst.msk [vmem:[#allocation0] sm:$0x1] %vm39_vm6, %v38_v21  }
  0x80   :  { %v44_v22 = vpop.permute.xlu0 %43   ;;  %v50_v23 = vpop.permute.xlu1 %49  }
  0x81   :  { %46 = vst.msk [vmem:[#allocation0] sm:$0x1] %vm45_vm7, %v44_v22  }
  0x82   :  { %52 = vst.msk [vmem:[#allocation0] sm:$0x1] %vm51_vm8, %v50_v23  }
  0x84   :  { %v56_v24 = vpop.permute.xlu0 %55   ;;  %v62_v25 = vpop.permute.xlu1 %61  }
  0x85   :  { %58 = vst.msk [vmem:[#allocation0] sm:$0x1] %vm57_vm9, %v56_v24  }
  0x86   :  { %64 = vst.msk [vmem:[#allocation0] sm:$0x1] %vm63_vm10, %v62_v25  }
  0x88   :  { %v68_v26 = vpop.permute.xlu0 %67   ;;  %v74_v27 = vpop.permute.xlu1 %73  }
  0x89   :  { %70 = vst.msk [vmem:[#allocation0] sm:$0x1] %vm69_vm11, %v68_v26  }
  0x8a   :  { %76 = vst.msk [vmem:[#allocation0] sm:$0x1] %vm75_vm12, %v74_v27  }
  0x8c   :  { %v80_v28 = vpop.permute.xlu0 %79   ;;  %v86_v29 = vpop.permute.xlu1 %85  }
  0x8d   :  { %82 = vst.msk [vmem:[#allocation0] sm:$0x1] %vm81_vm13, %v80_v28  }
  0x8e   :  { %88 = vst.msk [vmem:[#allocation0] sm:$0x1] %vm87_vm14, %v86_v29  }
  0x90   :  { %v92_v30 = vpop.permute.xlu0 %91  }
  0x91   :  { %94 = vst.msk [vmem:[#allocation0] sm:$0x1] %vm93_vm15, %v92_v30  }
  0x98   :  { %v98_v31 = vld [vmem:[#allocation0] sm:$0x1] }
  0x99   :  { %100 = vst [vmem:[%s208_s1] sm:$0x1] %v98_v31 }

// kernel: skull_unet_transformer_forward.50
= control target key start
LH: loop header
LB: loop body
LE: loop exit
PB: predicated region body
PF: predicated region fallthrough
CT: control target
= control target key end

     0   :  { %s2315_s12 = smov 0   ;;  %s2317_s13 = smov 0   ;;  %s2516_s0 = inlined_call_operand.vmem [shape: bf16[2048,128], index: 0, kind: input, shape index: {}]   ;;  %s2517_s1 = inlined_call_operand.vmem [shape: bf16[128,128], index: 1, kind: input, shape index: {}]   ;;  %s2518_s2 = inlined_call_operand.vmem [shape: f32[1,128], index: 2, kind: input, shape index: {}]   ;;  %s2519_s3 = inlined_call_operand.vmem [shape: bf16[2048,128], index: 3, kind: output, shape index: {}]  }
   0x1   :  { %s2319_s14 = smov 0  }
   0x2 LB: > { %s32_s15 = sadd.s32 1, %s2289_s13  ;;  %p1704_p0 = scmp.ge.s32.totalorder %s2293_s14, 1  ;;  %s2293_s14 = sphi %s2319_s14, %s13_s14   ;;  %s2289_s13 = sphi %s2317_s13, %s2521_s13   ;;  %s2285_s12 = sphi %s2315_s12, %s2520_s12  }
   0x3   : > { %p34_p1 = scmp.ge.s32.totalorder %s32_s15, 4  ;;  %p188_p2 = scmp.lt.s32.totalorder %s2293_s14, 5 }
   0x5   : > { %s2523_s15 = smov (%p34_p1, %s32_s15), 0  ;;  %p189_p3 = pnand %p1704_p0, %p188_p2 }
   0x6   : > { %v2231_v0 = vld [vmem:[%s2517_s1] sm:$0xff] (!%p189_p3)   ;;  %s1705_s18 = sshll.u32 (!%p189_p3), %s2285_s12, 6  ;;  %v2232_v1 = vld [vmem:[%s2517_s1 + $0x8] sm:$0xff] (!%p189_p3)   ;;  %v2233_v2 = vld [vmem:[%s2517_s1 + $0x10] sm:$0xff] (!%p189_p3)  }
   0x7   : > { %192 = sbr.rel (%p189_p3) target bundleno = 315 (0x13b), region = 32  ;;  %p230_p4 = scmp.lt.s32.totalorder (!%p189_p3), %s1705_s18, 255  ;;  %2111 = vmatprep.subr.bf16.mxu0 (!%p189_p3), %v2231_v0  ;;  %2191 = vmatprep.subr.bf16.mxu1 (!%p189_p3), %v2231_v0  ;;  %v2234_v3 = vld [vmem:[%s2517_s1 + $0x18] sm:$0xff] (!%p189_p3)   ;;  %v2235_v6 = vld [vmem:[%s2517_s1 + $0x20] sm:$0xff] (!%p189_p3)   ;;  %v2236_v7 = vld [vmem:[%s2517_s1 + $0x28] sm:$0xff] (!%p189_p3)  }
   0x8   : > { %2112 = vmatpush3.bf16.msra.mxu0 (!%p189_p3), %v2231_v0  ;;  %2199 = vmatpush3.bf16.msra.mxu1 (!%p189_p3), %v2231_v0  ;;  %v2237_v8 = vld [vmem:[%s2517_s1 + $0x30] sm:$0xff] (!%p189_p3)   ;;  %v2238_v9 = vld [vmem:[%s2517_s1 + $0x38] sm:$0xff] (!%p189_p3)   ;;  %v2402_v41 = vld [vmem:[%s2518_s2] ss:$0 sm:$0xff] (!%p189_p3) }
   0x9   : > { %2113 = vmatprep.subr.bf16.mxu0 (!%p189_p3), %v2232_v1  ;;  %2192 = vmatprep.subr.bf16.mxu1 (!%p189_p3), %v2232_v1 }
   0xc   : > { %2114 = vmatpush3.bf16.msra.mxu0 (!%p189_p3), %v2232_v1  ;;  %2200 = vmatpush3.bf16.msra.mxu1 (!%p189_p3), %v2232_v1 }
   0xd   : > { %2115 = vmatprep.subr.bf16.mxu0 (!%p189_p3), %v2233_v2  ;;  %2193 = vmatprep.subr.bf16.mxu1 (!%p189_p3), %v2233_v2 }
   0xe   : > { %s2525_s18 = smov (!%p230_p4, %s1705_s18), 255 }
   0xf   : > { %s1706_s23 = sshll.u32 %s2525_s18, 2 }
  0x10   : > { %s2350_s26 = scalar_lea.vmem %s2516_s0, %s1706_s23  ;;  %2116 = vmatpush3.bf16.msra.mxu0 %v2233_v2  ;;  %2201 = vmatpush3.bf16.msra.mxu1 %v2233_v2  ;;  %s2415_s17 = scalar_lea.vmem %s2519_s3, %s1706_s23 }
  0x11   : > { %v2239_v4 = vld [vmem:[%s2350_s26] sm:$0xff]   ;;  %2117 = vmatprep.subr.bf16.mxu0 %v2234_v3  ;;  %2194 = vmatprep.subr.bf16.mxu1 %v2234_v3  ;;  %v2241_v10 = vld [vmem:[%s2350_s26 + $0x8] sm:$0xff]   ;;  %v2243_v12 = vld [vmem:[%s2350_s26 + $0x10] sm:$0xff]  }
  0x12   : > { %v2240_v5 = vld [vmem:[%s2350_s26 + $0x80] sm:$0xff]   ;;  %2127 = vmatprep.mubr.bf16.mxu0 %v2239_v4  ;;  %v2242_v11 = vld [vmem:[%s2350_s26 + $0x88] sm:$0xff]   ;;  %v2244_v13 = vld [vmem:[%s2350_s26 + $0x90] sm:$0xff]  }
  0x13   : > { %2159 = vmatprep.mubr.bf16.mxu1 %v2240_v5  ;;  %v2245_v14 = vld [vmem:[%s2350_s26 + $0x18] sm:$0xff]   ;;  %v2247_v16 = vld [vmem:[%s2350_s26 + $0x20] sm:$0xff]   ;;  %v2249_v18 = vld [vmem:[%s2350_s26 + $0x28] sm:$0xff]  }
  0x14   : > { %2118 = vmatpush3.bf16.msra.mxu0 %v2234_v3  ;;  %2202 = vmatpush3.bf16.msra.mxu1 %v2234_v3  ;;  %v2246_v15 = vld [vmem:[%s2350_s26 + $0x98] sm:$0xff]   ;;  %v2248_v17 = vld [vmem:[%s2350_s26 + $0xa0] sm:$0xff]   ;;  %v2250_v19 = vld [vmem:[%s2350_s26 + $0xa8] sm:$0xff]  }
  0x15   : > { %2119 = vmatprep.subr.bf16.mxu0 %v2235_v6  ;;  %2195 = vmatprep.subr.bf16.mxu1 %v2235_v6  ;;  %v2251_v20 = vld [vmem:[%s2350_s26 + $0x30] sm:$0xff]   ;;  %v2253_v22 = vld [vmem:[%s2350_s26 + $0x38] sm:$0xff]   ;;  %v2255_v24 = vld [vmem:[%s2350_s26 + $0x40] sm:$0xff]  }
  0x16   : > { %v2252_v21 = vld [vmem:[%s2350_s26 + $0xb0] sm:$0xff]   ;;  %v2254_v23 = vld [vmem:[%s2350_s26 + $0xb8] sm:$0xff]   ;;  %v2256_v25 = vld [vmem:[%s2350_s26 + $0xc0] sm:$0xff]  }
  0x17   : > { %v2257_v26 = vld [vmem:[%s2350_s26 + $0x48] sm:$0xff]   ;;  %v2259_v28 = vld [vmem:[%s2350_s26 + $0x50] sm:$0xff]   ;;  %v2261_v30 = vld [vmem:[%s2350_s26 + $0x58] sm:$0xff]  }
  0x18   : > { %2120 = vmatpush3.bf16.msra.mxu0 %v2235_v6  ;;  %2203 = vmatpush3.bf16.msra.mxu1 %v2235_v6  ;;  %v2258_v27 = vld [vmem:[%s2350_s26 + $0xc8] sm:$0xff]   ;;  %v2260_v29 = vld [vmem:[%s2350_s26 + $0xd0] sm:$0xff]   ;;  %v2262_v31 = vld [vmem:[%s2350_s26 + $0xd8] sm:$0xff]  }
  0x19   : > { %2121 = vmatprep.subr.bf16.mxu0 %v2236_v7  ;;  %2196 = vmatprep.subr.bf16.mxu1 %v2236_v7  ;;  %v2263_v32 = vld [vmem:[%s2350_s26 + $0x60] sm:$0xff]   ;;  %v2265_v34 = vld [vmem:[%s2350_s26 + $0x68] sm:$0xff]   ;;  %v2267_v36 = vld [vmem:[%s2350_s26 + $0x70] sm:$0xff]  }
  0x1a   : > { %v2264_v33 = vld [vmem:[%s2350_s26 + $0xe0] sm:$0xff]   ;;  %v2266_v35 = vld [vmem:[%s2350_s26 + $0xe8] sm:$0xff]   ;;  %v2268_v37 = vld [vmem:[%s2350_s26 + $0xf0] sm:$0xff]  }
  0x1b   : > { %v2269_v38 = vld [vmem:[%s2350_s26 + $0x78] sm:$0xff]  }
  0x1c   : > { %2122 = vmatpush3.bf16.msra.mxu0 %v2236_v7  ;;  %2204 = vmatpush3.bf16.msra.mxu1 %v2236_v7  ;;  %v2270_v39 = vld [vmem:[%s2350_s26 + $0xf8] sm:$0xff]  }
  0x1d   : > { %2123 = vmatprep.subr.bf16.mxu0 %v2237_v8  ;;  %2197 = vmatprep.subr.bf16.mxu1 %v2237_v8 }
  0x20   : > { %2124 = vmatpush3.bf16.msra.mxu0 %v2237_v8  ;;  %2205 = vmatpush3.bf16.msra.mxu1 %v2237_v8 }
  0x21   : > { %2125 = vmatprep.subr.bf16.mxu0 %v2238_v9  ;;  %2198 = vmatprep.subr.bf16.mxu1 %v2238_v9 }
  0x24   : > { %2126 = vmatpush3.bf16.msra.mxu0 %v2238_v9  ;;  %2206 = vmatpush3.bf16.msra.mxu1 %v2238_v9 }
  0x27   : > { %2128 = vmatmul.mubr.bf16.vlgmr.msra.gmra.mrb[0].mxu0 %v2241_v10  ;;  %2160 = vmatmul.mubr.bf16.vlgmr.msra.gmra.mrb[0].mxu1 %v2242_v11 }
  0x28   : > { %2131 = vmatprep.mubr.bf16.mxu0 %v2243_v12  ;;  %2163 = vmatprep.mubr.bf16.mxu1 %v2244_v13 }
  0x2f   : > { %2132 = vmatmul.mubr.bf16.gmra.mrb[4].mxu0 %v2245_v14  ;;  %2164 = vmatmul.mubr.bf16.gmra.mrb[4].mxu1 %v2246_v15 }
  0x30   : > { %2135 = vmatprep.mubr.bf16.mxu0 %v2247_v16  ;;  %2167 = vmatprep.mubr.bf16.mxu1 %v2248_v17 }
  0x37   : > { %2136 = vmatmul.mubr.bf16.gmra.mrb[8].mxu0 %v2249_v18  ;;  %2168 = vmatmul.mubr.bf16.gmra.mrb[8].mxu1 %v2250_v19 }
  0x38   : > { %2139 = vmatprep.mubr.bf16.mxu0 %v2251_v20  ;;  %2171 = vmatprep.mubr.bf16.mxu1 %v2252_v21 }
  0x3f   : > { %2140 = vmatmul.mubr.bf16.gmra.mrb[12].mxu0 %v2253_v22  ;;  %2172 = vmatmul.mubr.bf16.gmra.mrb[12].mxu1 %v2254_v23 }
  0x40   : > { %2143 = vmatprep.mubr.bf16.mxu0 %v2255_v24  ;;  %2175 = vmatprep.mubr.bf16.mxu1 %v2256_v25 }
  0x47   : > { %2144 = vmatmul.mubr.bf16.gmra.mrb[16].mxu0 %v2257_v26  ;;  %2176 = vmatmul.mubr.bf16.gmra.mrb[16].mxu1 %v2258_v27 }
  0x48   : > { %2147 = vmatprep.mubr.bf16.mxu0 %v2259_v28  ;;  %2179 = vmatprep.mubr.bf16.mxu1 %v2260_v29 }
  0x4f   : > { %2148 = vmatmul.mubr.bf16.gmra.mrb[20].mxu0 %v2261_v30  ;;  %2180 = vmatmul.mubr.bf16.gmra.mrb[20].mxu1 %v2262_v31 }
  0x50   : > { %2151 = vmatprep.mubr.bf16.mxu0 %v2263_v32  ;;  %2183 = vmatprep.mubr.bf16.mxu1 %v2264_v33 }
  0x57   : > { %2152 = vmatmul.mubr.bf16.gmra.mrb[24].mxu0 %v2265_v34  ;;  %2184 = vmatmul.mubr.bf16.gmra.mrb[24].mxu1 %v2266_v35 }
  0x58   : > { %2155 = vmatprep.mubr.bf16.mxu0 %v2267_v36  ;;  %2187 = vmatprep.mubr.bf16.mxu1 %v2268_v37 }
  0x5f   : > { %2156 = vmatmul.mubr.bf16.gmra.mrb[28].mxu0 %v2269_v38  ;;  %2188 = vmatmul.mubr.bf16.gmra.mrb[28].mxu1 %v2270_v39 }
  0xfa   : > { %v2129_v40 = vpop.f32.mrb[0].mxu0  ;;  %v2161_v42 = vpop.f32.mrb[0].mxu1 }
  0xfb   : > { %v746_v43 = vpop.f32.mrb[1].mxu0  ;;  %v874_v44 = vpop.f32.mrb[1].mxu1  ;;  %v1205_v47 = vadd.f32 %v2129_v40, %v2402_v41  ;;  %v1237_v48 = vadd.f32 %v2161_v42, %v2402_v41 }
  0xfc   : > { %v2130_v45 = vpop.f32.mrb[2].mxu0  ;;  %v2162_v46 = vpop.f32.mrb[2].mxu1  ;;  %v1203_v53 = vadd.f32 %v2402_v41, %v746_v43  ;;  %v1235_v54 = vadd.f32 %v2402_v41, %v874_v44 }
  0xfd   : > { %v1206_v49 = vadd.f32 %v2130_v45, %v2402_v41  ;;  %v1238_v50 = vadd.f32 %v2162_v46, %v2402_v41  ;;  %v749_v51 = vpop.f32.mrb[3].mxu0  ;;  %v877_v52 = vpop.f32.mrb[3].mxu1 }
  0xfe   : > { %v1204_v55 = vadd.f32 %v2402_v41, %v749_v51  ;;  %v1236_v56 = vadd.f32 %v2402_v41, %v877_v52 }
  0xff   : > { %v1888_v57 = vpack.c.bf16 %v1206_v49, %v1205_v47  ;;  %v1968_v58 = vpack.c.bf16 %v1238_v50, %v1237_v48 }
 0x100   : > { %v1883_v59 = vpack.c.bf16 %v1204_v55, %v1203_v53  ;;  %v1963_v60 = vpack.c.bf16 %v1236_v56, %v1235_v54 }
 0x101   : > { %2040 = vst [vmem:[%s2415_s17 + $0x8] sm:$0xff] %v1888_v57   ;;  %2056 = vst [vmem:[%s2415_s17 + $0x88] sm:$0xff] %v1968_v58  }
 0x102   : > { %1884 = vst [vmem:[%s2415_s17] sm:$0xff] %v1883_v59   ;;  %2055 = vst [vmem:[%s2415_s17 + $0x80] sm:$0xff] %v1963_v60   ;;  %v2133_v61 = vpop.f32.mrb[4].mxu0  ;;  %v2165_v62 = vpop.f32.mrb[4].mxu1 }
 0x103   : > { %v762_v63 = vpop.f32.mrb[5].mxu0  ;;  %v890_v0 = vpop.f32.mrb[5].mxu1  ;;  %v1209_v3 = vadd.f32 %v2133_v61, %v2402_v41  ;;  %v1241_v4 = vadd.f32 %v2165_v62, %v2402_v41 }
 0x104   : > { %v2134_v1 = vpop.f32.mrb[6].mxu0  ;;  %v2166_v2 = vpop.f32.mrb[6].mxu1  ;;  %v1207_v9 = vadd.f32 %v2402_v41, %v762_v63  ;;  %v1239_v10 = vadd.f32 %v2402_v41, %v890_v0 }
 0x105   : > { %v1210_v5 = vadd.f32 %v2134_v1, %v2402_v41  ;;  %v1242_v6 = vadd.f32 %v2166_v2, %v2402_v41  ;;  %v765_v7 = vpop.f32.mrb[7].mxu0  ;;  %v893_v8 = vpop.f32.mrb[7].mxu1 }
 0x106   : > { %v1208_v11 = vadd.f32 %v2402_v41, %v765_v7  ;;  %v1240_v12 = vadd.f32 %v2402_v41, %v893_v8 }
 0x107   : > { %v1898_v13 = vpack.c.bf16 %v1210_v5, %v1209_v3  ;;  %v1978_v14 = vpack.c.bf16 %v1242_v6, %v1241_v4 }
 0x108   : > { %v1893_v15 = vpack.c.bf16 %v1208_v11, %v1207_v9  ;;  %v1973_v16 = vpack.c.bf16 %v1240_v12, %v1239_v10 }
 0x109   : > { %2042 = vst [vmem:[%s2415_s17 + $0x18] sm:$0xff] %v1898_v13   ;;  %2058 = vst [vmem:[%s2415_s17 + $0x98] sm:$0xff] %v1978_v14  }
 0x10a   : > { %2041 = vst [vmem:[%s2415_s17 + $0x10] sm:$0xff] %v1893_v15   ;;  %2057 = vst [vmem:[%s2415_s17 + $0x90] sm:$0xff] %v1973_v16   ;;  %v2137_v17 = vpop.f32.mrb[8].mxu0  ;;  %v2169_v18 = vpop.f32.mrb[8].mxu1 }
 0x10b   : > { %v778_v19 = vpop.f32.mrb[9].mxu0  ;;  %v906_v20 = vpop.f32.mrb[9].mxu1  ;;  %v1213_v23 = vadd.f32 %v2137_v17, %v2402_v41  ;;  %v1245_v24 = vadd.f32 %v2169_v18, %v2402_v41 }
 0x10c   : > { %v2138_v21 = vpop.f32.mrb[10].mxu0  ;;  %v2170_v22 = vpop.f32.mrb[10].mxu1  ;;  %v1211_v29 = vadd.f32 %v2402_v41, %v778_v19  ;;  %v1243_v30 = vadd.f32 %v2402_v41, %v906_v20 }
 0x10d   : > { %v1214_v25 = vadd.f32 %v2138_v21, %v2402_v41  ;;  %v1246_v26 = vadd.f32 %v2170_v22, %v2402_v41  ;;  %v781_v27 = vpop.f32.mrb[11].mxu0  ;;  %v909_v28 = vpop.f32.mrb[11].mxu1 }
 0x10e   : > { %v1212_v31 = vadd.f32 %v2402_v41, %v781_v27  ;;  %v1244_v32 = vadd.f32 %v2402_v41, %v909_v28 }
 0x10f   : > { %v1908_v33 = vpack.c.bf16 %v1214_v25, %v1213_v23  ;;  %v1988_v34 = vpack.c.bf16 %v1246_v26, %v1245_v24 }
 0x110   : > { %v1903_v35 = vpack.c.bf16 %v1212_v31, %v1211_v29  ;;  %v1983_v36 = vpack.c.bf16 %v1244_v32, %v1243_v30 }
 0x111   : > { %2044 = vst [vmem:[%s2415_s17 + $0x28] sm:$0xff] %v1908_v33   ;;  %2060 = vst [vmem:[%s2415_s17 + $0xa8] sm:$0xff] %v1988_v34  }
 0x112   : > { %2043 = vst [vmem:[%s2415_s17 + $0x20] sm:$0xff] %v1903_v35   ;;  %2059 = vst [vmem:[%s2415_s17 + $0xa0] sm:$0xff] %v1983_v36   ;;  %v2141_v37 = vpop.f32.mrb[12].mxu0  ;;  %v2173_v38 = vpop.f32.mrb[12].mxu1 }
 0x113   : > { %v794_v39 = vpop.f32.mrb[13].mxu0  ;;  %v922_v40 = vpop.f32.mrb[13].mxu1  ;;  %v1217_v44 = vadd.f32 %v2141_v37, %v2402_v41  ;;  %v1249_v45 = vadd.f32 %v2173_v38, %v2402_v41 }
 0x114   : > { %v2142_v42 = vpop.f32.mrb[14].mxu0  ;;  %v2174_v43 = vpop.f32.mrb[14].mxu1  ;;  %v1215_v50 = vadd.f32 %v2402_v41, %v794_v39  ;;  %v1247_v51 = vadd.f32 %v2402_v41, %v922_v40 }
 0x115   : > { %v1218_v46 = vadd.f32 %v2142_v42, %v2402_v41  ;;  %v1250_v47 = vadd.f32 %v2174_v43, %v2402_v41  ;;  %v797_v48 = vpop.f32.mrb[15].mxu0  ;;  %v925_v49 = vpop.f32.mrb[15].mxu1 }
 0x116   : > { %v1216_v52 = vadd.f32 %v2402_v41, %v797_v48  ;;  %v1248_v53 = vadd.f32 %v2402_v41, %v925_v49 }
 0x117   : > { %v1918_v54 = vpack.c.bf16 %v1218_v46, %v1217_v44  ;;  %v1998_v55 = vpack.c.bf16 %v1250_v47, %v1249_v45 }
 0x118   : > { %v1913_v56 = vpack.c.bf16 %v1216_v52, %v1215_v50  ;;  %v1993_v57 = vpack.c.bf16 %v1248_v53, %v1247_v51 }
 0x119   : > { %2046 = vst [vmem:[%s2415_s17 + $0x38] sm:$0xff] %v1918_v54   ;;  %2062 = vst [vmem:[%s2415_s17 + $0xb8] sm:$0xff] %v1998_v55  }
 0x11a   : > { %2045 = vst [vmem:[%s2415_s17 + $0x30] sm:$0xff] %v1913_v56   ;;  %2061 = vst [vmem:[%s2415_s17 + $0xb0] sm:$0xff] %v1993_v57   ;;  %v2145_v58 = vpop.f32.mrb[16].mxu0  ;;  %v2177_v59 = vpop.f32.mrb[16].mxu1 }
 0x11b   : > { %v810_v60 = vpop.f32.mrb[17].mxu0  ;;  %v938_v61 = vpop.f32.mrb[17].mxu1  ;;  %v1221_v0 = vadd.f32 %v2145_v58, %v2402_v41  ;;  %v1253_v1 = vadd.f32 %v2177_v59, %v2402_v41 }
 0x11c   : > { %v2146_v62 = vpop.f32.mrb[18].mxu0  ;;  %v2178_v63 = vpop.f32.mrb[18].mxu1  ;;  %v1219_v6 = vadd.f32 %v2402_v41, %v810_v60  ;;  %v1251_v7 = vadd.f32 %v2402_v41, %v938_v61 }
 0x11d   : > { %v1222_v2 = vadd.f32 %v2146_v62, %v2402_v41  ;;  %v1254_v3 = vadd.f32 %v2178_v63, %v2402_v41  ;;  %v813_v4 = vpop.f32.mrb[19].mxu0  ;;  %v941_v5 = vpop.f32.mrb[19].mxu1 }
 0x11e   : > { %v1220_v8 = vadd.f32 %v2402_v41, %v813_v4  ;;  %v1252_v9 = vadd.f32 %v2402_v41, %v941_v5 }
 0x11f   : > { %v1928_v10 = vpack.c.bf16 %v1222_v2, %v1221_v0  ;;  %v2008_v11 = vpack.c.bf16 %v1254_v3, %v1253_v1 }
 0x120   : > { %v1923_v12 = vpack.c.bf16 %v1220_v8, %v1219_v6  ;;  %v2003_v13 = vpack.c.bf16 %v1252_v9, %v1251_v7 }
 0x121   : > { %2048 = vst [vmem:[%s2415_s17 + $0x48] sm:$0xff] %v1928_v10   ;;  %2064 = vst [vmem:[%s2415_s17 + $0xc8] sm:$0xff] %v2008_v11  }
 0x122   : > { %2047 = vst [vmem:[%s2415_s17 + $0x40] sm:$0xff] %v1923_v12   ;;  %2063 = vst [vmem:[%s2415_s17 + $0xc0] sm:$0xff] %v2003_v13   ;;  %v2149_v14 = vpop.f32.mrb[20].mxu0  ;;  %v2181_v15 = vpop.f32.mrb[20].mxu1 }
 0x123   : > { %v826_v16 = vpop.f32.mrb[21].mxu0  ;;  %v954_v17 = vpop.f32.mrb[21].mxu1  ;;  %v1225_v20 = vadd.f32 %v2149_v14, %v2402_v41  ;;  %v1257_v21 = vadd.f32 %v2181_v15, %v2402_v41 }
 0x124   : > { %v2150_v18 = vpop.f32.mrb[22].mxu0  ;;  %v2182_v19 = vpop.f32.mrb[22].mxu1  ;;  %v1223_v26 = vadd.f32 %v2402_v41, %v826_v16  ;;  %v1255_v27 = vadd.f32 %v2402_v41, %v954_v17 }
 0x125   : > { %v1226_v22 = vadd.f32 %v2150_v18, %v2402_v41  ;;  %v1258_v23 = vadd.f32 %v2182_v19, %v2402_v41  ;;  %v829_v24 = vpop.f32.mrb[23].mxu0  ;;  %v957_v25 = vpop.f32.mrb[23].mxu1 }
 0x126   : > { %v1224_v28 = vadd.f32 %v2402_v41, %v829_v24  ;;  %v1256_v29 = vadd.f32 %v2402_v41, %v957_v25 }
 0x127   : > { %v1938_v30 = vpack.c.bf16 %v1226_v22, %v1225_v20  ;;  %v2018_v31 = vpack.c.bf16 %v1258_v23, %v1257_v21 }
 0x128   : > { %v1933_v32 = vpack.c.bf16 %v1224_v28, %v1223_v26  ;;  %v2013_v33 = vpack.c.bf16 %v1256_v29, %v1255_v27 }
 0x129   : > { %2050 = vst [vmem:[%s2415_s17 + $0x58] sm:$0xff] %v1938_v30   ;;  %2066 = vst [vmem:[%s2415_s17 + $0xd8] sm:$0xff] %v2018_v31  }
 0x12a   : > { %2049 = vst [vmem:[%s2415_s17 + $0x50] sm:$0xff] %v1933_v32   ;;  %2065 = vst [vmem:[%s2415_s17 + $0xd0] sm:$0xff] %v2013_v33   ;;  %v2153_v34 = vpop.f32.mrb[24].mxu0  ;;  %v2185_v35 = vpop.f32.mrb[24].mxu1 }
 0x12b   : > { %v842_v36 = vpop.f32.mrb[25].mxu0  ;;  %v970_v37 = vpop.f32.mrb[25].mxu1  ;;  %v1229_v40 = vadd.f32 %v2153_v34, %v2402_v41  ;;  %v1261_v42 = vadd.f32 %v2185_v35, %v2402_v41 }
 0x12c   : > { %v2154_v38 = vpop.f32.mrb[26].mxu0  ;;  %v2186_v39 = vpop.f32.mrb[26].mxu1  ;;  %v1227_v47 = vadd.f32 %v2402_v41, %v842_v36  ;;  %v1259_v48 = vadd.f32 %v2402_v41, %v970_v37 }
 0x12d   : > { %v1230_v43 = vadd.f32 %v2154_v38, %v2402_v41  ;;  %v1262_v44 = vadd.f32 %v2186_v39, %v2402_v41  ;;  %v845_v45 = vpop.f32.mrb[27].mxu0  ;;  %v973_v46 = vpop.f32.mrb[27].mxu1 }
 0x12e   : > { %v1228_v49 = vadd.f32 %v2402_v41, %v845_v45  ;;  %v1260_v50 = vadd.f32 %v2402_v41, %v973_v46 }
 0x12f   : > { %v1948_v51 = vpack.c.bf16 %v1230_v43, %v1229_v40  ;;  %v2028_v52 = vpack.c.bf16 %v1262_v44, %v1261_v42 }
 0x130   : > { %v1943_v53 = vpack.c.bf16 %v1228_v49, %v1227_v47  ;;  %v2023_v54 = vpack.c.bf16 %v1260_v50, %v1259_v48 }
 0x131   : > { %2052 = vst [vmem:[%s2415_s17 + $0x68] sm:$0xff] %v1948_v51   ;;  %2068 = vst [vmem:[%s2415_s17 + $0xe8] sm:$0xff] %v2028_v52  }
 0x132   : > { %2051 = vst [vmem:[%s2415_s17 + $0x60] sm:$0xff] %v1943_v53   ;;  %2067 = vst [vmem:[%s2415_s17 + $0xe0] sm:$0xff] %v2023_v54   ;;  %v2157_v55 = vpop.f32.mrb[28].mxu0  ;;  %v2189_v56 = vpop.f32.mrb[28].mxu1 }
 0x133   : > { %v858_v57 = vpop.f32.mrb[29].mxu0  ;;  %v986_v58 = vpop.f32.mrb[29].mxu1  ;;  %v1233_v61 = vadd.f32 %v2157_v55, %v2402_v41  ;;  %v1265_v62 = vadd.f32 %v2189_v56, %v2402_v41 }
 0x134   : > { %v2158_v59 = vpop.f32.mrb[30].mxu0  ;;  %v2190_v60 = vpop.f32.mrb[30].mxu1  ;;  %v1231_v3 = vadd.f32 %v2402_v41, %v858_v57  ;;  %v1263_v4 = vadd.f32 %v2402_v41, %v986_v58 }
 0x135   : > { %v1234_v63 = vadd.f32 %v2158_v59, %v2402_v41  ;;  %v1266_v0 = vadd.f32 %v2190_v60, %v2402_v41  ;;  %v861_v1 = vpop.f32.mrb[31].mxu0  ;;  %v989_v2 = vpop.f32.mrb[31].mxu1 }
 0x136   : > { %v1232_v5 = vadd.f32 %v2402_v41, %v861_v1  ;;  %v1264_v6 = vadd.f32 %v2402_v41, %v989_v2 }
 0x137   : > { %v1958_v7 = vpack.c.bf16 %v1234_v63, %v1233_v61  ;;  %v2038_v8 = vpack.c.bf16 %v1266_v0, %v1265_v62 }
 0x138   : > { %v1953_v9 = vpack.c.bf16 %v1232_v5, %v1231_v3  ;;  %v2033_v10 = vpack.c.bf16 %v1264_v6, %v1263_v4 }
 0x139   : > { %2054 = vst [vmem:[%s2415_s17 + $0x78] sm:$0xff] %v1958_v7   ;;  %2070 = vst [vmem:[%s2415_s17 + $0xf8] sm:$0xff] %v2038_v8  }
 0x13a   : > { %2053 = vst [vmem:[%s2415_s17 + $0x70] sm:$0xff] %v1953_v9   ;;  %2069 = vst [vmem:[%s2415_s17 + $0xf0] sm:$0xff] %v2033_v10  }
 0x13b PF: > { %s13_s14 = sadd.s32 1, %s2293_s14   ;;  %s2520_s12 = smov %s2289_s13 }
 0x13c   : > { %p10_p5 = scmp.ge.s32.totalorder %s13_s14, 6   ;;  %s2521_s13 = smov %s2523_s15 }
 0x13e   :  { %12 = sbr.rel (!%p10_p5) target bundleno = 2 (0x2), region = 76 }

// kernel: skull_unet_transformer_forward.51
= control target key start
LH: loop header
LB: loop body
LE: loop exit
PB: predicated region body
PF: predicated region fallthrough
CT: control target
= control target key end

     0   :  { %s2594_s12 = smov 0   ;;  %s2596_s13 = smov 0   ;;  %s2880_s0 = inlined_call_operand.vmem [shape: bf16[32768,256], index: 0, kind: input, shape index: {}]   ;;  %s2881_s1 = inlined_call_operand.vmem [shape: bf16[256,128], index: 1, kind: input, shape index: {}]   ;;  %s2882_s2 = inlined_call_operand.vmem [shape: f32[1,128], index: 2, kind: input, shape index: {}]   ;;  %s2883_s3 = inlined_call_operand.vmem [shape: bf16[32768,128], index: 3, kind: output, shape index: {}]  }
   0x1   :  { %s2598_s14 = smov 0  }
   0x2 LB: > { %s32_s15 = sadd.s32 1, %s2567_s13  ;;  %p1971_p0 = scmp.ge.s32.totalorder %s2571_s14, 1  ;;  %s2571_s14 = sphi %s2598_s14, %s13_s14   ;;  %s2567_s13 = sphi %s2596_s13, %s2885_s13   ;;  %s2563_s12 = sphi %s2594_s12, %s2884_s12  }
   0x3   : > { %p34_p1 = scmp.ge.s32.totalorder %s32_s15, 64  ;;  %p191_p2 = scmp.lt.s32.totalorder %s2571_s14, 65 }
   0x5   : > { %s2887_s15 = smov (%p34_p1, %s32_s15), 0  ;;  %p192_p3 = pnand %p1971_p0, %p191_p2 }
   0x6   : > { %v2437_v0 = vld [vmem:[%s2881_s1] sm:$0xff] (!%p192_p3)   ;;  %v2573_v1 = vmov (!%p192_p3), 0   ;;  %s1972_s18 = sshll.u32 (!%p192_p3), %s2563_s12, 6  ;;  %v2438_v2 = vld [vmem:[%s2881_s1 + $0x8] sm:$0xff] (!%p192_p3)   ;;  %v2439_v3 = vld [vmem:[%s2881_s1 + $0x10] sm:$0xff] (!%p192_p3)  }
   0x7   : > { %195 = sbr.rel (%p192_p3) target bundleno = 412 (0x19c), region = 32  ;;  %912 = vmatprep.subr.bf16.mxu0 (!%p192_p3), %v2573_v1  ;;  %2380 = vmatprep.subr.bf16.mxu1 (!%p192_p3), %v2573_v1  ;;  %p236_p4 = scmp.lt.s32.totalorder (!%p192_p3), %s1972_s18, 4095  ;;  %v2440_v4 = vld [vmem:[%s2881_s1 + $0x18] sm:$0xff] (!%p192_p3)   ;;  %v2441_v5 = vld [vmem:[%s2881_s1 + $0x20] sm:$0xff] (!%p192_p3)   ;;  %v2442_v7 = vld [vmem:[%s2881_s1 + $0x28] sm:$0xff] (!%p192_p3)  }
   0x8   : > { %913 = vmatpush1.bf16.msra.mxu0 (!%p192_p3), %v2437_v0  ;;  %2396 = vmatpush1.bf16.msra.mxu1 (!%p192_p3), %v2437_v0  ;;  %v2443_v9 = vld [vmem:[%s2881_s1 + $0x30] sm:$0xff] (!%p192_p3)   ;;  %v2444_v10 = vld [vmem:[%s2881_s1 + $0x38] sm:$0xff] (!%p192_p3)   ;;  %v2445_v11 = vld [vmem:[%s2881_s1 + $0x40] sm:$0xff] (!%p192_p3)  }
   0x9   : > { %914 = vmatprep.subr.bf16.mxu0 (!%p192_p3), %v2573_v1  ;;  %2381 = vmatprep.subr.bf16.mxu1 (!%p192_p3), %v2573_v1  ;;  %v2446_v12 = vld [vmem:[%s2881_s1 + $0x48] sm:$0xff] (!%p192_p3)   ;;  %v2447_v13 = vld [vmem:[%s2881_s1 + $0x50] sm:$0xff] (!%p192_p3)   ;;  %v2448_v14 = vld [vmem:[%s2881_s1 + $0x58] sm:$0xff] (!%p192_p3)  }
   0xa   : > { %v2449_v15 = vld [vmem:[%s2881_s1 + $0x60] sm:$0xff] (!%p192_p3)   ;;  %v2450_v16 = vld [vmem:[%s2881_s1 + $0x68] sm:$0xff] (!%p192_p3)   ;;  %v2451_v17 = vld [vmem:[%s2881_s1 + $0x70] sm:$0xff] (!%p192_p3)  }
   0xb   : > { %v2452_v18 = vld [vmem:[%s2881_s1 + $0x78] sm:$0xff] (!%p192_p3)  }
   0xc   : > { %915 = vmatpush1.bf16.msra.mxu0 (!%p192_p3), %v2438_v2  ;;  %2397 = vmatpush1.bf16.msra.mxu1 (!%p192_p3), %v2438_v2 }
   0xd   : > { %916 = vmatprep.subr.bf16.mxu0 (!%p192_p3), %v2573_v1  ;;  %2382 = vmatprep.subr.bf16.mxu1 (!%p192_p3), %v2573_v1 }
   0xe   : > { %s2889_s18 = smov (!%p236_p4, %s1972_s18), 4095 }
   0xf   : > { %s2124_s25 = sshll.u32 %s2889_s18, 3  ;;  %s1976_s6 = sshll.u32 %s2889_s18, 2 }
  0x10   : > { %917 = vmatpush1.bf16.msra.mxu0 %v2439_v3  ;;  %2398 = vmatpush1.bf16.msra.mxu1 %v2439_v3  ;;  %s2641_s30 = scalar_lea.vmem %s2880_s0, %s2124_s25  ;;  %s2777_s8 = scalar_lea.vmem %s2883_s3, %s1976_s6 }
  0x11   : > { %918 = vmatprep.subr.bf16.mxu0 %v2573_v1  ;;  %2383 = vmatprep.subr.bf16.mxu1 %v2573_v1  ;;  %v2455_v6 = vld [vmem:[%s2641_s30 + $0x4] ss:$8 sps:$4 sm:$0xff]   ;;  %v2453_v19 = vld [vmem:[%s2641_s30] ss:$8 sps:$4 sm:$0xff]   ;;  %v2459_v21 = vld [vmem:[%s2641_s30 + $0x14] ss:$8 sps:$4 sm:$0xff]  }
  0x12   : > { %v2458_v8 = vld [vmem:[%s2641_s30 + $0x104] ss:$8 sps:$4 sm:$0xff]   ;;  %944 = vmatprep.mubr.bf16.mxu0 %v2455_v6  ;;  %v2456_v20 = vld [vmem:[%s2641_s30 + $0x100] ss:$8 sps:$4 sm:$0xff]   ;;  %v2461_v22 = vld [vmem:[%s2641_s30 + $0x114] ss:$8 sps:$4 sm:$0xff]  }
  0x13   : > { %1072 = vmatprep.mubr.bf16.mxu1 %v2458_v8  ;;  %v2463_v23 = vld [vmem:[%s2641_s30 + $0x10] ss:$8 sps:$4 sm:$0xff]   ;;  %v2465_v25 = vld [vmem:[%s2641_s30 + $0x24] ss:$8 sps:$4 sm:$0xff]   ;;  %v2469_v27 = vld [vmem:[%s2641_s30 + $0x20] ss:$8 sps:$4 sm:$0xff]  }
  0x14   : > { %919 = vmatpush1.bf16.msra.mxu0 %v2440_v4  ;;  %2399 = vmatpush1.bf16.msra.mxu1 %v2440_v4  ;;  %v2464_v24 = vld [vmem:[%s2641_s30 + $0x110] ss:$8 sps:$4 sm:$0xff]   ;;  %v2467_v26 = vld [vmem:[%s2641_s30 + $0x124] ss:$8 sps:$4 sm:$0xff]   ;;  %v2470_v28 = vld [vmem:[%s2641_s30 + $0x120] ss:$8 sps:$4 sm:$0xff]  }
  0x15   : > { %920 = vmatprep.subr.bf16.mxu0 %v2573_v1  ;;  %2384 = vmatprep.subr.bf16.mxu1 %v2573_v1  ;;  %v2471_v29 = vld [vmem:[%s2641_s30 + $0x34] ss:$8 sps:$4 sm:$0xff]   ;;  %v2475_v31 = vld [vmem:[%s2641_s30 + $0x30] ss:$8 sps:$4 sm:$0xff]   ;;  %v2477_v33 = vld [vmem:[%s2641_s30 + $0x44] ss:$8 sps:$4 sm:$0xff]  }
  0x16   : > { %v2473_v30 = vld [vmem:[%s2641_s30 + $0x134] ss:$8 sps:$4 sm:$0xff]   ;;  %v2476_v32 = vld [vmem:[%s2641_s30 + $0x130] ss:$8 sps:$4 sm:$0xff]   ;;  %v2479_v34 = vld [vmem:[%s2641_s30 + $0x144] ss:$8 sps:$4 sm:$0xff]  }
  0x17   : > { %v2481_v35 = vld [vmem:[%s2641_s30 + $0x40] ss:$8 sps:$4 sm:$0xff]   ;;  %v2483_v37 = vld [vmem:[%s2641_s30 + $0x54] ss:$8 sps:$4 sm:$0xff]   ;;  %v2487_v39 = vld [vmem:[%s2641_s30 + $0x50] ss:$8 sps:$4 sm:$0xff]  }
  0x18   : > { %921 = vmatpush1.bf16.msra.mxu0 %v2441_v5  ;;  %2400 = vmatpush1.bf16.msra.mxu1 %v2441_v5  ;;  %v2482_v36 = vld [vmem:[%s2641_s30 + $0x140] ss:$8 sps:$4 sm:$0xff]   ;;  %v2485_v38 = vld [vmem:[%s2641_s30 + $0x154] ss:$8 sps:$4 sm:$0xff]   ;;  %v2488_v40 = vld [vmem:[%s2641_s30 + $0x150] ss:$8 sps:$4 sm:$0xff]  }
  0x19   : > { %922 = vmatprep.subr.bf16.mxu0 %v2573_v1  ;;  %2385 = vmatprep.subr.bf16.mxu1 %v2573_v1  ;;  %v2489_v41 = vld [vmem:[%s2641_s30 + $0x64] ss:$8 sps:$4 sm:$0xff]   ;;  %v2493_v43 = vld [vmem:[%s2641_s30 + $0x60] ss:$8 sps:$4 sm:$0xff]   ;;  %v2495_v45 = vld [vmem:[%s2641_s30 + $0x74] ss:$8 sps:$4 sm:$0xff]  }
  0x1a   : > { %v2491_v42 = vld [vmem:[%s2641_s30 + $0x164] ss:$8 sps:$4 sm:$0xff]   ;;  %v2494_v44 = vld [vmem:[%s2641_s30 + $0x160] ss:$8 sps:$4 sm:$0xff]   ;;  %v2497_v46 = vld [vmem:[%s2641_s30 + $0x174] ss:$8 sps:$4 sm:$0xff]  }
  0x1b   : > { %v2499_v47 = vld [vmem:[%s2641_s30 + $0x70] ss:$8 sps:$4 sm:$0xff]   ;;  %v2501_v49 = vld [vmem:[%s2641_s30 + $0x84] ss:$8 sps:$4 sm:$0xff]   ;;  %v2505_v51 = vld [vmem:[%s2641_s30 + $0x80] ss:$8 sps:$4 sm:$0xff]  }
  0x1c   : > { %923 = vmatpush1.bf16.msra.mxu0 %v2442_v7  ;;  %2401 = vmatpush1.bf16.msra.mxu1 %v2442_v7  ;;  %v2500_v48 = vld [vmem:[%s2641_s30 + $0x170] ss:$8 sps:$4 sm:$0xff]   ;;  %v2503_v50 = vld [vmem:[%s2641_s30 + $0x184] ss:$8 sps:$4 sm:$0xff]   ;;  %v2506_v52 = vld [vmem:[%s2641_s30 + $0x180] ss:$8 sps:$4 sm:$0xff]  }
  0x1d   : > { %924 = vmatprep.subr.bf16.mxu0 %v2573_v1  ;;  %2386 = vmatprep.subr.bf16.mxu1 %v2573_v1  ;;  %v2507_v53 = vld [vmem:[%s2641_s30 + $0x94] ss:$8 sps:$4 sm:$0xff]   ;;  %v2511_v55 = vld [vmem:[%s2641_s30 + $0x90] ss:$8 sps:$4 sm:$0xff]   ;;  %v2513_v57 = vld [vmem:[%s2641_s30 + $0xa4] ss:$8 sps:$4 sm:$0xff]  }
  0x1e   : > { %v2509_v54 = vld [vmem:[%s2641_s30 + $0x194] ss:$8 sps:$4 sm:$0xff]   ;;  %v2512_v56 = vld [vmem:[%s2641_s30 + $0x190] ss:$8 sps:$4 sm:$0xff]   ;;  %v2515_v58 = vld [vmem:[%s2641_s30 + $0x1a4] ss:$8 sps:$4 sm:$0xff]  }
  0x1f   : > { %v2517_v59 = vld [vmem:[%s2641_s30 + $0xa0] ss:$8 sps:$4 sm:$0xff]   ;;  %v2519_v61 = vld [vmem:[%s2641_s30 + $0xb4] ss:$8 sps:$4 sm:$0xff]   ;;  %v2523_v63 = vld [vmem:[%s2641_s30 + $0xb0] ss:$8 sps:$4 sm:$0xff]  }
  0x20   : > { %925 = vmatpush1.bf16.msra.mxu0 %v2443_v9  ;;  %2402 = vmatpush1.bf16.msra.mxu1 %v2443_v9  ;;  %v2518_v60 = vld [vmem:[%s2641_s30 + $0x1a0] ss:$8 sps:$4 sm:$0xff]   ;;  %v2521_v62 = vld [vmem:[%s2641_s30 + $0x1b4] ss:$8 sps:$4 sm:$0xff]   ;;  %v2524_v0 = vld [vmem:[%s2641_s30 + $0x1b0] ss:$8 sps:$4 sm:$0xff]  }
  0x21   : > { %926 = vmatprep.subr.bf16.mxu0 %v2573_v1  ;;  %2387 = vmatprep.subr.bf16.mxu1 %v2573_v1  ;;  %v2527_v2 = vld [vmem:[%s2641_s30 + $0x1c4] ss:$8 sps:$4 sm:$0xff]   ;;  %v2529_v3 = vld [vmem:[%s2641_s30 + $0xc0] ss:$8 sps:$4 sm:$0xff]   ;;  %v2531_v5 = vld [vmem:[%s2641_s30 + $0xd4] ss:$8 sps:$4 sm:$0xff]  }
  0x22   : > { %v2530_v4 = vld [vmem:[%s2641_s30 + $0x1c0] ss:$8 sps:$4 sm:$0xff]   ;;  %v2533_v6 = vld [vmem:[%s2641_s30 + $0x1d4] ss:$8 sps:$4 sm:$0xff]   ;;  %v2535_v7 = vld [vmem:[%s2641_s30 + $0xd0] ss:$8 sps:$4 sm:$0xff]  }
  0x23   : > { %v2536_v8 = vld [vmem:[%s2641_s30 + $0x1d0] ss:$8 sps:$4 sm:$0xff]   ;;  %v2537_v9 = vld [vmem:[%s2641_s30 + $0xe4] ss:$8 sps:$4 sm:$0xff]  }
  0x24   : > { %927 = vmatpush1.bf16.msra.mxu0 %v2444_v10  ;;  %2403 = vmatpush1.bf16.msra.mxu1 %v2444_v10  ;;  %v2539_v10 = vld [vmem:[%s2641_s30 + $0x1e4] ss:$8 sps:$4 sm:$0xff]  }
  0x25   : > { %928 = vmatprep.subr.bf16.mxu0 %v2573_v1  ;;  %2388 = vmatprep.subr.bf16.mxu1 %v2573_v1 }
  0x28   : > { %929 = vmatpush1.bf16.msra.mxu0 %v2445_v11  ;;  %2404 = vmatpush1.bf16.msra.mxu1 %v2445_v11  ;;  %v2541_v11 = vld [vmem:[%s2641_s30 + $0xe0] ss:$8 sps:$4 sm:$0xff]  }
  0x29   : > { %930 = vmatprep.subr.bf16.mxu0 %v2573_v1  ;;  %2389 = vmatprep.subr.bf16.mxu1 %v2573_v1 }
  0x2c   : > { %931 = vmatpush1.bf16.msra.mxu0 %v2446_v12  ;;  %2405 = vmatpush1.bf16.msra.mxu1 %v2446_v12  ;;  %v2542_v12 = vld [vmem:[%s2641_s30 + $0x1e0] ss:$8 sps:$4 sm:$0xff]  }
  0x2d   : > { %932 = vmatprep.subr.bf16.mxu0 %v2573_v1  ;;  %2390 = vmatprep.subr.bf16.mxu1 %v2573_v1 }
  0x30   : > { %933 = vmatpush1.bf16.msra.mxu0 %v2447_v13  ;;  %2406 = vmatpush1.bf16.msra.mxu1 %v2447_v13  ;;  %v2543_v13 = vld [vmem:[%s2641_s30 + $0xf4] ss:$8 sps:$4 sm:$0xff]  }
  0x31   : > { %934 = vmatprep.subr.bf16.mxu0 %v2573_v1  ;;  %2391 = vmatprep.subr.bf16.mxu1 %v2573_v1 }
  0x34   : > { %935 = vmatpush1.bf16.msra.mxu0 %v2448_v14  ;;  %2407 = vmatpush1.bf16.msra.mxu1 %v2448_v14  ;;  %v2545_v14 = vld [vmem:[%s2641_s30 + $0x1f4] ss:$8 sps:$4 sm:$0xff]  }
  0x35   : > { %936 = vmatprep.subr.bf16.mxu0 %v2573_v1  ;;  %2392 = vmatprep.subr.bf16.mxu1 %v2573_v1 }
  0x38   : > { %937 = vmatpush1.bf16.msra.mxu0 %v2449_v15  ;;  %2408 = vmatpush1.bf16.msra.mxu1 %v2449_v15  ;;  %v2547_v15 = vld [vmem:[%s2641_s30 + $0xf0] ss:$8 sps:$4 sm:$0xff]  }
  0x39   : > { %938 = vmatprep.subr.bf16.mxu0 %v2573_v1  ;;  %2393 = vmatprep.subr.bf16.mxu1 %v2573_v1 }
  0x3c   : > { %939 = vmatpush1.bf16.msra.mxu0 %v2450_v16  ;;  %2409 = vmatpush1.bf16.msra.mxu1 %v2450_v16  ;;  %v2548_v16 = vld [vmem:[%s2641_s30 + $0x1f0] ss:$8 sps:$4 sm:$0xff]  }
  0x3d   : > { %940 = vmatprep.subr.bf16.mxu0 %v2573_v1  ;;  %2394 = vmatprep.subr.bf16.mxu1 %v2573_v1 }
  0x40   : > { %941 = vmatpush1.bf16.msra.mxu0 %v2451_v17  ;;  %2410 = vmatpush1.bf16.msra.mxu1 %v2451_v17  ;;  %v2767_v17 = vld [vmem:[%s2882_s2] ss:$0 sm:$0xff] }
  0x41   : > { %942 = vmatprep.subr.bf16.mxu0 %v2573_v1  ;;  %2395 = vmatprep.subr.bf16.mxu1 %v2573_v1  ;;  %v2525_v1 = vld [vmem:[%s2641_s30 + $0xc4] ss:$8 sps:$4 sm:$0xff]  }
  0x44   : > { %943 = vmatpush1.bf16.msra.mxu0 %v2452_v18  ;;  %2411 = vmatpush1.bf16.msra.mxu1 %v2452_v18 }
  0x47   : > { %945 = vmatmul.mubr.bf16.vlgmr.msra.gmra.mrb[0].mxu0 %v2453_v19  ;;  %1073 = vmatmul.mubr.bf16.vlgmr.msra.gmra.mrb[0].mxu1 %v2456_v20 }
  0x48   : > { %952 = vmatprep.mubr.bf16.mxu0 %v2459_v21  ;;  %1080 = vmatprep.mubr.bf16.mxu1 %v2461_v22 }
  0x4f   : > { %953 = vmatmul.mubr.bf16.gmra.mrb[4].mxu0 %v2463_v23  ;;  %1081 = vmatmul.mubr.bf16.gmra.mrb[4].mxu1 %v2464_v24 }
  0x50   : > { %960 = vmatprep.mubr.bf16.mxu0 %v2465_v25  ;;  %1088 = vmatprep.mubr.bf16.mxu1 %v2467_v26 }
  0x57   : > { %961 = vmatmul.mubr.bf16.gmra.mrb[8].mxu0 %v2469_v27  ;;  %1089 = vmatmul.mubr.bf16.gmra.mrb[8].mxu1 %v2470_v28 }
  0x58   : > { %968 = vmatprep.mubr.bf16.mxu0 %v2471_v29  ;;  %1096 = vmatprep.mubr.bf16.mxu1 %v2473_v30 }
  0x5f   : > { %969 = vmatmul.mubr.bf16.gmra.mrb[12].mxu0 %v2475_v31  ;;  %1097 = vmatmul.mubr.bf16.gmra.mrb[12].mxu1 %v2476_v32 }
  0x60   : > { %976 = vmatprep.mubr.bf16.mxu0 %v2477_v33  ;;  %1104 = vmatprep.mubr.bf16.mxu1 %v2479_v34 }
  0x67   : > { %977 = vmatmul.mubr.bf16.gmra.mrb[16].mxu0 %v2481_v35  ;;  %1105 = vmatmul.mubr.bf16.gmra.mrb[16].mxu1 %v2482_v36 }
  0x68   : > { %984 = vmatprep.mubr.bf16.mxu0 %v2483_v37  ;;  %1112 = vmatprep.mubr.bf16.mxu1 %v2485_v38 }
  0x6f   : > { %985 = vmatmul.mubr.bf16.gmra.mrb[20].mxu0 %v2487_v39  ;;  %1113 = vmatmul.mubr.bf16.gmra.mrb[20].mxu1 %v2488_v40 }
  0x70   : > { %992 = vmatprep.mubr.bf16.mxu0 %v2489_v41  ;;  %1120 = vmatprep.mubr.bf16.mxu1 %v2491_v42 }
  0x77   : > { %993 = vmatmul.mubr.bf16.gmra.mrb[24].mxu0 %v2493_v43  ;;  %1121 = vmatmul.mubr.bf16.gmra.mrb[24].mxu1 %v2494_v44 }
  0x78   : > { %1000 = vmatprep.mubr.bf16.mxu0 %v2495_v45  ;;  %1128 = vmatprep.mubr.bf16.mxu1 %v2497_v46 }
  0x7f   : > { %1001 = vmatmul.mubr.bf16.gmra.mrb[28].mxu0 %v2499_v47  ;;  %1129 = vmatmul.mubr.bf16.gmra.mrb[28].mxu1 %v2500_v48 }
  0x80   : > { %1008 = vmatprep.mubr.bf16.mxu0 %v2501_v49  ;;  %1136 = vmatprep.mubr.bf16.mxu1 %v2503_v50 }
  0x87   : > { %1009 = vmatmul.mubr.bf16.gmra.mrb[32].mxu0 %v2505_v51  ;;  %1137 = vmatmul.mubr.bf16.gmra.mrb[32].mxu1 %v2506_v52 }
  0x88   : > { %1016 = vmatprep.mubr.bf16.mxu0 %v2507_v53  ;;  %1144 = vmatprep.mubr.bf16.mxu1 %v2509_v54 }
  0x8f   : > { %1017 = vmatmul.mubr.bf16.gmra.mrb[36].mxu0 %v2511_v55  ;;  %1145 = vmatmul.mubr.bf16.gmra.mrb[36].mxu1 %v2512_v56 }
  0x90   : > { %1024 = vmatprep.mubr.bf16.mxu0 %v2513_v57  ;;  %1152 = vmatprep.mubr.bf16.mxu1 %v2515_v58 }
  0x97   : > { %1025 = vmatmul.mubr.bf16.gmra.mrb[40].mxu0 %v2517_v59  ;;  %1153 = vmatmul.mubr.bf16.gmra.mrb[40].mxu1 %v2518_v60 }
  0x98   : > { %1032 = vmatprep.mubr.bf16.mxu0 %v2519_v61  ;;  %1160 = vmatprep.mubr.bf16.mxu1 %v2521_v62 }
  0x9f   : > { %1033 = vmatmul.mubr.bf16.gmra.mrb[44].mxu0 %v2523_v63  ;;  %1161 = vmatmul.mubr.bf16.gmra.mrb[44].mxu1 %v2524_v0 }
  0xa0   : > { %1040 = vmatprep.mubr.bf16.mxu0 %v2525_v1  ;;  %1168 = vmatprep.mubr.bf16.mxu1 %v2527_v2 }
  0xa7   : > { %1041 = vmatmul.mubr.bf16.gmra.mrb[48].mxu0 %v2529_v3  ;;  %1169 = vmatmul.mubr.bf16.gmra.mrb[48].mxu1 %v2530_v4 }
  0xa8   : > { %1048 = vmatprep.mubr.bf16.mxu0 %v2531_v5  ;;  %1176 = vmatprep.mubr.bf16.mxu1 %v2533_v6 }
  0xaf   : > { %1049 = vmatmul.mubr.bf16.gmra.mrb[52].mxu0 %v2535_v7  ;;  %1177 = vmatmul.mubr.bf16.gmra.mrb[52].mxu1 %v2536_v8 }
  0xb0   : > { %1056 = vmatprep.mubr.bf16.mxu0 %v2537_v9  ;;  %1184 = vmatprep.mubr.bf16.mxu1 %v2539_v10 }
  0xb7   : > { %1057 = vmatmul.mubr.bf16.gmra.mrb[56].mxu0 %v2541_v11  ;;  %1185 = vmatmul.mubr.bf16.gmra.mrb[56].mxu1 %v2542_v12 }
  0xb8   : > { %1064 = vmatprep.mubr.bf16.mxu0 %v2543_v13  ;;  %1192 = vmatprep.mubr.bf16.mxu1 %v2545_v14 }
  0xbf   : > { %1065 = vmatmul.mubr.bf16.gmra.mrb[60].mxu0 %v2547_v15  ;;  %1193 = vmatmul.mubr.bf16.gmra.mrb[60].mxu1 %v2548_v16 }
 0x11a   : > { %v946_v18 = vpop.f32.mrb[0].mxu0  ;;  %v1074_v19 = vpop.f32.mrb[0].mxu1 }
 0x11b   : > { %v1403_v20 = vadd.f32 %v2767_v17, %v946_v18  ;;  %v1435_v21 = vadd.f32 %v2767_v17, %v1074_v19  ;;  %v948_v22 = vpop.f32.mrb[1].mxu0  ;;  %v1076_v23 = vpop.f32.mrb[1].mxu1 }
 0x11c   : > { %v949_v24 = vpop.f32.mrb[2].mxu0  ;;  %v1077_v25 = vpop.f32.mrb[2].mxu1 }
 0x11d   : > { %v1404_v26 = vadd.f32 %v2767_v17, %v949_v24  ;;  %v1436_v27 = vadd.f32 %v2767_v17, %v1077_v25  ;;  %v951_v28 = vpop.f32.mrb[3].mxu0  ;;  %v1079_v29 = vpop.f32.mrb[3].mxu1  ;;  %v1467_v30 = vmax.f32 %v1403_v20, 0.0  ;;  %v1499_v31 = vmax.f32 %v1435_v21, 0.0 }
 0x11f   : > { %v1468_v32 = vmax.f32 %v1404_v26, 0.0  ;;  %v1500_v33 = vmax.f32 %v1436_v27, 0.0 }
 0x121   : > { %v2192_v34 = vpack.c.bf16 %v1468_v32, %v1467_v30  ;;  %v2272_v35 = vpack.c.bf16 %v1500_v33, %v1499_v31 }
 0x122   : > { %v954_v36 = vpop.f32.mrb[4].mxu0  ;;  %v1082_v37 = vpop.f32.mrb[4].mxu1 }
 0x123   : > { %2193 = vst [vmem:[%s2777_s8] sm:$0xff] %v2192_v34   ;;  %2364 = vst [vmem:[%s2777_s8 + $0x80] sm:$0xff] %v2272_v35   ;;  %v1405_v38 = vadd.f32 %v2767_v17, %v954_v36  ;;  %v1437_v39 = vadd.f32 %v2767_v17, %v1082_v37  ;;  %v956_v40 = vpop.f32.mrb[5].mxu0  ;;  %v1084_v41 = vpop.f32.mrb[5].mxu1 }
 0x124   : > { %v957_v42 = vpop.f32.mrb[6].mxu0  ;;  %v1085_v43 = vpop.f32.mrb[6].mxu1 }
 0x125   : > { %v1406_v44 = vadd.f32 %v2767_v17, %v957_v42  ;;  %v1438_v45 = vadd.f32 %v2767_v17, %v1085_v43  ;;  %v959_v46 = vpop.f32.mrb[7].mxu0  ;;  %v1087_v47 = vpop.f32.mrb[7].mxu1  ;;  %v1469_v48 = vmax.f32 %v1405_v38, 0.0  ;;  %v1501_v49 = vmax.f32 %v1437_v39, 0.0 }
 0x127   : > { %v1470_v50 = vmax.f32 %v1406_v44, 0.0  ;;  %v1502_v51 = vmax.f32 %v1438_v45, 0.0 }
 0x129   : > { %v2197_v52 = vpack.c.bf16 %v1470_v50, %v1469_v48  ;;  %v2277_v53 = vpack.c.bf16 %v1502_v51, %v1501_v49 }
 0x12a   : > { %v962_v54 = vpop.f32.mrb[8].mxu0  ;;  %v1090_v55 = vpop.f32.mrb[8].mxu1 }
 0x12b   : > { %2349 = vst [vmem:[%s2777_s8 + $0x8] sm:$0xff] %v2197_v52   ;;  %2365 = vst [vmem:[%s2777_s8 + $0x88] sm:$0xff] %v2277_v53   ;;  %v1407_v56 = vadd.f32 %v2767_v17, %v962_v54  ;;  %v1439_v57 = vadd.f32 %v2767_v17, %v1090_v55  ;;  %v964_v58 = vpop.f32.mrb[9].mxu0  ;;  %v1092_v59 = vpop.f32.mrb[9].mxu1 }
 0x12c   : > { %v965_v60 = vpop.f32.mrb[10].mxu0  ;;  %v1093_v61 = vpop.f32.mrb[10].mxu1 }
 0x12d   : > { %v1408_v62 = vadd.f32 %v2767_v17, %v965_v60  ;;  %v1440_v63 = vadd.f32 %v2767_v17, %v1093_v61  ;;  %v967_v0 = vpop.f32.mrb[11].mxu0  ;;  %v1095_v1 = vpop.f32.mrb[11].mxu1  ;;  %v1471_v2 = vmax.f32 %v1407_v56, 0.0  ;;  %v1503_v3 = vmax.f32 %v1439_v57, 0.0 }
 0x12f   : > { %v1472_v4 = vmax.f32 %v1408_v62, 0.0  ;;  %v1504_v5 = vmax.f32 %v1440_v63, 0.0 }
 0x131   : > { %v2202_v6 = vpack.c.bf16 %v1472_v4, %v1471_v2  ;;  %v2282_v7 = vpack.c.bf16 %v1504_v5, %v1503_v3 }
 0x132   : > { %v970_v8 = vpop.f32.mrb[12].mxu0  ;;  %v1098_v9 = vpop.f32.mrb[12].mxu1 }
 0x133   : > { %2350 = vst [vmem:[%s2777_s8 + $0x10] sm:$0xff] %v2202_v6   ;;  %2366 = vst [vmem:[%s2777_s8 + $0x90] sm:$0xff] %v2282_v7   ;;  %v1409_v10 = vadd.f32 %v2767_v17, %v970_v8  ;;  %v1441_v11 = vadd.f32 %v2767_v17, %v1098_v9  ;;  %v972_v12 = vpop.f32.mrb[13].mxu0  ;;  %v1100_v13 = vpop.f32.mrb[13].mxu1 }
 0x134   : > { %v973_v14 = vpop.f32.mrb[14].mxu0  ;;  %v1101_v15 = vpop.f32.mrb[14].mxu1 }
 0x135   : > { %v1410_v16 = vadd.f32 %v2767_v17, %v973_v14  ;;  %v1442_v18 = vadd.f32 %v2767_v17, %v1101_v15  ;;  %v975_v19 = vpop.f32.mrb[15].mxu0  ;;  %v1103_v20 = vpop.f32.mrb[15].mxu1  ;;  %v1473_v21 = vmax.f32 %v1409_v10, 0.0  ;;  %v1505_v22 = vmax.f32 %v1441_v11, 0.0 }
 0x137   : > { %v1474_v23 = vmax.f32 %v1410_v16, 0.0  ;;  %v1506_v24 = vmax.f32 %v1442_v18, 0.0 }
 0x139   : > { %v2207_v25 = vpack.c.bf16 %v1474_v23, %v1473_v21  ;;  %v2287_v26 = vpack.c.bf16 %v1506_v24, %v1505_v22 }
 0x13a   : > { %v978_v27 = vpop.f32.mrb[16].mxu0  ;;  %v1106_v28 = vpop.f32.mrb[16].mxu1 }
 0x13b   : > { %2351 = vst [vmem:[%s2777_s8 + $0x18] sm:$0xff] %v2207_v25   ;;  %2367 = vst [vmem:[%s2777_s8 + $0x98] sm:$0xff] %v2287_v26   ;;  %v1411_v29 = vadd.f32 %v2767_v17, %v978_v27  ;;  %v1443_v30 = vadd.f32 %v2767_v17, %v1106_v28  ;;  %v980_v31 = vpop.f32.mrb[17].mxu0  ;;  %v1108_v32 = vpop.f32.mrb[17].mxu1 }
 0x13c   : > { %v981_v33 = vpop.f32.mrb[18].mxu0  ;;  %v1109_v34 = vpop.f32.mrb[18].mxu1 }
 0x13d   : > { %v1412_v35 = vadd.f32 %v2767_v17, %v981_v33  ;;  %v1444_v36 = vadd.f32 %v2767_v17, %v1109_v34  ;;  %v983_v37 = vpop.f32.mrb[19].mxu0  ;;  %v1111_v38 = vpop.f32.mrb[19].mxu1  ;;  %v1475_v39 = vmax.f32 %v1411_v29, 0.0  ;;  %v1507_v40 = vmax.f32 %v1443_v30, 0.0 }
 0x13f   : > { %v1476_v41 = vmax.f32 %v1412_v35, 0.0  ;;  %v1508_v42 = vmax.f32 %v1444_v36, 0.0 }
 0x141   : > { %v2212_v43 = vpack.c.bf16 %v1476_v41, %v1475_v39  ;;  %v2292_v44 = vpack.c.bf16 %v1508_v42, %v1507_v40 }
 0x142   : > { %v986_v45 = vpop.f32.mrb[20].mxu0  ;;  %v1114_v46 = vpop.f32.mrb[20].mxu1 }
 0x143   : > { %2352 = vst [vmem:[%s2777_s8 + $0x20] sm:$0xff] %v2212_v43   ;;  %2368 = vst [vmem:[%s2777_s8 + $0xa0] sm:$0xff] %v2292_v44   ;;  %v1413_v47 = vadd.f32 %v2767_v17, %v986_v45  ;;  %v1445_v48 = vadd.f32 %v2767_v17, %v1114_v46  ;;  %v988_v49 = vpop.f32.mrb[21].mxu0  ;;  %v1116_v50 = vpop.f32.mrb[21].mxu1 }
 0x144   : > { %v989_v51 = vpop.f32.mrb[22].mxu0  ;;  %v1117_v52 = vpop.f32.mrb[22].mxu1 }
 0x145   : > { %v1414_v53 = vadd.f32 %v2767_v17, %v989_v51  ;;  %v1446_v54 = vadd.f32 %v2767_v17, %v1117_v52  ;;  %v991_v55 = vpop.f32.mrb[23].mxu0  ;;  %v1119_v56 = vpop.f32.mrb[23].mxu1  ;;  %v1477_v57 = vmax.f32 %v1413_v47, 0.0  ;;  %v1509_v58 = vmax.f32 %v1445_v48, 0.0 }
 0x147   : > { %v1478_v59 = vmax.f32 %v1414_v53, 0.0  ;;  %v1510_v60 = vmax.f32 %v1446_v54, 0.0 }
 0x149   : > { %v2217_v61 = vpack.c.bf16 %v1478_v59, %v1477_v57  ;;  %v2297_v62 = vpack.c.bf16 %v1510_v60, %v1509_v58 }
 0x14a   : > { %v994_v63 = vpop.f32.mrb[24].mxu0  ;;  %v1122_v0 = vpop.f32.mrb[24].mxu1 }
 0x14b   : > { %2353 = vst [vmem:[%s2777_s8 + $0x28] sm:$0xff] %v2217_v61   ;;  %2369 = vst [vmem:[%s2777_s8 + $0xa8] sm:$0xff] %v2297_v62   ;;  %v1415_v1 = vadd.f32 %v2767_v17, %v994_v63  ;;  %v1447_v2 = vadd.f32 %v2767_v17, %v1122_v0  ;;  %v996_v3 = vpop.f32.mrb[25].mxu0  ;;  %v1124_v4 = vpop.f32.mrb[25].mxu1 }
 0x14c   : > { %v997_v5 = vpop.f32.mrb[26].mxu0  ;;  %v1125_v6 = vpop.f32.mrb[26].mxu1 }
 0x14d   : > { %v1416_v7 = vadd.f32 %v2767_v17, %v997_v5  ;;  %v1448_v8 = vadd.f32 %v2767_v17, %v1125_v6  ;;  %v999_v9 = vpop.f32.mrb[27].mxu0  ;;  %v1127_v10 = vpop.f32.mrb[27].mxu1  ;;  %v1479_v11 = vmax.f32 %v1415_v1, 0.0  ;;  %v1511_v12 = vmax.f32 %v1447_v2, 0.0 }
 0x14f   : > { %v1480_v13 = vmax.f32 %v1416_v7, 0.0  ;;  %v1512_v14 = vmax.f32 %v1448_v8, 0.0 }
 0x151   : > { %v2222_v15 = vpack.c.bf16 %v1480_v13, %v1479_v11  ;;  %v2302_v16 = vpack.c.bf16 %v1512_v14, %v1511_v12 }
 0x152   : > { %v1002_v18 = vpop.f32.mrb[28].mxu0  ;;  %v1130_v19 = vpop.f32.mrb[28].mxu1 }
 0x153   : > { %2354 = vst [vmem:[%s2777_s8 + $0x30] sm:$0xff] %v2222_v15   ;;  %2370 = vst [vmem:[%s2777_s8 + $0xb0] sm:$0xff] %v2302_v16   ;;  %v1417_v20 = vadd.f32 %v2767_v17, %v1002_v18  ;;  %v1449_v21 = vadd.f32 %v2767_v17, %v1130_v19  ;;  %v1004_v22 = vpop.f32.mrb[29].mxu0  ;;  %v1132_v23 = vpop.f32.mrb[29].mxu1 }
 0x154   : > { %v1005_v24 = vpop.f32.mrb[30].mxu0  ;;  %v1133_v25 = vpop.f32.mrb[30].mxu1 }
 0x155   : > { %v1418_v26 = vadd.f32 %v2767_v17, %v1005_v24  ;;  %v1450_v27 = vadd.f32 %v2767_v17, %v1133_v25  ;;  %v1007_v28 = vpop.f32.mrb[31].mxu0  ;;  %v1135_v29 = vpop.f32.mrb[31].mxu1  ;;  %v1481_v30 = vmax.f32 %v1417_v20, 0.0  ;;  %v1513_v31 = vmax.f32 %v1449_v21, 0.0 }
 0x157   : > { %v1482_v32 = vmax.f32 %v1418_v26, 0.0  ;;  %v1514_v33 = vmax.f32 %v1450_v27, 0.0 }
 0x159   : > { %v2227_v34 = vpack.c.bf16 %v1482_v32, %v1481_v30  ;;  %v2307_v35 = vpack.c.bf16 %v1514_v33, %v1513_v31 }
 0x15a   : > { %v1010_v36 = vpop.f32.mrb[32].mxu0  ;;  %v1138_v37 = vpop.f32.mrb[32].mxu1 }
 0x15b   : > { %2355 = vst [vmem:[%s2777_s8 + $0x38] sm:$0xff] %v2227_v34   ;;  %2371 = vst [vmem:[%s2777_s8 + $0xb8] sm:$0xff] %v2307_v35   ;;  %v1419_v38 = vadd.f32 %v2767_v17, %v1010_v36  ;;  %v1451_v39 = vadd.f32 %v2767_v17, %v1138_v37  ;;  %v1012_v40 = vpop.f32.mrb[33].mxu0  ;;  %v1140_v41 = vpop.f32.mrb[33].mxu1 }
 0x15c   : > { %v1013_v42 = vpop.f32.mrb[34].mxu0  ;;  %v1141_v43 = vpop.f32.mrb[34].mxu1 }
 0x15d   : > { %v1420_v44 = vadd.f32 %v2767_v17, %v1013_v42  ;;  %v1452_v45 = vadd.f32 %v2767_v17, %v1141_v43  ;;  %v1015_v46 = vpop.f32.mrb[35].mxu0  ;;  %v1143_v47 = vpop.f32.mrb[35].mxu1  ;;  %v1483_v48 = vmax.f32 %v1419_v38, 0.0  ;;  %v1515_v49 = vmax.f32 %v1451_v39, 0.0 }
 0x15f   : > { %v1484_v50 = vmax.f32 %v1420_v44, 0.0  ;;  %v1516_v51 = vmax.f32 %v1452_v45, 0.0 }
 0x161   : > { %v2232_v52 = vpack.c.bf16 %v1484_v50, %v1483_v48  ;;  %v2312_v53 = vpack.c.bf16 %v1516_v51, %v1515_v49 }
 0x162   : > { %v1018_v54 = vpop.f32.mrb[36].mxu0  ;;  %v1146_v55 = vpop.f32.mrb[36].mxu1 }
 0x163   : > { %2356 = vst [vmem:[%s2777_s8 + $0x40] sm:$0xff] %v2232_v52   ;;  %2372 = vst [vmem:[%s2777_s8 + $0xc0] sm:$0xff] %v2312_v53   ;;  %v1421_v56 = vadd.f32 %v2767_v17, %v1018_v54  ;;  %v1453_v57 = vadd.f32 %v2767_v17, %v1146_v55  ;;  %v1020_v58 = vpop.f32.mrb[37].mxu0  ;;  %v1148_v59 = vpop.f32.mrb[37].mxu1 }
 0x164   : > { %v1021_v60 = vpop.f32.mrb[38].mxu0  ;;  %v1149_v61 = vpop.f32.mrb[38].mxu1 }
 0x165   : > { %v1422_v62 = vadd.f32 %v2767_v17, %v1021_v60  ;;  %v1454_v63 = vadd.f32 %v2767_v17, %v1149_v61  ;;  %v1023_v0 = vpop.f32.mrb[39].mxu0  ;;  %v1151_v1 = vpop.f32.mrb[39].mxu1  ;;  %v1485_v2 = vmax.f32 %v1421_v56, 0.0  ;;  %v1517_v3 = vmax.f32 %v1453_v57, 0.0 }
 0x167   : > { %v1486_v4 = vmax.f32 %v1422_v62, 0.0  ;;  %v1518_v5 = vmax.f32 %v1454_v63, 0.0 }
 0x169   : > { %v2237_v6 = vpack.c.bf16 %v1486_v4, %v1485_v2  ;;  %v2317_v7 = vpack.c.bf16 %v1518_v5, %v1517_v3 }
 0x16a   : > { %v1026_v8 = vpop.f32.mrb[40].mxu0  ;;  %v1154_v9 = vpop.f32.mrb[40].mxu1 }
 0x16b   : > { %2357 = vst [vmem:[%s2777_s8 + $0x48] sm:$0xff] %v2237_v6   ;;  %2373 = vst [vmem:[%s2777_s8 + $0xc8] sm:$0xff] %v2317_v7   ;;  %v1423_v10 = vadd.f32 %v2767_v17, %v1026_v8  ;;  %v1455_v11 = vadd.f32 %v2767_v17, %v1154_v9  ;;  %v1028_v12 = vpop.f32.mrb[41].mxu0  ;;  %v1156_v13 = vpop.f32.mrb[41].mxu1 }
 0x16c   : > { %v1029_v14 = vpop.f32.mrb[42].mxu0  ;;  %v1157_v15 = vpop.f32.mrb[42].mxu1 }
 0x16d   : > { %v1424_v16 = vadd.f32 %v2767_v17, %v1029_v14  ;;  %v1456_v18 = vadd.f32 %v2767_v17, %v1157_v15  ;;  %v1031_v19 = vpop.f32.mrb[43].mxu0  ;;  %v1159_v20 = vpop.f32.mrb[43].mxu1  ;;  %v1487_v21 = vmax.f32 %v1423_v10, 0.0  ;;  %v1519_v22 = vmax.f32 %v1455_v11, 0.0 }
 0x16f   : > { %v1488_v23 = vmax.f32 %v1424_v16, 0.0  ;;  %v1520_v24 = vmax.f32 %v1456_v18, 0.0 }
 0x171   : > { %v2242_v25 = vpack.c.bf16 %v1488_v23, %v1487_v21  ;;  %v2322_v26 = vpack.c.bf16 %v1520_v24, %v1519_v22 }
 0x172   : > { %v1034_v27 = vpop.f32.mrb[44].mxu0  ;;  %v1162_v28 = vpop.f32.mrb[44].mxu1 }
 0x173   : > { %2358 = vst [vmem:[%s2777_s8 + $0x50] sm:$0xff] %v2242_v25   ;;  %2374 = vst [vmem:[%s2777_s8 + $0xd0] sm:$0xff] %v2322_v26   ;;  %v1425_v29 = vadd.f32 %v2767_v17, %v1034_v27  ;;  %v1457_v30 = vadd.f32 %v2767_v17, %v1162_v28  ;;  %v1036_v31 = vpop.f32.mrb[45].mxu0  ;;  %v1164_v32 = vpop.f32.mrb[45].mxu1 }
 0x174   : > { %v1037_v33 = vpop.f32.mrb[46].mxu0  ;;  %v1165_v34 = vpop.f32.mrb[46].mxu1 }
 0x175   : > { %v1426_v35 = vadd.f32 %v2767_v17, %v1037_v33  ;;  %v1458_v36 = vadd.f32 %v2767_v17, %v1165_v34  ;;  %v1039_v37 = vpop.f32.mrb[47].mxu0  ;;  %v1167_v38 = vpop.f32.mrb[47].mxu1  ;;  %v1489_v39 = vmax.f32 %v1425_v29, 0.0  ;;  %v1521_v40 = vmax.f32 %v1457_v30, 0.0 }
 0x177   : > { %v1490_v41 = vmax.f32 %v1426_v35, 0.0  ;;  %v1522_v42 = vmax.f32 %v1458_v36, 0.0 }
 0x179   : > { %v2247_v43 = vpack.c.bf16 %v1490_v41, %v1489_v39  ;;  %v2327_v44 = vpack.c.bf16 %v1522_v42, %v1521_v40 }
 0x17a   : > { %v1042_v45 = vpop.f32.mrb[48].mxu0  ;;  %v1170_v46 = vpop.f32.mrb[48].mxu1 }
 0x17b   : > { %2359 = vst [vmem:[%s2777_s8 + $0x58] sm:$0xff] %v2247_v43   ;;  %2375 = vst [vmem:[%s2777_s8 + $0xd8] sm:$0xff] %v2327_v44   ;;  %v1427_v47 = vadd.f32 %v2767_v17, %v1042_v45  ;;  %v1459_v48 = vadd.f32 %v2767_v17, %v1170_v46  ;;  %v1044_v49 = vpop.f32.mrb[49].mxu0  ;;  %v1172_v50 = vpop.f32.mrb[49].mxu1 }
 0x17c   : > { %v1045_v51 = vpop.f32.mrb[50].mxu0  ;;  %v1173_v52 = vpop.f32.mrb[50].mxu1 }
 0x17d   : > { %v1428_v53 = vadd.f32 %v2767_v17, %v1045_v51  ;;  %v1460_v54 = vadd.f32 %v2767_v17, %v1173_v52  ;;  %v1047_v55 = vpop.f32.mrb[51].mxu0  ;;  %v1175_v56 = vpop.f32.mrb[51].mxu1  ;;  %v1491_v57 = vmax.f32 %v1427_v47, 0.0  ;;  %v1523_v58 = vmax.f32 %v1459_v48, 0.0 }
 0x17f   : > { %v1492_v59 = vmax.f32 %v1428_v53, 0.0  ;;  %v1524_v60 = vmax.f32 %v1460_v54, 0.0 }
 0x181   : > { %v2252_v61 = vpack.c.bf16 %v1492_v59, %v1491_v57  ;;  %v2332_v62 = vpack.c.bf16 %v1524_v60, %v1523_v58 }
 0x182   : > { %v1050_v63 = vpop.f32.mrb[52].mxu0  ;;  %v1178_v0 = vpop.f32.mrb[52].mxu1 }
 0x183   : > { %2360 = vst [vmem:[%s2777_s8 + $0x60] sm:$0xff] %v2252_v61   ;;  %2376 = vst [vmem:[%s2777_s8 + $0xe0] sm:$0xff] %v2332_v62   ;;  %v1429_v1 = vadd.f32 %v2767_v17, %v1050_v63  ;;  %v1461_v2 = vadd.f32 %v2767_v17, %v1178_v0  ;;  %v1052_v3 = vpop.f32.mrb[53].mxu0  ;;  %v1180_v4 = vpop.f32.mrb[53].mxu1 }
 0x184   : > { %v1053_v5 = vpop.f32.mrb[54].mxu0  ;;  %v1181_v6 = vpop.f32.mrb[54].mxu1 }
 0x185   : > { %v1430_v7 = vadd.f32 %v2767_v17, %v1053_v5  ;;  %v1462_v8 = vadd.f32 %v2767_v17, %v1181_v6  ;;  %v1055_v9 = vpop.f32.mrb[55].mxu0  ;;  %v1183_v10 = vpop.f32.mrb[55].mxu1  ;;  %v1493_v11 = vmax.f32 %v1429_v1, 0.0  ;;  %v1525_v12 = vmax.f32 %v1461_v2, 0.0 }
 0x187   : > { %v1494_v13 = vmax.f32 %v1430_v7, 0.0  ;;  %v1526_v14 = vmax.f32 %v1462_v8, 0.0 }
 0x189   : > { %v2257_v15 = vpack.c.bf16 %v1494_v13, %v1493_v11  ;;  %v2337_v16 = vpack.c.bf16 %v1526_v14, %v1525_v12 }
 0x18a   : > { %v1058_v18 = vpop.f32.mrb[56].mxu0  ;;  %v1186_v19 = vpop.f32.mrb[56].mxu1 }
 0x18b   : > { %2361 = vst [vmem:[%s2777_s8 + $0x68] sm:$0xff] %v2257_v15   ;;  %2377 = vst [vmem:[%s2777_s8 + $0xe8] sm:$0xff] %v2337_v16   ;;  %v1431_v20 = vadd.f32 %v2767_v17, %v1058_v18  ;;  %v1463_v21 = vadd.f32 %v2767_v17, %v1186_v19  ;;  %v1060_v22 = vpop.f32.mrb[57].mxu0  ;;  %v1188_v23 = vpop.f32.mrb[57].mxu1 }
 0x18c   : > { %v1061_v24 = vpop.f32.mrb[58].mxu0  ;;  %v1189_v25 = vpop.f32.mrb[58].mxu1 }
 0x18d   : > { %v1432_v26 = vadd.f32 %v2767_v17, %v1061_v24  ;;  %v1464_v27 = vadd.f32 %v2767_v17, %v1189_v25  ;;  %v1063_v28 = vpop.f32.mrb[59].mxu0  ;;  %v1191_v29 = vpop.f32.mrb[59].mxu1  ;;  %v1495_v30 = vmax.f32 %v1431_v20, 0.0  ;;  %v1527_v31 = vmax.f32 %v1463_v21, 0.0 }
 0x18f   : > { %v1496_v32 = vmax.f32 %v1432_v26, 0.0  ;;  %v1528_v33 = vmax.f32 %v1464_v27, 0.0 }
 0x191   : > { %v2262_v34 = vpack.c.bf16 %v1496_v32, %v1495_v30  ;;  %v2342_v35 = vpack.c.bf16 %v1528_v33, %v1527_v31 }
 0x192   : > { %v1066_v36 = vpop.f32.mrb[60].mxu0  ;;  %v1194_v37 = vpop.f32.mrb[60].mxu1 }
 0x193   : > { %2362 = vst [vmem:[%s2777_s8 + $0x70] sm:$0xff] %v2262_v34   ;;  %2378 = vst [vmem:[%s2777_s8 + $0xf0] sm:$0xff] %v2342_v35   ;;  %v1433_v38 = vadd.f32 %v2767_v17, %v1066_v36  ;;  %v1465_v39 = vadd.f32 %v2767_v17, %v1194_v37  ;;  %v1068_v40 = vpop.f32.mrb[61].mxu0  ;;  %v1196_v41 = vpop.f32.mrb[61].mxu1 }
 0x194   : > { %v1069_v42 = vpop.f32.mrb[62].mxu0  ;;  %v1197_v43 = vpop.f32.mrb[62].mxu1 }
 0x195   : > { %v1434_v44 = vadd.f32 %v2767_v17, %v1069_v42  ;;  %v1466_v45 = vadd.f32 %v2767_v17, %v1197_v43  ;;  %v1071_v46 = vpop.f32.mrb[63].mxu0  ;;  %v1199_v47 = vpop.f32.mrb[63].mxu1  ;;  %v1497_v48 = vmax.f32 %v1433_v38, 0.0  ;;  %v1529_v49 = vmax.f32 %v1465_v39, 0.0 }
 0x197   : > { %v1498_v50 = vmax.f32 %v1434_v44, 0.0  ;;  %v1530_v51 = vmax.f32 %v1466_v45, 0.0 }
 0x199   : > { %v2267_v52 = vpack.c.bf16 %v1498_v50, %v1497_v48  ;;  %v2347_v53 = vpack.c.bf16 %v1530_v51, %v1529_v49 }
 0x19b   : > { %2363 = vst [vmem:[%s2777_s8 + $0x78] sm:$0xff] %v2267_v52   ;;  %2379 = vst [vmem:[%s2777_s8 + $0xf8] sm:$0xff] %v2347_v53  }
 0x19c PF: > { %s13_s14 = sadd.s32 1, %s2571_s14   ;;  %s2884_s12 = smov %s2567_s13 }
 0x19d   : > { %p10_p5 = scmp.ge.s32.totalorder %s13_s14, 66   ;;  %s2885_s13 = smov %s2887_s15 }
 0x19f   :  { %12 = sbr.rel (!%p10_p5) target bundleno = 2 (0x2), region = 76 }

// kernel: skull_unet_transformer_forward.53
= control target key start
LH: loop header
LB: loop body
LE: loop exit
PB: predicated region body
PF: predicated region fallthrough
CT: control target
= control target key end

     0   :  { %s1740_s12 = smov 0   ;;  %s1742_s13 = smov 0   ;;  %s1970_s0 = inlined_call_operand.vmem [shape: bf16[32768,128], index: 0, kind: input, shape index: {}]   ;;  %s1971_s1 = inlined_call_operand.vmem [shape: bf16[128,128], index: 1, kind: input, shape index: {}]   ;;  %s1972_s2 = inlined_call_operand.vmem [shape: f32[1,128], index: 2, kind: input, shape index: {}]   ;;  %s1973_s3 = inlined_call_operand.vmem [shape: f32[32768,128], index: 3, kind: output, shape index: {}]  }
   0x1   :  { %s1744_s14 = smov 0  }
   0x2 LB: > { %s32_s15 = sadd.s32 1, %s1714_s13  ;;  %p1448_p0 = scmp.ge.s32.totalorder %s1718_s14, 1  ;;  %s1718_s14 = sphi %s1744_s14, %s13_s14   ;;  %s1714_s13 = sphi %s1742_s13, %s1975_s13   ;;  %s1710_s12 = sphi %s1740_s12, %s1974_s12  }
   0x3   : > { %p34_p1 = scmp.ge.s32.totalorder %s32_s15, 64  ;;  %p188_p2 = scmp.lt.s32.totalorder %s1718_s14, 65 }
   0x5   : > { %s1977_s15 = smov (%p34_p1, %s32_s15), 0  ;;  %p189_p3 = pnand %p1448_p0, %p188_p2 }
   0x6   : > { %v1656_v0 = vld [vmem:[%s1971_s1] sm:$0xff] (!%p189_p3)   ;;  %s1449_s18 = sshll.u32 (!%p189_p3), %s1710_s12, 6  ;;  %v1657_v1 = vld [vmem:[%s1971_s1 + $0x8] sm:$0xff] (!%p189_p3)   ;;  %v1658_v2 = vld [vmem:[%s1971_s1 + $0x10] sm:$0xff] (!%p189_p3)  }
   0x7   : > { %192 = sbr.rel (%p189_p3) target bundleno = 313 (0x139), region = 32  ;;  %p230_p4 = scmp.lt.s32.totalorder (!%p189_p3), %s1449_s18, 4095  ;;  %1536 = vmatprep.subr.bf16.mxu0 (!%p189_p3), %v1656_v0  ;;  %1616 = vmatprep.subr.bf16.mxu1 (!%p189_p3), %v1656_v0  ;;  %v1659_v3 = vld [vmem:[%s1971_s1 + $0x18] sm:$0xff] (!%p189_p3)   ;;  %v1660_v6 = vld [vmem:[%s1971_s1 + $0x20] sm:$0xff] (!%p189_p3)   ;;  %v1661_v7 = vld [vmem:[%s1971_s1 + $0x28] sm:$0xff] (!%p189_p3)  }
   0x8   : > { %1537 = vmatpush3.bf16.msra.mxu0 (!%p189_p3), %v1656_v0  ;;  %1624 = vmatpush3.bf16.msra.mxu1 (!%p189_p3), %v1656_v0  ;;  %v1662_v8 = vld [vmem:[%s1971_s1 + $0x30] sm:$0xff] (!%p189_p3)   ;;  %v1663_v9 = vld [vmem:[%s1971_s1 + $0x38] sm:$0xff] (!%p189_p3)   ;;  %v1826_v40 = vld [vmem:[%s1972_s2] ss:$0 sm:$0xff] (!%p189_p3) }
   0x9   : > { %1538 = vmatprep.subr.bf16.mxu0 (!%p189_p3), %v1657_v1  ;;  %1617 = vmatprep.subr.bf16.mxu1 (!%p189_p3), %v1657_v1 }
   0xc   : > { %1539 = vmatpush3.bf16.msra.mxu0 (!%p189_p3), %v1657_v1  ;;  %1625 = vmatpush3.bf16.msra.mxu1 (!%p189_p3), %v1657_v1 }
   0xd   : > { %1540 = vmatprep.subr.bf16.mxu0 (!%p189_p3), %v1658_v2  ;;  %1618 = vmatprep.subr.bf16.mxu1 (!%p189_p3), %v1658_v2 }
   0xe   : > { %s1979_s18 = smov (!%p230_p4, %s1449_s18), 4095 }
   0xf   : > { %s1450_s23 = sshll.u32 %s1979_s18, 2  ;;  %s1452_s10 = sshll.u32 %s1979_s18, 3 }
  0x10   : > { %s1773_s26 = scalar_lea.vmem %s1970_s0, %s1450_s23  ;;  %1541 = vmatpush3.bf16.msra.mxu0 %v1658_v2  ;;  %1626 = vmatpush3.bf16.msra.mxu1 %v1658_v2  ;;  %s1831_s19 = scalar_lea.vmem %s1973_s3, %s1452_s10 }
  0x11   : > { %v1664_v4 = vld [vmem:[%s1773_s26] sm:$0xff]   ;;  %1542 = vmatprep.subr.bf16.mxu0 %v1659_v3  ;;  %1619 = vmatprep.subr.bf16.mxu1 %v1659_v3  ;;  %v1666_v10 = vld [vmem:[%s1773_s26 + $0x8] sm:$0xff]   ;;  %v1668_v12 = vld [vmem:[%s1773_s26 + $0x10] sm:$0xff]  }
  0x12   : > { %v1665_v5 = vld [vmem:[%s1773_s26 + $0x80] sm:$0xff]   ;;  %1552 = vmatprep.mubr.bf16.mxu0 %v1664_v4  ;;  %v1667_v11 = vld [vmem:[%s1773_s26 + $0x88] sm:$0xff]   ;;  %v1669_v13 = vld [vmem:[%s1773_s26 + $0x90] sm:$0xff]  }
  0x13   : > { %1584 = vmatprep.mubr.bf16.mxu1 %v1665_v5  ;;  %v1670_v14 = vld [vmem:[%s1773_s26 + $0x18] sm:$0xff]   ;;  %v1672_v16 = vld [vmem:[%s1773_s26 + $0x20] sm:$0xff]   ;;  %v1674_v18 = vld [vmem:[%s1773_s26 + $0x28] sm:$0xff]  }
  0x14   : > { %1543 = vmatpush3.bf16.msra.mxu0 %v1659_v3  ;;  %1627 = vmatpush3.bf16.msra.mxu1 %v1659_v3  ;;  %v1671_v15 = vld [vmem:[%s1773_s26 + $0x98] sm:$0xff]   ;;  %v1673_v17 = vld [vmem:[%s1773_s26 + $0xa0] sm:$0xff]   ;;  %v1675_v19 = vld [vmem:[%s1773_s26 + $0xa8] sm:$0xff]  }
  0x15   : > { %1544 = vmatprep.subr.bf16.mxu0 %v1660_v6  ;;  %1620 = vmatprep.subr.bf16.mxu1 %v1660_v6  ;;  %v1676_v20 = vld [vmem:[%s1773_s26 + $0x30] sm:$0xff]   ;;  %v1678_v22 = vld [vmem:[%s1773_s26 + $0x38] sm:$0xff]   ;;  %v1680_v24 = vld [vmem:[%s1773_s26 + $0x40] sm:$0xff]  }
  0x16   : > { %v1677_v21 = vld [vmem:[%s1773_s26 + $0xb0] sm:$0xff]   ;;  %v1679_v23 = vld [vmem:[%s1773_s26 + $0xb8] sm:$0xff]   ;;  %v1681_v25 = vld [vmem:[%s1773_s26 + $0xc0] sm:$0xff]  }
  0x17   : > { %v1682_v26 = vld [vmem:[%s1773_s26 + $0x48] sm:$0xff]   ;;  %v1684_v28 = vld [vmem:[%s1773_s26 + $0x50] sm:$0xff]   ;;  %v1686_v30 = vld [vmem:[%s1773_s26 + $0x58] sm:$0xff]  }
  0x18   : > { %1545 = vmatpush3.bf16.msra.mxu0 %v1660_v6  ;;  %1628 = vmatpush3.bf16.msra.mxu1 %v1660_v6  ;;  %v1683_v27 = vld [vmem:[%s1773_s26 + $0xc8] sm:$0xff]   ;;  %v1685_v29 = vld [vmem:[%s1773_s26 + $0xd0] sm:$0xff]   ;;  %v1687_v31 = vld [vmem:[%s1773_s26 + $0xd8] sm:$0xff]  }
  0x19   : > { %1546 = vmatprep.subr.bf16.mxu0 %v1661_v7  ;;  %1621 = vmatprep.subr.bf16.mxu1 %v1661_v7  ;;  %v1688_v32 = vld [vmem:[%s1773_s26 + $0x60] sm:$0xff]   ;;  %v1690_v34 = vld [vmem:[%s1773_s26 + $0x68] sm:$0xff]   ;;  %v1692_v36 = vld [vmem:[%s1773_s26 + $0x70] sm:$0xff]  }
  0x1a   : > { %v1689_v33 = vld [vmem:[%s1773_s26 + $0xe0] sm:$0xff]   ;;  %v1691_v35 = vld [vmem:[%s1773_s26 + $0xe8] sm:$0xff]   ;;  %v1693_v37 = vld [vmem:[%s1773_s26 + $0xf0] sm:$0xff]  }
  0x1b   : > { %v1694_v38 = vld [vmem:[%s1773_s26 + $0x78] sm:$0xff]  }
  0x1c   : > { %1547 = vmatpush3.bf16.msra.mxu0 %v1661_v7  ;;  %1629 = vmatpush3.bf16.msra.mxu1 %v1661_v7  ;;  %v1695_v39 = vld [vmem:[%s1773_s26 + $0xf8] sm:$0xff]  }
  0x1d   : > { %1548 = vmatprep.subr.bf16.mxu0 %v1662_v8  ;;  %1622 = vmatprep.subr.bf16.mxu1 %v1662_v8 }
  0x20   : > { %1549 = vmatpush3.bf16.msra.mxu0 %v1662_v8  ;;  %1630 = vmatpush3.bf16.msra.mxu1 %v1662_v8 }
  0x21   : > { %1550 = vmatprep.subr.bf16.mxu0 %v1663_v9  ;;  %1623 = vmatprep.subr.bf16.mxu1 %v1663_v9 }
  0x24   : > { %1551 = vmatpush3.bf16.msra.mxu0 %v1663_v9  ;;  %1631 = vmatpush3.bf16.msra.mxu1 %v1663_v9 }
  0x27   : > { %1553 = vmatmul.mubr.bf16.vlgmr.msra.gmra.mrb[0].mxu0 %v1666_v10  ;;  %1585 = vmatmul.mubr.bf16.vlgmr.msra.gmra.mrb[0].mxu1 %v1667_v11 }
  0x28   : > { %1556 = vmatprep.mubr.bf16.mxu0 %v1668_v12  ;;  %1588 = vmatprep.mubr.bf16.mxu1 %v1669_v13 }
  0x2f   : > { %1557 = vmatmul.mubr.bf16.gmra.mrb[4].mxu0 %v1670_v14  ;;  %1589 = vmatmul.mubr.bf16.gmra.mrb[4].mxu1 %v1671_v15 }
  0x30   : > { %1560 = vmatprep.mubr.bf16.mxu0 %v1672_v16  ;;  %1592 = vmatprep.mubr.bf16.mxu1 %v1673_v17 }
  0x37   : > { %1561 = vmatmul.mubr.bf16.gmra.mrb[8].mxu0 %v1674_v18  ;;  %1593 = vmatmul.mubr.bf16.gmra.mrb[8].mxu1 %v1675_v19 }
  0x38   : > { %1564 = vmatprep.mubr.bf16.mxu0 %v1676_v20  ;;  %1596 = vmatprep.mubr.bf16.mxu1 %v1677_v21 }
  0x3f   : > { %1565 = vmatmul.mubr.bf16.gmra.mrb[12].mxu0 %v1678_v22  ;;  %1597 = vmatmul.mubr.bf16.gmra.mrb[12].mxu1 %v1679_v23 }
  0x40   : > { %1568 = vmatprep.mubr.bf16.mxu0 %v1680_v24  ;;  %1600 = vmatprep.mubr.bf16.mxu1 %v1681_v25 }
  0x47   : > { %1569 = vmatmul.mubr.bf16.gmra.mrb[16].mxu0 %v1682_v26  ;;  %1601 = vmatmul.mubr.bf16.gmra.mrb[16].mxu1 %v1683_v27 }
  0x48   : > { %1572 = vmatprep.mubr.bf16.mxu0 %v1684_v28  ;;  %1604 = vmatprep.mubr.bf16.mxu1 %v1685_v29 }
  0x4f   : > { %1573 = vmatmul.mubr.bf16.gmra.mrb[20].mxu0 %v1686_v30  ;;  %1605 = vmatmul.mubr.bf16.gmra.mrb[20].mxu1 %v1687_v31 }
  0x50   : > { %1576 = vmatprep.mubr.bf16.mxu0 %v1688_v32  ;;  %1608 = vmatprep.mubr.bf16.mxu1 %v1689_v33 }
  0x57   : > { %1577 = vmatmul.mubr.bf16.gmra.mrb[24].mxu0 %v1690_v34  ;;  %1609 = vmatmul.mubr.bf16.gmra.mrb[24].mxu1 %v1691_v35 }
  0x58   : > { %1580 = vmatprep.mubr.bf16.mxu0 %v1692_v36  ;;  %1612 = vmatprep.mubr.bf16.mxu1 %v1693_v37 }
  0x5f   : > { %1581 = vmatmul.mubr.bf16.gmra.mrb[28].mxu0 %v1694_v38  ;;  %1613 = vmatmul.mubr.bf16.gmra.mrb[28].mxu1 %v1695_v39 }
  0xfa   : > { %v1554_v41 = vpop.f32.mrb[0].mxu0  ;;  %v1586_v42 = vpop.f32.mrb[0].mxu1 }
  0xfb   : > { %v1205_v43 = vadd.f32 %v1554_v41, %v1826_v40  ;;  %v1237_v44 = vadd.f32 %v1586_v42, %v1826_v40  ;;  %v746_v45 = vpop.f32.mrb[1].mxu0  ;;  %v874_v46 = vpop.f32.mrb[1].mxu1 }
  0xfc   : > { %v1203_v47 = vadd.f32 %v1826_v40, %v746_v45  ;;  %v1235_v48 = vadd.f32 %v1826_v40, %v874_v46  ;;  %v1555_v49 = vpop.f32.mrb[2].mxu0  ;;  %v1587_v50 = vpop.f32.mrb[2].mxu1 }
  0xfd   : > { %1269 = vst [vmem:[%s1831_s19 + $0x10] sm:$0xff] %v1205_v43  ;;  %1301 = vst [vmem:[%s1831_s19 + $0x110] sm:$0xff] %v1237_v44  ;;  %v1206_v51 = vadd.f32 %v1555_v49, %v1826_v40  ;;  %v1238_v52 = vadd.f32 %v1587_v50, %v1826_v40  ;;  %v749_v53 = vpop.f32.mrb[3].mxu0  ;;  %v877_v54 = vpop.f32.mrb[3].mxu1 }
  0xfe   : > { %1267 = vst [vmem:[%s1831_s19] sm:$0xff] %v1203_v47  ;;  %1299 = vst [vmem:[%s1831_s19 + $0x100] sm:$0xff] %v1235_v48  ;;  %v1204_v55 = vadd.f32 %v1826_v40, %v749_v53  ;;  %v1236_v56 = vadd.f32 %v1826_v40, %v877_v54 }
  0xff   : > { %1270 = vst [vmem:[%s1831_s19 + $0x18] sm:$0xff] %v1206_v51  ;;  %1302 = vst [vmem:[%s1831_s19 + $0x118] sm:$0xff] %v1238_v52 }
 0x100   : > { %1268 = vst [vmem:[%s1831_s19 + $0x8] sm:$0xff] %v1204_v55  ;;  %1300 = vst [vmem:[%s1831_s19 + $0x108] sm:$0xff] %v1236_v56 }
 0x102   : > { %v1558_v57 = vpop.f32.mrb[4].mxu0  ;;  %v1590_v58 = vpop.f32.mrb[4].mxu1 }
 0x103   : > { %v1209_v59 = vadd.f32 %v1558_v57, %v1826_v40  ;;  %v1241_v60 = vadd.f32 %v1590_v58, %v1826_v40  ;;  %v762_v61 = vpop.f32.mrb[5].mxu0  ;;  %v890_v62 = vpop.f32.mrb[5].mxu1 }
 0x104   : > { %v1207_v63 = vadd.f32 %v1826_v40, %v762_v61  ;;  %v1239_v0 = vadd.f32 %v1826_v40, %v890_v62  ;;  %v1559_v1 = vpop.f32.mrb[6].mxu0  ;;  %v1591_v2 = vpop.f32.mrb[6].mxu1 }
 0x105   : > { %1273 = vst [vmem:[%s1831_s19 + $0x30] sm:$0xff] %v1209_v59  ;;  %1305 = vst [vmem:[%s1831_s19 + $0x130] sm:$0xff] %v1241_v60  ;;  %v1210_v3 = vadd.f32 %v1559_v1, %v1826_v40  ;;  %v1242_v4 = vadd.f32 %v1591_v2, %v1826_v40  ;;  %v765_v5 = vpop.f32.mrb[7].mxu0  ;;  %v893_v6 = vpop.f32.mrb[7].mxu1 }
 0x106   : > { %1271 = vst [vmem:[%s1831_s19 + $0x20] sm:$0xff] %v1207_v63  ;;  %1303 = vst [vmem:[%s1831_s19 + $0x120] sm:$0xff] %v1239_v0  ;;  %v1208_v7 = vadd.f32 %v1826_v40, %v765_v5  ;;  %v1240_v8 = vadd.f32 %v1826_v40, %v893_v6 }
 0x107   : > { %1274 = vst [vmem:[%s1831_s19 + $0x38] sm:$0xff] %v1210_v3  ;;  %1306 = vst [vmem:[%s1831_s19 + $0x138] sm:$0xff] %v1242_v4 }
 0x108   : > { %1272 = vst [vmem:[%s1831_s19 + $0x28] sm:$0xff] %v1208_v7  ;;  %1304 = vst [vmem:[%s1831_s19 + $0x128] sm:$0xff] %v1240_v8 }
 0x10a   : > { %v1562_v9 = vpop.f32.mrb[8].mxu0  ;;  %v1594_v10 = vpop.f32.mrb[8].mxu1 }
 0x10b   : > { %v1213_v11 = vadd.f32 %v1562_v9, %v1826_v40  ;;  %v1245_v12 = vadd.f32 %v1594_v10, %v1826_v40  ;;  %v778_v13 = vpop.f32.mrb[9].mxu0  ;;  %v906_v14 = vpop.f32.mrb[9].mxu1 }
 0x10c   : > { %v1211_v15 = vadd.f32 %v1826_v40, %v778_v13  ;;  %v1243_v16 = vadd.f32 %v1826_v40, %v906_v14  ;;  %v1563_v17 = vpop.f32.mrb[10].mxu0  ;;  %v1595_v18 = vpop.f32.mrb[10].mxu1 }
 0x10d   : > { %1277 = vst [vmem:[%s1831_s19 + $0x50] sm:$0xff] %v1213_v11  ;;  %1309 = vst [vmem:[%s1831_s19 + $0x150] sm:$0xff] %v1245_v12  ;;  %v1214_v19 = vadd.f32 %v1563_v17, %v1826_v40  ;;  %v1246_v20 = vadd.f32 %v1595_v18, %v1826_v40  ;;  %v781_v21 = vpop.f32.mrb[11].mxu0  ;;  %v909_v22 = vpop.f32.mrb[11].mxu1 }
 0x10e   : > { %1275 = vst [vmem:[%s1831_s19 + $0x40] sm:$0xff] %v1211_v15  ;;  %1307 = vst [vmem:[%s1831_s19 + $0x140] sm:$0xff] %v1243_v16  ;;  %v1212_v23 = vadd.f32 %v1826_v40, %v781_v21  ;;  %v1244_v24 = vadd.f32 %v1826_v40, %v909_v22 }
 0x10f   : > { %1278 = vst [vmem:[%s1831_s19 + $0x58] sm:$0xff] %v1214_v19  ;;  %1310 = vst [vmem:[%s1831_s19 + $0x158] sm:$0xff] %v1246_v20 }
 0x110   : > { %1276 = vst [vmem:[%s1831_s19 + $0x48] sm:$0xff] %v1212_v23  ;;  %1308 = vst [vmem:[%s1831_s19 + $0x148] sm:$0xff] %v1244_v24 }
 0x112   : > { %v1566_v25 = vpop.f32.mrb[12].mxu0  ;;  %v1598_v26 = vpop.f32.mrb[12].mxu1 }
 0x113   : > { %v1217_v27 = vadd.f32 %v1566_v25, %v1826_v40  ;;  %v1249_v28 = vadd.f32 %v1598_v26, %v1826_v40  ;;  %v794_v29 = vpop.f32.mrb[13].mxu0  ;;  %v922_v30 = vpop.f32.mrb[13].mxu1 }
 0x114   : > { %v1215_v31 = vadd.f32 %v1826_v40, %v794_v29  ;;  %v1247_v32 = vadd.f32 %v1826_v40, %v922_v30  ;;  %v1567_v33 = vpop.f32.mrb[14].mxu0  ;;  %v1599_v34 = vpop.f32.mrb[14].mxu1 }
 0x115   : > { %1281 = vst [vmem:[%s1831_s19 + $0x70] sm:$0xff] %v1217_v27  ;;  %1313 = vst [vmem:[%s1831_s19 + $0x170] sm:$0xff] %v1249_v28  ;;  %v1218_v35 = vadd.f32 %v1567_v33, %v1826_v40  ;;  %v1250_v36 = vadd.f32 %v1599_v34, %v1826_v40  ;;  %v797_v37 = vpop.f32.mrb[15].mxu0  ;;  %v925_v38 = vpop.f32.mrb[15].mxu1 }
 0x116   : > { %1279 = vst [vmem:[%s1831_s19 + $0x60] sm:$0xff] %v1215_v31  ;;  %1311 = vst [vmem:[%s1831_s19 + $0x160] sm:$0xff] %v1247_v32  ;;  %v1216_v39 = vadd.f32 %v1826_v40, %v797_v37  ;;  %v1248_v41 = vadd.f32 %v1826_v40, %v925_v38 }
 0x117   : > { %1282 = vst [vmem:[%s1831_s19 + $0x78] sm:$0xff] %v1218_v35  ;;  %1314 = vst [vmem:[%s1831_s19 + $0x178] sm:$0xff] %v1250_v36 }
 0x118   : > { %1280 = vst [vmem:[%s1831_s19 + $0x68] sm:$0xff] %v1216_v39  ;;  %1312 = vst [vmem:[%s1831_s19 + $0x168] sm:$0xff] %v1248_v41 }
 0x11a   : > { %v1570_v42 = vpop.f32.mrb[16].mxu0  ;;  %v1602_v43 = vpop.f32.mrb[16].mxu1 }
 0x11b   : > { %v1221_v44 = vadd.f32 %v1570_v42, %v1826_v40  ;;  %v1253_v45 = vadd.f32 %v1602_v43, %v1826_v40  ;;  %v810_v46 = vpop.f32.mrb[17].mxu0  ;;  %v938_v47 = vpop.f32.mrb[17].mxu1 }
 0x11c   : > { %v1219_v48 = vadd.f32 %v1826_v40, %v810_v46  ;;  %v1251_v49 = vadd.f32 %v1826_v40, %v938_v47  ;;  %v1571_v50 = vpop.f32.mrb[18].mxu0  ;;  %v1603_v51 = vpop.f32.mrb[18].mxu1 }
 0x11d   : > { %1285 = vst [vmem:[%s1831_s19 + $0x90] sm:$0xff] %v1221_v44  ;;  %1317 = vst [vmem:[%s1831_s19 + $0x190] sm:$0xff] %v1253_v45  ;;  %v1222_v52 = vadd.f32 %v1571_v50, %v1826_v40  ;;  %v1254_v53 = vadd.f32 %v1603_v51, %v1826_v40  ;;  %v813_v54 = vpop.f32.mrb[19].mxu0  ;;  %v941_v55 = vpop.f32.mrb[19].mxu1 }
 0x11e   : > { %1283 = vst [vmem:[%s1831_s19 + $0x80] sm:$0xff] %v1219_v48  ;;  %1315 = vst [vmem:[%s1831_s19 + $0x180] sm:$0xff] %v1251_v49  ;;  %v1220_v56 = vadd.f32 %v1826_v40, %v813_v54  ;;  %v1252_v57 = vadd.f32 %v1826_v40, %v941_v55 }
 0x11f   : > { %1286 = vst [vmem:[%s1831_s19 + $0x98] sm:$0xff] %v1222_v52  ;;  %1318 = vst [vmem:[%s1831_s19 + $0x198] sm:$0xff] %v1254_v53 }
 0x120   : > { %1284 = vst [vmem:[%s1831_s19 + $0x88] sm:$0xff] %v1220_v56  ;;  %1316 = vst [vmem:[%s1831_s19 + $0x188] sm:$0xff] %v1252_v57 }
 0x122   : > { %v1574_v58 = vpop.f32.mrb[20].mxu0  ;;  %v1606_v59 = vpop.f32.mrb[20].mxu1 }
 0x123   : > { %v1225_v60 = vadd.f32 %v1574_v58, %v1826_v40  ;;  %v1257_v61 = vadd.f32 %v1606_v59, %v1826_v40  ;;  %v826_v62 = vpop.f32.mrb[21].mxu0  ;;  %v954_v63 = vpop.f32.mrb[21].mxu1 }
 0x124   : > { %v1223_v0 = vadd.f32 %v1826_v40, %v826_v62  ;;  %v1255_v1 = vadd.f32 %v1826_v40, %v954_v63  ;;  %v1575_v2 = vpop.f32.mrb[22].mxu0  ;;  %v1607_v3 = vpop.f32.mrb[22].mxu1 }
 0x125   : > { %1289 = vst [vmem:[%s1831_s19 + $0xb0] sm:$0xff] %v1225_v60  ;;  %1321 = vst [vmem:[%s1831_s19 + $0x1b0] sm:$0xff] %v1257_v61  ;;  %v1226_v4 = vadd.f32 %v1575_v2, %v1826_v40  ;;  %v1258_v5 = vadd.f32 %v1607_v3, %v1826_v40  ;;  %v829_v6 = vpop.f32.mrb[23].mxu0  ;;  %v957_v7 = vpop.f32.mrb[23].mxu1 }
 0x126   : > { %1287 = vst [vmem:[%s1831_s19 + $0xa0] sm:$0xff] %v1223_v0  ;;  %1319 = vst [vmem:[%s1831_s19 + $0x1a0] sm:$0xff] %v1255_v1  ;;  %v1224_v8 = vadd.f32 %v1826_v40, %v829_v6  ;;  %v1256_v9 = vadd.f32 %v1826_v40, %v957_v7 }
 0x127   : > { %1290 = vst [vmem:[%s1831_s19 + $0xb8] sm:$0xff] %v1226_v4  ;;  %1322 = vst [vmem:[%s1831_s19 + $0x1b8] sm:$0xff] %v1258_v5 }
 0x128   : > { %1288 = vst [vmem:[%s1831_s19 + $0xa8] sm:$0xff] %v1224_v8  ;;  %1320 = vst [vmem:[%s1831_s19 + $0x1a8] sm:$0xff] %v1256_v9 }
 0x12a   : > { %v1578_v10 = vpop.f32.mrb[24].mxu0  ;;  %v1610_v11 = vpop.f32.mrb[24].mxu1 }
 0x12b   : > { %v1229_v12 = vadd.f32 %v1578_v10, %v1826_v40  ;;  %v1261_v13 = vadd.f32 %v1610_v11, %v1826_v40  ;;  %v842_v14 = vpop.f32.mrb[25].mxu0  ;;  %v970_v15 = vpop.f32.mrb[25].mxu1 }
 0x12c   : > { %v1227_v16 = vadd.f32 %v1826_v40, %v842_v14  ;;  %v1259_v17 = vadd.f32 %v1826_v40, %v970_v15  ;;  %v1579_v18 = vpop.f32.mrb[26].mxu0  ;;  %v1611_v19 = vpop.f32.mrb[26].mxu1 }
 0x12d   : > { %1293 = vst [vmem:[%s1831_s19 + $0xd0] sm:$0xff] %v1229_v12  ;;  %1325 = vst [vmem:[%s1831_s19 + $0x1d0] sm:$0xff] %v1261_v13  ;;  %v1230_v20 = vadd.f32 %v1579_v18, %v1826_v40  ;;  %v1262_v21 = vadd.f32 %v1611_v19, %v1826_v40  ;;  %v845_v22 = vpop.f32.mrb[27].mxu0  ;;  %v973_v23 = vpop.f32.mrb[27].mxu1 }
 0x12e   : > { %1291 = vst [vmem:[%s1831_s19 + $0xc0] sm:$0xff] %v1227_v16  ;;  %1323 = vst [vmem:[%s1831_s19 + $0x1c0] sm:$0xff] %v1259_v17  ;;  %v1228_v24 = vadd.f32 %v1826_v40, %v845_v22  ;;  %v1260_v25 = vadd.f32 %v1826_v40, %v973_v23 }
 0x12f   : > { %1294 = vst [vmem:[%s1831_s19 + $0xd8] sm:$0xff] %v1230_v20  ;;  %1326 = vst [vmem:[%s1831_s19 + $0x1d8] sm:$0xff] %v1262_v21 }
 0x130   : > { %1292 = vst [vmem:[%s1831_s19 + $0xc8] sm:$0xff] %v1228_v24  ;;  %1324 = vst [vmem:[%s1831_s19 + $0x1c8] sm:$0xff] %v1260_v25 }
 0x132   : > { %v1582_v26 = vpop.f32.mrb[28].mxu0  ;;  %v1614_v27 = vpop.f32.mrb[28].mxu1 }
 0x133   : > { %v1233_v28 = vadd.f32 %v1582_v26, %v1826_v40  ;;  %v1265_v29 = vadd.f32 %v1614_v27, %v1826_v40  ;;  %v858_v30 = vpop.f32.mrb[29].mxu0  ;;  %v986_v31 = vpop.f32.mrb[29].mxu1 }
 0x134   : > { %v1231_v32 = vadd.f32 %v1826_v40, %v858_v30  ;;  %v1263_v33 = vadd.f32 %v1826_v40, %v986_v31  ;;  %v1583_v34 = vpop.f32.mrb[30].mxu0  ;;  %v1615_v35 = vpop.f32.mrb[30].mxu1 }
 0x135   : > { %1297 = vst [vmem:[%s1831_s19 + $0xf0] sm:$0xff] %v1233_v28  ;;  %1329 = vst [vmem:[%s1831_s19 + $0x1f0] sm:$0xff] %v1265_v29  ;;  %v1234_v36 = vadd.f32 %v1583_v34, %v1826_v40  ;;  %v1266_v37 = vadd.f32 %v1615_v35, %v1826_v40  ;;  %v861_v38 = vpop.f32.mrb[31].mxu0  ;;  %v989_v39 = vpop.f32.mrb[31].mxu1 }
 0x136   : > { %1295 = vst [vmem:[%s1831_s19 + $0xe0] sm:$0xff] %v1231_v32  ;;  %1327 = vst [vmem:[%s1831_s19 + $0x1e0] sm:$0xff] %v1263_v33  ;;  %v1232_v41 = vadd.f32 %v1826_v40, %v861_v38  ;;  %v1264_v42 = vadd.f32 %v1826_v40, %v989_v39 }
 0x137   : > { %1298 = vst [vmem:[%s1831_s19 + $0xf8] sm:$0xff] %v1234_v36  ;;  %1330 = vst [vmem:[%s1831_s19 + $0x1f8] sm:$0xff] %v1266_v37 }
 0x138   : > { %1296 = vst [vmem:[%s1831_s19 + $0xe8] sm:$0xff] %v1232_v41  ;;  %1328 = vst [vmem:[%s1831_s19 + $0x1e8] sm:$0xff] %v1264_v42 }
 0x139 PF: > { %s13_s14 = sadd.s32 1, %s1718_s14   ;;  %s1974_s12 = smov %s1714_s13 }
 0x13a   : > { %p10_p5 = scmp.ge.s32.totalorder %s13_s14, 66   ;;  %s1975_s13 = smov %s1977_s15 }
 0x13c   :  { %12 = sbr.rel (!%p10_p5) target bundleno = 2 (0x2), region = 76 }

</bundles_post_ra>
